<compile_context>
chip_gen: v6e
topology: v6e:2x2x1
jax: 0.10.0
libtpu: 0.0.40
codegen_flags: <defaults>
</compile_context>

<pallas_src>
import functools
import math

import jax
import jax.numpy as jnp
from jax.experimental import pallas as pl
from jax.experimental.pallas import tpu as pltpu


# --------------------------------------------------------------------------
# small helpers
# --------------------------------------------------------------------------

def _round_up(x, m):
    return ((x + m - 1) // m) * m


def _const_spec(arr):
    """Full-array BlockSpec with a grid-independent index map (no re-DMA)."""
    zero_idx = (0,) * arr.ndim
    return pl.BlockSpec(arr.shape, lambda b: zero_idx)


def _pad_last(a, width):
    return jnp.pad(a, [(0, 0)] * (a.ndim - 1) + [(0, width - a.shape[-1])])


# fixed weight ordering used by both the wrapper and the fused kernel
_ENC_KEYS = ('wqkv', 'bqkv', 'wo', 'bo', 'ln1g', 'ln1b',
             'w1', 'b1', 'w2', 'b2', 'ln2g', 'ln2b')
_DEC_KEYS = ('s_wqkv', 's_bqkv', 's_wo', 's_bo', 'ln1g', 'ln1b',
             'c_wqkv', 'c_bqkv', 'c_wo', 'c_bo', 'ln2g', 'ln2b',
             'w1', 'b1', 'w2', 'b2', 'ln3g', 'ln3b')


# --------------------------------------------------------------------------
# in-kernel building blocks (operate on values, called from the fused kernel)
# --------------------------------------------------------------------------

def _mha_block(xq, mask_row, w_qkv, b_qkv, w_o_heads, b_o,
               *, num_heads, d_head, xkv=None):
    """Multi-head attention on padded activations.

    xq: (Sq, Dp) f32.  xkv: (Sk, Dp) f32 or None (self-attention -> reuse xq).
    mask_row: (1, Mp) f32 or None.
    w_qkv: (Dp, QKVp) bf16 with Q|K|V head-major columns in the first
           3*d_model lanes.  b_qkv: (1, QKVp) f32.
    w_o_heads: (H, d_head, Dp) bf16 (fc_out rows regrouped per head).
    b_o: (1, Dp) f32.
    """
    bf16 = jnp.bfloat16
    d_model = num_heads * d_head

    # fused QKV projection: one (Sq,128)x(128,128) MXU pass, cast once.
    pq = jnp.dot(xq.astype(bf16), w_qkv,
                 preferred_element_type=jnp.float32) + b_qkv
    if xkv is None:
        pkv, Sk = pq, xq.shape[0]
    else:
        pkv = jnp.dot(xkv.astype(bf16), w_qkv,
                      preferred_element_type=jnp.float32) + b_qkv
        Sk = xkv.shape[0]

    scale = 1.0 / math.sqrt(d_head)
    attn = None
    for h in range(num_heads):
        lo = h * d_head
        qh = pq[:, lo:lo + d_head].astype(bf16)                          # (Sq, dh)
        kh = pkv[:, d_model + lo:d_model + lo + d_head].astype(bf16)     # (Sk, dh)
        vh = pkv[:, 2 * d_model + lo:2 * d_model + lo + d_head].astype(bf16)
        # scores: contract the head dim of both operands (q @ k^T)
        s = jax.lax.dot_general(qh, kh, (((1,), (1,)), ((), ())),
                                preferred_element_type=jnp.float32) * scale
        if mask_row is not None:
            # large finite negative instead of -inf: no NaN on fully-masked rows
            s = jnp.where(mask_row[:, :Sk] == 0.0, -1e30, s)
        m = jnp.max(s, axis=-1, keepdims=True)
        e = jnp.exp(s - m)
        p = e * pl.reciprocal(jnp.sum(e, axis=-1, keepdims=True), approx=True)
        oh = jnp.dot(p.astype(bf16), vh,
                     preferred_element_type=jnp.float32)                 # (Sq, dh)
        # per-head slice of the output projection (no concat / transpose)
        contrib = jnp.dot(oh.astype(bf16), w_o_heads[h],
                          preferred_element_type=jnp.float32)            # (Sq, Dp)
        attn = contrib if attn is None else attn + contrib
    return attn + b_o


def _residual_layernorm(x1, x2, gamma, beta, d_real):
    """LayerNorm(x1 + x2) over the real (un-padded) last-axis width d_real."""
    x = x1 + x2                               # padded lanes stay exactly zero
    mean = jnp.sum(x, axis=-1, keepdims=True) * (1.0 / d_real)
    col = jax.lax.broadcasted_iota(jnp.int32, x.shape, x.ndim - 1)
    centered = jnp.where(col < d_real, x - mean, 0.0)
    var = jnp.sum(centered * centered, axis=-1, keepdims=True) * (1.0 / d_real)
    xn = (x - mean) * jax.lax.rsqrt(var + 1e-5)
    return xn * gamma + beta                  # zero-padded gamma/beta -> pads stay 0


def _ffn_block(x, w1, b1, w2, b2):
    bf16 = jnp.bfloat16
    h = jnp.dot(x.astype(bf16), w1, preferred_element_type=jnp.float32) + b1
    h = 0.5 * h * (1.0 + jax.lax.erf(h * 0.7071067811865476))   # exact GELU
    return jnp.dot(h.astype(bf16), w2, preferred_element_type=jnp.float32) + b2


# --------------------------------------------------------------------------
# fused whole-model kernel
# --------------------------------------------------------------------------

def _transformer_kernel(*refs, num_heads, d_head, d_real, n_enc, n_dec):
    x1_ref, x2_ref, m_ref = refs[0], refs[1], refs[2]
    o_ref = refs[-1]
    w = refs[3:-1]

    nE, nD = len(_ENC_KEYS), len(_DEC_KEYS)
    E = dict(zip(_ENC_KEYS, w[:nE]))
    Dd = dict(zip(_DEC_KEYS, w[nE:nE + nD]))
    ow_ref, ob_ref = w[nE + nD], w[nE + nD + 1]

    x1 = x1_ref[0]              # (S1, Dp) f32
    x2 = x2_ref[0]              # (S2, Dp) f32
    mask = m_ref[0]             # (1, Mp)  f32

    # ---- encoder stack (unrolled; weights stacked on a leading layer axis)
    for l in range(n_enc):
        attn = _mha_block(x1, mask, E['wqkv'][l], E['bqkv'][l],
                          E['wo'][l], E['bo'][l],
                          num_heads=num_heads, d_head=d_head)
        y = _residual_layernorm(x1, attn, E['ln1g'][l], E['ln1b'][l], d_real)
        f = _ffn_block(y, E['w1'][l], E['b1'][l], E['w2'][l], E['b2'][l])
        x1 = _residual_layernorm(y, f, E['ln2g'][l], E['ln2b'][l], d_real)

    # ---- decoder stack
    for l in range(n_dec):
        sa = _mha_block(x2, mask, Dd['s_wqkv'][l], Dd['s_bqkv'][l],
                        Dd['s_wo'][l], Dd['s_bo'][l],
                        num_heads=num_heads, d_head=d_head)
        y = _residual_layernorm(x2, sa, Dd['ln1g'][l], Dd['ln1b'][l], d_real)
        ca = _mha_block(y, None, Dd['c_wqkv'][l], Dd['c_bqkv'][l],
                        Dd['c_wo'][l], Dd['c_bo'][l],
                        num_heads=num_heads, d_head=d_head, xkv=x1)
        y = _residual_layernorm(y, ca, Dd['ln2g'][l], Dd['ln2b'][l], d_real)
        f = _ffn_block(y, Dd['w1'][l], Dd['b1'][l], Dd['w2'][l], Dd['b2'][l])
        x2 = _residual_layernorm(y, f, Dd['ln3g'][l], Dd['ln3b'][l], d_real)

    # ---- final vocab projection (fused into the same kernel)
    o_ref[0] = (jnp.dot(x2.astype(jnp.bfloat16), ow_ref[...],
                        preferred_element_type=jnp.float32) + ob_ref[...])


# --------------------------------------------------------------------------
# Pallas wrapper: whole forward pass in one pallas_call
# --------------------------------------------------------------------------

def transformer_forward(kp, x1_ids, x2_ids, mask, *, num_heads, d_head,
                        d_model, vocab):
    pe = kp['pe']
    # torch.add(x, positional_encoding(x)) where positional_encoding returns
    # x + pe  ==>  2*emb + pe.  (elementwise glue, fused with the gather by XLA)
    e1 = jnp.take(kp['in_emb'], x1_ids, axis=0)
    x1 = e1 + (e1 + pe[:x1_ids.shape[1]][None])
    e2 = jnp.take(kp['out_emb'], x2_ids, axis=0)
    x2 = e2 + (e2 + pe[:x2_ids.shape[1]][None])

    B, S1, Dp = x1.shape
    S2 = x2.shape[1]
    Vp = kp['out_w'].shape[-1]
    Mp = 128                                  # lane-dense mask tile
    mask3 = jnp.zeros((B, 1, Mp), jnp.float32)
    mask3 = mask3.at[:, 0, :mask.shape[1]].set(mask.astype(jnp.float32))

    n_enc = kp['enc'][_ENC_KEYS[0]].shape[0]
    n_dec = kp['dec'][_DEC_KEYS[0]].shape[0]

    weights = tuple(kp['enc'][k] for k in _ENC_KEYS) \
            + tuple(kp['dec'][k] for k in _DEC_KEYS) \
            + (kp['out_w'], kp['out_b'])

    kernel = functools.partial(_transformer_kernel, num_heads=num_heads,
                               d_head=d_head, d_real=d_model,
                               n_enc=n_enc, n_dec=n_dec)

    in_specs = [pl.BlockSpec((1, S1, Dp), lambda b: (b, 0, 0)),
                pl.BlockSpec((1, S2, Dp), lambda b: (b, 0, 0)),
                pl.BlockSpec((1, 1, Mp), lambda b: (b, 0, 0))]
    in_specs += [_const_spec(w) for w in weights]

    logits_p = pl.pallas_call(
        kernel,
        out_shape=jax.ShapeDtypeStruct((B, S2, Vp), jnp.float32),
        grid=(B,),
        in_specs=in_specs,
        out_specs=pl.BlockSpec((1, S2, Vp), lambda b: (b, 0, 0)),
        compiler_params=pltpu.CompilerParams(
            dimension_semantics=("parallel",),
            vmem_limit_bytes=32 * 1024 * 1024),
    )(x1, x2, mask3, *weights)
    return logits_p[..., :vocab]


# --------------------------------------------------------------------------
# logical (un-padded) parameter construction  (matches PyTorch defaults)
# --------------------------------------------------------------------------

def init_linear(key, in_dim, out_dim):
    k1, k2 = jax.random.split(key)
    bound = 1.0 / math.sqrt(in_dim)
    w = jax.random.uniform(k1, (in_dim, out_dim), jnp.float32,
                           -bound, bound).astype(jnp.bfloat16)   # bf16 weights
    b = jax.random.uniform(k2, (1, out_dim), jnp.float32, -bound, bound)
    return w, b


def init_mha(key, d_model):
    ks = jax.random.split(key, 4)
    wq, bq = init_linear(ks[0], d_model, d_model)
    wk, bk = init_linear(ks[1], d_model, d_model)
    wv, bv = init_linear(ks[2], d_model, d_model)
    wo, bo = init_linear(ks[3], d_model, d_model)
    return dict(wq=wq, bq=bq, wk=wk, bk=bk, wv=wv, bv=bv, wo=wo, bo=bo)


def init_ffn(key, d_model):
    k1, k2 = jax.random.split(key)
    w1, b1 = init_linear(k1, d_model, 4 * d_model)
    w2, b2 = init_linear(k2, 4 * d_model, d_model)
    return dict(w1=w1, b1=b1, w2=w2, b2=b2)


def init_encoder(key, d_model):
    k1, k2 = jax.random.split(key)
    return dict(
        mha=init_mha(k1, d_model),
        ln1_g=jnp.ones((1, d_model), jnp.float32),
        ln1_b=jnp.zeros((1, d_model), jnp.float32),
        ffn=init_ffn(k2, d_model),
        ln2_g=jnp.ones((1, d_model), jnp.float32),
        ln2_b=jnp.zeros((1, d_model), jnp.float32),
    )


def init_decoder(key, d_model):
    k1, k2, k3 = jax.random.split(key, 3)
    # TODO(synk): self_attn_query_layer exists in the PyTorch module but is unused in forward(); omitted.
    return dict(
        self=init_mha(k1, d_model),
        ln1_g=jnp.ones((1, d_model), jnp.float32),
        ln1_b=jnp.zeros((1, d_model), jnp.float32),
        cross=init_mha(k2, d_model),
        ln2_g=jnp.ones((1, d_model), jnp.float32),
        ln2_b=jnp.zeros((1, d_model), jnp.float32),
        ffn=init_ffn(k3, d_model),
        ln3_g=jnp.ones((1, d_model), jnp.float32),
        ln3_b=jnp.zeros((1, d_model), jnp.float32),
    )


def make_positional_encoding(position, d_model):
    pos = jnp.arange(position, dtype=jnp.float32)[:, None]
    div = jnp.power(10000.0,
                    -jnp.arange(0, d_model, 2, dtype=jnp.float32) / d_model)
    pe = jnp.zeros((position, d_model), jnp.float32)
    pe = pe.at[:, 0::2].set(jnp.sin(pos * div))
    pe = pe.at[:, 1::2].set(jnp.cos(pos * div))
    return pe


def init_params(key, vocab_size, d_model, position, n_enc, n_dec):
    keys = jax.random.split(key, 3 + n_enc + n_dec)
    in_emb = jax.random.normal(keys[0], (vocab_size, d_model), jnp.float32)
    out_emb = jax.random.normal(keys[1], (vocab_size, d_model), jnp.float32)
    out_w, out_b = init_linear(keys[2], d_model, vocab_size)
    encoders = [init_encoder(keys[3 + i], d_model) for i in range(n_enc)]
    decoders = [init_decoder(keys[3 + n_enc + i], d_model) for i in range(n_dec)]
    return dict(in_emb=in_emb, out_emb=out_emb,
                pe=make_positional_encoding(position, d_model),
                encoders=encoders, decoders=decoders,
                out_w=out_w, out_b=out_b)


# --------------------------------------------------------------------------
# kernel-ready (lane-padded, fused-QKV, layer-stacked) parameters
# --------------------------------------------------------------------------

def build_kernel_params(lp, num_heads, d_head, dp, hidp, vp):
    d_model = num_heads * d_head
    qkvp = _round_up(3 * d_model, 128)

    def mha_k(p):
        w = jnp.zeros((dp, qkvp), jnp.bfloat16)
        w = w.at[:d_model, 0:d_model].set(p['wq'])
        w = w.at[:d_model, d_model:2 * d_model].set(p['wk'])
        w = w.at[:d_model, 2 * d_model:3 * d_model].set(p['wv'])
        b = jnp.zeros((1, qkvp), jnp.float32)
        b = b.at[:, 0:d_model].set(p['bq'])
        b = b.at[:, d_model:2 * d_model].set(p['bk'])
        b = b.at[:, 2 * d_model:3 * d_model].set(p['bv'])
        # fc_out: regroup rows per head -> (H, d_head, Dp), pad out-dim only
        wo = _pad_last(p['wo'].reshape(num_heads, d_head, d_model), dp)
        bo = _pad_last(p['bo'], dp)
        return dict(wqkv=w, bqkv=b, wo=wo, bo=bo)

    def ffn_k(p):
        h4 = 4 * d_model
        w1 = jnp.zeros((dp, hidp), jnp.bfloat16).at[:d_model, :h4].set(p['w1'])
        b1 = _pad_last(p['b1'], hidp)
        w2 = jnp.zeros((hidp, dp), jnp.bfloat16).at[:h4, :d_model].set(p['w2'])
        b2 = _pad_last(p['b2'], dp)
        return dict(w1=w1, b1=b1, w2=w2, b2=b2)

    enc_layers = []
    for e in lp['encoders']:
        m = mha_k(e['mha'])
        f = ffn_k(e['ffn'])
        enc_layers.append(dict(
            wqkv=m['wqkv'], bqkv=m['bqkv'], wo=m['wo'], bo=m['bo'],
            ln1g=_pad_last(e['ln1_g'], dp), ln1b=_pad_last(e['ln1_b'], dp),
            w1=f['w1'], b1=f['b1'], w2=f['w2'], b2=f['b2'],
            ln2g=_pad_last(e['ln2_g'], dp), ln2b=_pad_last(e['ln2_b'], dp)))
    enc = {k: jnp.stack([d[k] for d in enc_layers], axis=0) for k in _ENC_KEYS}

    dec_layers = []
    for dc in lp['decoders']:
        s = mha_k(dc['self'])
        c = mha_k(dc['cross'])
        f = ffn_k(dc['ffn'])
        dec_layers.append(dict(
            s_wqkv=s['wqkv'], s_bqkv=s['bqkv'], s_wo=s['wo'], s_bo=s['bo'],
            ln1g=_pad_last(dc['ln1_g'], dp), ln1b=_pad_last(dc['ln1_b'], dp),
            c_wqkv=c['wqkv'], c_bqkv=c['bqkv'], c_wo=c['wo'], c_bo=c['bo'],
            ln2g=_pad_last(dc['ln2_g'], dp), ln2b=_pad_last(dc['ln2_b'], dp),
            w1=f['w1'], b1=f['b1'], w2=f['w2'], b2=f['b2'],
            ln3g=_pad_last(dc['ln3_g'], dp), ln3b=_pad_last(dc['ln3_b'], dp)))
    dec = {k: jnp.stack([d[k] for d in dec_layers], axis=0) for k in _DEC_KEYS}

    D, V = lp['out_w'].shape
    out_w = jnp.zeros((dp, vp), jnp.bfloat16).at[:D, :V].set(lp['out_w'])
    out_b = jnp.zeros((1, vp), jnp.float32).at[:, :V].set(lp['out_b'])

    return dict(in_emb=_pad_last(lp['in_emb'], dp),
                out_emb=_pad_last(lp['out_emb'], dp),
                pe=_pad_last(lp['pe'], dp),
                enc=enc, dec=dec, out_w=out_w, out_b=out_b)


# --------------------------------------------------------------------------
# pure-JAX reference (same bf16-operand / f32-accumulate arithmetic)
# --------------------------------------------------------------------------

def ref_mha(q_in, k_in, v_in, mask, p, num_heads):
    bf16 = jnp.bfloat16
    B, Sq, D = q_in.shape
    Sk = k_in.shape[1]
    dh = D // num_heads

    def proj(x, w, b):
        return jnp.einsum('bsd,de->bse', x.astype(bf16), w,
                          preferred_element_type=jnp.float32) + b

    Q = proj(q_in, p['wq'], p['bq']).reshape(B, Sq, num_heads, dh).transpose(0, 2, 1, 3)
    K = proj(k_in, p['wk'], p['bk']).reshape(B, Sk, num_heads, dh).transpose(0, 2, 1, 3)
    V = proj(v_in, p['wv'], p['bv']).reshape(B, Sk, num_heads, dh).transpose(0, 2, 1, 3)
    s = jnp.einsum('bhqd,bhkd->bhqk', Q.astype(bf16), K.astype(bf16),
                   preferred_element_type=jnp.float32) * (1.0 / math.sqrt(dh))
    if mask is not None:
        s = jnp.where(mask[:, None, None, :] == 0, -1e30, s)
    a = jax.nn.softmax(s, axis=-1)
    o = jnp.einsum('bhqk,bhkd->bhqd', a.astype(bf16), V.astype(bf16),
                   preferred_element_type=jnp.float32)
    o = o.transpose(0, 2, 1, 3).reshape(B, Sq, D)
    return jnp.einsum('bsd,de->bse', o.astype(bf16), p['wo'],
                      preferred_element_type=jnp.float32) + p['bo']


def ref_residual_ln(x1, x2, g, b):
    x = x1 + x2
    mean = jnp.mean(x, axis=-1, keepdims=True)
    var = jnp.mean((x - mean) ** 2, axis=-1, keepdims=True)
    return (x - mean) * jax.lax.rsqrt(var + 1e-5) * g + b


def ref_ffn(x, p):
    bf16 = jnp.bfloat16
    h = jnp.einsum('bsd,dh->bsh', x.astype(bf16), p['w1'],
                   preferred_element_type=jnp.float32) + p['b1']
    h = 0.5 * h * (1.0 + jax.lax.erf(h * 0.7071067811865476))
    return jnp.einsum('bsh,hd->bsd', h.astype(bf16), p['w2'],
                      preferred_element_type=jnp.float32) + p['b2']


def reference_forward(lp, x1_ids, x2_ids, mask, num_heads):
    pe = lp['pe']
    e1 = jnp.take(lp['in_emb'], x1_ids, axis=0)
    x1 = e1 + (e1 + pe[:x1_ids.shape[1]][None])
    e2 = jnp.take(lp['out_emb'], x2_ids, axis=0)
    x2 = e2 + (e2 + pe[:x2_ids.shape[1]][None])
    for enc in lp['encoders']:
        a = ref_mha(x1, x1, x1, mask, enc['mha'], num_heads)
        x1 = ref_residual_ln(x1, a, enc['ln1_g'], enc['ln1_b'])
        f = ref_ffn(x1, enc['ffn'])
        x1 = ref_residual_ln(x1, f, enc['ln2_g'], enc['ln2_b'])
    for dec in lp['decoders']:
        sa = ref_mha(x2, x2, x2, mask, dec['self'], num_heads)
        y = ref_residual_ln(x2, sa, dec['ln1_g'], dec['ln1_b'])
        ca = ref_mha(y, x1, x1, None, dec['cross'], num_heads)
        y = ref_residual_ln(y, ca, dec['ln2_g'], dec['ln2_b'])
        f = ref_ffn(y, dec['ffn'])
        x2 = ref_residual_ln(y, f, dec['ln3_g'], dec['ln3_b'])
    return jnp.einsum('bsd,dv->bsv', x2.astype(jnp.bfloat16), lp['out_w'],
                      preferred_element_type=jnp.float32) + lp['out_b']


# --------------------------------------------------------------------------
# main
# --------------------------------------------------------------------------

if __name__ == "__main__":
    vocab_size = 32
    d_model = 32
    position = 16
    num_heads = 4
    d_head = d_model // num_heads
    num_encoder_layers = 2
    num_decoder_layers = 2
    B, S = 2, 8

    DP = _round_up(d_model, 128)        # padded d_model (lane width)
    HIDP = _round_up(4 * d_model, 128)  # padded FFN hidden (already 128)
    VP = _round_up(vocab_size, 128)     # padded vocab for the output proj

    root = jax.random.PRNGKey(0)
    kparam, kx1, kx2, km = jax.random.split(root, 4)

    logical = init_params(kparam, vocab_size, d_model, position,
                          num_encoder_layers, num_decoder_layers)
    kparams = build_kernel_params(logical, num_heads, d_head, DP, HIDP, VP)

    x1_ids = jax.random.randint(kx1, (B, S), 0, vocab_size, dtype=jnp.int32)
    x2_ids = jax.random.randint(kx2, (B, S), 0, vocab_size, dtype=jnp.int32)
    mask = (jax.random.uniform(km, (B, S)) > 0.3).astype(jnp.float32)
    # no mask[:,0]=1 fixup needed: masking uses -1e30, safe for fully-masked rows

    fwd = jax.jit(functools.partial(transformer_forward, num_heads=num_heads,
                                    d_head=d_head, d_model=d_model,
                                    vocab=vocab_size))
    logits = jax.block_until_ready(fwd(kparams, x1_ids, x2_ids, mask))

    ref = reference_forward(logical, x1_ids, x2_ids, mask, num_heads)
    assert logits.shape == (B, S, vocab_size), logits.shape
    assert bool(jnp.all(jnp.isfinite(logits)))
    max_err = float(jnp.max(jnp.abs(logits - ref)))
    # slightly looser than before: the kernel softmax uses the EUP approximate
    # reciprocal (pl.reciprocal(approx=True)) on top of bf16 matmul noise.
    assert bool(jnp.allclose(logits, ref, atol=3e-2, rtol=3e-2)), max_err

    print("KERNEL_OK")
</pallas_src>

<mosaic_0001>
module attributes {stable_mosaic.version = 11 : i64} {
  func.func @_transformer_kernel(%arg0: i32, %arg1: memref<1x8x128xf32, #tpu.memory_space<vmem>>, %arg2: memref<1x8x128xf32, #tpu.memory_space<vmem>>, %arg3: memref<1x1x128xf32, #tpu.memory_space<vmem>>, %arg4: memref<2x128x128xbf16, #tpu.memory_space<vmem>>, %arg5: memref<2x1x128xf32, #tpu.memory_space<vmem>>, %arg6: memref<2x4x8x128xbf16, #tpu.memory_space<vmem>>, %arg7: memref<2x1x128xf32, #tpu.memory_space<vmem>>, %arg8: memref<2x1x128xf32, #tpu.memory_space<vmem>>, %arg9: memref<2x1x128xf32, #tpu.memory_space<vmem>>, %arg10: memref<2x128x128xbf16, #tpu.memory_space<vmem>>, %arg11: memref<2x1x128xf32, #tpu.memory_space<vmem>>, %arg12: memref<2x128x128xbf16, #tpu.memory_space<vmem>>, %arg13: memref<2x1x128xf32, #tpu.memory_space<vmem>>, %arg14: memref<2x1x128xf32, #tpu.memory_space<vmem>>, %arg15: memref<2x1x128xf32, #tpu.memory_space<vmem>>, %arg16: memref<2x128x128xbf16, #tpu.memory_space<vmem>>, %arg17: memref<2x1x128xf32, #tpu.memory_space<vmem>>, %arg18: memref<2x4x8x128xbf16, #tpu.memory_space<vmem>>, %arg19: memref<2x1x128xf32, #tpu.memory_space<vmem>>, %arg20: memref<2x1x128xf32, #tpu.memory_space<vmem>>, %arg21: memref<2x1x128xf32, #tpu.memory_space<vmem>>, %arg22: memref<2x128x128xbf16, #tpu.memory_space<vmem>>, %arg23: memref<2x1x128xf32, #tpu.memory_space<vmem>>, %arg24: memref<2x4x8x128xbf16, #tpu.memory_space<vmem>>, %arg25: memref<2x1x128xf32, #tpu.memory_space<vmem>>, %arg26: memref<2x1x128xf32, #tpu.memory_space<vmem>>, %arg27: memref<2x1x128xf32, #tpu.memory_space<vmem>>, %arg28: memref<2x128x128xbf16, #tpu.memory_space<vmem>>, %arg29: memref<2x1x128xf32, #tpu.memory_space<vmem>>, %arg30: memref<2x128x128xbf16, #tpu.memory_space<vmem>>, %arg31: memref<2x1x128xf32, #tpu.memory_space<vmem>>, %arg32: memref<2x1x128xf32, #tpu.memory_space<vmem>>, %arg33: memref<2x1x128xf32, #tpu.memory_space<vmem>>, %arg34: memref<128x128xbf16, #tpu.memory_space<vmem>>, %arg35: memref<1x128xf32, #tpu.memory_space<vmem>>, %arg36: memref<1x8x128xf32, #tpu.memory_space<vmem>>) attributes {dimension_semantics = [#tpu.dimension_semantics<parallel>], iteration_bounds = array<i64: 2>, scalar_prefetch = 0 : i64, scratch_operands = 0 : i64, tpu.core_type = #tpu.core_type<tc>, window_params = [{transform_indices = @transform_0, window_bounds = array<i64: 1, 8, 128>}, {transform_indices = @transform_1, window_bounds = array<i64: 1, 8, 128>}, {transform_indices = @transform_2, window_bounds = array<i64: 1, 1, 128>}, {pipeline_mode = #tpu.pipeline_mode<synchronous>, transform_indices = @transform_3, window_bounds = array<i64: 2, 128, 128>}, {pipeline_mode = #tpu.pipeline_mode<synchronous>, transform_indices = @transform_4, window_bounds = array<i64: 2, 1, 128>}, {pipeline_mode = #tpu.pipeline_mode<synchronous>, transform_indices = @transform_5, window_bounds = array<i64: 2, 4, 8, 128>}, {pipeline_mode = #tpu.pipeline_mode<synchronous>, transform_indices = @transform_6, window_bounds = array<i64: 2, 1, 128>}, {pipeline_mode = #tpu.pipeline_mode<synchronous>, transform_indices = @transform_7, window_bounds = array<i64: 2, 1, 128>}, {pipeline_mode = #tpu.pipeline_mode<synchronous>, transform_indices = @transform_8, window_bounds = array<i64: 2, 1, 128>}, {pipeline_mode = #tpu.pipeline_mode<synchronous>, transform_indices = @transform_9, window_bounds = array<i64: 2, 128, 128>}, {pipeline_mode = #tpu.pipeline_mode<synchronous>, transform_indices = @transform_10, window_bounds = array<i64: 2, 1, 128>}, {pipeline_mode = #tpu.pipeline_mode<synchronous>, transform_indices = @transform_11, window_bounds = array<i64: 2, 128, 128>}, {pipeline_mode = #tpu.pipeline_mode<synchronous>, transform_indices = @transform_12, window_bounds = array<i64: 2, 1, 128>}, {pipeline_mode = #tpu.pipeline_mode<synchronous>, transform_indices = @transform_13, window_bounds = array<i64: 2, 1, 128>}, {pipeline_mode = #tpu.pipeline_mode<synchronous>, transform_indices = @transform_14, window_bounds = array<i64: 2, 1, 128>}, {pipeline_mode = #tpu.pipeline_mode<synchronous>, transform_indices = @transform_15, window_bounds = array<i64: 2, 128, 128>}, {pipeline_mode = #tpu.pipeline_mode<synchronous>, transform_indices = @transform_16, window_bounds = array<i64: 2, 1, 128>}, {pipeline_mode = #tpu.pipeline_mode<synchronous>, transform_indices = @transform_17, window_bounds = array<i64: 2, 4, 8, 128>}, {pipeline_mode = #tpu.pipeline_mode<synchronous>, transform_indices = @transform_18, window_bounds = array<i64: 2, 1, 128>}, {pipeline_mode = #tpu.pipeline_mode<synchronous>, transform_indices = @transform_19, window_bounds = array<i64: 2, 1, 128>}, {pipeline_mode = #tpu.pipeline_mode<synchronous>, transform_indices = @transform_20, window_bounds = array<i64: 2, 1, 128>}, {pipeline_mode = #tpu.pipeline_mode<synchronous>, transform_indices = @transform_21, window_bounds = array<i64: 2, 128, 128>}, {pipeline_mode = #tpu.pipeline_mode<synchronous>, transform_indices = @transform_22, window_bounds = array<i64: 2, 1, 128>}, {pipeline_mode = #tpu.pipeline_mode<synchronous>, transform_indices = @transform_23, window_bounds = array<i64: 2, 4, 8, 128>}, {pipeline_mode = #tpu.pipeline_mode<synchronous>, transform_indices = @transform_24, window_bounds = array<i64: 2, 1, 128>}, {pipeline_mode = #tpu.pipeline_mode<synchronous>, transform_indices = @transform_25, window_bounds = array<i64: 2, 1, 128>}, {pipeline_mode = #tpu.pipeline_mode<synchronous>, transform_indices = @transform_26, window_bounds = array<i64: 2, 1, 128>}, {pipeline_mode = #tpu.pipeline_mode<synchronous>, transform_indices = @transform_27, window_bounds = array<i64: 2, 128, 128>}, {pipeline_mode = #tpu.pipeline_mode<synchronous>, transform_indices = @transform_28, window_bounds = array<i64: 2, 1, 128>}, {pipeline_mode = #tpu.pipeline_mode<synchronous>, transform_indices = @transform_29, window_bounds = array<i64: 2, 128, 128>}, {pipeline_mode = #tpu.pipeline_mode<synchronous>, transform_indices = @transform_30, window_bounds = array<i64: 2, 1, 128>}, {pipeline_mode = #tpu.pipeline_mode<synchronous>, transform_indices = @transform_31, window_bounds = array<i64: 2, 1, 128>}, {pipeline_mode = #tpu.pipeline_mode<synchronous>, transform_indices = @transform_32, window_bounds = array<i64: 2, 1, 128>}, {pipeline_mode = #tpu.pipeline_mode<synchronous>, transform_indices = @transform_33, window_bounds = array<i64: 128, 128>}, {pipeline_mode = #tpu.pipeline_mode<synchronous>, transform_indices = @transform_34, window_bounds = array<i64: 1, 128>}, {transform_indices = @transform_35, window_bounds = array<i64: 1, 8, 128>}]} {
    %c0 = arith.constant 0 : index
    %c0_0 = arith.constant 0 : index
    %c0_1 = arith.constant 0 : index
    %0 = vector.load %arg1[%c0, %c0_0, %c0_1] : memref<1x8x128xf32, #tpu.memory_space<vmem>>, vector<1x8x128xf32>
    %1 = vector.shape_cast %0 : vector<1x8x128xf32> to vector<8x128xf32>
    %c0_2 = arith.constant 0 : index
    %c0_3 = arith.constant 0 : index
    %c0_4 = arith.constant 0 : index
    %2 = vector.load %arg2[%c0_2, %c0_3, %c0_4] : memref<1x8x128xf32, #tpu.memory_space<vmem>>, vector<1x8x128xf32>
    %3 = vector.shape_cast %2 : vector<1x8x128xf32> to vector<8x128xf32>
    %c0_5 = arith.constant 0 : index
    %c0_6 = arith.constant 0 : index
    %c0_7 = arith.constant 0 : index
    %4 = vector.load %arg3[%c0_5, %c0_6, %c0_7] : memref<1x1x128xf32, #tpu.memory_space<vmem>>, vector<1x1x128xf32>
    %5 = vector.shape_cast %4 : vector<1x1x128xf32> to vector<1x128xf32>
    %c0_8 = arith.constant 0 : index
    %c0_9 = arith.constant 0 : index
    %c0_10 = arith.constant 0 : index
    %6 = vector.load %arg4[%c0_8, %c0_9, %c0_10] : memref<2x128x128xbf16, #tpu.memory_space<vmem>>, vector<1x128x128xbf16>
    %7 = vector.shape_cast %6 : vector<1x128x128xbf16> to vector<128x128xbf16>
    %c0_11 = arith.constant 0 : index
    %c0_12 = arith.constant 0 : index
    %c0_13 = arith.constant 0 : index
    %8 = vector.load %arg5[%c0_11, %c0_12, %c0_13] : memref<2x1x128xf32, #tpu.memory_space<vmem>>, vector<1x1x128xf32>
    %9 = vector.shape_cast %8 : vector<1x1x128xf32> to vector<1x128xf32>
    %c0_14 = arith.constant 0 : index
    %c0_15 = arith.constant 0 : index
    %c0_16 = arith.constant 0 : index
    %c0_17 = arith.constant 0 : index
    %10 = vector.load %arg6[%c0_14, %c0_15, %c0_16, %c0_17] : memref<2x4x8x128xbf16, #tpu.memory_space<vmem>>, vector<1x4x8x128xbf16>
    %11 = vector.shape_cast %10 : vector<1x4x8x128xbf16> to vector<4x8x128xbf16>
    %c0_18 = arith.constant 0 : index
    %c0_19 = arith.constant 0 : index
    %c0_20 = arith.constant 0 : index
    %12 = vector.load %arg7[%c0_18, %c0_19, %c0_20] : memref<2x1x128xf32, #tpu.memory_space<vmem>>, vector<1x1x128xf32>
    %13 = vector.shape_cast %12 : vector<1x1x128xf32> to vector<1x128xf32>
    %14 = arith.truncf %1 : vector<8x128xf32> to vector<8x128xbf16>
    %cst = arith.constant dense<0.000000e+00> : vector<8x128xf32>
    %15 = tpu.matmul %14, %7, %cst {dimension_numbers = #tpu.dot_dimension_numbers<[1], [0], [0], [1], [0, 0, 1, 1], [], []>} : vector<8x128xbf16>, vector<128x128xbf16>, vector<8x128xf32> -> vector<8x128xf32>
    %16 = vector.broadcast %9 : vector<1x128xf32> to vector<8x128xf32>
    %17 = arith.addf %15, %16 : vector<8x128xf32>
    %18 = vector.extract_strided_slice %17 {offsets = [0, 0], sizes = [8, 8], strides = [1, 1]} : vector<8x128xf32> to vector<8x8xf32>
    %19 = arith.truncf %18 : vector<8x8xf32> to vector<8x8xbf16>
    %20 = vector.extract_strided_slice %17 {offsets = [0, 32], sizes = [8, 8], strides = [1, 1]} : vector<8x128xf32> to vector<8x8xf32>
    %21 = arith.truncf %20 : vector<8x8xf32> to vector<8x8xbf16>
    %22 = vector.extract_strided_slice %17 {offsets = [0, 64], sizes = [8, 8], strides = [1, 1]} : vector<8x128xf32> to vector<8x8xf32>
    %23 = arith.truncf %22 : vector<8x8xf32> to vector<8x8xbf16>
    %cst_21 = arith.constant dense<0.000000e+00> : vector<8x8xf32>
    %24 = tpu.matmul %19, %21, %cst_21 {dimension_numbers = #tpu.dot_dimension_numbers<[1], [1], [0], [0], [0, 0, 1, 0], [], []>} : vector<8x8xbf16>, vector<8x8xbf16>, vector<8x8xf32> -> vector<8x8xf32>
    %cst_22 = arith.constant 0.353553385 : f32
    %25 = vector.broadcast %cst_22 : f32 to vector<8x8xf32>
    %26 = arith.mulf %24, %25 : vector<8x8xf32>
    %27 = vector.extract_strided_slice %5 {offsets = [0, 0], sizes = [1, 8], strides = [1, 1]} : vector<1x128xf32> to vector<1x8xf32>
    %cst_23 = arith.constant 0.000000e+00 : f32
    %28 = vector.broadcast %cst_23 : f32 to vector<1x8xf32>
    %29 = arith.cmpf oeq, %27, %28 : vector<1x8xf32>
    %cst_24 = arith.constant -1.000000e+30 : f32
    %30 = vector.shape_cast %29 : vector<1x8xi1> to vector<1x8xi1>
    %31 = vector.broadcast %30 : vector<1x8xi1> to vector<8x8xi1>
    %32 = vector.broadcast %cst_24 : f32 to vector<8x8xf32>
    %33 = arith.select %31, %32, %26 : vector<8x8xi1>, vector<8x8xf32>
    %cst_25 = arith.constant dense<0xFF800000> : vector<8xf32>
    %34 = vector.multi_reduction <maximumf>, %33, %cst_25 [1] : vector<8x8xf32> to vector<8xf32>
    %35 = vector.shape_cast %34 : vector<8xf32> to vector<8x1xf32>
    %36 = vector.broadcast %35 : vector<8x1xf32> to vector<8x8xf32>
    %37 = arith.subf %33, %36 : vector<8x8xf32>
    %38 = math.exp %37 : vector<8x8xf32>
    %cst_26 = arith.constant dense<0.000000e+00> : vector<8xf32>
    %39 = vector.multi_reduction <add>, %38, %cst_26 [1] : vector<8x8xf32> to vector<8xf32>
    %40 = vector.shape_cast %39 : vector<8xf32> to vector<8x1xf32>
    %41 = tpu.reciprocal %40 {approx = true} : vector<8x1xf32> -> vector<8x1xf32>
    %42 = vector.broadcast %41 : vector<8x1xf32> to vector<8x8xf32>
    %43 = arith.mulf %38, %42 : vector<8x8xf32>
    %44 = arith.truncf %43 : vector<8x8xf32> to vector<8x8xbf16>
    %cst_27 = arith.constant dense<0.000000e+00> : vector<8x8xf32>
    %45 = tpu.matmul %44, %23, %cst_27 {dimension_numbers = #tpu.dot_dimension_numbers<[1], [0], [0], [1], [0, 0, 1, 1], [], []>} : vector<8x8xbf16>, vector<8x8xbf16>, vector<8x8xf32> -> vector<8x8xf32>
    %46 = arith.truncf %45 : vector<8x8xf32> to vector<8x8xbf16>
    %47 = vector.extract_strided_slice %11 {offsets = [0, 0, 0], sizes = [1, 8, 128], strides = [1, 1, 1]} : vector<4x8x128xbf16> to vector<1x8x128xbf16>
    %48 = vector.shape_cast %47 : vector<1x8x128xbf16> to vector<8x128xbf16>
    %cst_28 = arith.constant dense<0.000000e+00> : vector<8x128xf32>
    %49 = tpu.matmul %46, %48, %cst_28 {dimension_numbers = #tpu.dot_dimension_numbers<[1], [0], [0], [1], [0, 0, 1, 1], [], []>} : vector<8x8xbf16>, vector<8x128xbf16>, vector<8x128xf32> -> vector<8x128xf32>
    %50 = vector.extract_strided_slice %17 {offsets = [0, 8], sizes = [8, 8], strides = [1, 1]} : vector<8x128xf32> to vector<8x8xf32>
    %51 = arith.truncf %50 : vector<8x8xf32> to vector<8x8xbf16>
    %52 = vector.extract_strided_slice %17 {offsets = [0, 40], sizes = [8, 8], strides = [1, 1]} : vector<8x128xf32> to vector<8x8xf32>
    %53 = arith.truncf %52 : vector<8x8xf32> to vector<8x8xbf16>
    %54 = vector.extract_strided_slice %17 {offsets = [0, 72], sizes = [8, 8], strides = [1, 1]} : vector<8x128xf32> to vector<8x8xf32>
    %55 = arith.truncf %54 : vector<8x8xf32> to vector<8x8xbf16>
    %cst_29 = arith.constant dense<0.000000e+00> : vector<8x8xf32>
    %56 = tpu.matmul %51, %53, %cst_29 {dimension_numbers = #tpu.dot_dimension_numbers<[1], [1], [0], [0], [0, 0, 1, 0], [], []>} : vector<8x8xbf16>, vector<8x8xbf16>, vector<8x8xf32> -> vector<8x8xf32>
    %cst_30 = arith.constant 0.353553385 : f32
    %57 = vector.broadcast %cst_30 : f32 to vector<8x8xf32>
    %58 = arith.mulf %56, %57 : vector<8x8xf32>
    %59 = vector.extract_strided_slice %5 {offsets = [0, 0], sizes = [1, 8], strides = [1, 1]} : vector<1x128xf32> to vector<1x8xf32>
    %cst_31 = arith.constant 0.000000e+00 : f32
    %60 = vector.broadcast %cst_31 : f32 to vector<1x8xf32>
    %61 = arith.cmpf oeq, %59, %60 : vector<1x8xf32>
    %cst_32 = arith.constant -1.000000e+30 : f32
    %62 = vector.shape_cast %61 : vector<1x8xi1> to vector<1x8xi1>
    %63 = vector.broadcast %62 : vector<1x8xi1> to vector<8x8xi1>
    %64 = vector.broadcast %cst_32 : f32 to vector<8x8xf32>
    %65 = arith.select %63, %64, %58 : vector<8x8xi1>, vector<8x8xf32>
    %cst_33 = arith.constant dense<0xFF800000> : vector<8xf32>
    %66 = vector.multi_reduction <maximumf>, %65, %cst_33 [1] : vector<8x8xf32> to vector<8xf32>
    %67 = vector.shape_cast %66 : vector<8xf32> to vector<8x1xf32>
    %68 = vector.broadcast %67 : vector<8x1xf32> to vector<8x8xf32>
    %69 = arith.subf %65, %68 : vector<8x8xf32>
    %70 = math.exp %69 : vector<8x8xf32>
    %cst_34 = arith.constant dense<0.000000e+00> : vector<8xf32>
    %71 = vector.multi_reduction <add>, %70, %cst_34 [1] : vector<8x8xf32> to vector<8xf32>
    %72 = vector.shape_cast %71 : vector<8xf32> to vector<8x1xf32>
    %73 = tpu.reciprocal %72 {approx = true} : vector<8x1xf32> -> vector<8x1xf32>
    %74 = vector.broadcast %73 : vector<8x1xf32> to vector<8x8xf32>
    %75 = arith.mulf %70, %74 : vector<8x8xf32>
    %76 = arith.truncf %75 : vector<8x8xf32> to vector<8x8xbf16>
    %cst_35 = arith.constant dense<0.000000e+00> : vector<8x8xf32>
    %77 = tpu.matmul %76, %55, %cst_35 {dimension_numbers = #tpu.dot_dimension_numbers<[1], [0], [0], [1], [0, 0, 1, 1], [], []>} : vector<8x8xbf16>, vector<8x8xbf16>, vector<8x8xf32> -> vector<8x8xf32>
    %78 = arith.truncf %77 : vector<8x8xf32> to vector<8x8xbf16>
    %79 = vector.extract_strided_slice %11 {offsets = [1, 0, 0], sizes = [1, 8, 128], strides = [1, 1, 1]} : vector<4x8x128xbf16> to vector<1x8x128xbf16>
    %80 = vector.shape_cast %79 : vector<1x8x128xbf16> to vector<8x128xbf16>
    %cst_36 = arith.constant dense<0.000000e+00> : vector<8x128xf32>
    %81 = tpu.matmul %78, %80, %cst_36 {dimension_numbers = #tpu.dot_dimension_numbers<[1], [0], [0], [1], [0, 0, 1, 1], [], []>} : vector<8x8xbf16>, vector<8x128xbf16>, vector<8x128xf32> -> vector<8x128xf32>
    %82 = arith.addf %49, %81 : vector<8x128xf32>
    %83 = vector.extract_strided_slice %17 {offsets = [0, 16], sizes = [8, 8], strides = [1, 1]} : vector<8x128xf32> to vector<8x8xf32>
    %84 = arith.truncf %83 : vector<8x8xf32> to vector<8x8xbf16>
    %85 = vector.extract_strided_slice %17 {offsets = [0, 48], sizes = [8, 8], strides = [1, 1]} : vector<8x128xf32> to vector<8x8xf32>
    %86 = arith.truncf %85 : vector<8x8xf32> to vector<8x8xbf16>
    %87 = vector.extract_strided_slice %17 {offsets = [0, 80], sizes = [8, 8], strides = [1, 1]} : vector<8x128xf32> to vector<8x8xf32>
    %88 = arith.truncf %87 : vector<8x8xf32> to vector<8x8xbf16>
    %cst_37 = arith.constant dense<0.000000e+00> : vector<8x8xf32>
    %89 = tpu.matmul %84, %86, %cst_37 {dimension_numbers = #tpu.dot_dimension_numbers<[1], [1], [0], [0], [0, 0, 1, 0], [], []>} : vector<8x8xbf16>, vector<8x8xbf16>, vector<8x8xf32> -> vector<8x8xf32>
    %cst_38 = arith.constant 0.353553385 : f32
    %90 = vector.broadcast %cst_38 : f32 to vector<8x8xf32>
    %91 = arith.mulf %89, %90 : vector<8x8xf32>
    %92 = vector.extract_strided_slice %5 {offsets = [0, 0], sizes = [1, 8], strides = [1, 1]} : vector<1x128xf32> to vector<1x8xf32>
    %cst_39 = arith.constant 0.000000e+00 : f32
    %93 = vector.broadcast %cst_39 : f32 to vector<1x8xf32>
    %94 = arith.cmpf oeq, %92, %93 : vector<1x8xf32>
    %cst_40 = arith.constant -1.000000e+30 : f32
    %95 = vector.shape_cast %94 : vector<1x8xi1> to vector<1x8xi1>
    %96 = vector.broadcast %95 : vector<1x8xi1> to vector<8x8xi1>
    %97 = vector.broadcast %cst_40 : f32 to vector<8x8xf32>
    %98 = arith.select %96, %97, %91 : vector<8x8xi1>, vector<8x8xf32>
    %cst_41 = arith.constant dense<0xFF800000> : vector<8xf32>
    %99 = vector.multi_reduction <maximumf>, %98, %cst_41 [1] : vector<8x8xf32> to vector<8xf32>
    %100 = vector.shape_cast %99 : vector<8xf32> to vector<8x1xf32>
    %101 = vector.broadcast %100 : vector<8x1xf32> to vector<8x8xf32>
    %102 = arith.subf %98, %101 : vector<8x8xf32>
    %103 = math.exp %102 : vector<8x8xf32>
    %cst_42 = arith.constant dense<0.000000e+00> : vector<8xf32>
    %104 = vector.multi_reduction <add>, %103, %cst_42 [1] : vector<8x8xf32> to vector<8xf32>
    %105 = vector.shape_cast %104 : vector<8xf32> to vector<8x1xf32>
    %106 = tpu.reciprocal %105 {approx = true} : vector<8x1xf32> -> vector<8x1xf32>
    %107 = vector.broadcast %106 : vector<8x1xf32> to vector<8x8xf32>
    %108 = arith.mulf %103, %107 : vector<8x8xf32>
    %109 = arith.truncf %108 : vector<8x8xf32> to vector<8x8xbf16>
    %cst_43 = arith.constant dense<0.000000e+00> : vector<8x8xf32>
    %110 = tpu.matmul %109, %88, %cst_43 {dimension_numbers = #tpu.dot_dimension_numbers<[1], [0], [0], [1], [0, 0, 1, 1], [], []>} : vector<8x8xbf16>, vector<8x8xbf16>, vector<8x8xf32> -> vector<8x8xf32>
    %111 = arith.truncf %110 : vector<8x8xf32> to vector<8x8xbf16>
    %112 = vector.extract_strided_slice %11 {offsets = [2, 0, 0], sizes = [1, 8, 128], strides = [1, 1, 1]} : vector<4x8x128xbf16> to vector<1x8x128xbf16>
    %113 = vector.shape_cast %112 : vector<1x8x128xbf16> to vector<8x128xbf16>
    %cst_44 = arith.constant dense<0.000000e+00> : vector<8x128xf32>
    %114 = tpu.matmul %111, %113, %cst_44 {dimension_numbers = #tpu.dot_dimension_numbers<[1], [0], [0], [1], [0, 0, 1, 1], [], []>} : vector<8x8xbf16>, vector<8x128xbf16>, vector<8x128xf32> -> vector<8x128xf32>
    %115 = arith.addf %82, %114 : vector<8x128xf32>
    %116 = vector.extract_strided_slice %17 {offsets = [0, 24], sizes = [8, 8], strides = [1, 1]} : vector<8x128xf32> to vector<8x8xf32>
    %117 = arith.truncf %116 : vector<8x8xf32> to vector<8x8xbf16>
    %118 = vector.extract_strided_slice %17 {offsets = [0, 56], sizes = [8, 8], strides = [1, 1]} : vector<8x128xf32> to vector<8x8xf32>
    %119 = arith.truncf %118 : vector<8x8xf32> to vector<8x8xbf16>
    %120 = vector.extract_strided_slice %17 {offsets = [0, 88], sizes = [8, 8], strides = [1, 1]} : vector<8x128xf32> to vector<8x8xf32>
    %121 = arith.truncf %120 : vector<8x8xf32> to vector<8x8xbf16>
    %cst_45 = arith.constant dense<0.000000e+00> : vector<8x8xf32>
    %122 = tpu.matmul %117, %119, %cst_45 {dimension_numbers = #tpu.dot_dimension_numbers<[1], [1], [0], [0], [0, 0, 1, 0], [], []>} : vector<8x8xbf16>, vector<8x8xbf16>, vector<8x8xf32> -> vector<8x8xf32>
    %cst_46 = arith.constant 0.353553385 : f32
    %123 = vector.broadcast %cst_46 : f32 to vector<8x8xf32>
    %124 = arith.mulf %122, %123 : vector<8x8xf32>
    %125 = vector.extract_strided_slice %5 {offsets = [0, 0], sizes = [1, 8], strides = [1, 1]} : vector<1x128xf32> to vector<1x8xf32>
    %cst_47 = arith.constant 0.000000e+00 : f32
    %126 = vector.broadcast %cst_47 : f32 to vector<1x8xf32>
    %127 = arith.cmpf oeq, %125, %126 : vector<1x8xf32>
    %cst_48 = arith.constant -1.000000e+30 : f32
    %128 = vector.shape_cast %127 : vector<1x8xi1> to vector<1x8xi1>
    %129 = vector.broadcast %128 : vector<1x8xi1> to vector<8x8xi1>
    %130 = vector.broadcast %cst_48 : f32 to vector<8x8xf32>
    %131 = arith.select %129, %130, %124 : vector<8x8xi1>, vector<8x8xf32>
    %cst_49 = arith.constant dense<0xFF800000> : vector<8xf32>
    %132 = vector.multi_reduction <maximumf>, %131, %cst_49 [1] : vector<8x8xf32> to vector<8xf32>
    %133 = vector.shape_cast %132 : vector<8xf32> to vector<8x1xf32>
    %134 = vector.broadcast %133 : vector<8x1xf32> to vector<8x8xf32>
    %135 = arith.subf %131, %134 : vector<8x8xf32>
    %136 = math.exp %135 : vector<8x8xf32>
    %cst_50 = arith.constant dense<0.000000e+00> : vector<8xf32>
    %137 = vector.multi_reduction <add>, %136, %cst_50 [1] : vector<8x8xf32> to vector<8xf32>
    %138 = vector.shape_cast %137 : vector<8xf32> to vector<8x1xf32>
    %139 = tpu.reciprocal %138 {approx = true} : vector<8x1xf32> -> vector<8x1xf32>
    %140 = vector.broadcast %139 : vector<8x1xf32> to vector<8x8xf32>
    %141 = arith.mulf %136, %140 : vector<8x8xf32>
    %142 = arith.truncf %141 : vector<8x8xf32> to vector<8x8xbf16>
    %cst_51 = arith.constant dense<0.000000e+00> : vector<8x8xf32>
    %143 = tpu.matmul %142, %121, %cst_51 {dimension_numbers = #tpu.dot_dimension_numbers<[1], [0], [0], [1], [0, 0, 1, 1], [], []>} : vector<8x8xbf16>, vector<8x8xbf16>, vector<8x8xf32> -> vector<8x8xf32>
    %144 = arith.truncf %143 : vector<8x8xf32> to vector<8x8xbf16>
    %145 = vector.extract_strided_slice %11 {offsets = [3, 0, 0], sizes = [1, 8, 128], strides = [1, 1, 1]} : vector<4x8x128xbf16> to vector<1x8x128xbf16>
    %146 = vector.shape_cast %145 : vector<1x8x128xbf16> to vector<8x128xbf16>
    %cst_52 = arith.constant dense<0.000000e+00> : vector<8x128xf32>
    %147 = tpu.matmul %144, %146, %cst_52 {dimension_numbers = #tpu.dot_dimension_numbers<[1], [0], [0], [1], [0, 0, 1, 1], [], []>} : vector<8x8xbf16>, vector<8x128xbf16>, vector<8x128xf32> -> vector<8x128xf32>
    %148 = arith.addf %115, %147 : vector<8x128xf32>
    %149 = vector.broadcast %13 : vector<1x128xf32> to vector<8x128xf32>
    %150 = arith.addf %148, %149 : vector<8x128xf32>
    %c0_53 = arith.constant 0 : index
    %c0_54 = arith.constant 0 : index
    %c0_55 = arith.constant 0 : index
    %151 = vector.load %arg8[%c0_53, %c0_54, %c0_55] : memref<2x1x128xf32, #tpu.memory_space<vmem>>, vector<1x1x128xf32>
    %152 = vector.shape_cast %151 : vector<1x1x128xf32> to vector<1x128xf32>
    %c0_56 = arith.constant 0 : index
    %c0_57 = arith.constant 0 : index
    %c0_58 = arith.constant 0 : index
    %153 = vector.load %arg9[%c0_56, %c0_57, %c0_58] : memref<2x1x128xf32, #tpu.memory_space<vmem>>, vector<1x1x128xf32>
    %154 = vector.shape_cast %153 : vector<1x1x128xf32> to vector<1x128xf32>
    %155 = arith.addf %1, %150 : vector<8x128xf32>
    %cst_59 = arith.constant dense<0.000000e+00> : vector<8xf32>
    %156 = vector.multi_reduction <add>, %155, %cst_59 [1] : vector<8x128xf32> to vector<8xf32>
    %157 = vector.shape_cast %156 : vector<8xf32> to vector<8x1xf32>
    %cst_60 = arith.constant 3.125000e-02 : f32
    %158 = vector.broadcast %cst_60 : f32 to vector<8x1xf32>
    %159 = arith.mulf %157, %158 : vector<8x1xf32>
    %160 = tpu.iota {dimensions = array<i32: 1>} : vector<8x128xi32>
    %c32_i32 = arith.constant 32 : i32
    %161 = vector.broadcast %c32_i32 : i32 to vector<8x128xi32>
    %162 = arith.cmpi slt, %160, %161 : vector<8x128xi32>
    %163 = vector.broadcast %159 : vector<8x1xf32> to vector<8x128xf32>
    %164 = arith.subf %155, %163 : vector<8x128xf32>
    %cst_61 = arith.constant 0.000000e+00 : f32
    %165 = vector.broadcast %cst_61 : f32 to vector<8x128xf32>
    %166 = arith.select %162, %164, %165 : vector<8x128xi1>, vector<8x128xf32>
    %167 = arith.mulf %166, %166 : vector<8x128xf32>
    %cst_62 = arith.constant dense<0.000000e+00> : vector<8xf32>
    %168 = vector.multi_reduction <add>, %167, %cst_62 [1] : vector<8x128xf32> to vector<8xf32>
    %169 = vector.shape_cast %168 : vector<8xf32> to vector<8x1xf32>
    %cst_63 = arith.constant 3.125000e-02 : f32
    %170 = vector.broadcast %cst_63 : f32 to vector<8x1xf32>
    %171 = arith.mulf %169, %170 : vector<8x1xf32>
    %172 = vector.broadcast %159 : vector<8x1xf32> to vector<8x128xf32>
    %173 = arith.subf %155, %172 : vector<8x128xf32>
    %cst_64 = arith.constant 9.99999974E-6 : f32
    %174 = vector.broadcast %cst_64 : f32 to vector<8x1xf32>
    %175 = arith.addf %171, %174 : vector<8x1xf32>
    %176 = math.rsqrt %175 : vector<8x1xf32>
    %177 = vector.broadcast %176 : vector<8x1xf32> to vector<8x128xf32>
    %178 = arith.mulf %173, %177 : vector<8x128xf32>
    %179 = vector.broadcast %152 : vector<1x128xf32> to vector<8x128xf32>
    %180 = arith.mulf %178, %179 : vector<8x128xf32>
    %181 = vector.broadcast %154 : vector<1x128xf32> to vector<8x128xf32>
    %182 = arith.addf %180, %181 : vector<8x128xf32>
    %c0_65 = arith.constant 0 : index
    %c0_66 = arith.constant 0 : index
    %c0_67 = arith.constant 0 : index
    %183 = vector.load %arg10[%c0_65, %c0_66, %c0_67] : memref<2x128x128xbf16, #tpu.memory_space<vmem>>, vector<1x128x128xbf16>
    %184 = vector.shape_cast %183 : vector<1x128x128xbf16> to vector<128x128xbf16>
    %c0_68 = arith.constant 0 : index
    %c0_69 = arith.constant 0 : index
    %c0_70 = arith.constant 0 : index
    %185 = vector.load %arg11[%c0_68, %c0_69, %c0_70] : memref<2x1x128xf32, #tpu.memory_space<vmem>>, vector<1x1x128xf32>
    %186 = vector.shape_cast %185 : vector<1x1x128xf32> to vector<1x128xf32>
    %c0_71 = arith.constant 0 : index
    %c0_72 = arith.constant 0 : index
    %c0_73 = arith.constant 0 : index
    %187 = vector.load %arg12[%c0_71, %c0_72, %c0_73] : memref<2x128x128xbf16, #tpu.memory_space<vmem>>, vector<1x128x128xbf16>
    %188 = vector.shape_cast %187 : vector<1x128x128xbf16> to vector<128x128xbf16>
    %c0_74 = arith.constant 0 : index
    %c0_75 = arith.constant 0 : index
    %c0_76 = arith.constant 0 : index
    %189 = vector.load %arg13[%c0_74, %c0_75, %c0_76] : memref<2x1x128xf32, #tpu.memory_space<vmem>>, vector<1x1x128xf32>
    %190 = vector.shape_cast %189 : vector<1x1x128xf32> to vector<1x128xf32>
    %191 = arith.truncf %182 : vector<8x128xf32> to vector<8x128xbf16>
    %cst_77 = arith.constant dense<0.000000e+00> : vector<8x128xf32>
    %192 = tpu.matmul %191, %184, %cst_77 {dimension_numbers = #tpu.dot_dimension_numbers<[1], [0], [0], [1], [0, 0, 1, 1], [], []>} : vector<8x128xbf16>, vector<128x128xbf16>, vector<8x128xf32> -> vector<8x128xf32>
    %193 = vector.broadcast %186 : vector<1x128xf32> to vector<8x128xf32>
    %194 = arith.addf %192, %193 : vector<8x128xf32>
    %cst_78 = arith.constant 5.000000e-01 : f32
    %195 = vector.broadcast %cst_78 : f32 to vector<8x128xf32>
    %196 = arith.mulf %195, %194 : vector<8x128xf32>
    %cst_79 = arith.constant 0.707106769 : f32
    %197 = vector.broadcast %cst_79 : f32 to vector<8x128xf32>
    %198 = arith.mulf %194, %197 : vector<8x128xf32>
    %199 = math.erf %198 : vector<8x128xf32>
    %cst_80 = arith.constant 1.000000e+00 : f32
    %200 = vector.broadcast %cst_80 : f32 to vector<8x128xf32>
    %201 = arith.addf %200, %199 : vector<8x128xf32>
    %202 = arith.mulf %196, %201 : vector<8x128xf32>
    %203 = arith.truncf %202 : vector<8x128xf32> to vector<8x128xbf16>
    %cst_81 = arith.constant dense<0.000000e+00> : vector<8x128xf32>
    %204 = tpu.matmul %203, %188, %cst_81 {dimension_numbers = #tpu.dot_dimension_numbers<[1], [0], [0], [1], [0, 0, 1, 1], [], []>} : vector<8x128xbf16>, vector<128x128xbf16>, vector<8x128xf32> -> vector<8x128xf32>
    %205 = vector.broadcast %190 : vector<1x128xf32> to vector<8x128xf32>
    %206 = arith.addf %204, %205 : vector<8x128xf32>
    %c0_82 = arith.constant 0 : index
    %c0_83 = arith.constant 0 : index
    %c0_84 = arith.constant 0 : index
    %207 = vector.load %arg14[%c0_82, %c0_83, %c0_84] : memref<2x1x128xf32, #tpu.memory_space<vmem>>, vector<1x1x128xf32>
    %208 = vector.shape_cast %207 : vector<1x1x128xf32> to vector<1x128xf32>
    %c0_85 = arith.constant 0 : index
    %c0_86 = arith.constant 0 : index
    %c0_87 = arith.constant 0 : index
    %209 = vector.load %arg15[%c0_85, %c0_86, %c0_87] : memref<2x1x128xf32, #tpu.memory_space<vmem>>, vector<1x1x128xf32>
    %210 = vector.shape_cast %209 : vector<1x1x128xf32> to vector<1x128xf32>
    %211 = arith.addf %182, %206 : vector<8x128xf32>
    %cst_88 = arith.constant dense<0.000000e+00> : vector<8xf32>
    %212 = vector.multi_reduction <add>, %211, %cst_88 [1] : vector<8x128xf32> to vector<8xf32>
    %213 = vector.shape_cast %212 : vector<8xf32> to vector<8x1xf32>
    %cst_89 = arith.constant 3.125000e-02 : f32
    %214 = vector.broadcast %cst_89 : f32 to vector<8x1xf32>
    %215 = arith.mulf %213, %214 : vector<8x1xf32>
    %216 = tpu.iota {dimensions = array<i32: 1>} : vector<8x128xi32>
    %c32_i32_90 = arith.constant 32 : i32
    %217 = vector.broadcast %c32_i32_90 : i32 to vector<8x128xi32>
    %218 = arith.cmpi slt, %216, %217 : vector<8x128xi32>
    %219 = vector.broadcast %215 : vector<8x1xf32> to vector<8x128xf32>
    %220 = arith.subf %211, %219 : vector<8x128xf32>
    %cst_91 = arith.constant 0.000000e+00 : f32
    %221 = vector.broadcast %cst_91 : f32 to vector<8x128xf32>
    %222 = arith.select %218, %220, %221 : vector<8x128xi1>, vector<8x128xf32>
    %223 = arith.mulf %222, %222 : vector<8x128xf32>
    %cst_92 = arith.constant dense<0.000000e+00> : vector<8xf32>
    %224 = vector.multi_reduction <add>, %223, %cst_92 [1] : vector<8x128xf32> to vector<8xf32>
    %225 = vector.shape_cast %224 : vector<8xf32> to vector<8x1xf32>
    %cst_93 = arith.constant 3.125000e-02 : f32
    %226 = vector.broadcast %cst_93 : f32 to vector<8x1xf32>
    %227 = arith.mulf %225, %226 : vector<8x1xf32>
    %228 = vector.broadcast %215 : vector<8x1xf32> to vector<8x128xf32>
    %229 = arith.subf %211, %228 : vector<8x128xf32>
    %cst_94 = arith.constant 9.99999974E-6 : f32
    %230 = vector.broadcast %cst_94 : f32 to vector<8x1xf32>
    %231 = arith.addf %227, %230 : vector<8x1xf32>
    %232 = math.rsqrt %231 : vector<8x1xf32>
    %233 = vector.broadcast %232 : vector<8x1xf32> to vector<8x128xf32>
    %234 = arith.mulf %229, %233 : vector<8x128xf32>
    %235 = vector.broadcast %208 : vector<1x128xf32> to vector<8x128xf32>
    %236 = arith.mulf %234, %235 : vector<8x128xf32>
    %237 = vector.broadcast %210 : vector<1x128xf32> to vector<8x128xf32>
    %238 = arith.addf %236, %237 : vector<8x128xf32>
    %c1 = arith.constant 1 : index
    %c0_95 = arith.constant 0 : index
    %c0_96 = arith.constant 0 : index
    %239 = vector.load %arg4[%c1, %c0_95, %c0_96] : memref<2x128x128xbf16, #tpu.memory_space<vmem>>, vector<1x128x128xbf16>
    %240 = vector.shape_cast %239 : vector<1x128x128xbf16> to vector<128x128xbf16>
    %c1_97 = arith.constant 1 : index
    %c0_98 = arith.constant 0 : index
    %c0_99 = arith.constant 0 : index
    %241 = vector.load %arg5[%c1_97, %c0_98, %c0_99] : memref<2x1x128xf32, #tpu.memory_space<vmem>>, vector<1x1x128xf32>
    %242 = vector.shape_cast %241 : vector<1x1x128xf32> to vector<1x128xf32>
    %c1_100 = arith.constant 1 : index
    %c0_101 = arith.constant 0 : index
    %c0_102 = arith.constant 0 : index
    %c0_103 = arith.constant 0 : index
    %243 = vector.load %arg6[%c1_100, %c0_101, %c0_102, %c0_103] : memref<2x4x8x128xbf16, #tpu.memory_space<vmem>>, vector<1x4x8x128xbf16>
    %244 = vector.shape_cast %243 : vector<1x4x8x128xbf16> to vector<4x8x128xbf16>
    %c1_104 = arith.constant 1 : index
    %c0_105 = arith.constant 0 : index
    %c0_106 = arith.constant 0 : index
    %245 = vector.load %arg7[%c1_104, %c0_105, %c0_106] : memref<2x1x128xf32, #tpu.memory_space<vmem>>, vector<1x1x128xf32>
    %246 = vector.shape_cast %245 : vector<1x1x128xf32> to vector<1x128xf32>
    %247 = arith.truncf %238 : vector<8x128xf32> to vector<8x128xbf16>
    %cst_107 = arith.constant dense<0.000000e+00> : vector<8x128xf32>
    %248 = tpu.matmul %247, %240, %cst_107 {dimension_numbers = #tpu.dot_dimension_numbers<[1], [0], [0], [1], [0, 0, 1, 1], [], []>} : vector<8x128xbf16>, vector<128x128xbf16>, vector<8x128xf32> -> vector<8x128xf32>
    %249 = vector.broadcast %242 : vector<1x128xf32> to vector<8x128xf32>
    %250 = arith.addf %248, %249 : vector<8x128xf32>
    %251 = vector.extract_strided_slice %250 {offsets = [0, 0], sizes = [8, 8], strides = [1, 1]} : vector<8x128xf32> to vector<8x8xf32>
    %252 = arith.truncf %251 : vector<8x8xf32> to vector<8x8xbf16>
    %253 = vector.extract_strided_slice %250 {offsets = [0, 32], sizes = [8, 8], strides = [1, 1]} : vector<8x128xf32> to vector<8x8xf32>
    %254 = arith.truncf %253 : vector<8x8xf32> to vector<8x8xbf16>
    %255 = vector.extract_strided_slice %250 {offsets = [0, 64], sizes = [8, 8], strides = [1, 1]} : vector<8x128xf32> to vector<8x8xf32>
    %256 = arith.truncf %255 : vector<8x8xf32> to vector<8x8xbf16>
    %cst_108 = arith.constant dense<0.000000e+00> : vector<8x8xf32>
    %257 = tpu.matmul %252, %254, %cst_108 {dimension_numbers = #tpu.dot_dimension_numbers<[1], [1], [0], [0], [0, 0, 1, 0], [], []>} : vector<8x8xbf16>, vector<8x8xbf16>, vector<8x8xf32> -> vector<8x8xf32>
    %cst_109 = arith.constant 0.353553385 : f32
    %258 = vector.broadcast %cst_109 : f32 to vector<8x8xf32>
    %259 = arith.mulf %257, %258 : vector<8x8xf32>
    %260 = vector.extract_strided_slice %5 {offsets = [0, 0], sizes = [1, 8], strides = [1, 1]} : vector<1x128xf32> to vector<1x8xf32>
    %cst_110 = arith.constant 0.000000e+00 : f32
    %261 = vector.broadcast %cst_110 : f32 to vector<1x8xf32>
    %262 = arith.cmpf oeq, %260, %261 : vector<1x8xf32>
    %cst_111 = arith.constant -1.000000e+30 : f32
    %263 = vector.shape_cast %262 : vector<1x8xi1> to vector<1x8xi1>
    %264 = vector.broadcast %263 : vector<1x8xi1> to vector<8x8xi1>
    %265 = vector.broadcast %cst_111 : f32 to vector<8x8xf32>
    %266 = arith.select %264, %265, %259 : vector<8x8xi1>, vector<8x8xf32>
    %cst_112 = arith.constant dense<0xFF800000> : vector<8xf32>
    %267 = vector.multi_reduction <maximumf>, %266, %cst_112 [1] : vector<8x8xf32> to vector<8xf32>
    %268 = vector.shape_cast %267 : vector<8xf32> to vector<8x1xf32>
    %269 = vector.broadcast %268 : vector<8x1xf32> to vector<8x8xf32>
    %270 = arith.subf %266, %269 : vector<8x8xf32>
    %271 = math.exp %270 : vector<8x8xf32>
    %cst_113 = arith.constant dense<0.000000e+00> : vector<8xf32>
    %272 = vector.multi_reduction <add>, %271, %cst_113 [1] : vector<8x8xf32> to vector<8xf32>
    %273 = vector.shape_cast %272 : vector<8xf32> to vector<8x1xf32>
    %274 = tpu.reciprocal %273 {approx = true} : vector<8x1xf32> -> vector<8x1xf32>
    %275 = vector.broadcast %274 : vector<8x1xf32> to vector<8x8xf32>
    %276 = arith.mulf %271, %275 : vector<8x8xf32>
    %277 = arith.truncf %276 : vector<8x8xf32> to vector<8x8xbf16>
    %cst_114 = arith.constant dense<0.000000e+00> : vector<8x8xf32>
    %278 = tpu.matmul %277, %256, %cst_114 {dimension_numbers = #tpu.dot_dimension_numbers<[1], [0], [0], [1], [0, 0, 1, 1], [], []>} : vector<8x8xbf16>, vector<8x8xbf16>, vector<8x8xf32> -> vector<8x8xf32>
    %279 = arith.truncf %278 : vector<8x8xf32> to vector<8x8xbf16>
    %280 = vector.extract_strided_slice %244 {offsets = [0, 0, 0], sizes = [1, 8, 128], strides = [1, 1, 1]} : vector<4x8x128xbf16> to vector<1x8x128xbf16>
    %281 = vector.shape_cast %280 : vector<1x8x128xbf16> to vector<8x128xbf16>
    %cst_115 = arith.constant dense<0.000000e+00> : vector<8x128xf32>
    %282 = tpu.matmul %279, %281, %cst_115 {dimension_numbers = #tpu.dot_dimension_numbers<[1], [0], [0], [1], [0, 0, 1, 1], [], []>} : vector<8x8xbf16>, vector<8x128xbf16>, vector<8x128xf32> -> vector<8x128xf32>
    %283 = vector.extract_strided_slice %250 {offsets = [0, 8], sizes = [8, 8], strides = [1, 1]} : vector<8x128xf32> to vector<8x8xf32>
    %284 = arith.truncf %283 : vector<8x8xf32> to vector<8x8xbf16>
    %285 = vector.extract_strided_slice %250 {offsets = [0, 40], sizes = [8, 8], strides = [1, 1]} : vector<8x128xf32> to vector<8x8xf32>
    %286 = arith.truncf %285 : vector<8x8xf32> to vector<8x8xbf16>
    %287 = vector.extract_strided_slice %250 {offsets = [0, 72], sizes = [8, 8], strides = [1, 1]} : vector<8x128xf32> to vector<8x8xf32>
    %288 = arith.truncf %287 : vector<8x8xf32> to vector<8x8xbf16>
    %cst_116 = arith.constant dense<0.000000e+00> : vector<8x8xf32>
    %289 = tpu.matmul %284, %286, %cst_116 {dimension_numbers = #tpu.dot_dimension_numbers<[1], [1], [0], [0], [0, 0, 1, 0], [], []>} : vector<8x8xbf16>, vector<8x8xbf16>, vector<8x8xf32> -> vector<8x8xf32>
    %cst_117 = arith.constant 0.353553385 : f32
    %290 = vector.broadcast %cst_117 : f32 to vector<8x8xf32>
    %291 = arith.mulf %289, %290 : vector<8x8xf32>
    %292 = vector.extract_strided_slice %5 {offsets = [0, 0], sizes = [1, 8], strides = [1, 1]} : vector<1x128xf32> to vector<1x8xf32>
    %cst_118 = arith.constant 0.000000e+00 : f32
    %293 = vector.broadcast %cst_118 : f32 to vector<1x8xf32>
    %294 = arith.cmpf oeq, %292, %293 : vector<1x8xf32>
    %cst_119 = arith.constant -1.000000e+30 : f32
    %295 = vector.shape_cast %294 : vector<1x8xi1> to vector<1x8xi1>
    %296 = vector.broadcast %295 : vector<1x8xi1> to vector<8x8xi1>
    %297 = vector.broadcast %cst_119 : f32 to vector<8x8xf32>
    %298 = arith.select %296, %297, %291 : vector<8x8xi1>, vector<8x8xf32>
    %cst_120 = arith.constant dense<0xFF800000> : vector<8xf32>
    %299 = vector.multi_reduction <maximumf>, %298, %cst_120 [1] : vector<8x8xf32> to vector<8xf32>
    %300 = vector.shape_cast %299 : vector<8xf32> to vector<8x1xf32>
    %301 = vector.broadcast %300 : vector<8x1xf32> to vector<8x8xf32>
    %302 = arith.subf %298, %301 : vector<8x8xf32>
    %303 = math.exp %302 : vector<8x8xf32>
    %cst_121 = arith.constant dense<0.000000e+00> : vector<8xf32>
    %304 = vector.multi_reduction <add>, %303, %cst_121 [1] : vector<8x8xf32> to vector<8xf32>
    %305 = vector.shape_cast %304 : vector<8xf32> to vector<8x1xf32>
    %306 = tpu.reciprocal %305 {approx = true} : vector<8x1xf32> -> vector<8x1xf32>
    %307 = vector.broadcast %306 : vector<8x1xf32> to vector<8x8xf32>
    %308 = arith.mulf %303, %307 : vector<8x8xf32>
    %309 = arith.truncf %308 : vector<8x8xf32> to vector<8x8xbf16>
    %cst_122 = arith.constant dense<0.000000e+00> : vector<8x8xf32>
    %310 = tpu.matmul %309, %288, %cst_122 {dimension_numbers = #tpu.dot_dimension_numbers<[1], [0], [0], [1], [0, 0, 1, 1], [], []>} : vector<8x8xbf16>, vector<8x8xbf16>, vector<8x8xf32> -> vector<8x8xf32>
    %311 = arith.truncf %310 : vector<8x8xf32> to vector<8x8xbf16>
    %312 = vector.extract_strided_slice %244 {offsets = [1, 0, 0], sizes = [1, 8, 128], strides = [1, 1, 1]} : vector<4x8x128xbf16> to vector<1x8x128xbf16>
    %313 = vector.shape_cast %312 : vector<1x8x128xbf16> to vector<8x128xbf16>
    %cst_123 = arith.constant dense<0.000000e+00> : vector<8x128xf32>
    %314 = tpu.matmul %311, %313, %cst_123 {dimension_numbers = #tpu.dot_dimension_numbers<[1], [0], [0], [1], [0, 0, 1, 1], [], []>} : vector<8x8xbf16>, vector<8x128xbf16>, vector<8x128xf32> -> vector<8x128xf32>
    %315 = arith.addf %282, %314 : vector<8x128xf32>
    %316 = vector.extract_strided_slice %250 {offsets = [0, 16], sizes = [8, 8], strides = [1, 1]} : vector<8x128xf32> to vector<8x8xf32>
    %317 = arith.truncf %316 : vector<8x8xf32> to vector<8x8xbf16>
    %318 = vector.extract_strided_slice %250 {offsets = [0, 48], sizes = [8, 8], strides = [1, 1]} : vector<8x128xf32> to vector<8x8xf32>
    %319 = arith.truncf %318 : vector<8x8xf32> to vector<8x8xbf16>
    %320 = vector.extract_strided_slice %250 {offsets = [0, 80], sizes = [8, 8], strides = [1, 1]} : vector<8x128xf32> to vector<8x8xf32>
    %321 = arith.truncf %320 : vector<8x8xf32> to vector<8x8xbf16>
    %cst_124 = arith.constant dense<0.000000e+00> : vector<8x8xf32>
    %322 = tpu.matmul %317, %319, %cst_124 {dimension_numbers = #tpu.dot_dimension_numbers<[1], [1], [0], [0], [0, 0, 1, 0], [], []>} : vector<8x8xbf16>, vector<8x8xbf16>, vector<8x8xf32> -> vector<8x8xf32>
    %cst_125 = arith.constant 0.353553385 : f32
    %323 = vector.broadcast %cst_125 : f32 to vector<8x8xf32>
    %324 = arith.mulf %322, %323 : vector<8x8xf32>
    %325 = vector.extract_strided_slice %5 {offsets = [0, 0], sizes = [1, 8], strides = [1, 1]} : vector<1x128xf32> to vector<1x8xf32>
    %cst_126 = arith.constant 0.000000e+00 : f32
    %326 = vector.broadcast %cst_126 : f32 to vector<1x8xf32>
    %327 = arith.cmpf oeq, %325, %326 : vector<1x8xf32>
    %cst_127 = arith.constant -1.000000e+30 : f32
    %328 = vector.shape_cast %327 : vector<1x8xi1> to vector<1x8xi1>
    %329 = vector.broadcast %328 : vector<1x8xi1> to vector<8x8xi1>
    %330 = vector.broadcast %cst_127 : f32 to vector<8x8xf32>
    %331 = arith.select %329, %330, %324 : vector<8x8xi1>, vector<8x8xf32>
    %cst_128 = arith.constant dense<0xFF800000> : vector<8xf32>
    %332 = vector.multi_reduction <maximumf>, %331, %cst_128 [1] : vector<8x8xf32> to vector<8xf32>
    %333 = vector.shape_cast %332 : vector<8xf32> to vector<8x1xf32>
    %334 = vector.broadcast %333 : vector<8x1xf32> to vector<8x8xf32>
    %335 = arith.subf %331, %334 : vector<8x8xf32>
    %336 = math.exp %335 : vector<8x8xf32>
    %cst_129 = arith.constant dense<0.000000e+00> : vector<8xf32>
    %337 = vector.multi_reduction <add>, %336, %cst_129 [1] : vector<8x8xf32> to vector<8xf32>
    %338 = vector.shape_cast %337 : vector<8xf32> to vector<8x1xf32>
    %339 = tpu.reciprocal %338 {approx = true} : vector<8x1xf32> -> vector<8x1xf32>
    %340 = vector.broadcast %339 : vector<8x1xf32> to vector<8x8xf32>
    %341 = arith.mulf %336, %340 : vector<8x8xf32>
    %342 = arith.truncf %341 : vector<8x8xf32> to vector<8x8xbf16>
    %cst_130 = arith.constant dense<0.000000e+00> : vector<8x8xf32>
    %343 = tpu.matmul %342, %321, %cst_130 {dimension_numbers = #tpu.dot_dimension_numbers<[1], [0], [0], [1], [0, 0, 1, 1], [], []>} : vector<8x8xbf16>, vector<8x8xbf16>, vector<8x8xf32> -> vector<8x8xf32>
    %344 = arith.truncf %343 : vector<8x8xf32> to vector<8x8xbf16>
    %345 = vector.extract_strided_slice %244 {offsets = [2, 0, 0], sizes = [1, 8, 128], strides = [1, 1, 1]} : vector<4x8x128xbf16> to vector<1x8x128xbf16>
    %346 = vector.shape_cast %345 : vector<1x8x128xbf16> to vector<8x128xbf16>
    %cst_131 = arith.constant dense<0.000000e+00> : vector<8x128xf32>
    %347 = tpu.matmul %344, %346, %cst_131 {dimension_numbers = #tpu.dot_dimension_numbers<[1], [0], [0], [1], [0, 0, 1, 1], [], []>} : vector<8x8xbf16>, vector<8x128xbf16>, vector<8x128xf32> -> vector<8x128xf32>
    %348 = arith.addf %315, %347 : vector<8x128xf32>
    %349 = vector.extract_strided_slice %250 {offsets = [0, 24], sizes = [8, 8], strides = [1, 1]} : vector<8x128xf32> to vector<8x8xf32>
    %350 = arith.truncf %349 : vector<8x8xf32> to vector<8x8xbf16>
    %351 = vector.extract_strided_slice %250 {offsets = [0, 56], sizes = [8, 8], strides = [1, 1]} : vector<8x128xf32> to vector<8x8xf32>
    %352 = arith.truncf %351 : vector<8x8xf32> to vector<8x8xbf16>
    %353 = vector.extract_strided_slice %250 {offsets = [0, 88], sizes = [8, 8], strides = [1, 1]} : vector<8x128xf32> to vector<8x8xf32>
    %354 = arith.truncf %353 : vector<8x8xf32> to vector<8x8xbf16>
    %cst_132 = arith.constant dense<0.000000e+00> : vector<8x8xf32>
    %355 = tpu.matmul %350, %352, %cst_132 {dimension_numbers = #tpu.dot_dimension_numbers<[1], [1], [0], [0], [0, 0, 1, 0], [], []>} : vector<8x8xbf16>, vector<8x8xbf16>, vector<8x8xf32> -> vector<8x8xf32>
    %cst_133 = arith.constant 0.353553385 : f32
    %356 = vector.broadcast %cst_133 : f32 to vector<8x8xf32>
    %357 = arith.mulf %355, %356 : vector<8x8xf32>
    %358 = vector.extract_strided_slice %5 {offsets = [0, 0], sizes = [1, 8], strides = [1, 1]} : vector<1x128xf32> to vector<1x8xf32>
    %cst_134 = arith.constant 0.000000e+00 : f32
    %359 = vector.broadcast %cst_134 : f32 to vector<1x8xf32>
    %360 = arith.cmpf oeq, %358, %359 : vector<1x8xf32>
    %cst_135 = arith.constant -1.000000e+30 : f32
    %361 = vector.shape_cast %360 : vector<1x8xi1> to vector<1x8xi1>
    %362 = vector.broadcast %361 : vector<1x8xi1> to vector<8x8xi1>
    %363 = vector.broadcast %cst_135 : f32 to vector<8x8xf32>
    %364 = arith.select %362, %363, %357 : vector<8x8xi1>, vector<8x8xf32>
    %cst_136 = arith.constant dense<0xFF800000> : vector<8xf32>
    %365 = vector.multi_reduction <maximumf>, %364, %cst_136 [1] : vector<8x8xf32> to vector<8xf32>
    %366 = vector.shape_cast %365 : vector<8xf32> to vector<8x1xf32>
    %367 = vector.broadcast %366 : vector<8x1xf32> to vector<8x8xf32>
    %368 = arith.subf %364, %367 : vector<8x8xf32>
    %369 = math.exp %368 : vector<8x8xf32>
    %cst_137 = arith.constant dense<0.000000e+00> : vector<8xf32>
    %370 = vector.multi_reduction <add>, %369, %cst_137 [1] : vector<8x8xf32> to vector<8xf32>
    %371 = vector.shape_cast %370 : vector<8xf32> to vector<8x1xf32>
    %372 = tpu.reciprocal %371 {approx = true} : vector<8x1xf32> -> vector<8x1xf32>
    %373 = vector.broadcast %372 : vector<8x1xf32> to vector<8x8xf32>
    %374 = arith.mulf %369, %373 : vector<8x8xf32>
    %375 = arith.truncf %374 : vector<8x8xf32> to vector<8x8xbf16>
    %cst_138 = arith.constant dense<0.000000e+00> : vector<8x8xf32>
    %376 = tpu.matmul %375, %354, %cst_138 {dimension_numbers = #tpu.dot_dimension_numbers<[1], [0], [0], [1], [0, 0, 1, 1], [], []>} : vector<8x8xbf16>, vector<8x8xbf16>, vector<8x8xf32> -> vector<8x8xf32>
    %377 = arith.truncf %376 : vector<8x8xf32> to vector<8x8xbf16>
    %378 = vector.extract_strided_slice %244 {offsets = [3, 0, 0], sizes = [1, 8, 128], strides = [1, 1, 1]} : vector<4x8x128xbf16> to vector<1x8x128xbf16>
    %379 = vector.shape_cast %378 : vector<1x8x128xbf16> to vector<8x128xbf16>
    %cst_139 = arith.constant dense<0.000000e+00> : vector<8x128xf32>
    %380 = tpu.matmul %377, %379, %cst_139 {dimension_numbers = #tpu.dot_dimension_numbers<[1], [0], [0], [1], [0, 0, 1, 1], [], []>} : vector<8x8xbf16>, vector<8x128xbf16>, vector<8x128xf32> -> vector<8x128xf32>
    %381 = arith.addf %348, %380 : vector<8x128xf32>
    %382 = vector.broadcast %246 : vector<1x128xf32> to vector<8x128xf32>
    %383 = arith.addf %381, %382 : vector<8x128xf32>
    %c1_140 = arith.constant 1 : index
    %c0_141 = arith.constant 0 : index
    %c0_142 = arith.constant 0 : index
    %384 = vector.load %arg8[%c1_140, %c0_141, %c0_142] : memref<2x1x128xf32, #tpu.memory_space<vmem>>, vector<1x1x128xf32>
    %385 = vector.shape_cast %384 : vector<1x1x128xf32> to vector<1x128xf32>
    %c1_143 = arith.constant 1 : index
    %c0_144 = arith.constant 0 : index
    %c0_145 = arith.constant 0 : index
    %386 = vector.load %arg9[%c1_143, %c0_144, %c0_145] : memref<2x1x128xf32, #tpu.memory_space<vmem>>, vector<1x1x128xf32>
    %387 = vector.shape_cast %386 : vector<1x1x128xf32> to vector<1x128xf32>
    %388 = arith.addf %238, %383 : vector<8x128xf32>
    %cst_146 = arith.constant dense<0.000000e+00> : vector<8xf32>
    %389 = vector.multi_reduction <add>, %388, %cst_146 [1] : vector<8x128xf32> to vector<8xf32>
    %390 = vector.shape_cast %389 : vector<8xf32> to vector<8x1xf32>
    %cst_147 = arith.constant 3.125000e-02 : f32
    %391 = vector.broadcast %cst_147 : f32 to vector<8x1xf32>
    %392 = arith.mulf %390, %391 : vector<8x1xf32>
    %393 = tpu.iota {dimensions = array<i32: 1>} : vector<8x128xi32>
    %c32_i32_148 = arith.constant 32 : i32
    %394 = vector.broadcast %c32_i32_148 : i32 to vector<8x128xi32>
    %395 = arith.cmpi slt, %393, %394 : vector<8x128xi32>
    %396 = vector.broadcast %392 : vector<8x1xf32> to vector<8x128xf32>
    %397 = arith.subf %388, %396 : vector<8x128xf32>
    %cst_149 = arith.constant 0.000000e+00 : f32
    %398 = vector.broadcast %cst_149 : f32 to vector<8x128xf32>
    %399 = arith.select %395, %397, %398 : vector<8x128xi1>, vector<8x128xf32>
    %400 = arith.mulf %399, %399 : vector<8x128xf32>
    %cst_150 = arith.constant dense<0.000000e+00> : vector<8xf32>
    %401 = vector.multi_reduction <add>, %400, %cst_150 [1] : vector<8x128xf32> to vector<8xf32>
    %402 = vector.shape_cast %401 : vector<8xf32> to vector<8x1xf32>
    %cst_151 = arith.constant 3.125000e-02 : f32
    %403 = vector.broadcast %cst_151 : f32 to vector<8x1xf32>
    %404 = arith.mulf %402, %403 : vector<8x1xf32>
    %405 = vector.broadcast %392 : vector<8x1xf32> to vector<8x128xf32>
    %406 = arith.subf %388, %405 : vector<8x128xf32>
    %cst_152 = arith.constant 9.99999974E-6 : f32
    %407 = vector.broadcast %cst_152 : f32 to vector<8x1xf32>
    %408 = arith.addf %404, %407 : vector<8x1xf32>
    %409 = math.rsqrt %408 : vector<8x1xf32>
    %410 = vector.broadcast %409 : vector<8x1xf32> to vector<8x128xf32>
    %411 = arith.mulf %406, %410 : vector<8x128xf32>
    %412 = vector.broadcast %385 : vector<1x128xf32> to vector<8x128xf32>
    %413 = arith.mulf %411, %412 : vector<8x128xf32>
    %414 = vector.broadcast %387 : vector<1x128xf32> to vector<8x128xf32>
    %415 = arith.addf %413, %414 : vector<8x128xf32>
    %c1_153 = arith.constant 1 : index
    %c0_154 = arith.constant 0 : index
    %c0_155 = arith.constant 0 : index
    %416 = vector.load %arg10[%c1_153, %c0_154, %c0_155] : memref<2x128x128xbf16, #tpu.memory_space<vmem>>, vector<1x128x128xbf16>
    %417 = vector.shape_cast %416 : vector<1x128x128xbf16> to vector<128x128xbf16>
    %c1_156 = arith.constant 1 : index
    %c0_157 = arith.constant 0 : index
    %c0_158 = arith.constant 0 : index
    %418 = vector.load %arg11[%c1_156, %c0_157, %c0_158] : memref<2x1x128xf32, #tpu.memory_space<vmem>>, vector<1x1x128xf32>
    %419 = vector.shape_cast %418 : vector<1x1x128xf32> to vector<1x128xf32>
    %c1_159 = arith.constant 1 : index
    %c0_160 = arith.constant 0 : index
    %c0_161 = arith.constant 0 : index
    %420 = vector.load %arg12[%c1_159, %c0_160, %c0_161] : memref<2x128x128xbf16, #tpu.memory_space<vmem>>, vector<1x128x128xbf16>
    %421 = vector.shape_cast %420 : vector<1x128x128xbf16> to vector<128x128xbf16>
    %c1_162 = arith.constant 1 : index
    %c0_163 = arith.constant 0 : index
    %c0_164 = arith.constant 0 : index
    %422 = vector.load %arg13[%c1_162, %c0_163, %c0_164] : memref<2x1x128xf32, #tpu.memory_space<vmem>>, vector<1x1x128xf32>
    %423 = vector.shape_cast %422 : vector<1x1x128xf32> to vector<1x128xf32>
    %424 = arith.truncf %415 : vector<8x128xf32> to vector<8x128xbf16>
    %cst_165 = arith.constant dense<0.000000e+00> : vector<8x128xf32>
    %425 = tpu.matmul %424, %417, %cst_165 {dimension_numbers = #tpu.dot_dimension_numbers<[1], [0], [0], [1], [0, 0, 1, 1], [], []>} : vector<8x128xbf16>, vector<128x128xbf16>, vector<8x128xf32> -> vector<8x128xf32>
    %426 = vector.broadcast %419 : vector<1x128xf32> to vector<8x128xf32>
    %427 = arith.addf %425, %426 : vector<8x128xf32>
    %cst_166 = arith.constant 5.000000e-01 : f32
    %428 = vector.broadcast %cst_166 : f32 to vector<8x128xf32>
    %429 = arith.mulf %428, %427 : vector<8x128xf32>
    %cst_167 = arith.constant 0.707106769 : f32
    %430 = vector.broadcast %cst_167 : f32 to vector<8x128xf32>
    %431 = arith.mulf %427, %430 : vector<8x128xf32>
    %432 = math.erf %431 : vector<8x128xf32>
    %cst_168 = arith.constant 1.000000e+00 : f32
    %433 = vector.broadcast %cst_168 : f32 to vector<8x128xf32>
    %434 = arith.addf %433, %432 : vector<8x128xf32>
    %435 = arith.mulf %429, %434 : vector<8x128xf32>
    %436 = arith.truncf %435 : vector<8x128xf32> to vector<8x128xbf16>
    %cst_169 = arith.constant dense<0.000000e+00> : vector<8x128xf32>
    %437 = tpu.matmul %436, %421, %cst_169 {dimension_numbers = #tpu.dot_dimension_numbers<[1], [0], [0], [1], [0, 0, 1, 1], [], []>} : vector<8x128xbf16>, vector<128x128xbf16>, vector<8x128xf32> -> vector<8x128xf32>
    %438 = vector.broadcast %423 : vector<1x128xf32> to vector<8x128xf32>
    %439 = arith.addf %437, %438 : vector<8x128xf32>
    %c1_170 = arith.constant 1 : index
    %c0_171 = arith.constant 0 : index
    %c0_172 = arith.constant 0 : index
    %440 = vector.load %arg14[%c1_170, %c0_171, %c0_172] : memref<2x1x128xf32, #tpu.memory_space<vmem>>, vector<1x1x128xf32>
    %441 = vector.shape_cast %440 : vector<1x1x128xf32> to vector<1x128xf32>
    %c1_173 = arith.constant 1 : index
    %c0_174 = arith.constant 0 : index
    %c0_175 = arith.constant 0 : index
    %442 = vector.load %arg15[%c1_173, %c0_174, %c0_175] : memref<2x1x128xf32, #tpu.memory_space<vmem>>, vector<1x1x128xf32>
    %443 = vector.shape_cast %442 : vector<1x1x128xf32> to vector<1x128xf32>
    %444 = arith.addf %415, %439 : vector<8x128xf32>
    %cst_176 = arith.constant dense<0.000000e+00> : vector<8xf32>
    %445 = vector.multi_reduction <add>, %444, %cst_176 [1] : vector<8x128xf32> to vector<8xf32>
    %446 = vector.shape_cast %445 : vector<8xf32> to vector<8x1xf32>
    %cst_177 = arith.constant 3.125000e-02 : f32
    %447 = vector.broadcast %cst_177 : f32 to vector<8x1xf32>
    %448 = arith.mulf %446, %447 : vector<8x1xf32>
    %449 = tpu.iota {dimensions = array<i32: 1>} : vector<8x128xi32>
    %c32_i32_178 = arith.constant 32 : i32
    %450 = vector.broadcast %c32_i32_178 : i32 to vector<8x128xi32>
    %451 = arith.cmpi slt, %449, %450 : vector<8x128xi32>
    %452 = vector.broadcast %448 : vector<8x1xf32> to vector<8x128xf32>
    %453 = arith.subf %444, %452 : vector<8x128xf32>
    %cst_179 = arith.constant 0.000000e+00 : f32
    %454 = vector.broadcast %cst_179 : f32 to vector<8x128xf32>
    %455 = arith.select %451, %453, %454 : vector<8x128xi1>, vector<8x128xf32>
    %456 = arith.mulf %455, %455 : vector<8x128xf32>
    %cst_180 = arith.constant dense<0.000000e+00> : vector<8xf32>
    %457 = vector.multi_reduction <add>, %456, %cst_180 [1] : vector<8x128xf32> to vector<8xf32>
    %458 = vector.shape_cast %457 : vector<8xf32> to vector<8x1xf32>
    %cst_181 = arith.constant 3.125000e-02 : f32
    %459 = vector.broadcast %cst_181 : f32 to vector<8x1xf32>
    %460 = arith.mulf %458, %459 : vector<8x1xf32>
    %461 = vector.broadcast %448 : vector<8x1xf32> to vector<8x128xf32>
    %462 = arith.subf %444, %461 : vector<8x128xf32>
    %cst_182 = arith.constant 9.99999974E-6 : f32
    %463 = vector.broadcast %cst_182 : f32 to vector<8x1xf32>
    %464 = arith.addf %460, %463 : vector<8x1xf32>
    %465 = math.rsqrt %464 : vector<8x1xf32>
    %466 = vector.broadcast %465 : vector<8x1xf32> to vector<8x128xf32>
    %467 = arith.mulf %462, %466 : vector<8x128xf32>
    %468 = vector.broadcast %441 : vector<1x128xf32> to vector<8x128xf32>
    %469 = arith.mulf %467, %468 : vector<8x128xf32>
    %470 = vector.broadcast %443 : vector<1x128xf32> to vector<8x128xf32>
    %471 = arith.addf %469, %470 : vector<8x128xf32>
    %c0_183 = arith.constant 0 : index
    %c0_184 = arith.constant 0 : index
    %c0_185 = arith.constant 0 : index
    %472 = vector.load %arg16[%c0_183, %c0_184, %c0_185] : memref<2x128x128xbf16, #tpu.memory_space<vmem>>, vector<1x128x128xbf16>
    %473 = vector.shape_cast %472 : vector<1x128x128xbf16> to vector<128x128xbf16>
    %c0_186 = arith.constant 0 : index
    %c0_187 = arith.constant 0 : index
    %c0_188 = arith.constant 0 : index
    %474 = vector.load %arg17[%c0_186, %c0_187, %c0_188] : memref<2x1x128xf32, #tpu.memory_space<vmem>>, vector<1x1x128xf32>
    %475 = vector.shape_cast %474 : vector<1x1x128xf32> to vector<1x128xf32>
    %c0_189 = arith.constant 0 : index
    %c0_190 = arith.constant 0 : index
    %c0_191 = arith.constant 0 : index
    %c0_192 = arith.constant 0 : index
    %476 = vector.load %arg18[%c0_189, %c0_190, %c0_191, %c0_192] : memref<2x4x8x128xbf16, #tpu.memory_space<vmem>>, vector<1x4x8x128xbf16>
    %477 = vector.shape_cast %476 : vector<1x4x8x128xbf16> to vector<4x8x128xbf16>
    %c0_193 = arith.constant 0 : index
    %c0_194 = arith.constant 0 : index
    %c0_195 = arith.constant 0 : index
    %478 = vector.load %arg19[%c0_193, %c0_194, %c0_195] : memref<2x1x128xf32, #tpu.memory_space<vmem>>, vector<1x1x128xf32>
    %479 = vector.shape_cast %478 : vector<1x1x128xf32> to vector<1x128xf32>
    %480 = arith.truncf %3 : vector<8x128xf32> to vector<8x128xbf16>
    %cst_196 = arith.constant dense<0.000000e+00> : vector<8x128xf32>
    %481 = tpu.matmul %480, %473, %cst_196 {dimension_numbers = #tpu.dot_dimension_numbers<[1], [0], [0], [1], [0, 0, 1, 1], [], []>} : vector<8x128xbf16>, vector<128x128xbf16>, vector<8x128xf32> -> vector<8x128xf32>
    %482 = vector.broadcast %475 : vector<1x128xf32> to vector<8x128xf32>
    %483 = arith.addf %481, %482 : vector<8x128xf32>
    %484 = vector.extract_strided_slice %483 {offsets = [0, 0], sizes = [8, 8], strides = [1, 1]} : vector<8x128xf32> to vector<8x8xf32>
    %485 = arith.truncf %484 : vector<8x8xf32> to vector<8x8xbf16>
    %486 = vector.extract_strided_slice %483 {offsets = [0, 32], sizes = [8, 8], strides = [1, 1]} : vector<8x128xf32> to vector<8x8xf32>
    %487 = arith.truncf %486 : vector<8x8xf32> to vector<8x8xbf16>
    %488 = vector.extract_strided_slice %483 {offsets = [0, 64], sizes = [8, 8], strides = [1, 1]} : vector<8x128xf32> to vector<8x8xf32>
    %489 = arith.truncf %488 : vector<8x8xf32> to vector<8x8xbf16>
    %cst_197 = arith.constant dense<0.000000e+00> : vector<8x8xf32>
    %490 = tpu.matmul %485, %487, %cst_197 {dimension_numbers = #tpu.dot_dimension_numbers<[1], [1], [0], [0], [0, 0, 1, 0], [], []>} : vector<8x8xbf16>, vector<8x8xbf16>, vector<8x8xf32> -> vector<8x8xf32>
    %cst_198 = arith.constant 0.353553385 : f32
    %491 = vector.broadcast %cst_198 : f32 to vector<8x8xf32>
    %492 = arith.mulf %490, %491 : vector<8x8xf32>
    %493 = vector.extract_strided_slice %5 {offsets = [0, 0], sizes = [1, 8], strides = [1, 1]} : vector<1x128xf32> to vector<1x8xf32>
    %cst_199 = arith.constant 0.000000e+00 : f32
    %494 = vector.broadcast %cst_199 : f32 to vector<1x8xf32>
    %495 = arith.cmpf oeq, %493, %494 : vector<1x8xf32>
    %cst_200 = arith.constant -1.000000e+30 : f32
    %496 = vector.shape_cast %495 : vector<1x8xi1> to vector<1x8xi1>
    %497 = vector.broadcast %496 : vector<1x8xi1> to vector<8x8xi1>
    %498 = vector.broadcast %cst_200 : f32 to vector<8x8xf32>
    %499 = arith.select %497, %498, %492 : vector<8x8xi1>, vector<8x8xf32>
    %cst_201 = arith.constant dense<0xFF800000> : vector<8xf32>
    %500 = vector.multi_reduction <maximumf>, %499, %cst_201 [1] : vector<8x8xf32> to vector<8xf32>
    %501 = vector.shape_cast %500 : vector<8xf32> to vector<8x1xf32>
    %502 = vector.broadcast %501 : vector<8x1xf32> to vector<8x8xf32>
    %503 = arith.subf %499, %502 : vector<8x8xf32>
    %504 = math.exp %503 : vector<8x8xf32>
    %cst_202 = arith.constant dense<0.000000e+00> : vector<8xf32>
    %505 = vector.multi_reduction <add>, %504, %cst_202 [1] : vector<8x8xf32> to vector<8xf32>
    %506 = vector.shape_cast %505 : vector<8xf32> to vector<8x1xf32>
    %507 = tpu.reciprocal %506 {approx = true} : vector<8x1xf32> -> vector<8x1xf32>
    %508 = vector.broadcast %507 : vector<8x1xf32> to vector<8x8xf32>
    %509 = arith.mulf %504, %508 : vector<8x8xf32>
    %510 = arith.truncf %509 : vector<8x8xf32> to vector<8x8xbf16>
    %cst_203 = arith.constant dense<0.000000e+00> : vector<8x8xf32>
    %511 = tpu.matmul %510, %489, %cst_203 {dimension_numbers = #tpu.dot_dimension_numbers<[1], [0], [0], [1], [0, 0, 1, 1], [], []>} : vector<8x8xbf16>, vector<8x8xbf16>, vector<8x8xf32> -> vector<8x8xf32>
    %512 = arith.truncf %511 : vector<8x8xf32> to vector<8x8xbf16>
    %513 = vector.extract_strided_slice %477 {offsets = [0, 0, 0], sizes = [1, 8, 128], strides = [1, 1, 1]} : vector<4x8x128xbf16> to vector<1x8x128xbf16>
    %514 = vector.shape_cast %513 : vector<1x8x128xbf16> to vector<8x128xbf16>
    %cst_204 = arith.constant dense<0.000000e+00> : vector<8x128xf32>
    %515 = tpu.matmul %512, %514, %cst_204 {dimension_numbers = #tpu.dot_dimension_numbers<[1], [0], [0], [1], [0, 0, 1, 1], [], []>} : vector<8x8xbf16>, vector<8x128xbf16>, vector<8x128xf32> -> vector<8x128xf32>
    %516 = vector.extract_strided_slice %483 {offsets = [0, 8], sizes = [8, 8], strides = [1, 1]} : vector<8x128xf32> to vector<8x8xf32>
    %517 = arith.truncf %516 : vector<8x8xf32> to vector<8x8xbf16>
    %518 = vector.extract_strided_slice %483 {offsets = [0, 40], sizes = [8, 8], strides = [1, 1]} : vector<8x128xf32> to vector<8x8xf32>
    %519 = arith.truncf %518 : vector<8x8xf32> to vector<8x8xbf16>
    %520 = vector.extract_strided_slice %483 {offsets = [0, 72], sizes = [8, 8], strides = [1, 1]} : vector<8x128xf32> to vector<8x8xf32>
    %521 = arith.truncf %520 : vector<8x8xf32> to vector<8x8xbf16>
    %cst_205 = arith.constant dense<0.000000e+00> : vector<8x8xf32>
    %522 = tpu.matmul %517, %519, %cst_205 {dimension_numbers = #tpu.dot_dimension_numbers<[1], [1], [0], [0], [0, 0, 1, 0], [], []>} : vector<8x8xbf16>, vector<8x8xbf16>, vector<8x8xf32> -> vector<8x8xf32>
    %cst_206 = arith.constant 0.353553385 : f32
    %523 = vector.broadcast %cst_206 : f32 to vector<8x8xf32>
    %524 = arith.mulf %522, %523 : vector<8x8xf32>
    %525 = vector.extract_strided_slice %5 {offsets = [0, 0], sizes = [1, 8], strides = [1, 1]} : vector<1x128xf32> to vector<1x8xf32>
    %cst_207 = arith.constant 0.000000e+00 : f32
    %526 = vector.broadcast %cst_207 : f32 to vector<1x8xf32>
    %527 = arith.cmpf oeq, %525, %526 : vector<1x8xf32>
    %cst_208 = arith.constant -1.000000e+30 : f32
    %528 = vector.shape_cast %527 : vector<1x8xi1> to vector<1x8xi1>
    %529 = vector.broadcast %528 : vector<1x8xi1> to vector<8x8xi1>
    %530 = vector.broadcast %cst_208 : f32 to vector<8x8xf32>
    %531 = arith.select %529, %530, %524 : vector<8x8xi1>, vector<8x8xf32>
    %cst_209 = arith.constant dense<0xFF800000> : vector<8xf32>
    %532 = vector.multi_reduction <maximumf>, %531, %cst_209 [1] : vector<8x8xf32> to vector<8xf32>
    %533 = vector.shape_cast %532 : vector<8xf32> to vector<8x1xf32>
    %534 = vector.broadcast %533 : vector<8x1xf32> to vector<8x8xf32>
    %535 = arith.subf %531, %534 : vector<8x8xf32>
    %536 = math.exp %535 : vector<8x8xf32>
    %cst_210 = arith.constant dense<0.000000e+00> : vector<8xf32>
    %537 = vector.multi_reduction <add>, %536, %cst_210 [1] : vector<8x8xf32> to vector<8xf32>
    %538 = vector.shape_cast %537 : vector<8xf32> to vector<8x1xf32>
    %539 = tpu.reciprocal %538 {approx = true} : vector<8x1xf32> -> vector<8x1xf32>
    %540 = vector.broadcast %539 : vector<8x1xf32> to vector<8x8xf32>
    %541 = arith.mulf %536, %540 : vector<8x8xf32>
    %542 = arith.truncf %541 : vector<8x8xf32> to vector<8x8xbf16>
    %cst_211 = arith.constant dense<0.000000e+00> : vector<8x8xf32>
    %543 = tpu.matmul %542, %521, %cst_211 {dimension_numbers = #tpu.dot_dimension_numbers<[1], [0], [0], [1], [0, 0, 1, 1], [], []>} : vector<8x8xbf16>, vector<8x8xbf16>, vector<8x8xf32> -> vector<8x8xf32>
    %544 = arith.truncf %543 : vector<8x8xf32> to vector<8x8xbf16>
    %545 = vector.extract_strided_slice %477 {offsets = [1, 0, 0], sizes = [1, 8, 128], strides = [1, 1, 1]} : vector<4x8x128xbf16> to vector<1x8x128xbf16>
    %546 = vector.shape_cast %545 : vector<1x8x128xbf16> to vector<8x128xbf16>
    %cst_212 = arith.constant dense<0.000000e+00> : vector<8x128xf32>
    %547 = tpu.matmul %544, %546, %cst_212 {dimension_numbers = #tpu.dot_dimension_numbers<[1], [0], [0], [1], [0, 0, 1, 1], [], []>} : vector<8x8xbf16>, vector<8x128xbf16>, vector<8x128xf32> -> vector<8x128xf32>
    %548 = arith.addf %515, %547 : vector<8x128xf32>
    %549 = vector.extract_strided_slice %483 {offsets = [0, 16], sizes = [8, 8], strides = [1, 1]} : vector<8x128xf32> to vector<8x8xf32>
    %550 = arith.truncf %549 : vector<8x8xf32> to vector<8x8xbf16>
    %551 = vector.extract_strided_slice %483 {offsets = [0, 48], sizes = [8, 8], strides = [1, 1]} : vector<8x128xf32> to vector<8x8xf32>
    %552 = arith.truncf %551 : vector<8x8xf32> to vector<8x8xbf16>
    %553 = vector.extract_strided_slice %483 {offsets = [0, 80], sizes = [8, 8], strides = [1, 1]} : vector<8x128xf32> to vector<8x8xf32>
    %554 = arith.truncf %553 : vector<8x8xf32> to vector<8x8xbf16>
    %cst_213 = arith.constant dense<0.000000e+00> : vector<8x8xf32>
    %555 = tpu.matmul %550, %552, %cst_213 {dimension_numbers = #tpu.dot_dimension_numbers<[1], [1], [0], [0], [0, 0, 1, 0], [], []>} : vector<8x8xbf16>, vector<8x8xbf16>, vector<8x8xf32> -> vector<8x8xf32>
    %cst_214 = arith.constant 0.353553385 : f32
    %556 = vector.broadcast %cst_214 : f32 to vector<8x8xf32>
    %557 = arith.mulf %555, %556 : vector<8x8xf32>
    %558 = vector.extract_strided_slice %5 {offsets = [0, 0], sizes = [1, 8], strides = [1, 1]} : vector<1x128xf32> to vector<1x8xf32>
    %cst_215 = arith.constant 0.000000e+00 : f32
    %559 = vector.broadcast %cst_215 : f32 to vector<1x8xf32>
    %560 = arith.cmpf oeq, %558, %559 : vector<1x8xf32>
    %cst_216 = arith.constant -1.000000e+30 : f32
    %561 = vector.shape_cast %560 : vector<1x8xi1> to vector<1x8xi1>
    %562 = vector.broadcast %561 : vector<1x8xi1> to vector<8x8xi1>
    %563 = vector.broadcast %cst_216 : f32 to vector<8x8xf32>
    %564 = arith.select %562, %563, %557 : vector<8x8xi1>, vector<8x8xf32>
    %cst_217 = arith.constant dense<0xFF800000> : vector<8xf32>
    %565 = vector.multi_reduction <maximumf>, %564, %cst_217 [1] : vector<8x8xf32> to vector<8xf32>
    %566 = vector.shape_cast %565 : vector<8xf32> to vector<8x1xf32>
    %567 = vector.broadcast %566 : vector<8x1xf32> to vector<8x8xf32>
    %568 = arith.subf %564, %567 : vector<8x8xf32>
    %569 = math.exp %568 : vector<8x8xf32>
    %cst_218 = arith.constant dense<0.000000e+00> : vector<8xf32>
    %570 = vector.multi_reduction <add>, %569, %cst_218 [1] : vector<8x8xf32> to vector<8xf32>
    %571 = vector.shape_cast %570 : vector<8xf32> to vector<8x1xf32>
    %572 = tpu.reciprocal %571 {approx = true} : vector<8x1xf32> -> vector<8x1xf32>
    %573 = vector.broadcast %572 : vector<8x1xf32> to vector<8x8xf32>
    %574 = arith.mulf %569, %573 : vector<8x8xf32>
    %575 = arith.truncf %574 : vector<8x8xf32> to vector<8x8xbf16>
    %cst_219 = arith.constant dense<0.000000e+00> : vector<8x8xf32>
    %576 = tpu.matmul %575, %554, %cst_219 {dimension_numbers = #tpu.dot_dimension_numbers<[1], [0], [0], [1], [0, 0, 1, 1], [], []>} : vector<8x8xbf16>, vector<8x8xbf16>, vector<8x8xf32> -> vector<8x8xf32>
    %577 = arith.truncf %576 : vector<8x8xf32> to vector<8x8xbf16>
    %578 = vector.extract_strided_slice %477 {offsets = [2, 0, 0], sizes = [1, 8, 128], strides = [1, 1, 1]} : vector<4x8x128xbf16> to vector<1x8x128xbf16>
    %579 = vector.shape_cast %578 : vector<1x8x128xbf16> to vector<8x128xbf16>
    %cst_220 = arith.constant dense<0.000000e+00> : vector<8x128xf32>
    %580 = tpu.matmul %577, %579, %cst_220 {dimension_numbers = #tpu.dot_dimension_numbers<[1], [0], [0], [1], [0, 0, 1, 1], [], []>} : vector<8x8xbf16>, vector<8x128xbf16>, vector<8x128xf32> -> vector<8x128xf32>
    %581 = arith.addf %548, %580 : vector<8x128xf32>
    %582 = vector.extract_strided_slice %483 {offsets = [0, 24], sizes = [8, 8], strides = [1, 1]} : vector<8x128xf32> to vector<8x8xf32>
    %583 = arith.truncf %582 : vector<8x8xf32> to vector<8x8xbf16>
    %584 = vector.extract_strided_slice %483 {offsets = [0, 56], sizes = [8, 8], strides = [1, 1]} : vector<8x128xf32> to vector<8x8xf32>
    %585 = arith.truncf %584 : vector<8x8xf32> to vector<8x8xbf16>
    %586 = vector.extract_strided_slice %483 {offsets = [0, 88], sizes = [8, 8], strides = [1, 1]} : vector<8x128xf32> to vector<8x8xf32>
    %587 = arith.truncf %586 : vector<8x8xf32> to vector<8x8xbf16>
    %cst_221 = arith.constant dense<0.000000e+00> : vector<8x8xf32>
    %588 = tpu.matmul %583, %585, %cst_221 {dimension_numbers = #tpu.dot_dimension_numbers<[1], [1], [0], [0], [0, 0, 1, 0], [], []>} : vector<8x8xbf16>, vector<8x8xbf16>, vector<8x8xf32> -> vector<8x8xf32>
    %cst_222 = arith.constant 0.353553385 : f32
    %589 = vector.broadcast %cst_222 : f32 to vector<8x8xf32>
    %590 = arith.mulf %588, %589 : vector<8x8xf32>
    %591 = vector.extract_strided_slice %5 {offsets = [0, 0], sizes = [1, 8], strides = [1, 1]} : vector<1x128xf32> to vector<1x8xf32>
    %cst_223 = arith.constant 0.000000e+00 : f32
    %592 = vector.broadcast %cst_223 : f32 to vector<1x8xf32>
    %593 = arith.cmpf oeq, %591, %592 : vector<1x8xf32>
    %cst_224 = arith.constant -1.000000e+30 : f32
    %594 = vector.shape_cast %593 : vector<1x8xi1> to vector<1x8xi1>
    %595 = vector.broadcast %594 : vector<1x8xi1> to vector<8x8xi1>
    %596 = vector.broadcast %cst_224 : f32 to vector<8x8xf32>
    %597 = arith.select %595, %596, %590 : vector<8x8xi1>, vector<8x8xf32>
    %cst_225 = arith.constant dense<0xFF800000> : vector<8xf32>
    %598 = vector.multi_reduction <maximumf>, %597, %cst_225 [1] : vector<8x8xf32> to vector<8xf32>
    %599 = vector.shape_cast %598 : vector<8xf32> to vector<8x1xf32>
    %600 = vector.broadcast %599 : vector<8x1xf32> to vector<8x8xf32>
    %601 = arith.subf %597, %600 : vector<8x8xf32>
    %602 = math.exp %601 : vector<8x8xf32>
    %cst_226 = arith.constant dense<0.000000e+00> : vector<8xf32>
    %603 = vector.multi_reduction <add>, %602, %cst_226 [1] : vector<8x8xf32> to vector<8xf32>
    %604 = vector.shape_cast %603 : vector<8xf32> to vector<8x1xf32>
    %605 = tpu.reciprocal %604 {approx = true} : vector<8x1xf32> -> vector<8x1xf32>
    %606 = vector.broadcast %605 : vector<8x1xf32> to vector<8x8xf32>
    %607 = arith.mulf %602, %606 : vector<8x8xf32>
    %608 = arith.truncf %607 : vector<8x8xf32> to vector<8x8xbf16>
    %cst_227 = arith.constant dense<0.000000e+00> : vector<8x8xf32>
    %609 = tpu.matmul %608, %587, %cst_227 {dimension_numbers = #tpu.dot_dimension_numbers<[1], [0], [0], [1], [0, 0, 1, 1], [], []>} : vector<8x8xbf16>, vector<8x8xbf16>, vector<8x8xf32> -> vector<8x8xf32>
    %610 = arith.truncf %609 : vector<8x8xf32> to vector<8x8xbf16>
    %611 = vector.extract_strided_slice %477 {offsets = [3, 0, 0], sizes = [1, 8, 128], strides = [1, 1, 1]} : vector<4x8x128xbf16> to vector<1x8x128xbf16>
    %612 = vector.shape_cast %611 : vector<1x8x128xbf16> to vector<8x128xbf16>
    %cst_228 = arith.constant dense<0.000000e+00> : vector<8x128xf32>
    %613 = tpu.matmul %610, %612, %cst_228 {dimension_numbers = #tpu.dot_dimension_numbers<[1], [0], [0], [1], [0, 0, 1, 1], [], []>} : vector<8x8xbf16>, vector<8x128xbf16>, vector<8x128xf32> -> vector<8x128xf32>
    %614 = arith.addf %581, %613 : vector<8x128xf32>
    %615 = vector.broadcast %479 : vector<1x128xf32> to vector<8x128xf32>
    %616 = arith.addf %614, %615 : vector<8x128xf32>
    %c0_229 = arith.constant 0 : index
    %c0_230 = arith.constant 0 : index
    %c0_231 = arith.constant 0 : index
    %617 = vector.load %arg20[%c0_229, %c0_230, %c0_231] : memref<2x1x128xf32, #tpu.memory_space<vmem>>, vector<1x1x128xf32>
    %618 = vector.shape_cast %617 : vector<1x1x128xf32> to vector<1x128xf32>
    %c0_232 = arith.constant 0 : index
    %c0_233 = arith.constant 0 : index
    %c0_234 = arith.constant 0 : index
    %619 = vector.load %arg21[%c0_232, %c0_233, %c0_234] : memref<2x1x128xf32, #tpu.memory_space<vmem>>, vector<1x1x128xf32>
    %620 = vector.shape_cast %619 : vector<1x1x128xf32> to vector<1x128xf32>
    %621 = arith.addf %3, %616 : vector<8x128xf32>
    %cst_235 = arith.constant dense<0.000000e+00> : vector<8xf32>
    %622 = vector.multi_reduction <add>, %621, %cst_235 [1] : vector<8x128xf32> to vector<8xf32>
    %623 = vector.shape_cast %622 : vector<8xf32> to vector<8x1xf32>
    %cst_236 = arith.constant 3.125000e-02 : f32
    %624 = vector.broadcast %cst_236 : f32 to vector<8x1xf32>
    %625 = arith.mulf %623, %624 : vector<8x1xf32>
    %626 = tpu.iota {dimensions = array<i32: 1>} : vector<8x128xi32>
    %c32_i32_237 = arith.constant 32 : i32
    %627 = vector.broadcast %c32_i32_237 : i32 to vector<8x128xi32>
    %628 = arith.cmpi slt, %626, %627 : vector<8x128xi32>
    %629 = vector.broadcast %625 : vector<8x1xf32> to vector<8x128xf32>
    %630 = arith.subf %621, %629 : vector<8x128xf32>
    %cst_238 = arith.constant 0.000000e+00 : f32
    %631 = vector.broadcast %cst_238 : f32 to vector<8x128xf32>
    %632 = arith.select %628, %630, %631 : vector<8x128xi1>, vector<8x128xf32>
    %633 = arith.mulf %632, %632 : vector<8x128xf32>
    %cst_239 = arith.constant dense<0.000000e+00> : vector<8xf32>
    %634 = vector.multi_reduction <add>, %633, %cst_239 [1] : vector<8x128xf32> to vector<8xf32>
    %635 = vector.shape_cast %634 : vector<8xf32> to vector<8x1xf32>
    %cst_240 = arith.constant 3.125000e-02 : f32
    %636 = vector.broadcast %cst_240 : f32 to vector<8x1xf32>
    %637 = arith.mulf %635, %636 : vector<8x1xf32>
    %638 = vector.broadcast %625 : vector<8x1xf32> to vector<8x128xf32>
    %639 = arith.subf %621, %638 : vector<8x128xf32>
    %cst_241 = arith.constant 9.99999974E-6 : f32
    %640 = vector.broadcast %cst_241 : f32 to vector<8x1xf32>
    %641 = arith.addf %637, %640 : vector<8x1xf32>
    %642 = math.rsqrt %641 : vector<8x1xf32>
    %643 = vector.broadcast %642 : vector<8x1xf32> to vector<8x128xf32>
    %644 = arith.mulf %639, %643 : vector<8x128xf32>
    %645 = vector.broadcast %618 : vector<1x128xf32> to vector<8x128xf32>
    %646 = arith.mulf %644, %645 : vector<8x128xf32>
    %647 = vector.broadcast %620 : vector<1x128xf32> to vector<8x128xf32>
    %648 = arith.addf %646, %647 : vector<8x128xf32>
    %c0_242 = arith.constant 0 : index
    %c0_243 = arith.constant 0 : index
    %c0_244 = arith.constant 0 : index
    %649 = vector.load %arg22[%c0_242, %c0_243, %c0_244] : memref<2x128x128xbf16, #tpu.memory_space<vmem>>, vector<1x128x128xbf16>
    %650 = vector.shape_cast %649 : vector<1x128x128xbf16> to vector<128x128xbf16>
    %c0_245 = arith.constant 0 : index
    %c0_246 = arith.constant 0 : index
    %c0_247 = arith.constant 0 : index
    %651 = vector.load %arg23[%c0_245, %c0_246, %c0_247] : memref<2x1x128xf32, #tpu.memory_space<vmem>>, vector<1x1x128xf32>
    %652 = vector.shape_cast %651 : vector<1x1x128xf32> to vector<1x128xf32>
    %c0_248 = arith.constant 0 : index
    %c0_249 = arith.constant 0 : index
    %c0_250 = arith.constant 0 : index
    %c0_251 = arith.constant 0 : index
    %653 = vector.load %arg24[%c0_248, %c0_249, %c0_250, %c0_251] : memref<2x4x8x128xbf16, #tpu.memory_space<vmem>>, vector<1x4x8x128xbf16>
    %654 = vector.shape_cast %653 : vector<1x4x8x128xbf16> to vector<4x8x128xbf16>
    %c0_252 = arith.constant 0 : index
    %c0_253 = arith.constant 0 : index
    %c0_254 = arith.constant 0 : index
    %655 = vector.load %arg25[%c0_252, %c0_253, %c0_254] : memref<2x1x128xf32, #tpu.memory_space<vmem>>, vector<1x1x128xf32>
    %656 = vector.shape_cast %655 : vector<1x1x128xf32> to vector<1x128xf32>
    %657 = arith.truncf %648 : vector<8x128xf32> to vector<8x128xbf16>
    %cst_255 = arith.constant dense<0.000000e+00> : vector<8x128xf32>
    %658 = tpu.matmul %657, %650, %cst_255 {dimension_numbers = #tpu.dot_dimension_numbers<[1], [0], [0], [1], [0, 0, 1, 1], [], []>} : vector<8x128xbf16>, vector<128x128xbf16>, vector<8x128xf32> -> vector<8x128xf32>
    %659 = vector.broadcast %652 : vector<1x128xf32> to vector<8x128xf32>
    %660 = arith.addf %658, %659 : vector<8x128xf32>
    %661 = arith.truncf %471 : vector<8x128xf32> to vector<8x128xbf16>
    %cst_256 = arith.constant dense<0.000000e+00> : vector<8x128xf32>
    %662 = tpu.matmul %661, %650, %cst_256 {dimension_numbers = #tpu.dot_dimension_numbers<[1], [0], [0], [1], [0, 0, 1, 1], [], []>} : vector<8x128xbf16>, vector<128x128xbf16>, vector<8x128xf32> -> vector<8x128xf32>
    %663 = vector.broadcast %652 : vector<1x128xf32> to vector<8x128xf32>
    %664 = arith.addf %662, %663 : vector<8x128xf32>
    %665 = vector.extract_strided_slice %660 {offsets = [0, 0], sizes = [8, 8], strides = [1, 1]} : vector<8x128xf32> to vector<8x8xf32>
    %666 = arith.truncf %665 : vector<8x8xf32> to vector<8x8xbf16>
    %667 = vector.extract_strided_slice %664 {offsets = [0, 32], sizes = [8, 8], strides = [1, 1]} : vector<8x128xf32> to vector<8x8xf32>
    %668 = arith.truncf %667 : vector<8x8xf32> to vector<8x8xbf16>
    %669 = vector.extract_strided_slice %664 {offsets = [0, 64], sizes = [8, 8], strides = [1, 1]} : vector<8x128xf32> to vector<8x8xf32>
    %670 = arith.truncf %669 : vector<8x8xf32> to vector<8x8xbf16>
    %cst_257 = arith.constant dense<0.000000e+00> : vector<8x8xf32>
    %671 = tpu.matmul %666, %668, %cst_257 {dimension_numbers = #tpu.dot_dimension_numbers<[1], [1], [0], [0], [0, 0, 1, 0], [], []>} : vector<8x8xbf16>, vector<8x8xbf16>, vector<8x8xf32> -> vector<8x8xf32>
    %cst_258 = arith.constant 0.353553385 : f32
    %672 = vector.broadcast %cst_258 : f32 to vector<8x8xf32>
    %673 = arith.mulf %671, %672 : vector<8x8xf32>
    %cst_259 = arith.constant dense<0xFF800000> : vector<8xf32>
    %674 = vector.multi_reduction <maximumf>, %673, %cst_259 [1] : vector<8x8xf32> to vector<8xf32>
    %675 = vector.shape_cast %674 : vector<8xf32> to vector<8x1xf32>
    %676 = vector.broadcast %675 : vector<8x1xf32> to vector<8x8xf32>
    %677 = arith.subf %673, %676 : vector<8x8xf32>
    %678 = math.exp %677 : vector<8x8xf32>
    %cst_260 = arith.constant dense<0.000000e+00> : vector<8xf32>
    %679 = vector.multi_reduction <add>, %678, %cst_260 [1] : vector<8x8xf32> to vector<8xf32>
    %680 = vector.shape_cast %679 : vector<8xf32> to vector<8x1xf32>
    %681 = tpu.reciprocal %680 {approx = true} : vector<8x1xf32> -> vector<8x1xf32>
    %682 = vector.broadcast %681 : vector<8x1xf32> to vector<8x8xf32>
    %683 = arith.mulf %678, %682 : vector<8x8xf32>
    %684 = arith.truncf %683 : vector<8x8xf32> to vector<8x8xbf16>
    %cst_261 = arith.constant dense<0.000000e+00> : vector<8x8xf32>
    %685 = tpu.matmul %684, %670, %cst_261 {dimension_numbers = #tpu.dot_dimension_numbers<[1], [0], [0], [1], [0, 0, 1, 1], [], []>} : vector<8x8xbf16>, vector<8x8xbf16>, vector<8x8xf32> -> vector<8x8xf32>
    %686 = arith.truncf %685 : vector<8x8xf32> to vector<8x8xbf16>
    %687 = vector.extract_strided_slice %654 {offsets = [0, 0, 0], sizes = [1, 8, 128], strides = [1, 1, 1]} : vector<4x8x128xbf16> to vector<1x8x128xbf16>
    %688 = vector.shape_cast %687 : vector<1x8x128xbf16> to vector<8x128xbf16>
    %cst_262 = arith.constant dense<0.000000e+00> : vector<8x128xf32>
    %689 = tpu.matmul %686, %688, %cst_262 {dimension_numbers = #tpu.dot_dimension_numbers<[1], [0], [0], [1], [0, 0, 1, 1], [], []>} : vector<8x8xbf16>, vector<8x128xbf16>, vector<8x128xf32> -> vector<8x128xf32>
    %690 = vector.extract_strided_slice %660 {offsets = [0, 8], sizes = [8, 8], strides = [1, 1]} : vector<8x128xf32> to vector<8x8xf32>
    %691 = arith.truncf %690 : vector<8x8xf32> to vector<8x8xbf16>
    %692 = vector.extract_strided_slice %664 {offsets = [0, 40], sizes = [8, 8], strides = [1, 1]} : vector<8x128xf32> to vector<8x8xf32>
    %693 = arith.truncf %692 : vector<8x8xf32> to vector<8x8xbf16>
    %694 = vector.extract_strided_slice %664 {offsets = [0, 72], sizes = [8, 8], strides = [1, 1]} : vector<8x128xf32> to vector<8x8xf32>
    %695 = arith.truncf %694 : vector<8x8xf32> to vector<8x8xbf16>
    %cst_263 = arith.constant dense<0.000000e+00> : vector<8x8xf32>
    %696 = tpu.matmul %691, %693, %cst_263 {dimension_numbers = #tpu.dot_dimension_numbers<[1], [1], [0], [0], [0, 0, 1, 0], [], []>} : vector<8x8xbf16>, vector<8x8xbf16>, vector<8x8xf32> -> vector<8x8xf32>
    %cst_264 = arith.constant 0.353553385 : f32
    %697 = vector.broadcast %cst_264 : f32 to vector<8x8xf32>
    %698 = arith.mulf %696, %697 : vector<8x8xf32>
    %cst_265 = arith.constant dense<0xFF800000> : vector<8xf32>
    %699 = vector.multi_reduction <maximumf>, %698, %cst_265 [1] : vector<8x8xf32> to vector<8xf32>
    %700 = vector.shape_cast %699 : vector<8xf32> to vector<8x1xf32>
    %701 = vector.broadcast %700 : vector<8x1xf32> to vector<8x8xf32>
    %702 = arith.subf %698, %701 : vector<8x8xf32>
    %703 = math.exp %702 : vector<8x8xf32>
    %cst_266 = arith.constant dense<0.000000e+00> : vector<8xf32>
    %704 = vector.multi_reduction <add>, %703, %cst_266 [1] : vector<8x8xf32> to vector<8xf32>
    %705 = vector.shape_cast %704 : vector<8xf32> to vector<8x1xf32>
    %706 = tpu.reciprocal %705 {approx = true} : vector<8x1xf32> -> vector<8x1xf32>
    %707 = vector.broadcast %706 : vector<8x1xf32> to vector<8x8xf32>
    %708 = arith.mulf %703, %707 : vector<8x8xf32>
    %709 = arith.truncf %708 : vector<8x8xf32> to vector<8x8xbf16>
    %cst_267 = arith.constant dense<0.000000e+00> : vector<8x8xf32>
    %710 = tpu.matmul %709, %695, %cst_267 {dimension_numbers = #tpu.dot_dimension_numbers<[1], [0], [0], [1], [0, 0, 1, 1], [], []>} : vector<8x8xbf16>, vector<8x8xbf16>, vector<8x8xf32> -> vector<8x8xf32>
    %711 = arith.truncf %710 : vector<8x8xf32> to vector<8x8xbf16>
    %712 = vector.extract_strided_slice %654 {offsets = [1, 0, 0], sizes = [1, 8, 128], strides = [1, 1, 1]} : vector<4x8x128xbf16> to vector<1x8x128xbf16>
    %713 = vector.shape_cast %712 : vector<1x8x128xbf16> to vector<8x128xbf16>
    %cst_268 = arith.constant dense<0.000000e+00> : vector<8x128xf32>
    %714 = tpu.matmul %711, %713, %cst_268 {dimension_numbers = #tpu.dot_dimension_numbers<[1], [0], [0], [1], [0, 0, 1, 1], [], []>} : vector<8x8xbf16>, vector<8x128xbf16>, vector<8x128xf32> -> vector<8x128xf32>
    %715 = arith.addf %689, %714 : vector<8x128xf32>
    %716 = vector.extract_strided_slice %660 {offsets = [0, 16], sizes = [8, 8], strides = [1, 1]} : vector<8x128xf32> to vector<8x8xf32>
    %717 = arith.truncf %716 : vector<8x8xf32> to vector<8x8xbf16>
    %718 = vector.extract_strided_slice %664 {offsets = [0, 48], sizes = [8, 8], strides = [1, 1]} : vector<8x128xf32> to vector<8x8xf32>
    %719 = arith.truncf %718 : vector<8x8xf32> to vector<8x8xbf16>
    %720 = vector.extract_strided_slice %664 {offsets = [0, 80], sizes = [8, 8], strides = [1, 1]} : vector<8x128xf32> to vector<8x8xf32>
    %721 = arith.truncf %720 : vector<8x8xf32> to vector<8x8xbf16>
    %cst_269 = arith.constant dense<0.000000e+00> : vector<8x8xf32>
    %722 = tpu.matmul %717, %719, %cst_269 {dimension_numbers = #tpu.dot_dimension_numbers<[1], [1], [0], [0], [0, 0, 1, 0], [], []>} : vector<8x8xbf16>, vector<8x8xbf16>, vector<8x8xf32> -> vector<8x8xf32>
    %cst_270 = arith.constant 0.353553385 : f32
    %723 = vector.broadcast %cst_270 : f32 to vector<8x8xf32>
    %724 = arith.mulf %722, %723 : vector<8x8xf32>
    %cst_271 = arith.constant dense<0xFF800000> : vector<8xf32>
    %725 = vector.multi_reduction <maximumf>, %724, %cst_271 [1] : vector<8x8xf32> to vector<8xf32>
    %726 = vector.shape_cast %725 : vector<8xf32> to vector<8x1xf32>
    %727 = vector.broadcast %726 : vector<8x1xf32> to vector<8x8xf32>
    %728 = arith.subf %724, %727 : vector<8x8xf32>
    %729 = math.exp %728 : vector<8x8xf32>
    %cst_272 = arith.constant dense<0.000000e+00> : vector<8xf32>
    %730 = vector.multi_reduction <add>, %729, %cst_272 [1] : vector<8x8xf32> to vector<8xf32>
    %731 = vector.shape_cast %730 : vector<8xf32> to vector<8x1xf32>
    %732 = tpu.reciprocal %731 {approx = true} : vector<8x1xf32> -> vector<8x1xf32>
    %733 = vector.broadcast %732 : vector<8x1xf32> to vector<8x8xf32>
    %734 = arith.mulf %729, %733 : vector<8x8xf32>
    %735 = arith.truncf %734 : vector<8x8xf32> to vector<8x8xbf16>
    %cst_273 = arith.constant dense<0.000000e+00> : vector<8x8xf32>
    %736 = tpu.matmul %735, %721, %cst_273 {dimension_numbers = #tpu.dot_dimension_numbers<[1], [0], [0], [1], [0, 0, 1, 1], [], []>} : vector<8x8xbf16>, vector<8x8xbf16>, vector<8x8xf32> -> vector<8x8xf32>
    %737 = arith.truncf %736 : vector<8x8xf32> to vector<8x8xbf16>
    %738 = vector.extract_strided_slice %654 {offsets = [2, 0, 0], sizes = [1, 8, 128], strides = [1, 1, 1]} : vector<4x8x128xbf16> to vector<1x8x128xbf16>
    %739 = vector.shape_cast %738 : vector<1x8x128xbf16> to vector<8x128xbf16>
    %cst_274 = arith.constant dense<0.000000e+00> : vector<8x128xf32>
    %740 = tpu.matmul %737, %739, %cst_274 {dimension_numbers = #tpu.dot_dimension_numbers<[1], [0], [0], [1], [0, 0, 1, 1], [], []>} : vector<8x8xbf16>, vector<8x128xbf16>, vector<8x128xf32> -> vector<8x128xf32>
    %741 = arith.addf %715, %740 : vector<8x128xf32>
    %742 = vector.extract_strided_slice %660 {offsets = [0, 24], sizes = [8, 8], strides = [1, 1]} : vector<8x128xf32> to vector<8x8xf32>
    %743 = arith.truncf %742 : vector<8x8xf32> to vector<8x8xbf16>
    %744 = vector.extract_strided_slice %664 {offsets = [0, 56], sizes = [8, 8], strides = [1, 1]} : vector<8x128xf32> to vector<8x8xf32>
    %745 = arith.truncf %744 : vector<8x8xf32> to vector<8x8xbf16>
    %746 = vector.extract_strided_slice %664 {offsets = [0, 88], sizes = [8, 8], strides = [1, 1]} : vector<8x128xf32> to vector<8x8xf32>
    %747 = arith.truncf %746 : vector<8x8xf32> to vector<8x8xbf16>
    %cst_275 = arith.constant dense<0.000000e+00> : vector<8x8xf32>
    %748 = tpu.matmul %743, %745, %cst_275 {dimension_numbers = #tpu.dot_dimension_numbers<[1], [1], [0], [0], [0, 0, 1, 0], [], []>} : vector<8x8xbf16>, vector<8x8xbf16>, vector<8x8xf32> -> vector<8x8xf32>
    %cst_276 = arith.constant 0.353553385 : f32
    %749 = vector.broadcast %cst_276 : f32 to vector<8x8xf32>
    %750 = arith.mulf %748, %749 : vector<8x8xf32>
    %cst_277 = arith.constant dense<0xFF800000> : vector<8xf32>
    %751 = vector.multi_reduction <maximumf>, %750, %cst_277 [1] : vector<8x8xf32> to vector<8xf32>
    %752 = vector.shape_cast %751 : vector<8xf32> to vector<8x1xf32>
    %753 = vector.broadcast %752 : vector<8x1xf32> to vector<8x8xf32>
    %754 = arith.subf %750, %753 : vector<8x8xf32>
    %755 = math.exp %754 : vector<8x8xf32>
    %cst_278 = arith.constant dense<0.000000e+00> : vector<8xf32>
    %756 = vector.multi_reduction <add>, %755, %cst_278 [1] : vector<8x8xf32> to vector<8xf32>
    %757 = vector.shape_cast %756 : vector<8xf32> to vector<8x1xf32>
    %758 = tpu.reciprocal %757 {approx = true} : vector<8x1xf32> -> vector<8x1xf32>
    %759 = vector.broadcast %758 : vector<8x1xf32> to vector<8x8xf32>
    %760 = arith.mulf %755, %759 : vector<8x8xf32>
    %761 = arith.truncf %760 : vector<8x8xf32> to vector<8x8xbf16>
    %cst_279 = arith.constant dense<0.000000e+00> : vector<8x8xf32>
    %762 = tpu.matmul %761, %747, %cst_279 {dimension_numbers = #tpu.dot_dimension_numbers<[1], [0], [0], [1], [0, 0, 1, 1], [], []>} : vector<8x8xbf16>, vector<8x8xbf16>, vector<8x8xf32> -> vector<8x8xf32>
    %763 = arith.truncf %762 : vector<8x8xf32> to vector<8x8xbf16>
    %764 = vector.extract_strided_slice %654 {offsets = [3, 0, 0], sizes = [1, 8, 128], strides = [1, 1, 1]} : vector<4x8x128xbf16> to vector<1x8x128xbf16>
    %765 = vector.shape_cast %764 : vector<1x8x128xbf16> to vector<8x128xbf16>
    %cst_280 = arith.constant dense<0.000000e+00> : vector<8x128xf32>
    %766 = tpu.matmul %763, %765, %cst_280 {dimension_numbers = #tpu.dot_dimension_numbers<[1], [0], [0], [1], [0, 0, 1, 1], [], []>} : vector<8x8xbf16>, vector<8x128xbf16>, vector<8x128xf32> -> vector<8x128xf32>
    %767 = arith.addf %741, %766 : vector<8x128xf32>
    %768 = vector.broadcast %656 : vector<1x128xf32> to vector<8x128xf32>
    %769 = arith.addf %767, %768 : vector<8x128xf32>
    %c0_281 = arith.constant 0 : index
    %c0_282 = arith.constant 0 : index
    %c0_283 = arith.constant 0 : index
    %770 = vector.load %arg26[%c0_281, %c0_282, %c0_283] : memref<2x1x128xf32, #tpu.memory_space<vmem>>, vector<1x1x128xf32>
    %771 = vector.shape_cast %770 : vector<1x1x128xf32> to vector<1x128xf32>
    %c0_284 = arith.constant 0 : index
    %c0_285 = arith.constant 0 : index
    %c0_286 = arith.constant 0 : index
    %772 = vector.load %arg27[%c0_284, %c0_285, %c0_286] : memref<2x1x128xf32, #tpu.memory_space<vmem>>, vector<1x1x128xf32>
    %773 = vector.shape_cast %772 : vector<1x1x128xf32> to vector<1x128xf32>
    %774 = arith.addf %648, %769 : vector<8x128xf32>
    %cst_287 = arith.constant dense<0.000000e+00> : vector<8xf32>
    %775 = vector.multi_reduction <add>, %774, %cst_287 [1] : vector<8x128xf32> to vector<8xf32>
    %776 = vector.shape_cast %775 : vector<8xf32> to vector<8x1xf32>
    %cst_288 = arith.constant 3.125000e-02 : f32
    %777 = vector.broadcast %cst_288 : f32 to vector<8x1xf32>
    %778 = arith.mulf %776, %777 : vector<8x1xf32>
    %779 = tpu.iota {dimensions = array<i32: 1>} : vector<8x128xi32>
    %c32_i32_289 = arith.constant 32 : i32
    %780 = vector.broadcast %c32_i32_289 : i32 to vector<8x128xi32>
    %781 = arith.cmpi slt, %779, %780 : vector<8x128xi32>
    %782 = vector.broadcast %778 : vector<8x1xf32> to vector<8x128xf32>
    %783 = arith.subf %774, %782 : vector<8x128xf32>
    %cst_290 = arith.constant 0.000000e+00 : f32
    %784 = vector.broadcast %cst_290 : f32 to vector<8x128xf32>
    %785 = arith.select %781, %783, %784 : vector<8x128xi1>, vector<8x128xf32>
    %786 = arith.mulf %785, %785 : vector<8x128xf32>
    %cst_291 = arith.constant dense<0.000000e+00> : vector<8xf32>
    %787 = vector.multi_reduction <add>, %786, %cst_291 [1] : vector<8x128xf32> to vector<8xf32>
    %788 = vector.shape_cast %787 : vector<8xf32> to vector<8x1xf32>
    %cst_292 = arith.constant 3.125000e-02 : f32
    %789 = vector.broadcast %cst_292 : f32 to vector<8x1xf32>
    %790 = arith.mulf %788, %789 : vector<8x1xf32>
    %791 = vector.broadcast %778 : vector<8x1xf32> to vector<8x128xf32>
    %792 = arith.subf %774, %791 : vector<8x128xf32>
    %cst_293 = arith.constant 9.99999974E-6 : f32
    %793 = vector.broadcast %cst_293 : f32 to vector<8x1xf32>
    %794 = arith.addf %790, %793 : vector<8x1xf32>
    %795 = math.rsqrt %794 : vector<8x1xf32>
    %796 = vector.broadcast %795 : vector<8x1xf32> to vector<8x128xf32>
    %797 = arith.mulf %792, %796 : vector<8x128xf32>
    %798 = vector.broadcast %771 : vector<1x128xf32> to vector<8x128xf32>
    %799 = arith.mulf %797, %798 : vector<8x128xf32>
    %800 = vector.broadcast %773 : vector<1x128xf32> to vector<8x128xf32>
    %801 = arith.addf %799, %800 : vector<8x128xf32>
    %c0_294 = arith.constant 0 : index
    %c0_295 = arith.constant 0 : index
    %c0_296 = arith.constant 0 : index
    %802 = vector.load %arg28[%c0_294, %c0_295, %c0_296] : memref<2x128x128xbf16, #tpu.memory_space<vmem>>, vector<1x128x128xbf16>
    %803 = vector.shape_cast %802 : vector<1x128x128xbf16> to vector<128x128xbf16>
    %c0_297 = arith.constant 0 : index
    %c0_298 = arith.constant 0 : index
    %c0_299 = arith.constant 0 : index
    %804 = vector.load %arg29[%c0_297, %c0_298, %c0_299] : memref<2x1x128xf32, #tpu.memory_space<vmem>>, vector<1x1x128xf32>
    %805 = vector.shape_cast %804 : vector<1x1x128xf32> to vector<1x128xf32>
    %c0_300 = arith.constant 0 : index
    %c0_301 = arith.constant 0 : index
    %c0_302 = arith.constant 0 : index
    %806 = vector.load %arg30[%c0_300, %c0_301, %c0_302] : memref<2x128x128xbf16, #tpu.memory_space<vmem>>, vector<1x128x128xbf16>
    %807 = vector.shape_cast %806 : vector<1x128x128xbf16> to vector<128x128xbf16>
    %c0_303 = arith.constant 0 : index
    %c0_304 = arith.constant 0 : index
    %c0_305 = arith.constant 0 : index
    %808 = vector.load %arg31[%c0_303, %c0_304, %c0_305] : memref<2x1x128xf32, #tpu.memory_space<vmem>>, vector<1x1x128xf32>
    %809 = vector.shape_cast %808 : vector<1x1x128xf32> to vector<1x128xf32>
    %810 = arith.truncf %801 : vector<8x128xf32> to vector<8x128xbf16>
    %cst_306 = arith.constant dense<0.000000e+00> : vector<8x128xf32>
    %811 = tpu.matmul %810, %803, %cst_306 {dimension_numbers = #tpu.dot_dimension_numbers<[1], [0], [0], [1], [0, 0, 1, 1], [], []>} : vector<8x128xbf16>, vector<128x128xbf16>, vector<8x128xf32> -> vector<8x128xf32>
    %812 = vector.broadcast %805 : vector<1x128xf32> to vector<8x128xf32>
    %813 = arith.addf %811, %812 : vector<8x128xf32>
    %cst_307 = arith.constant 5.000000e-01 : f32
    %814 = vector.broadcast %cst_307 : f32 to vector<8x128xf32>
    %815 = arith.mulf %814, %813 : vector<8x128xf32>
    %cst_308 = arith.constant 0.707106769 : f32
    %816 = vector.broadcast %cst_308 : f32 to vector<8x128xf32>
    %817 = arith.mulf %813, %816 : vector<8x128xf32>
    %818 = math.erf %817 : vector<8x128xf32>
    %cst_309 = arith.constant 1.000000e+00 : f32
    %819 = vector.broadcast %cst_309 : f32 to vector<8x128xf32>
    %820 = arith.addf %819, %818 : vector<8x128xf32>
    %821 = arith.mulf %815, %820 : vector<8x128xf32>
    %822 = arith.truncf %821 : vector<8x128xf32> to vector<8x128xbf16>
    %cst_310 = arith.constant dense<0.000000e+00> : vector<8x128xf32>
    %823 = tpu.matmul %822, %807, %cst_310 {dimension_numbers = #tpu.dot_dimension_numbers<[1], [0], [0], [1], [0, 0, 1, 1], [], []>} : vector<8x128xbf16>, vector<128x128xbf16>, vector<8x128xf32> -> vector<8x128xf32>
    %824 = vector.broadcast %809 : vector<1x128xf32> to vector<8x128xf32>
    %825 = arith.addf %823, %824 : vector<8x128xf32>
    %c0_311 = arith.constant 0 : index
    %c0_312 = arith.constant 0 : index
    %c0_313 = arith.constant 0 : index
    %826 = vector.load %arg32[%c0_311, %c0_312, %c0_313] : memref<2x1x128xf32, #tpu.memory_space<vmem>>, vector<1x1x128xf32>
    %827 = vector.shape_cast %826 : vector<1x1x128xf32> to vector<1x128xf32>
    %c0_314 = arith.constant 0 : index
    %c0_315 = arith.constant 0 : index
    %c0_316 = arith.constant 0 : index
    %828 = vector.load %arg33[%c0_314, %c0_315, %c0_316] : memref<2x1x128xf32, #tpu.memory_space<vmem>>, vector<1x1x128xf32>
    %829 = vector.shape_cast %828 : vector<1x1x128xf32> to vector<1x128xf32>
    %830 = arith.addf %801, %825 : vector<8x128xf32>
    %cst_317 = arith.constant dense<0.000000e+00> : vector<8xf32>
    %831 = vector.multi_reduction <add>, %830, %cst_317 [1] : vector<8x128xf32> to vector<8xf32>
    %832 = vector.shape_cast %831 : vector<8xf32> to vector<8x1xf32>
    %cst_318 = arith.constant 3.125000e-02 : f32
    %833 = vector.broadcast %cst_318 : f32 to vector<8x1xf32>
    %834 = arith.mulf %832, %833 : vector<8x1xf32>
    %835 = tpu.iota {dimensions = array<i32: 1>} : vector<8x128xi32>
    %c32_i32_319 = arith.constant 32 : i32
    %836 = vector.broadcast %c32_i32_319 : i32 to vector<8x128xi32>
    %837 = arith.cmpi slt, %835, %836 : vector<8x128xi32>
    %838 = vector.broadcast %834 : vector<8x1xf32> to vector<8x128xf32>
    %839 = arith.subf %830, %838 : vector<8x128xf32>
    %cst_320 = arith.constant 0.000000e+00 : f32
    %840 = vector.broadcast %cst_320 : f32 to vector<8x128xf32>
    %841 = arith.select %837, %839, %840 : vector<8x128xi1>, vector<8x128xf32>
    %842 = arith.mulf %841, %841 : vector<8x128xf32>
    %cst_321 = arith.constant dense<0.000000e+00> : vector<8xf32>
    %843 = vector.multi_reduction <add>, %842, %cst_321 [1] : vector<8x128xf32> to vector<8xf32>
    %844 = vector.shape_cast %843 : vector<8xf32> to vector<8x1xf32>
    %cst_322 = arith.constant 3.125000e-02 : f32
    %845 = vector.broadcast %cst_322 : f32 to vector<8x1xf32>
    %846 = arith.mulf %844, %845 : vector<8x1xf32>
    %847 = vector.broadcast %834 : vector<8x1xf32> to vector<8x128xf32>
    %848 = arith.subf %830, %847 : vector<8x128xf32>
    %cst_323 = arith.constant 9.99999974E-6 : f32
    %849 = vector.broadcast %cst_323 : f32 to vector<8x1xf32>
    %850 = arith.addf %846, %849 : vector<8x1xf32>
    %851 = math.rsqrt %850 : vector<8x1xf32>
    %852 = vector.broadcast %851 : vector<8x1xf32> to vector<8x128xf32>
    %853 = arith.mulf %848, %852 : vector<8x128xf32>
    %854 = vector.broadcast %827 : vector<1x128xf32> to vector<8x128xf32>
    %855 = arith.mulf %853, %854 : vector<8x128xf32>
    %856 = vector.broadcast %829 : vector<1x128xf32> to vector<8x128xf32>
    %857 = arith.addf %855, %856 : vector<8x128xf32>
    %c1_324 = arith.constant 1 : index
    %c0_325 = arith.constant 0 : index
    %c0_326 = arith.constant 0 : index
    %858 = vector.load %arg16[%c1_324, %c0_325, %c0_326] : memref<2x128x128xbf16, #tpu.memory_space<vmem>>, vector<1x128x128xbf16>
    %859 = vector.shape_cast %858 : vector<1x128x128xbf16> to vector<128x128xbf16>
    %c1_327 = arith.constant 1 : index
    %c0_328 = arith.constant 0 : index
    %c0_329 = arith.constant 0 : index
    %860 = vector.load %arg17[%c1_327, %c0_328, %c0_329] : memref<2x1x128xf32, #tpu.memory_space<vmem>>, vector<1x1x128xf32>
    %861 = vector.shape_cast %860 : vector<1x1x128xf32> to vector<1x128xf32>
    %c1_330 = arith.constant 1 : index
    %c0_331 = arith.constant 0 : index
    %c0_332 = arith.constant 0 : index
    %c0_333 = arith.constant 0 : index
    %862 = vector.load %arg18[%c1_330, %c0_331, %c0_332, %c0_333] : memref<2x4x8x128xbf16, #tpu.memory_space<vmem>>, vector<1x4x8x128xbf16>
    %863 = vector.shape_cast %862 : vector<1x4x8x128xbf16> to vector<4x8x128xbf16>
    %c1_334 = arith.constant 1 : index
    %c0_335 = arith.constant 0 : index
    %c0_336 = arith.constant 0 : index
    %864 = vector.load %arg19[%c1_334, %c0_335, %c0_336] : memref<2x1x128xf32, #tpu.memory_space<vmem>>, vector<1x1x128xf32>
    %865 = vector.shape_cast %864 : vector<1x1x128xf32> to vector<1x128xf32>
    %866 = arith.truncf %857 : vector<8x128xf32> to vector<8x128xbf16>
    %cst_337 = arith.constant dense<0.000000e+00> : vector<8x128xf32>
    %867 = tpu.matmul %866, %859, %cst_337 {dimension_numbers = #tpu.dot_dimension_numbers<[1], [0], [0], [1], [0, 0, 1, 1], [], []>} : vector<8x128xbf16>, vector<128x128xbf16>, vector<8x128xf32> -> vector<8x128xf32>
    %868 = vector.broadcast %861 : vector<1x128xf32> to vector<8x128xf32>
    %869 = arith.addf %867, %868 : vector<8x128xf32>
    %870 = vector.extract_strided_slice %869 {offsets = [0, 0], sizes = [8, 8], strides = [1, 1]} : vector<8x128xf32> to vector<8x8xf32>
    %871 = arith.truncf %870 : vector<8x8xf32> to vector<8x8xbf16>
    %872 = vector.extract_strided_slice %869 {offsets = [0, 32], sizes = [8, 8], strides = [1, 1]} : vector<8x128xf32> to vector<8x8xf32>
    %873 = arith.truncf %872 : vector<8x8xf32> to vector<8x8xbf16>
    %874 = vector.extract_strided_slice %869 {offsets = [0, 64], sizes = [8, 8], strides = [1, 1]} : vector<8x128xf32> to vector<8x8xf32>
    %875 = arith.truncf %874 : vector<8x8xf32> to vector<8x8xbf16>
    %cst_338 = arith.constant dense<0.000000e+00> : vector<8x8xf32>
    %876 = tpu.matmul %871, %873, %cst_338 {dimension_numbers = #tpu.dot_dimension_numbers<[1], [1], [0], [0], [0, 0, 1, 0], [], []>} : vector<8x8xbf16>, vector<8x8xbf16>, vector<8x8xf32> -> vector<8x8xf32>
    %cst_339 = arith.constant 0.353553385 : f32
    %877 = vector.broadcast %cst_339 : f32 to vector<8x8xf32>
    %878 = arith.mulf %876, %877 : vector<8x8xf32>
    %879 = vector.extract_strided_slice %5 {offsets = [0, 0], sizes = [1, 8], strides = [1, 1]} : vector<1x128xf32> to vector<1x8xf32>
    %cst_340 = arith.constant 0.000000e+00 : f32
    %880 = vector.broadcast %cst_340 : f32 to vector<1x8xf32>
    %881 = arith.cmpf oeq, %879, %880 : vector<1x8xf32>
    %cst_341 = arith.constant -1.000000e+30 : f32
    %882 = vector.shape_cast %881 : vector<1x8xi1> to vector<1x8xi1>
    %883 = vector.broadcast %882 : vector<1x8xi1> to vector<8x8xi1>
    %884 = vector.broadcast %cst_341 : f32 to vector<8x8xf32>
    %885 = arith.select %883, %884, %878 : vector<8x8xi1>, vector<8x8xf32>
    %cst_342 = arith.constant dense<0xFF800000> : vector<8xf32>
    %886 = vector.multi_reduction <maximumf>, %885, %cst_342 [1] : vector<8x8xf32> to vector<8xf32>
    %887 = vector.shape_cast %886 : vector<8xf32> to vector<8x1xf32>
    %888 = vector.broadcast %887 : vector<8x1xf32> to vector<8x8xf32>
    %889 = arith.subf %885, %888 : vector<8x8xf32>
    %890 = math.exp %889 : vector<8x8xf32>
    %cst_343 = arith.constant dense<0.000000e+00> : vector<8xf32>
    %891 = vector.multi_reduction <add>, %890, %cst_343 [1] : vector<8x8xf32> to vector<8xf32>
    %892 = vector.shape_cast %891 : vector<8xf32> to vector<8x1xf32>
    %893 = tpu.reciprocal %892 {approx = true} : vector<8x1xf32> -> vector<8x1xf32>
    %894 = vector.broadcast %893 : vector<8x1xf32> to vector<8x8xf32>
    %895 = arith.mulf %890, %894 : vector<8x8xf32>
    %896 = arith.truncf %895 : vector<8x8xf32> to vector<8x8xbf16>
    %cst_344 = arith.constant dense<0.000000e+00> : vector<8x8xf32>
    %897 = tpu.matmul %896, %875, %cst_344 {dimension_numbers = #tpu.dot_dimension_numbers<[1], [0], [0], [1], [0, 0, 1, 1], [], []>} : vector<8x8xbf16>, vector<8x8xbf16>, vector<8x8xf32> -> vector<8x8xf32>
    %898 = arith.truncf %897 : vector<8x8xf32> to vector<8x8xbf16>
    %899 = vector.extract_strided_slice %863 {offsets = [0, 0, 0], sizes = [1, 8, 128], strides = [1, 1, 1]} : vector<4x8x128xbf16> to vector<1x8x128xbf16>
    %900 = vector.shape_cast %899 : vector<1x8x128xbf16> to vector<8x128xbf16>
    %cst_345 = arith.constant dense<0.000000e+00> : vector<8x128xf32>
    %901 = tpu.matmul %898, %900, %cst_345 {dimension_numbers = #tpu.dot_dimension_numbers<[1], [0], [0], [1], [0, 0, 1, 1], [], []>} : vector<8x8xbf16>, vector<8x128xbf16>, vector<8x128xf32> -> vector<8x128xf32>
    %902 = vector.extract_strided_slice %869 {offsets = [0, 8], sizes = [8, 8], strides = [1, 1]} : vector<8x128xf32> to vector<8x8xf32>
    %903 = arith.truncf %902 : vector<8x8xf32> to vector<8x8xbf16>
    %904 = vector.extract_strided_slice %869 {offsets = [0, 40], sizes = [8, 8], strides = [1, 1]} : vector<8x128xf32> to vector<8x8xf32>
    %905 = arith.truncf %904 : vector<8x8xf32> to vector<8x8xbf16>
    %906 = vector.extract_strided_slice %869 {offsets = [0, 72], sizes = [8, 8], strides = [1, 1]} : vector<8x128xf32> to vector<8x8xf32>
    %907 = arith.truncf %906 : vector<8x8xf32> to vector<8x8xbf16>
    %cst_346 = arith.constant dense<0.000000e+00> : vector<8x8xf32>
    %908 = tpu.matmul %903, %905, %cst_346 {dimension_numbers = #tpu.dot_dimension_numbers<[1], [1], [0], [0], [0, 0, 1, 0], [], []>} : vector<8x8xbf16>, vector<8x8xbf16>, vector<8x8xf32> -> vector<8x8xf32>
    %cst_347 = arith.constant 0.353553385 : f32
    %909 = vector.broadcast %cst_347 : f32 to vector<8x8xf32>
    %910 = arith.mulf %908, %909 : vector<8x8xf32>
    %911 = vector.extract_strided_slice %5 {offsets = [0, 0], sizes = [1, 8], strides = [1, 1]} : vector<1x128xf32> to vector<1x8xf32>
    %cst_348 = arith.constant 0.000000e+00 : f32
    %912 = vector.broadcast %cst_348 : f32 to vector<1x8xf32>
    %913 = arith.cmpf oeq, %911, %912 : vector<1x8xf32>
    %cst_349 = arith.constant -1.000000e+30 : f32
    %914 = vector.shape_cast %913 : vector<1x8xi1> to vector<1x8xi1>
    %915 = vector.broadcast %914 : vector<1x8xi1> to vector<8x8xi1>
    %916 = vector.broadcast %cst_349 : f32 to vector<8x8xf32>
    %917 = arith.select %915, %916, %910 : vector<8x8xi1>, vector<8x8xf32>
    %cst_350 = arith.constant dense<0xFF800000> : vector<8xf32>
    %918 = vector.multi_reduction <maximumf>, %917, %cst_350 [1] : vector<8x8xf32> to vector<8xf32>
    %919 = vector.shape_cast %918 : vector<8xf32> to vector<8x1xf32>
    %920 = vector.broadcast %919 : vector<8x1xf32> to vector<8x8xf32>
    %921 = arith.subf %917, %920 : vector<8x8xf32>
    %922 = math.exp %921 : vector<8x8xf32>
    %cst_351 = arith.constant dense<0.000000e+00> : vector<8xf32>
    %923 = vector.multi_reduction <add>, %922, %cst_351 [1] : vector<8x8xf32> to vector<8xf32>
    %924 = vector.shape_cast %923 : vector<8xf32> to vector<8x1xf32>
    %925 = tpu.reciprocal %924 {approx = true} : vector<8x1xf32> -> vector<8x1xf32>
    %926 = vector.broadcast %925 : vector<8x1xf32> to vector<8x8xf32>
    %927 = arith.mulf %922, %926 : vector<8x8xf32>
    %928 = arith.truncf %927 : vector<8x8xf32> to vector<8x8xbf16>
    %cst_352 = arith.constant dense<0.000000e+00> : vector<8x8xf32>
    %929 = tpu.matmul %928, %907, %cst_352 {dimension_numbers = #tpu.dot_dimension_numbers<[1], [0], [0], [1], [0, 0, 1, 1], [], []>} : vector<8x8xbf16>, vector<8x8xbf16>, vector<8x8xf32> -> vector<8x8xf32>
    %930 = arith.truncf %929 : vector<8x8xf32> to vector<8x8xbf16>
    %931 = vector.extract_strided_slice %863 {offsets = [1, 0, 0], sizes = [1, 8, 128], strides = [1, 1, 1]} : vector<4x8x128xbf16> to vector<1x8x128xbf16>
    %932 = vector.shape_cast %931 : vector<1x8x128xbf16> to vector<8x128xbf16>
    %cst_353 = arith.constant dense<0.000000e+00> : vector<8x128xf32>
    %933 = tpu.matmul %930, %932, %cst_353 {dimension_numbers = #tpu.dot_dimension_numbers<[1], [0], [0], [1], [0, 0, 1, 1], [], []>} : vector<8x8xbf16>, vector<8x128xbf16>, vector<8x128xf32> -> vector<8x128xf32>
    %934 = arith.addf %901, %933 : vector<8x128xf32>
    %935 = vector.extract_strided_slice %869 {offsets = [0, 16], sizes = [8, 8], strides = [1, 1]} : vector<8x128xf32> to vector<8x8xf32>
    %936 = arith.truncf %935 : vector<8x8xf32> to vector<8x8xbf16>
    %937 = vector.extract_strided_slice %869 {offsets = [0, 48], sizes = [8, 8], strides = [1, 1]} : vector<8x128xf32> to vector<8x8xf32>
    %938 = arith.truncf %937 : vector<8x8xf32> to vector<8x8xbf16>
    %939 = vector.extract_strided_slice %869 {offsets = [0, 80], sizes = [8, 8], strides = [1, 1]} : vector<8x128xf32> to vector<8x8xf32>
    %940 = arith.truncf %939 : vector<8x8xf32> to vector<8x8xbf16>
    %cst_354 = arith.constant dense<0.000000e+00> : vector<8x8xf32>
    %941 = tpu.matmul %936, %938, %cst_354 {dimension_numbers = #tpu.dot_dimension_numbers<[1], [1], [0], [0], [0, 0, 1, 0], [], []>} : vector<8x8xbf16>, vector<8x8xbf16>, vector<8x8xf32> -> vector<8x8xf32>
    %cst_355 = arith.constant 0.353553385 : f32
    %942 = vector.broadcast %cst_355 : f32 to vector<8x8xf32>
    %943 = arith.mulf %941, %942 : vector<8x8xf32>
    %944 = vector.extract_strided_slice %5 {offsets = [0, 0], sizes = [1, 8], strides = [1, 1]} : vector<1x128xf32> to vector<1x8xf32>
    %cst_356 = arith.constant 0.000000e+00 : f32
    %945 = vector.broadcast %cst_356 : f32 to vector<1x8xf32>
    %946 = arith.cmpf oeq, %944, %945 : vector<1x8xf32>
    %cst_357 = arith.constant -1.000000e+30 : f32
    %947 = vector.shape_cast %946 : vector<1x8xi1> to vector<1x8xi1>
    %948 = vector.broadcast %947 : vector<1x8xi1> to vector<8x8xi1>
    %949 = vector.broadcast %cst_357 : f32 to vector<8x8xf32>
    %950 = arith.select %948, %949, %943 : vector<8x8xi1>, vector<8x8xf32>
    %cst_358 = arith.constant dense<0xFF800000> : vector<8xf32>
    %951 = vector.multi_reduction <maximumf>, %950, %cst_358 [1] : vector<8x8xf32> to vector<8xf32>
    %952 = vector.shape_cast %951 : vector<8xf32> to vector<8x1xf32>
    %953 = vector.broadcast %952 : vector<8x1xf32> to vector<8x8xf32>
    %954 = arith.subf %950, %953 : vector<8x8xf32>
    %955 = math.exp %954 : vector<8x8xf32>
    %cst_359 = arith.constant dense<0.000000e+00> : vector<8xf32>
    %956 = vector.multi_reduction <add>, %955, %cst_359 [1] : vector<8x8xf32> to vector<8xf32>
    %957 = vector.shape_cast %956 : vector<8xf32> to vector<8x1xf32>
    %958 = tpu.reciprocal %957 {approx = true} : vector<8x1xf32> -> vector<8x1xf32>
    %959 = vector.broadcast %958 : vector<8x1xf32> to vector<8x8xf32>
    %960 = arith.mulf %955, %959 : vector<8x8xf32>
    %961 = arith.truncf %960 : vector<8x8xf32> to vector<8x8xbf16>
    %cst_360 = arith.constant dense<0.000000e+00> : vector<8x8xf32>
    %962 = tpu.matmul %961, %940, %cst_360 {dimension_numbers = #tpu.dot_dimension_numbers<[1], [0], [0], [1], [0, 0, 1, 1], [], []>} : vector<8x8xbf16>, vector<8x8xbf16>, vector<8x8xf32> -> vector<8x8xf32>
    %963 = arith.truncf %962 : vector<8x8xf32> to vector<8x8xbf16>
    %964 = vector.extract_strided_slice %863 {offsets = [2, 0, 0], sizes = [1, 8, 128], strides = [1, 1, 1]} : vector<4x8x128xbf16> to vector<1x8x128xbf16>
    %965 = vector.shape_cast %964 : vector<1x8x128xbf16> to vector<8x128xbf16>
    %cst_361 = arith.constant dense<0.000000e+00> : vector<8x128xf32>
    %966 = tpu.matmul %963, %965, %cst_361 {dimension_numbers = #tpu.dot_dimension_numbers<[1], [0], [0], [1], [0, 0, 1, 1], [], []>} : vector<8x8xbf16>, vector<8x128xbf16>, vector<8x128xf32> -> vector<8x128xf32>
    %967 = arith.addf %934, %966 : vector<8x128xf32>
    %968 = vector.extract_strided_slice %869 {offsets = [0, 24], sizes = [8, 8], strides = [1, 1]} : vector<8x128xf32> to vector<8x8xf32>
    %969 = arith.truncf %968 : vector<8x8xf32> to vector<8x8xbf16>
    %970 = vector.extract_strided_slice %869 {offsets = [0, 56], sizes = [8, 8], strides = [1, 1]} : vector<8x128xf32> to vector<8x8xf32>
    %971 = arith.truncf %970 : vector<8x8xf32> to vector<8x8xbf16>
    %972 = vector.extract_strided_slice %869 {offsets = [0, 88], sizes = [8, 8], strides = [1, 1]} : vector<8x128xf32> to vector<8x8xf32>
    %973 = arith.truncf %972 : vector<8x8xf32> to vector<8x8xbf16>
    %cst_362 = arith.constant dense<0.000000e+00> : vector<8x8xf32>
    %974 = tpu.matmul %969, %971, %cst_362 {dimension_numbers = #tpu.dot_dimension_numbers<[1], [1], [0], [0], [0, 0, 1, 0], [], []>} : vector<8x8xbf16>, vector<8x8xbf16>, vector<8x8xf32> -> vector<8x8xf32>
    %cst_363 = arith.constant 0.353553385 : f32
    %975 = vector.broadcast %cst_363 : f32 to vector<8x8xf32>
    %976 = arith.mulf %974, %975 : vector<8x8xf32>
    %977 = vector.extract_strided_slice %5 {offsets = [0, 0], sizes = [1, 8], strides = [1, 1]} : vector<1x128xf32> to vector<1x8xf32>
    %cst_364 = arith.constant 0.000000e+00 : f32
    %978 = vector.broadcast %cst_364 : f32 to vector<1x8xf32>
    %979 = arith.cmpf oeq, %977, %978 : vector<1x8xf32>
    %cst_365 = arith.constant -1.000000e+30 : f32
    %980 = vector.shape_cast %979 : vector<1x8xi1> to vector<1x8xi1>
    %981 = vector.broadcast %980 : vector<1x8xi1> to vector<8x8xi1>
    %982 = vector.broadcast %cst_365 : f32 to vector<8x8xf32>
    %983 = arith.select %981, %982, %976 : vector<8x8xi1>, vector<8x8xf32>
    %cst_366 = arith.constant dense<0xFF800000> : vector<8xf32>
    %984 = vector.multi_reduction <maximumf>, %983, %cst_366 [1] : vector<8x8xf32> to vector<8xf32>
    %985 = vector.shape_cast %984 : vector<8xf32> to vector<8x1xf32>
    %986 = vector.broadcast %985 : vector<8x1xf32> to vector<8x8xf32>
    %987 = arith.subf %983, %986 : vector<8x8xf32>
    %988 = math.exp %987 : vector<8x8xf32>
    %cst_367 = arith.constant dense<0.000000e+00> : vector<8xf32>
    %989 = vector.multi_reduction <add>, %988, %cst_367 [1] : vector<8x8xf32> to vector<8xf32>
    %990 = vector.shape_cast %989 : vector<8xf32> to vector<8x1xf32>
    %991 = tpu.reciprocal %990 {approx = true} : vector<8x1xf32> -> vector<8x1xf32>
    %992 = vector.broadcast %991 : vector<8x1xf32> to vector<8x8xf32>
    %993 = arith.mulf %988, %992 : vector<8x8xf32>
    %994 = arith.truncf %993 : vector<8x8xf32> to vector<8x8xbf16>
    %cst_368 = arith.constant dense<0.000000e+00> : vector<8x8xf32>
    %995 = tpu.matmul %994, %973, %cst_368 {dimension_numbers = #tpu.dot_dimension_numbers<[1], [0], [0], [1], [0, 0, 1, 1], [], []>} : vector<8x8xbf16>, vector<8x8xbf16>, vector<8x8xf32> -> vector<8x8xf32>
    %996 = arith.truncf %995 : vector<8x8xf32> to vector<8x8xbf16>
    %997 = vector.extract_strided_slice %863 {offsets = [3, 0, 0], sizes = [1, 8, 128], strides = [1, 1, 1]} : vector<4x8x128xbf16> to vector<1x8x128xbf16>
    %998 = vector.shape_cast %997 : vector<1x8x128xbf16> to vector<8x128xbf16>
    %cst_369 = arith.constant dense<0.000000e+00> : vector<8x128xf32>
    %999 = tpu.matmul %996, %998, %cst_369 {dimension_numbers = #tpu.dot_dimension_numbers<[1], [0], [0], [1], [0, 0, 1, 1], [], []>} : vector<8x8xbf16>, vector<8x128xbf16>, vector<8x128xf32> -> vector<8x128xf32>
    %1000 = arith.addf %967, %999 : vector<8x128xf32>
    %1001 = vector.broadcast %865 : vector<1x128xf32> to vector<8x128xf32>
    %1002 = arith.addf %1000, %1001 : vector<8x128xf32>
    %c1_370 = arith.constant 1 : index
    %c0_371 = arith.constant 0 : index
    %c0_372 = arith.constant 0 : index
    %1003 = vector.load %arg20[%c1_370, %c0_371, %c0_372] : memref<2x1x128xf32, #tpu.memory_space<vmem>>, vector<1x1x128xf32>
    %1004 = vector.shape_cast %1003 : vector<1x1x128xf32> to vector<1x128xf32>
    %c1_373 = arith.constant 1 : index
    %c0_374 = arith.constant 0 : index
    %c0_375 = arith.constant 0 : index
    %1005 = vector.load %arg21[%c1_373, %c0_374, %c0_375] : memref<2x1x128xf32, #tpu.memory_space<vmem>>, vector<1x1x128xf32>
    %1006 = vector.shape_cast %1005 : vector<1x1x128xf32> to vector<1x128xf32>
    %1007 = arith.addf %857, %1002 : vector<8x128xf32>
    %cst_376 = arith.constant dense<0.000000e+00> : vector<8xf32>
    %1008 = vector.multi_reduction <add>, %1007, %cst_376 [1] : vector<8x128xf32> to vector<8xf32>
    %1009 = vector.shape_cast %1008 : vector<8xf32> to vector<8x1xf32>
    %cst_377 = arith.constant 3.125000e-02 : f32
    %1010 = vector.broadcast %cst_377 : f32 to vector<8x1xf32>
    %1011 = arith.mulf %1009, %1010 : vector<8x1xf32>
    %1012 = tpu.iota {dimensions = array<i32: 1>} : vector<8x128xi32>
    %c32_i32_378 = arith.constant 32 : i32
    %1013 = vector.broadcast %c32_i32_378 : i32 to vector<8x128xi32>
    %1014 = arith.cmpi slt, %1012, %1013 : vector<8x128xi32>
    %1015 = vector.broadcast %1011 : vector<8x1xf32> to vector<8x128xf32>
    %1016 = arith.subf %1007, %1015 : vector<8x128xf32>
    %cst_379 = arith.constant 0.000000e+00 : f32
    %1017 = vector.broadcast %cst_379 : f32 to vector<8x128xf32>
    %1018 = arith.select %1014, %1016, %1017 : vector<8x128xi1>, vector<8x128xf32>
    %1019 = arith.mulf %1018, %1018 : vector<8x128xf32>
    %cst_380 = arith.constant dense<0.000000e+00> : vector<8xf32>
    %1020 = vector.multi_reduction <add>, %1019, %cst_380 [1] : vector<8x128xf32> to vector<8xf32>
    %1021 = vector.shape_cast %1020 : vector<8xf32> to vector<8x1xf32>
    %cst_381 = arith.constant 3.125000e-02 : f32
    %1022 = vector.broadcast %cst_381 : f32 to vector<8x1xf32>
    %1023 = arith.mulf %1021, %1022 : vector<8x1xf32>
    %1024 = vector.broadcast %1011 : vector<8x1xf32> to vector<8x128xf32>
    %1025 = arith.subf %1007, %1024 : vector<8x128xf32>
    %cst_382 = arith.constant 9.99999974E-6 : f32
    %1026 = vector.broadcast %cst_382 : f32 to vector<8x1xf32>
    %1027 = arith.addf %1023, %1026 : vector<8x1xf32>
    %1028 = math.rsqrt %1027 : vector<8x1xf32>
    %1029 = vector.broadcast %1028 : vector<8x1xf32> to vector<8x128xf32>
    %1030 = arith.mulf %1025, %1029 : vector<8x128xf32>
    %1031 = vector.broadcast %1004 : vector<1x128xf32> to vector<8x128xf32>
    %1032 = arith.mulf %1030, %1031 : vector<8x128xf32>
    %1033 = vector.broadcast %1006 : vector<1x128xf32> to vector<8x128xf32>
    %1034 = arith.addf %1032, %1033 : vector<8x128xf32>
    %c1_383 = arith.constant 1 : index
    %c0_384 = arith.constant 0 : index
    %c0_385 = arith.constant 0 : index
    %1035 = vector.load %arg22[%c1_383, %c0_384, %c0_385] : memref<2x128x128xbf16, #tpu.memory_space<vmem>>, vector<1x128x128xbf16>
    %1036 = vector.shape_cast %1035 : vector<1x128x128xbf16> to vector<128x128xbf16>
    %c1_386 = arith.constant 1 : index
    %c0_387 = arith.constant 0 : index
    %c0_388 = arith.constant 0 : index
    %1037 = vector.load %arg23[%c1_386, %c0_387, %c0_388] : memref<2x1x128xf32, #tpu.memory_space<vmem>>, vector<1x1x128xf32>
    %1038 = vector.shape_cast %1037 : vector<1x1x128xf32> to vector<1x128xf32>
    %c1_389 = arith.constant 1 : index
    %c0_390 = arith.constant 0 : index
    %c0_391 = arith.constant 0 : index
    %c0_392 = arith.constant 0 : index
    %1039 = vector.load %arg24[%c1_389, %c0_390, %c0_391, %c0_392] : memref<2x4x8x128xbf16, #tpu.memory_space<vmem>>, vector<1x4x8x128xbf16>
    %1040 = vector.shape_cast %1039 : vector<1x4x8x128xbf16> to vector<4x8x128xbf16>
    %c1_393 = arith.constant 1 : index
    %c0_394 = arith.constant 0 : index
    %c0_395 = arith.constant 0 : index
    %1041 = vector.load %arg25[%c1_393, %c0_394, %c0_395] : memref<2x1x128xf32, #tpu.memory_space<vmem>>, vector<1x1x128xf32>
    %1042 = vector.shape_cast %1041 : vector<1x1x128xf32> to vector<1x128xf32>
    %1043 = arith.truncf %1034 : vector<8x128xf32> to vector<8x128xbf16>
    %cst_396 = arith.constant dense<0.000000e+00> : vector<8x128xf32>
    %1044 = tpu.matmul %1043, %1036, %cst_396 {dimension_numbers = #tpu.dot_dimension_numbers<[1], [0], [0], [1], [0, 0, 1, 1], [], []>} : vector<8x128xbf16>, vector<128x128xbf16>, vector<8x128xf32> -> vector<8x128xf32>
    %1045 = vector.broadcast %1038 : vector<1x128xf32> to vector<8x128xf32>
    %1046 = arith.addf %1044, %1045 : vector<8x128xf32>
    %1047 = arith.truncf %471 : vector<8x128xf32> to vector<8x128xbf16>
    %cst_397 = arith.constant dense<0.000000e+00> : vector<8x128xf32>
    %1048 = tpu.matmul %1047, %1036, %cst_397 {dimension_numbers = #tpu.dot_dimension_numbers<[1], [0], [0], [1], [0, 0, 1, 1], [], []>} : vector<8x128xbf16>, vector<128x128xbf16>, vector<8x128xf32> -> vector<8x128xf32>
    %1049 = vector.broadcast %1038 : vector<1x128xf32> to vector<8x128xf32>
    %1050 = arith.addf %1048, %1049 : vector<8x128xf32>
    %1051 = vector.extract_strided_slice %1046 {offsets = [0, 0], sizes = [8, 8], strides = [1, 1]} : vector<8x128xf32> to vector<8x8xf32>
    %1052 = arith.truncf %1051 : vector<8x8xf32> to vector<8x8xbf16>
    %1053 = vector.extract_strided_slice %1050 {offsets = [0, 32], sizes = [8, 8], strides = [1, 1]} : vector<8x128xf32> to vector<8x8xf32>
    %1054 = arith.truncf %1053 : vector<8x8xf32> to vector<8x8xbf16>
    %1055 = vector.extract_strided_slice %1050 {offsets = [0, 64], sizes = [8, 8], strides = [1, 1]} : vector<8x128xf32> to vector<8x8xf32>
    %1056 = arith.truncf %1055 : vector<8x8xf32> to vector<8x8xbf16>
    %cst_398 = arith.constant dense<0.000000e+00> : vector<8x8xf32>
    %1057 = tpu.matmul %1052, %1054, %cst_398 {dimension_numbers = #tpu.dot_dimension_numbers<[1], [1], [0], [0], [0, 0, 1, 0], [], []>} : vector<8x8xbf16>, vector<8x8xbf16>, vector<8x8xf32> -> vector<8x8xf32>
    %cst_399 = arith.constant 0.353553385 : f32
    %1058 = vector.broadcast %cst_399 : f32 to vector<8x8xf32>
    %1059 = arith.mulf %1057, %1058 : vector<8x8xf32>
    %cst_400 = arith.constant dense<0xFF800000> : vector<8xf32>
    %1060 = vector.multi_reduction <maximumf>, %1059, %cst_400 [1] : vector<8x8xf32> to vector<8xf32>
    %1061 = vector.shape_cast %1060 : vector<8xf32> to vector<8x1xf32>
    %1062 = vector.broadcast %1061 : vector<8x1xf32> to vector<8x8xf32>
    %1063 = arith.subf %1059, %1062 : vector<8x8xf32>
    %1064 = math.exp %1063 : vector<8x8xf32>
    %cst_401 = arith.constant dense<0.000000e+00> : vector<8xf32>
    %1065 = vector.multi_reduction <add>, %1064, %cst_401 [1] : vector<8x8xf32> to vector<8xf32>
    %1066 = vector.shape_cast %1065 : vector<8xf32> to vector<8x1xf32>
    %1067 = tpu.reciprocal %1066 {approx = true} : vector<8x1xf32> -> vector<8x1xf32>
    %1068 = vector.broadcast %1067 : vector<8x1xf32> to vector<8x8xf32>
    %1069 = arith.mulf %1064, %1068 : vector<8x8xf32>
    %1070 = arith.truncf %1069 : vector<8x8xf32> to vector<8x8xbf16>
    %cst_402 = arith.constant dense<0.000000e+00> : vector<8x8xf32>
    %1071 = tpu.matmul %1070, %1056, %cst_402 {dimension_numbers = #tpu.dot_dimension_numbers<[1], [0], [0], [1], [0, 0, 1, 1], [], []>} : vector<8x8xbf16>, vector<8x8xbf16>, vector<8x8xf32> -> vector<8x8xf32>
    %1072 = arith.truncf %1071 : vector<8x8xf32> to vector<8x8xbf16>
    %1073 = vector.extract_strided_slice %1040 {offsets = [0, 0, 0], sizes = [1, 8, 128], strides = [1, 1, 1]} : vector<4x8x128xbf16> to vector<1x8x128xbf16>
    %1074 = vector.shape_cast %1073 : vector<1x8x128xbf16> to vector<8x128xbf16>
    %cst_403 = arith.constant dense<0.000000e+00> : vector<8x128xf32>
    %1075 = tpu.matmul %1072, %1074, %cst_403 {dimension_numbers = #tpu.dot_dimension_numbers<[1], [0], [0], [1], [0, 0, 1, 1], [], []>} : vector<8x8xbf16>, vector<8x128xbf16>, vector<8x128xf32> -> vector<8x128xf32>
    %1076 = vector.extract_strided_slice %1046 {offsets = [0, 8], sizes = [8, 8], strides = [1, 1]} : vector<8x128xf32> to vector<8x8xf32>
    %1077 = arith.truncf %1076 : vector<8x8xf32> to vector<8x8xbf16>
    %1078 = vector.extract_strided_slice %1050 {offsets = [0, 40], sizes = [8, 8], strides = [1, 1]} : vector<8x128xf32> to vector<8x8xf32>
    %1079 = arith.truncf %1078 : vector<8x8xf32> to vector<8x8xbf16>
    %1080 = vector.extract_strided_slice %1050 {offsets = [0, 72], sizes = [8, 8], strides = [1, 1]} : vector<8x128xf32> to vector<8x8xf32>
    %1081 = arith.truncf %1080 : vector<8x8xf32> to vector<8x8xbf16>
    %cst_404 = arith.constant dense<0.000000e+00> : vector<8x8xf32>
    %1082 = tpu.matmul %1077, %1079, %cst_404 {dimension_numbers = #tpu.dot_dimension_numbers<[1], [1], [0], [0], [0, 0, 1, 0], [], []>} : vector<8x8xbf16>, vector<8x8xbf16>, vector<8x8xf32> -> vector<8x8xf32>
    %cst_405 = arith.constant 0.353553385 : f32
    %1083 = vector.broadcast %cst_405 : f32 to vector<8x8xf32>
    %1084 = arith.mulf %1082, %1083 : vector<8x8xf32>
    %cst_406 = arith.constant dense<0xFF800000> : vector<8xf32>
    %1085 = vector.multi_reduction <maximumf>, %1084, %cst_406 [1] : vector<8x8xf32> to vector<8xf32>
    %1086 = vector.shape_cast %1085 : vector<8xf32> to vector<8x1xf32>
    %1087 = vector.broadcast %1086 : vector<8x1xf32> to vector<8x8xf32>
    %1088 = arith.subf %1084, %1087 : vector<8x8xf32>
    %1089 = math.exp %1088 : vector<8x8xf32>
    %cst_407 = arith.constant dense<0.000000e+00> : vector<8xf32>
    %1090 = vector.multi_reduction <add>, %1089, %cst_407 [1] : vector<8x8xf32> to vector<8xf32>
    %1091 = vector.shape_cast %1090 : vector<8xf32> to vector<8x1xf32>
    %1092 = tpu.reciprocal %1091 {approx = true} : vector<8x1xf32> -> vector<8x1xf32>
    %1093 = vector.broadcast %1092 : vector<8x1xf32> to vector<8x8xf32>
    %1094 = arith.mulf %1089, %1093 : vector<8x8xf32>
    %1095 = arith.truncf %1094 : vector<8x8xf32> to vector<8x8xbf16>
    %cst_408 = arith.constant dense<0.000000e+00> : vector<8x8xf32>
    %1096 = tpu.matmul %1095, %1081, %cst_408 {dimension_numbers = #tpu.dot_dimension_numbers<[1], [0], [0], [1], [0, 0, 1, 1], [], []>} : vector<8x8xbf16>, vector<8x8xbf16>, vector<8x8xf32> -> vector<8x8xf32>
    %1097 = arith.truncf %1096 : vector<8x8xf32> to vector<8x8xbf16>
    %1098 = vector.extract_strided_slice %1040 {offsets = [1, 0, 0], sizes = [1, 8, 128], strides = [1, 1, 1]} : vector<4x8x128xbf16> to vector<1x8x128xbf16>
    %1099 = vector.shape_cast %1098 : vector<1x8x128xbf16> to vector<8x128xbf16>
    %cst_409 = arith.constant dense<0.000000e+00> : vector<8x128xf32>
    %1100 = tpu.matmul %1097, %1099, %cst_409 {dimension_numbers = #tpu.dot_dimension_numbers<[1], [0], [0], [1], [0, 0, 1, 1], [], []>} : vector<8x8xbf16>, vector<8x128xbf16>, vector<8x128xf32> -> vector<8x128xf32>
    %1101 = arith.addf %1075, %1100 : vector<8x128xf32>
    %1102 = vector.extract_strided_slice %1046 {offsets = [0, 16], sizes = [8, 8], strides = [1, 1]} : vector<8x128xf32> to vector<8x8xf32>
    %1103 = arith.truncf %1102 : vector<8x8xf32> to vector<8x8xbf16>
    %1104 = vector.extract_strided_slice %1050 {offsets = [0, 48], sizes = [8, 8], strides = [1, 1]} : vector<8x128xf32> to vector<8x8xf32>
    %1105 = arith.truncf %1104 : vector<8x8xf32> to vector<8x8xbf16>
    %1106 = vector.extract_strided_slice %1050 {offsets = [0, 80], sizes = [8, 8], strides = [1, 1]} : vector<8x128xf32> to vector<8x8xf32>
    %1107 = arith.truncf %1106 : vector<8x8xf32> to vector<8x8xbf16>
    %cst_410 = arith.constant dense<0.000000e+00> : vector<8x8xf32>
    %1108 = tpu.matmul %1103, %1105, %cst_410 {dimension_numbers = #tpu.dot_dimension_numbers<[1], [1], [0], [0], [0, 0, 1, 0], [], []>} : vector<8x8xbf16>, vector<8x8xbf16>, vector<8x8xf32> -> vector<8x8xf32>
    %cst_411 = arith.constant 0.353553385 : f32
    %1109 = vector.broadcast %cst_411 : f32 to vector<8x8xf32>
    %1110 = arith.mulf %1108, %1109 : vector<8x8xf32>
    %cst_412 = arith.constant dense<0xFF800000> : vector<8xf32>
    %1111 = vector.multi_reduction <maximumf>, %1110, %cst_412 [1] : vector<8x8xf32> to vector<8xf32>
    %1112 = vector.shape_cast %1111 : vector<8xf32> to vector<8x1xf32>
    %1113 = vector.broadcast %1112 : vector<8x1xf32> to vector<8x8xf32>
    %1114 = arith.subf %1110, %1113 : vector<8x8xf32>
    %1115 = math.exp %1114 : vector<8x8xf32>
    %cst_413 = arith.constant dense<0.000000e+00> : vector<8xf32>
    %1116 = vector.multi_reduction <add>, %1115, %cst_413 [1] : vector<8x8xf32> to vector<8xf32>
    %1117 = vector.shape_cast %1116 : vector<8xf32> to vector<8x1xf32>
    %1118 = tpu.reciprocal %1117 {approx = true} : vector<8x1xf32> -> vector<8x1xf32>
    %1119 = vector.broadcast %1118 : vector<8x1xf32> to vector<8x8xf32>
    %1120 = arith.mulf %1115, %1119 : vector<8x8xf32>
    %1121 = arith.truncf %1120 : vector<8x8xf32> to vector<8x8xbf16>
    %cst_414 = arith.constant dense<0.000000e+00> : vector<8x8xf32>
    %1122 = tpu.matmul %1121, %1107, %cst_414 {dimension_numbers = #tpu.dot_dimension_numbers<[1], [0], [0], [1], [0, 0, 1, 1], [], []>} : vector<8x8xbf16>, vector<8x8xbf16>, vector<8x8xf32> -> vector<8x8xf32>
    %1123 = arith.truncf %1122 : vector<8x8xf32> to vector<8x8xbf16>
    %1124 = vector.extract_strided_slice %1040 {offsets = [2, 0, 0], sizes = [1, 8, 128], strides = [1, 1, 1]} : vector<4x8x128xbf16> to vector<1x8x128xbf16>
    %1125 = vector.shape_cast %1124 : vector<1x8x128xbf16> to vector<8x128xbf16>
    %cst_415 = arith.constant dense<0.000000e+00> : vector<8x128xf32>
    %1126 = tpu.matmul %1123, %1125, %cst_415 {dimension_numbers = #tpu.dot_dimension_numbers<[1], [0], [0], [1], [0, 0, 1, 1], [], []>} : vector<8x8xbf16>, vector<8x128xbf16>, vector<8x128xf32> -> vector<8x128xf32>
    %1127 = arith.addf %1101, %1126 : vector<8x128xf32>
    %1128 = vector.extract_strided_slice %1046 {offsets = [0, 24], sizes = [8, 8], strides = [1, 1]} : vector<8x128xf32> to vector<8x8xf32>
    %1129 = arith.truncf %1128 : vector<8x8xf32> to vector<8x8xbf16>
    %1130 = vector.extract_strided_slice %1050 {offsets = [0, 56], sizes = [8, 8], strides = [1, 1]} : vector<8x128xf32> to vector<8x8xf32>
    %1131 = arith.truncf %1130 : vector<8x8xf32> to vector<8x8xbf16>
    %1132 = vector.extract_strided_slice %1050 {offsets = [0, 88], sizes = [8, 8], strides = [1, 1]} : vector<8x128xf32> to vector<8x8xf32>
    %1133 = arith.truncf %1132 : vector<8x8xf32> to vector<8x8xbf16>
    %cst_416 = arith.constant dense<0.000000e+00> : vector<8x8xf32>
    %1134 = tpu.matmul %1129, %1131, %cst_416 {dimension_numbers = #tpu.dot_dimension_numbers<[1], [1], [0], [0], [0, 0, 1, 0], [], []>} : vector<8x8xbf16>, vector<8x8xbf16>, vector<8x8xf32> -> vector<8x8xf32>
    %cst_417 = arith.constant 0.353553385 : f32
    %1135 = vector.broadcast %cst_417 : f32 to vector<8x8xf32>
    %1136 = arith.mulf %1134, %1135 : vector<8x8xf32>
    %cst_418 = arith.constant dense<0xFF800000> : vector<8xf32>
    %1137 = vector.multi_reduction <maximumf>, %1136, %cst_418 [1] : vector<8x8xf32> to vector<8xf32>
    %1138 = vector.shape_cast %1137 : vector<8xf32> to vector<8x1xf32>
    %1139 = vector.broadcast %1138 : vector<8x1xf32> to vector<8x8xf32>
    %1140 = arith.subf %1136, %1139 : vector<8x8xf32>
    %1141 = math.exp %1140 : vector<8x8xf32>
    %cst_419 = arith.constant dense<0.000000e+00> : vector<8xf32>
    %1142 = vector.multi_reduction <add>, %1141, %cst_419 [1] : vector<8x8xf32> to vector<8xf32>
    %1143 = vector.shape_cast %1142 : vector<8xf32> to vector<8x1xf32>
    %1144 = tpu.reciprocal %1143 {approx = true} : vector<8x1xf32> -> vector<8x1xf32>
    %1145 = vector.broadcast %1144 : vector<8x1xf32> to vector<8x8xf32>
    %1146 = arith.mulf %1141, %1145 : vector<8x8xf32>
    %1147 = arith.truncf %1146 : vector<8x8xf32> to vector<8x8xbf16>
    %cst_420 = arith.constant dense<0.000000e+00> : vector<8x8xf32>
    %1148 = tpu.matmul %1147, %1133, %cst_420 {dimension_numbers = #tpu.dot_dimension_numbers<[1], [0], [0], [1], [0, 0, 1, 1], [], []>} : vector<8x8xbf16>, vector<8x8xbf16>, vector<8x8xf32> -> vector<8x8xf32>
    %1149 = arith.truncf %1148 : vector<8x8xf32> to vector<8x8xbf16>
    %1150 = vector.extract_strided_slice %1040 {offsets = [3, 0, 0], sizes = [1, 8, 128], strides = [1, 1, 1]} : vector<4x8x128xbf16> to vector<1x8x128xbf16>
    %1151 = vector.shape_cast %1150 : vector<1x8x128xbf16> to vector<8x128xbf16>
    %cst_421 = arith.constant dense<0.000000e+00> : vector<8x128xf32>
    %1152 = tpu.matmul %1149, %1151, %cst_421 {dimension_numbers = #tpu.dot_dimension_numbers<[1], [0], [0], [1], [0, 0, 1, 1], [], []>} : vector<8x8xbf16>, vector<8x128xbf16>, vector<8x128xf32> -> vector<8x128xf32>
    %1153 = arith.addf %1127, %1152 : vector<8x128xf32>
    %1154 = vector.broadcast %1042 : vector<1x128xf32> to vector<8x128xf32>
    %1155 = arith.addf %1153, %1154 : vector<8x128xf32>
    %c1_422 = arith.constant 1 : index
    %c0_423 = arith.constant 0 : index
    %c0_424 = arith.constant 0 : index
    %1156 = vector.load %arg26[%c1_422, %c0_423, %c0_424] : memref<2x1x128xf32, #tpu.memory_space<vmem>>, vector<1x1x128xf32>
    %1157 = vector.shape_cast %1156 : vector<1x1x128xf32> to vector<1x128xf32>
    %c1_425 = arith.constant 1 : index
    %c0_426 = arith.constant 0 : index
    %c0_427 = arith.constant 0 : index
    %1158 = vector.load %arg27[%c1_425, %c0_426, %c0_427] : memref<2x1x128xf32, #tpu.memory_space<vmem>>, vector<1x1x128xf32>
    %1159 = vector.shape_cast %1158 : vector<1x1x128xf32> to vector<1x128xf32>
    %1160 = arith.addf %1034, %1155 : vector<8x128xf32>
    %cst_428 = arith.constant dense<0.000000e+00> : vector<8xf32>
    %1161 = vector.multi_reduction <add>, %1160, %cst_428 [1] : vector<8x128xf32> to vector<8xf32>
    %1162 = vector.shape_cast %1161 : vector<8xf32> to vector<8x1xf32>
    %cst_429 = arith.constant 3.125000e-02 : f32
    %1163 = vector.broadcast %cst_429 : f32 to vector<8x1xf32>
    %1164 = arith.mulf %1162, %1163 : vector<8x1xf32>
    %1165 = tpu.iota {dimensions = array<i32: 1>} : vector<8x128xi32>
    %c32_i32_430 = arith.constant 32 : i32
    %1166 = vector.broadcast %c32_i32_430 : i32 to vector<8x128xi32>
    %1167 = arith.cmpi slt, %1165, %1166 : vector<8x128xi32>
    %1168 = vector.broadcast %1164 : vector<8x1xf32> to vector<8x128xf32>
    %1169 = arith.subf %1160, %1168 : vector<8x128xf32>
    %cst_431 = arith.constant 0.000000e+00 : f32
    %1170 = vector.broadcast %cst_431 : f32 to vector<8x128xf32>
    %1171 = arith.select %1167, %1169, %1170 : vector<8x128xi1>, vector<8x128xf32>
    %1172 = arith.mulf %1171, %1171 : vector<8x128xf32>
    %cst_432 = arith.constant dense<0.000000e+00> : vector<8xf32>
    %1173 = vector.multi_reduction <add>, %1172, %cst_432 [1] : vector<8x128xf32> to vector<8xf32>
    %1174 = vector.shape_cast %1173 : vector<8xf32> to vector<8x1xf32>
    %cst_433 = arith.constant 3.125000e-02 : f32
    %1175 = vector.broadcast %cst_433 : f32 to vector<8x1xf32>
    %1176 = arith.mulf %1174, %1175 : vector<8x1xf32>
    %1177 = vector.broadcast %1164 : vector<8x1xf32> to vector<8x128xf32>
    %1178 = arith.subf %1160, %1177 : vector<8x128xf32>
    %cst_434 = arith.constant 9.99999974E-6 : f32
    %1179 = vector.broadcast %cst_434 : f32 to vector<8x1xf32>
    %1180 = arith.addf %1176, %1179 : vector<8x1xf32>
    %1181 = math.rsqrt %1180 : vector<8x1xf32>
    %1182 = vector.broadcast %1181 : vector<8x1xf32> to vector<8x128xf32>
    %1183 = arith.mulf %1178, %1182 : vector<8x128xf32>
    %1184 = vector.broadcast %1157 : vector<1x128xf32> to vector<8x128xf32>
    %1185 = arith.mulf %1183, %1184 : vector<8x128xf32>
    %1186 = vector.broadcast %1159 : vector<1x128xf32> to vector<8x128xf32>
    %1187 = arith.addf %1185, %1186 : vector<8x128xf32>
    %c1_435 = arith.constant 1 : index
    %c0_436 = arith.constant 0 : index
    %c0_437 = arith.constant 0 : index
    %1188 = vector.load %arg28[%c1_435, %c0_436, %c0_437] : memref<2x128x128xbf16, #tpu.memory_space<vmem>>, vector<1x128x128xbf16>
    %1189 = vector.shape_cast %1188 : vector<1x128x128xbf16> to vector<128x128xbf16>
    %c1_438 = arith.constant 1 : index
    %c0_439 = arith.constant 0 : index
    %c0_440 = arith.constant 0 : index
    %1190 = vector.load %arg29[%c1_438, %c0_439, %c0_440] : memref<2x1x128xf32, #tpu.memory_space<vmem>>, vector<1x1x128xf32>
    %1191 = vector.shape_cast %1190 : vector<1x1x128xf32> to vector<1x128xf32>
    %c1_441 = arith.constant 1 : index
    %c0_442 = arith.constant 0 : index
    %c0_443 = arith.constant 0 : index
    %1192 = vector.load %arg30[%c1_441, %c0_442, %c0_443] : memref<2x128x128xbf16, #tpu.memory_space<vmem>>, vector<1x128x128xbf16>
    %1193 = vector.shape_cast %1192 : vector<1x128x128xbf16> to vector<128x128xbf16>
    %c1_444 = arith.constant 1 : index
    %c0_445 = arith.constant 0 : index
    %c0_446 = arith.constant 0 : index
    %1194 = vector.load %arg31[%c1_444, %c0_445, %c0_446] : memref<2x1x128xf32, #tpu.memory_space<vmem>>, vector<1x1x128xf32>
    %1195 = vector.shape_cast %1194 : vector<1x1x128xf32> to vector<1x128xf32>
    %1196 = arith.truncf %1187 : vector<8x128xf32> to vector<8x128xbf16>
    %cst_447 = arith.constant dense<0.000000e+00> : vector<8x128xf32>
    %1197 = tpu.matmul %1196, %1189, %cst_447 {dimension_numbers = #tpu.dot_dimension_numbers<[1], [0], [0], [1], [0, 0, 1, 1], [], []>} : vector<8x128xbf16>, vector<128x128xbf16>, vector<8x128xf32> -> vector<8x128xf32>
    %1198 = vector.broadcast %1191 : vector<1x128xf32> to vector<8x128xf32>
    %1199 = arith.addf %1197, %1198 : vector<8x128xf32>
    %cst_448 = arith.constant 5.000000e-01 : f32
    %1200 = vector.broadcast %cst_448 : f32 to vector<8x128xf32>
    %1201 = arith.mulf %1200, %1199 : vector<8x128xf32>
    %cst_449 = arith.constant 0.707106769 : f32
    %1202 = vector.broadcast %cst_449 : f32 to vector<8x128xf32>
    %1203 = arith.mulf %1199, %1202 : vector<8x128xf32>
    %1204 = math.erf %1203 : vector<8x128xf32>
    %cst_450 = arith.constant 1.000000e+00 : f32
    %1205 = vector.broadcast %cst_450 : f32 to vector<8x128xf32>
    %1206 = arith.addf %1205, %1204 : vector<8x128xf32>
    %1207 = arith.mulf %1201, %1206 : vector<8x128xf32>
    %1208 = arith.truncf %1207 : vector<8x128xf32> to vector<8x128xbf16>
    %cst_451 = arith.constant dense<0.000000e+00> : vector<8x128xf32>
    %1209 = tpu.matmul %1208, %1193, %cst_451 {dimension_numbers = #tpu.dot_dimension_numbers<[1], [0], [0], [1], [0, 0, 1, 1], [], []>} : vector<8x128xbf16>, vector<128x128xbf16>, vector<8x128xf32> -> vector<8x128xf32>
    %1210 = vector.broadcast %1195 : vector<1x128xf32> to vector<8x128xf32>
    %1211 = arith.addf %1209, %1210 : vector<8x128xf32>
    %c1_452 = arith.constant 1 : index
    %c0_453 = arith.constant 0 : index
    %c0_454 = arith.constant 0 : index
    %1212 = vector.load %arg32[%c1_452, %c0_453, %c0_454] : memref<2x1x128xf32, #tpu.memory_space<vmem>>, vector<1x1x128xf32>
    %1213 = vector.shape_cast %1212 : vector<1x1x128xf32> to vector<1x128xf32>
    %c1_455 = arith.constant 1 : index
    %c0_456 = arith.constant 0 : index
    %c0_457 = arith.constant 0 : index
    %1214 = vector.load %arg33[%c1_455, %c0_456, %c0_457] : memref<2x1x128xf32, #tpu.memory_space<vmem>>, vector<1x1x128xf32>
    %1215 = vector.shape_cast %1214 : vector<1x1x128xf32> to vector<1x128xf32>
    %1216 = arith.addf %1187, %1211 : vector<8x128xf32>
    %cst_458 = arith.constant dense<0.000000e+00> : vector<8xf32>
    %1217 = vector.multi_reduction <add>, %1216, %cst_458 [1] : vector<8x128xf32> to vector<8xf32>
    %1218 = vector.shape_cast %1217 : vector<8xf32> to vector<8x1xf32>
    %cst_459 = arith.constant 3.125000e-02 : f32
    %1219 = vector.broadcast %cst_459 : f32 to vector<8x1xf32>
    %1220 = arith.mulf %1218, %1219 : vector<8x1xf32>
    %1221 = tpu.iota {dimensions = array<i32: 1>} : vector<8x128xi32>
    %c32_i32_460 = arith.constant 32 : i32
    %1222 = vector.broadcast %c32_i32_460 : i32 to vector<8x128xi32>
    %1223 = arith.cmpi slt, %1221, %1222 : vector<8x128xi32>
    %1224 = vector.broadcast %1220 : vector<8x1xf32> to vector<8x128xf32>
    %1225 = arith.subf %1216, %1224 : vector<8x128xf32>
    %cst_461 = arith.constant 0.000000e+00 : f32
    %1226 = vector.broadcast %cst_461 : f32 to vector<8x128xf32>
    %1227 = arith.select %1223, %1225, %1226 : vector<8x128xi1>, vector<8x128xf32>
    %1228 = arith.mulf %1227, %1227 : vector<8x128xf32>
    %cst_462 = arith.constant dense<0.000000e+00> : vector<8xf32>
    %1229 = vector.multi_reduction <add>, %1228, %cst_462 [1] : vector<8x128xf32> to vector<8xf32>
    %1230 = vector.shape_cast %1229 : vector<8xf32> to vector<8x1xf32>
    %cst_463 = arith.constant 3.125000e-02 : f32
    %1231 = vector.broadcast %cst_463 : f32 to vector<8x1xf32>
    %1232 = arith.mulf %1230, %1231 : vector<8x1xf32>
    %1233 = vector.broadcast %1220 : vector<8x1xf32> to vector<8x128xf32>
    %1234 = arith.subf %1216, %1233 : vector<8x128xf32>
    %cst_464 = arith.constant 9.99999974E-6 : f32
    %1235 = vector.broadcast %cst_464 : f32 to vector<8x1xf32>
    %1236 = arith.addf %1232, %1235 : vector<8x1xf32>
    %1237 = math.rsqrt %1236 : vector<8x1xf32>
    %1238 = vector.broadcast %1237 : vector<8x1xf32> to vector<8x128xf32>
    %1239 = arith.mulf %1234, %1238 : vector<8x128xf32>
    %1240 = vector.broadcast %1213 : vector<1x128xf32> to vector<8x128xf32>
    %1241 = arith.mulf %1239, %1240 : vector<8x128xf32>
    %1242 = vector.broadcast %1215 : vector<1x128xf32> to vector<8x128xf32>
    %1243 = arith.addf %1241, %1242 : vector<8x128xf32>
    %1244 = arith.truncf %1243 : vector<8x128xf32> to vector<8x128xbf16>
    %c0_465 = arith.constant 0 : index
    %c0_466 = arith.constant 0 : index
    %1245 = vector.load %arg34[%c0_465, %c0_466] : memref<128x128xbf16, #tpu.memory_space<vmem>>, vector<128x128xbf16>
    %cst_467 = arith.constant dense<0.000000e+00> : vector<8x128xf32>
    %1246 = tpu.matmul %1244, %1245, %cst_467 {dimension_numbers = #tpu.dot_dimension_numbers<[1], [0], [0], [1], [0, 0, 1, 1], [], []>} : vector<8x128xbf16>, vector<128x128xbf16>, vector<8x128xf32> -> vector<8x128xf32>
    %c0_468 = arith.constant 0 : index
    %c0_469 = arith.constant 0 : index
    %1247 = vector.load %arg35[%c0_468, %c0_469] : memref<1x128xf32, #tpu.memory_space<vmem>>, vector<1x128xf32>
    %1248 = vector.broadcast %1247 : vector<1x128xf32> to vector<8x128xf32>
    %1249 = arith.addf %1246, %1248 : vector<8x128xf32>
    %c0_470 = arith.constant 0 : index
    %c0_471 = arith.constant 0 : index
    %c0_472 = arith.constant 0 : index
    %1250 = vector.load %arg36[%c0_470, %c0_471, %c0_472] : memref<1x8x128xf32, #tpu.memory_space<vmem>>, vector<1x8x128xf32>
    %1251 = vector.shape_cast %1250 : vector<1x8x128xf32> to vector<8x128xf32>
    %1252 = vector.shape_cast %1249 : vector<8x128xf32> to vector<1x8x128xf32>
    tpu.vector_store %arg36[%c0_470, %c0_471, %c0_472], %1252 {strides = array<i32>} : memref<1x8x128xf32, #tpu.memory_space<vmem>>, vector<1x8x128xf32>,
    return
  }
  func.func @transform_0(%arg0: i32) -> (i32, i32, i32) {
    %c0_i32 = arith.constant 0 : i32
    %c0_i32_0 = arith.constant 0 : i32
    %c0_i32_1 = arith.constant 0 : i32
    return %arg0, %c0_i32, %c0_i32_0 : i32, i32, i32
  }
  func.func @transform_1(%arg0: i32) -> (i32, i32, i32) {
    %c0_i32 = arith.constant 0 : i32
    %c0_i32_0 = arith.constant 0 : i32
    %c0_i32_1 = arith.constant 0 : i32
    return %arg0, %c0_i32, %c0_i32_0 : i32, i32, i32
  }
  func.func @transform_2(%arg0: i32) -> (i32, i32, i32) {
    %c0_i32 = arith.constant 0 : i32
    %c0_i32_0 = arith.constant 0 : i32
    %c0_i32_1 = arith.constant 0 : i32
    return %arg0, %c0_i32, %c0_i32_0 : i32, i32, i32
  }
  func.func @transform_3(%arg0: i32) -> (i32, i32, i32) {
    %c0_i32 = arith.constant 0 : i32
    %c0_i32_0 = arith.constant 0 : i32
    %c0_i32_1 = arith.constant 0 : i32
    %c0_i32_2 = arith.constant 0 : i32
    return %c0_i32, %c0_i32_0, %c0_i32_1 : i32, i32, i32
  }
  func.func @transform_4(%arg0: i32) -> (i32, i32, i32) {
    %c0_i32 = arith.constant 0 : i32
    %c0_i32_0 = arith.constant 0 : i32
    %c0_i32_1 = arith.constant 0 : i32
    %c0_i32_2 = arith.constant 0 : i32
    return %c0_i32, %c0_i32_0, %c0_i32_1 : i32, i32, i32
  }
  func.func @transform_5(%arg0: i32) -> (i32, i32, i32, i32) {
    %c0_i32 = arith.constant 0 : i32
    %c0_i32_0 = arith.constant 0 : i32
    %c0_i32_1 = arith.constant 0 : i32
    %c0_i32_2 = arith.constant 0 : i32
    %c0_i32_3 = arith.constant 0 : i32
    return %c0_i32, %c0_i32_0, %c0_i32_1, %c0_i32_2 : i32, i32, i32, i32
  }
  func.func @transform_6(%arg0: i32) -> (i32, i32, i32) {
    %c0_i32 = arith.constant 0 : i32
    %c0_i32_0 = arith.constant 0 : i32
    %c0_i32_1 = arith.constant 0 : i32
    %c0_i32_2 = arith.constant 0 : i32
    return %c0_i32, %c0_i32_0, %c0_i32_1 : i32, i32, i32
  }
  func.func @transform_7(%arg0: i32) -> (i32, i32, i32) {
    %c0_i32 = arith.constant 0 : i32
    %c0_i32_0 = arith.constant 0 : i32
    %c0_i32_1 = arith.constant 0 : i32
    %c0_i32_2 = arith.constant 0 : i32
    return %c0_i32, %c0_i32_0, %c0_i32_1 : i32, i32, i32
  }
  func.func @transform_8(%arg0: i32) -> (i32, i32, i32) {
    %c0_i32 = arith.constant 0 : i32
    %c0_i32_0 = arith.constant 0 : i32
    %c0_i32_1 = arith.constant 0 : i32
    %c0_i32_2 = arith.constant 0 : i32
    return %c0_i32, %c0_i32_0, %c0_i32_1 : i32, i32, i32
  }
  func.func @transform_9(%arg0: i32) -> (i32, i32, i32) {
    %c0_i32 = arith.constant 0 : i32
    %c0_i32_0 = arith.constant 0 : i32
    %c0_i32_1 = arith.constant 0 : i32
    %c0_i32_2 = arith.constant 0 : i32
    return %c0_i32, %c0_i32_0, %c0_i32_1 : i32, i32, i32
  }
  func.func @transform_10(%arg0: i32) -> (i32, i32, i32) {
    %c0_i32 = arith.constant 0 : i32
    %c0_i32_0 = arith.constant 0 : i32
    %c0_i32_1 = arith.constant 0 : i32
    %c0_i32_2 = arith.constant 0 : i32
    return %c0_i32, %c0_i32_0, %c0_i32_1 : i32, i32, i32
  }
  func.func @transform_11(%arg0: i32) -> (i32, i32, i32) {
    %c0_i32 = arith.constant 0 : i32
    %c0_i32_0 = arith.constant 0 : i32
    %c0_i32_1 = arith.constant 0 : i32
    %c0_i32_2 = arith.constant 0 : i32
    return %c0_i32, %c0_i32_0, %c0_i32_1 : i32, i32, i32
  }
  func.func @transform_12(%arg0: i32) -> (i32, i32, i32) {
    %c0_i32 = arith.constant 0 : i32
    %c0_i32_0 = arith.constant 0 : i32
    %c0_i32_1 = arith.constant 0 : i32
    %c0_i32_2 = arith.constant 0 : i32
    return %c0_i32, %c0_i32_0, %c0_i32_1 : i32, i32, i32
  }
  func.func @transform_13(%arg0: i32) -> (i32, i32, i32) {
    %c0_i32 = arith.constant 0 : i32
    %c0_i32_0 = arith.constant 0 : i32
    %c0_i32_1 = arith.constant 0 : i32
    %c0_i32_2 = arith.constant 0 : i32
    return %c0_i32, %c0_i32_0, %c0_i32_1 : i32, i32, i32
  }
  func.func @transform_14(%arg0: i32) -> (i32, i32, i32) {
    %c0_i32 = arith.constant 0 : i32
    %c0_i32_0 = arith.constant 0 : i32
    %c0_i32_1 = arith.constant 0 : i32
    %c0_i32_2 = arith.constant 0 : i32
    return %c0_i32, %c0_i32_0, %c0_i32_1 : i32, i32, i32
  }
  func.func @transform_15(%arg0: i32) -> (i32, i32, i32) {
    %c0_i32 = arith.constant 0 : i32
    %c0_i32_0 = arith.constant 0 : i32
    %c0_i32_1 = arith.constant 0 : i32
    %c0_i32_2 = arith.constant 0 : i32
    return %c0_i32, %c0_i32_0, %c0_i32_1 : i32, i32, i32
  }
  func.func @transform_16(%arg0: i32) -> (i32, i32, i32) {
    %c0_i32 = arith.constant 0 : i32
    %c0_i32_0 = arith.constant 0 : i32
    %c0_i32_1 = arith.constant 0 : i32
    %c0_i32_2 = arith.constant 0 : i32
    return %c0_i32, %c0_i32_0, %c0_i32_1 : i32, i32, i32
  }
  func.func @transform_17(%arg0: i32) -> (i32, i32, i32, i32) {
    %c0_i32 = arith.constant 0 : i32
    %c0_i32_0 = arith.constant 0 : i32
    %c0_i32_1 = arith.constant 0 : i32
    %c0_i32_2 = arith.constant 0 : i32
    %c0_i32_3 = arith.constant 0 : i32
    return %c0_i32, %c0_i32_0, %c0_i32_1, %c0_i32_2 : i32, i32, i32, i32
  }
  func.func @transform_18(%arg0: i32) -> (i32, i32, i32) {
    %c0_i32 = arith.constant 0 : i32
    %c0_i32_0 = arith.constant 0 : i32
    %c0_i32_1 = arith.constant 0 : i32
    %c0_i32_2 = arith.constant 0 : i32
    return %c0_i32, %c0_i32_0, %c0_i32_1 : i32, i32, i32
  }
  func.func @transform_19(%arg0: i32) -> (i32, i32, i32) {
    %c0_i32 = arith.constant 0 : i32
    %c0_i32_0 = arith.constant 0 : i32
    %c0_i32_1 = arith.constant 0 : i32
    %c0_i32_2 = arith.constant 0 : i32
    return %c0_i32, %c0_i32_0, %c0_i32_1 : i32, i32, i32
  }
  func.func @transform_20(%arg0: i32) -> (i32, i32, i32) {
    %c0_i32 = arith.constant 0 : i32
    %c0_i32_0 = arith.constant 0 : i32
    %c0_i32_1 = arith.constant 0 : i32
    %c0_i32_2 = arith.constant 0 : i32
    return %c0_i32, %c0_i32_0, %c0_i32_1 : i32, i32, i32
  }
  func.func @transform_21(%arg0: i32) -> (i32, i32, i32) {
    %c0_i32 = arith.constant 0 : i32
    %c0_i32_0 = arith.constant 0 : i32
    %c0_i32_1 = arith.constant 0 : i32
    %c0_i32_2 = arith.constant 0 : i32
    return %c0_i32, %c0_i32_0, %c0_i32_1 : i32, i32, i32
  }
  func.func @transform_22(%arg0: i32) -> (i32, i32, i32) {
    %c0_i32 = arith.constant 0 : i32
    %c0_i32_0 = arith.constant 0 : i32
    %c0_i32_1 = arith.constant 0 : i32
    %c0_i32_2 = arith.constant 0 : i32
    return %c0_i32, %c0_i32_0, %c0_i32_1 : i32, i32, i32
  }
  func.func @transform_23(%arg0: i32) -> (i32, i32, i32, i32) {
    %c0_i32 = arith.constant 0 : i32
    %c0_i32_0 = arith.constant 0 : i32
    %c0_i32_1 = arith.constant 0 : i32
    %c0_i32_2 = arith.constant 0 : i32
    %c0_i32_3 = arith.constant 0 : i32
    return %c0_i32, %c0_i32_0, %c0_i32_1, %c0_i32_2 : i32, i32, i32, i32
  }
  func.func @transform_24(%arg0: i32) -> (i32, i32, i32) {
    %c0_i32 = arith.constant 0 : i32
    %c0_i32_0 = arith.constant 0 : i32
    %c0_i32_1 = arith.constant 0 : i32
    %c0_i32_2 = arith.constant 0 : i32
    return %c0_i32, %c0_i32_0, %c0_i32_1 : i32, i32, i32
  }
  func.func @transform_25(%arg0: i32) -> (i32, i32, i32) {
    %c0_i32 = arith.constant 0 : i32
    %c0_i32_0 = arith.constant 0 : i32
    %c0_i32_1 = arith.constant 0 : i32
    %c0_i32_2 = arith.constant 0 : i32
    return %c0_i32, %c0_i32_0, %c0_i32_1 : i32, i32, i32
  }
  func.func @transform_26(%arg0: i32) -> (i32, i32, i32) {
    %c0_i32 = arith.constant 0 : i32
    %c0_i32_0 = arith.constant 0 : i32
    %c0_i32_1 = arith.constant 0 : i32
    %c0_i32_2 = arith.constant 0 : i32
    return %c0_i32, %c0_i32_0, %c0_i32_1 : i32, i32, i32
  }
  func.func @transform_27(%arg0: i32) -> (i32, i32, i32) {
    %c0_i32 = arith.constant 0 : i32
    %c0_i32_0 = arith.constant 0 : i32
    %c0_i32_1 = arith.constant 0 : i32
    %c0_i32_2 = arith.constant 0 : i32
    return %c0_i32, %c0_i32_0, %c0_i32_1 : i32, i32, i32
  }
  func.func @transform_28(%arg0: i32) -> (i32, i32, i32) {
    %c0_i32 = arith.constant 0 : i32
    %c0_i32_0 = arith.constant 0 : i32
    %c0_i32_1 = arith.constant 0 : i32
    %c0_i32_2 = arith.constant 0 : i32
    return %c0_i32, %c0_i32_0, %c0_i32_1 : i32, i32, i32
  }
  func.func @transform_29(%arg0: i32) -> (i32, i32, i32) {
    %c0_i32 = arith.constant 0 : i32
    %c0_i32_0 = arith.constant 0 : i32
    %c0_i32_1 = arith.constant 0 : i32
    %c0_i32_2 = arith.constant 0 : i32
    return %c0_i32, %c0_i32_0, %c0_i32_1 : i32, i32, i32
  }
  func.func @transform_30(%arg0: i32) -> (i32, i32, i32) {
    %c0_i32 = arith.constant 0 : i32
    %c0_i32_0 = arith.constant 0 : i32
    %c0_i32_1 = arith.constant 0 : i32
    %c0_i32_2 = arith.constant 0 : i32
    return %c0_i32, %c0_i32_0, %c0_i32_1 : i32, i32, i32
  }
  func.func @transform_31(%arg0: i32) -> (i32, i32, i32) {
    %c0_i32 = arith.constant 0 : i32
    %c0_i32_0 = arith.constant 0 : i32
    %c0_i32_1 = arith.constant 0 : i32
    %c0_i32_2 = arith.constant 0 : i32
    return %c0_i32, %c0_i32_0, %c0_i32_1 : i32, i32, i32
  }
  func.func @transform_32(%arg0: i32) -> (i32, i32, i32) {
    %c0_i32 = arith.constant 0 : i32
    %c0_i32_0 = arith.constant 0 : i32
    %c0_i32_1 = arith.constant 0 : i32
    %c0_i32_2 = arith.constant 0 : i32
    return %c0_i32, %c0_i32_0, %c0_i32_1 : i32, i32, i32
  }
  func.func @transform_33(%arg0: i32) -> (i32, i32) {
    %c0_i32 = arith.constant 0 : i32
    %c0_i32_0 = arith.constant 0 : i32
    %c0_i32_1 = arith.constant 0 : i32
    return %c0_i32, %c0_i32_0 : i32, i32
  }
  func.func @transform_34(%arg0: i32) -> (i32, i32) {
    %c0_i32 = arith.constant 0 : i32
    %c0_i32_0 = arith.constant 0 : i32
    %c0_i32_1 = arith.constant 0 : i32
    return %c0_i32, %c0_i32_0 : i32, i32
  }
  func.func @transform_35(%arg0: i32) -> (i32, i32, i32) {
    %c0_i32 = arith.constant 0 : i32
    %c0_i32_0 = arith.constant 0 : i32
    %c0_i32_1 = arith.constant 0 : i32
    return %arg0, %c0_i32, %c0_i32_0 : i32, i32, i32
  }
}

</mosaic_0001>

<bundles_post_ra>
// kernel: transformer_forward.1
= control target key start
LH: loop header
LB: loop body
LE: loop exit
PB: predicated region body
PF: predicated region fallthrough
CT: control target
= control target key end

     0   :  { %s10298_s6 = smov 1   ;;  %s10299_s10 = smov 2   ;;  %s11822_s0 = inlined_call_operand.smem [shape: u32[36], index: -1, kind: input, shape index: {}] }
   0x1   :  { %s10380_s5 = sld [smem:[%s11822_s0]]   ;;  %s10300_s14 = smov 3  }
   0x2   :  { %s10385_s9 = sld [smem:[%s11822_s0 + %s10298_s6]]   ;;  %s10301_s18 = smov 4  }
   0x3   :  { %s10390_s13 = sld [smem:[%s11822_s0 + %s10299_s10]]   ;;  %s10302_s22 = smov 5  }
   0x4   :  { %s10395_s17 = sld [smem:[%s11822_s0 + %s10300_s14]]   ;;  %s10303_s26 = smov 6  }
   0x5   :  { %s10400_s21 = sld [smem:[%s11822_s0 + %s10301_s18]]   ;;  %s10304_s30 = smov 7  }
   0x6   :  { %s10405_s25 = sld [smem:[%s11822_s0 + %s10302_s22]]   ;;  %s10305_s4 = smov 8  }
   0x7   :  { %11881 = sst [smem:[#allocation47_spill]] %s10380_s5  ;;  %s10306_s10 = smov 9  }
   0x8   :  { %11882 = sst [smem:[#allocation48_spill]] %s10385_s9  ;;  %s10307_s15 = smov 10  }
   0x9   :  { %11883 = sst [smem:[#allocation49_spill]] %s10390_s13  ;;  %s10308_s20 = smov 11  }
   0xa   :  { %11884 = sst [smem:[#allocation50_spill]] %s10395_s17  ;;  %s10310_s1 = smov 13  }
   0xb   :  { %s10410_s29 = sld [smem:[%s11822_s0 + %s10303_s26]]   ;;  %s10309_s26 = smov 12  }
   0xc   :  { %s10415_s3 = sld [smem:[%s11822_s0 + %s10304_s30]]   ;;  %s10311_s7 = smov 14  }
   0xd   :  { %s10420_s8 = sld [smem:[%s11822_s0 + %s10305_s4]]   ;;  %s10313_s22 = smov 16  }
   0xe   :  { %s10425_s14 = sld [smem:[%s11822_s0 + %s10306_s10]]   ;;  %s10314_s28 = smov 17  }
   0xf   :  { %s10430_s19 = sld [smem:[%s11822_s0 + %s10307_s15]]   ;;  %s10312_s15 = smov 15  }
  0x10   :  { %s10435_s24 = sld [smem:[%s11822_s0 + %s10308_s20]]  }
  0x11   :  { %s10440_s30 = sld [smem:[%s11822_s0 + %s10309_s26]]  }
  0x12   :  { %11885 = sst [smem:[#allocation51_spill]] %s10415_s3 }
  0x13   :  { %11886 = sst [smem:[#allocation52_spill]] %s10420_s8 }
  0x14   :  { %11887 = sst [smem:[#allocation53_spill]] %s10425_s14 }
  0x15   :  { %s10445_s6 = sld [smem:[%s11822_s0 + %s10310_s1]]  }
  0x16   :  { %11888 = sst [smem:[#allocation54_spill]] %s10435_s24 }
  0x17   :  { %s10450_s12 = sld [smem:[%s11822_s0 + %s10311_s7]]   ;;  %s10315_s7 = smov 18  }
  0x18   :  { %s10455_s20 = sld [smem:[%s11822_s0 + %s10312_s15]]   ;;  %s10316_s15 = smov 19  }
  0x19   :  { %s10460_s27 = sld [smem:[%s11822_s0 + %s10313_s22]]   ;;  %s10317_s22 = smov 20  }
  0x1a   :  { %s10465_s4 = sld [smem:[%s11822_s0 + %s10314_s28]]   ;;  %s10318_s28 = smov 21  }
  0x1b   :  { %11889 = sst [smem:[#allocation55_spill]] %s10445_s6 }
  0x1c   :  { %s10470_s9 = sld [smem:[%s11822_s0 + %s10315_s7]]   ;;  %s10319_s7 = smov 22  }
  0x1d   :  { %11890 = sst [smem:[#allocation56_spill]] %s10450_s12 }
  0x1e   :  { %s10475_s24 = sld [smem:[%s11822_s0 + %s10316_s15]]   ;;  %s10320_s15 = smov 23  }
  0x1f   :  { %11891 = sst [smem:[#allocation57_spill]] %s10460_s27 }
  0x20   :  { %11892 = sst [smem:[#allocation58_spill]] %s10465_s4 }
  0x21   :  { %s10480_s27 = sld [smem:[%s11822_s0 + %s10317_s22]]   ;;  %s10321_s22 = smov 24  }
  0x22   :  { %11893 = sst [smem:[#allocation59_spill]] %s10470_s9 }
  0x23   :  { %s10485_s4 = sld [smem:[%s11822_s0 + %s10318_s28]]   ;;  %s10322_s28 = smov 25  }
  0x24   :  { %11894 = sst [smem:[#allocation60_spill]] %s10475_s24 }
  0x25   :  { %s10490_s9 = sld [smem:[%s11822_s0 + %s10319_s7]]   ;;  %s10323_s7 = smov 26  }
  0x26   :  { %s10495_s24 = sld [smem:[%s11822_s0 + %s10320_s15]]   ;;  %s10324_s15 = smov 27  }
  0x27   :  { %11895 = sst [smem:[#allocation61_spill]] %s10480_s27 }
  0x28   :  { %s10500_s27 = sld [smem:[%s11822_s0 + %s10321_s22]]   ;;  %s10325_s22 = smov 28  }
  0x29   :  { %11896 = sst [smem:[#allocation62_spill]] %s10485_s4 }
  0x2a   :  { %s10505_s14 = sld [smem:[%s11822_s0 + %s10322_s28]]   ;;  %s10326_s28 = smov 29  }
  0x2b   :  { %11897 = sst [smem:[#allocation63_spill]] %s10490_s9 }
  0x2c   :  { %s10510_s9 = sld [smem:[%s11822_s0 + %s10323_s7]]   ;;  %s10327_s7 = smov 30  }
  0x2d   :  { %s10515_s13 = sld [smem:[%s11822_s0 + %s10324_s15]]   ;;  %s10328_s15 = smov 31  }
  0x2e   :  { %11898 = sst [smem:[#allocation64_spill]] %s10500_s27 }
  0x2f   :  { %s10520_s27 = sld [smem:[%s11822_s0 + %s10325_s22]]   ;;  %s10329_s22 = smov 32  }
  0x30   :  { %11899 = sst [smem:[#allocation65_spill]] %s10505_s14 }
  0x31   :  { %s10525_s5 = sld [smem:[%s11822_s0 + %s10326_s28]]   ;;  %s10330_s28 = smov 33  }
  0x32   :  { %11900 = sst [smem:[#allocation66_spill]] %s10510_s9 }
  0x33   :  { %11901 = sst [smem:[#allocation67_spill]] %s10515_s13 }
  0x34   :  { %s10530_s17 = sld [smem:[%s11822_s0 + %s10327_s7]]   ;;  %s10331_s7 = smov 34  }
  0x35   :  { %11902 = sst [smem:[#allocation68_spill]] %s10520_s27 }
  0x36   :  { %s10535_s13 = sld [smem:[%s11822_s0 + %s10328_s15]]   ;;  %s10332_s15 = smov 35  }
  0x37   :  { %11903 = sst [smem:[#allocation69_spill]] %s10525_s5 }
  0x38   :  { %s10540_s27 = sld [smem:[%s11822_s0 + %s10329_s22]]  }
  0x39   :  { %s10545_s14 = sld [smem:[%s11822_s0 + %s10330_s28]]  }
  0x3a   :  { %11904 = sst [smem:[#allocation70_spill]] %s10530_s17 }
  0x3b   :  { %s10550_s17 = sld [smem:[%s11822_s0 + %s10331_s7]]  }
  0x3c   :  { %11905 = sst [smem:[#allocation71_spill]] %s10535_s13 }
  0x3d   :  { %s10555_s13 = sld [smem:[%s11822_s0 + %s10332_s15]]  }
  0x43   :  { %11906 = sst [smem:[#allocation72_spill]] %s10555_s13 }
  0x44   :  { %76 = vsyncpa [#allocation3], 0 }
  0x45   :  { %77 = vsyncpa [#allocation6], 0 }
  0x46   :  { %78 = vsyncpa [#allocation9], 0 }
  0x47   :  { %79 = vsyncpa [#allocation12], 0 }
  0x48   :  { %80 = vsyncpa [#allocation15], 0 }
  0x49   :  { %81 = vsyncpa [#allocation18], 0 }
  0x4a   :  { %82 = vsyncpa [#allocation21], 0 }
  0x4b   :  { %83 = vsyncpa [#allocation24], 0 }
  0x4c   :  { %84 = vsyncpa [#allocation27], 0 }
  0x4d   :  { %85 = vsyncpa [#allocation30], 0 }
  0x4e   :  { %86 = vsyncpa [#allocation33], 0 }
  0x4f   :  { %87 = vsyncpa [#allocation4], 0 }
  0x50   :  { %89 = vsyncpa [#allocation4 + $0x1], 0  ;;  %s10557_s22 = smov 0   ;;  %s10559_s23 = smov 0  }
  0x51   :  { %s10561_s26 = smov 0   ;;  %s10563_s0 = smov 0  }
  0x52 LB: > { %11907 = sst [smem:[#allocation73_spill]] %s10284_s22  ;;  %s10578_s28 = sadd.s32 4294967295, %s10296_s0   ;;  %s10296_s0 = sphi %s10563_s0, %s11991_s0   ;;  %s10292_s26 = sphi %s10561_s26, %s11993_s26   ;;  %s10288_s23 = sphi %s10559_s23, %s11995_s23   ;;  %s10284_s22 = sphi %s10557_s22, %s11994_s22  }
  0x53   : > { %11908 = sst [smem:[#allocation74_spill]] %s10292_s26  ;;  %s7722_s1 = sadd.s32 4294967294, %s10296_s0  }
  0x54   : > { %11909 = sst [smem:[#allocation75_spill]] %s10296_s0  ;;  %s10582_s2 = sadd.s32 1, %s10296_s0  }
  0x55   : > { %11910 = sst [smem:[#allocation76_spill]] %s10582_s2  ;;  %s852_s7 = sadd.s32 1, %s10292_s26 }
  0x56   : > { %s849_s10 = ssub.s32 %s10296_s0, %s10582_s2  ;;  %p862_p0 = scmp.ne.s32.totalorder %s10292_s26, %s10288_s23 }
  0x57   : > { %p850_p1 = scmp.eq.s32.totalorder %s849_s10, 0  ;;  %p863_p2 = scmp.eq.s32.totalorder %s10578_s28, 1 }
  0x58   : > { %p868_p3 = scmp.ne.s32.totalorder %s10288_s23, %s10284_s22  ;;  %p869_p4 = scmp.eq.s32.totalorder %s7722_s1, 1 }
  0x59   : > { %s10593_s11 = scalar_select %p850_p1, %s10292_s26, %s852_s7  }
  0x5a   : > { %p10595_p5 = por %p863_p2, %p862_p0  ;;  %p10599_p6 = por %p869_p4, %p868_p3 }
  0x5b   : > { %11911 = sst [smem:[#allocation77_spill]] %s10593_s11  ;;  %p7723_p7 = scmp.ge.s32.totalorder %s10296_s0, 1 }
  0x5c   : > { %s11912_s15 = scalar_select %p10595_p5, 1, 0 }
  0x5d   : > { %s11914_s16 = scalar_select %p10599_p6, 1, 0 }
  0x5e   : > { %11913 = sst [smem:[#allocation78_spill]] %s11912_s15  ;;  %p876_p8 = scmp.lt.s32.totalorder %s10296_s0, 3 }
  0x5f   : > { %11915 = sst [smem:[#allocation79_spill]] %s11914_s16  ;;  %p11844_p9 = scmp.eq.s32.totalorder %s10578_s28, 0 }
  0x60   : > { %p10606_p10 = pnand %p7723_p7, %p876_p8  ;;  %s10333_s10 = smov [#allocation5]  }
  0x61   : > { %s904_s1 = sshll.u32 %s10333_s10, 4  ;;  %s10334_s11 = smov [#allocation8]   ;;  %s905_s1 = int_to_ptr.vmem [resolvable:$true] %s904_s1 }
  0x62   : > { %p9217_p11 = pneg %p10606_p10  ;;  %s930_s26 = sshll.u32 %s10334_s11, 4  ;;  %s931_s26 = int_to_ptr.vmem [resolvable:$true] %s930_s26 }
  0x63   : > { %s9683_s16 = scalar_lea.vmem %s905_s1, 512  ;;  %p9691_p3 = scmp.lt.s32.totalorder %s905_s1, %s905_s1 }
  0x64   : > { %p10614_p12 = pnand %p11844_p9, %p9217_p11  ;;  %p9684_p0 = scmp.ne.s32.totalorder %s905_s1, %s9683_s16 }
  0x65   : > { %p9692_p4 = scmp.lt.s32.totalorder %s9683_s16, %s9683_s16 }
  0x66   : > { %p10620_p13 = pneg %p10614_p12 }
  0x67   : > { %p9693_p7 = por %p9692_p4, %p9691_p3 }
  0x68   : > { %p9686_p1 = pnand %p9684_p0, %p10620_p13 }
  0x6a   : > { %p9687_p2 = pneg %p9686_p1 }
  0x6c   : > { %p9694_p8 = pnand %p9693_p7, %p9687_p2 }
  0x6e   : > { %9697 = shalt.err (!%p9694_p8)
}
  0x6f   : > { %s11845_s10 = smov 64   ;;  %s11847_s11 = smov 4  }
  0x70   : > { %9223 = dma.hbm_to_vmem [thread:$0]  (!%p10614_p12), %s10405_s25, 512, %s905_s1, [#allocation6], %s11845_s10, %s11845_s10, %s11847_s11  }
  0x71   : > { %s10337_s22 = smov [#allocation11]   ;;  %s9709_s15 = scalar_lea.vmem %s931_s26, 32 }
  0x72   : > { %s959_s0 = sshll.u32 %s10337_s22, 4  ;;  %p9710_p11 = scmp.ne.s32.totalorder %s931_s26, %s9709_s15  ;;  %s960_s0 = int_to_ptr.vmem [resolvable:$true] %s959_s0 }
  0x73   : > { %p9717_p2 = scmp.lt.s32.totalorder %s931_s26, %s931_s26  ;;  %p9718_p3 = scmp.lt.s32.totalorder %s9709_s15, %s9709_s15 }
  0x74   : > { %p9712_p0 = pnand %p9710_p11, %p10620_p13 }
  0x75   : > { %p9719_p4 = por %p9718_p3, %p9717_p2 }
  0x76   : > { %p9713_p1 = pneg %p9712_p0 }
  0x78   : > { %p9720_p7 = pnand %p9719_p4, %p9713_p1 }
  0x7a   : > { %9723 = shalt.err (!%p9720_p7)
}
  0x7b   : > { %s11850_s16 = smov 16   ;;  %s11919_s3 = sld [smem:[#allocation51_spill]] }
  0x7c   : > { %s11852_s13 = smov 1   ;;  %s9735_s22 = scalar_lea.vmem %s960_s0, 32 }
  0x7d   : > { %p9736_p8 = scmp.ne.s32.totalorder %s960_s0, %s9735_s22  ;;  %p9743_p9 = scmp.lt.s32.totalorder %s960_s0, %s960_s0 }
  0x7e   : > { %p9744_p2 = scmp.lt.s32.totalorder %s9735_s22, %s9735_s22 }
  0x7f   : > { %p9738_p11 = pnand %p9736_p8, %p10620_p13 }
  0x80   : > { %p9745_p1 = por %p9744_p2, %p9743_p9 }
  0x81   : > { %9229 = dma.hbm_to_vmem [thread:$0]  (!%p10614_p12), %s11919_s3, 32, %s931_s26, [#allocation9], %s11850_s16, %s11850_s16, %s11852_s13  }
  0x82   : > { %p9739_p0 = pneg %p9738_p11 }
  0x84   : > { %p9746_p3 = pnand %p9745_p1, %p9739_p0 }
  0x86   : > { %9749 = shalt.err (!%p9746_p3)
}
  0x87   : > { %9235 = dma.hbm_to_vmem [thread:$0]  (!%p10614_p12), %s10430_s19, 32, %s960_s0, [#allocation12], %s11850_s16, %s11850_s16, %s11852_s13  }
  0x88   : > { %s10340_s26 = smov [#allocation14]   ;;  %s10341_s1 = smov [#allocation17]  }
  0x89   : > { %s988_s15 = sshll.u32 %s10340_s26, 4  ;;  %s1014_s10 = sshll.u32 %s10341_s1, 4  ;;  %s989_s15 = int_to_ptr.vmem [resolvable:$true] %s988_s15  ;;  %s1015_s10 = int_to_ptr.vmem [resolvable:$true] %s1014_s10 }
  0x8a   : > { %s9761_s11 = scalar_lea.vmem %s989_s15, 32  ;;  %p9769_p8 = scmp.lt.s32.totalorder %s989_s15, %s989_s15 }
  0x8b   : > { %p9762_p4 = scmp.ne.s32.totalorder %s989_s15, %s9761_s11  ;;  %p9770_p11 = scmp.lt.s32.totalorder %s9761_s11, %s9761_s11 }
  0x8d   : > { %p9764_p7 = pnand %p9762_p4, %p10620_p13  ;;  %p9771_p0 = por %p9770_p11, %p9769_p8 }
  0x8f   : > { %p9765_p9 = pneg %p9764_p7 }
  0x91   : > { %p9772_p2 = pnand %p9771_p0, %p9765_p9 }
  0x93   : > { %9775 = shalt.err (!%p9772_p2)
}
  0x94   : > { %s11920_s6 = sld [smem:[#allocation55_spill]]  ;;  %s9787_s0 = scalar_lea.vmem %s1015_s10, 2048 }
  0x95   : > { %p9788_p1 = scmp.ne.s32.totalorder %s1015_s10, %s9787_s0  ;;  %p9795_p7 = scmp.lt.s32.totalorder %s1015_s10, %s1015_s10 }
  0x96   : > { %p9796_p6 = scmp.lt.s32.totalorder %s9787_s0, %s9787_s0 }
  0x97   : > { %p9790_p3 = pnand %p9788_p1, %p10620_p13 }
  0x98   : > { %p9797_p5 = por %p9796_p6, %p9795_p7 }
  0x99   : > { %p9791_p4 = pneg %p9790_p3 }
  0x9a   : > { %9241 = dma.hbm_to_vmem [thread:$0]  (!%p10614_p12), %s11920_s6, 32, %s989_s15, [#allocation15], %s11850_s16, %s11850_s16, %s11852_s13  }
  0x9b   : > { %p9798_p8 = pnand %p9797_p5, %p9791_p4 }
  0x9d   : > { %9801 = shalt.err (!%p9798_p8)
}
  0x9e   : > { %s11921_s11 = smov 4   ;;  %s11922_s22 = smov 64  }
  0x9f   : > { %9247 = dma.hbm_to_vmem [thread:$0]  (!%p10614_p12), %s10455_s20, 2048, %s1015_s10, [#allocation18], %s11922_s22, %s11922_s22, %s11921_s11  }
  0xa0   : > { %s10342_s26 = smov [#allocation20]   ;;  %s10343_s1 = smov [#allocation23]  }
  0xa1   : > { %s1058_s15 = sshll.u32 %s10342_s26, 4  ;;  %s1087_s16 = sshll.u32 %s10343_s1, 4  ;;  %s1059_s15 = int_to_ptr.vmem [resolvable:$true] %s1058_s15  ;;  %s1088_s16 = int_to_ptr.vmem [resolvable:$true] %s1087_s16 }
  0xa2   : > { %s9813_s13 = scalar_lea.vmem %s1059_s15, 512  ;;  %p9821_p5 = scmp.lt.s32.totalorder %s1059_s15, %s1059_s15 }
  0xa3   : > { %p9814_p9 = scmp.ne.s32.totalorder %s1059_s15, %s9813_s13  ;;  %p9822_p0 = scmp.lt.s32.totalorder %s9813_s13, %s9813_s13 }
  0xa5   : > { %p9816_p11 = pnand %p9814_p9, %p10620_p13  ;;  %p9823_p2 = por %p9822_p0, %p9821_p5 }
  0xa7   : > { %p9817_p6 = pneg %p9816_p11 }
  0xa9   : > { %p9824_p1 = pnand %p9823_p2, %p9817_p6 }
  0xab   : > { %9827 = shalt.err (!%p9824_p1)
}
  0xac   : > { %9253 = dma.hbm_to_vmem [thread:$0]  (!%p10614_p12), %s10495_s24, 512, %s1059_s15, [#allocation21], %s11922_s22, %s11922_s22, %s11921_s11  }
  0xad   : > { %s9839_s10 = scalar_lea.vmem %s1088_s16, 32  ;;  %p9847_p8 = scmp.lt.s32.totalorder %s1088_s16, %s1088_s16 }
  0xae   : > { %p9840_p3 = scmp.ne.s32.totalorder %s1088_s16, %s9839_s10  ;;  %p9848_p9 = scmp.lt.s32.totalorder %s9839_s10, %s9839_s10 }
  0xb0   : > { %p9842_p4 = pnand %p9840_p3, %p10620_p13  ;;  %p9849_p11 = por %p9848_p9, %p9847_p8 }
  0xb2   : > { %p9843_p7 = pneg %p9842_p4 }
  0xb4   : > { %p9850_p5 = pnand %p9849_p11, %p9843_p7 }
  0xb6   : > { %9853 = shalt.err (!%p9850_p5)
}
  0xb7   : > { %s11923_s13 = smov 1   ;;  %s11924_s0 = smov 16  }
  0xb8   : > { %s11925_s9 = sld [smem:[#allocation66_spill]]  ;;  %s10344_s26 = smov [#allocation26]  }
  0xb9   : > { %s1116_s15 = sshll.u32 %s10344_s26, 4  ;;  %s10345_s1 = smov [#allocation29]   ;;  %s1117_s15 = int_to_ptr.vmem [resolvable:$true] %s1116_s15 }
  0xba   : > { %s1145_s3 = sshll.u32 %s10345_s1, 4  ;;  %s9865_s6 = scalar_lea.vmem %s1117_s15, 2048  ;;  %s1146_s3 = int_to_ptr.vmem [resolvable:$true] %s1145_s3 }
  0xbb   : > { %p9866_p6 = scmp.ne.s32.totalorder %s1117_s15, %s9865_s6  ;;  %p9873_p1 = scmp.lt.s32.totalorder %s1117_s15, %s1117_s15 }
  0xbc   : > { %p9874_p3 = scmp.lt.s32.totalorder %s9865_s6, %s9865_s6 }
  0xbd   : > { %p9868_p0 = pnand %p9866_p6, %p10620_p13 }
  0xbe   : > { %9259 = dma.hbm_to_vmem [thread:$0]  (!%p10614_p12), %s11925_s9, 32, %s1088_s16, [#allocation24], %s11924_s0, %s11924_s0, %s11923_s13  }
  0xbf   : > { %p9869_p2 = pneg %p9868_p0  ;;  %p9875_p4 = por %p9874_p3, %p9873_p1 }
  0xc1   : > { %p9876_p7 = pnand %p9875_p4, %p9869_p2 }
  0xc3   : > { %9879 = shalt.err (!%p9876_p7)
}
  0xc4   : > { %s11926_s5 = sld [smem:[#allocation69_spill]]  ;;  %s9891_s16 = scalar_lea.vmem %s1146_s3, 32 }
  0xc5   : > { %p9892_p8 = scmp.ne.s32.totalorder %s1146_s3, %s9891_s16  ;;  %p9899_p5 = scmp.lt.s32.totalorder %s1146_s3, %s1146_s3 }
  0xc6   : > { %p9900_p6 = scmp.lt.s32.totalorder %s9891_s16, %s9891_s16 }
  0xc7   : > { %p9894_p9 = pnand %p9892_p8, %p10620_p13 }
  0xc8   : > { %p9901_p0 = por %p9900_p6, %p9899_p5 }
  0xc9   : > { %p9895_p11 = pneg %p9894_p9 }
  0xca   : > { %9265 = dma.hbm_to_vmem [thread:$0]  (!%p10614_p12), %s11926_s5, 2048, %s1117_s15, [#allocation27], %s11922_s22, %s11922_s22, %s11921_s11  }
  0xcb   : > { %p9902_p1 = pnand %p9901_p0, %p9895_p11 }
  0xcd   : > { %9905 = shalt.err (!%p9902_p1)
}
  0xce   : > { %9271 = dma.hbm_to_vmem [thread:$0]  (!%p10614_p12), %s10540_s27, 32, %s1146_s3, [#allocation30], %s11924_s0, %s11924_s0, %s11923_s13  }
  0xcf   : > { %s10346_s6 = smov [#allocation2]   ;;  %s10347_s26 = smov [#allocation7]  }
  0xd0   : > { %s891_s10 = sshll.u32 %s10346_s6, 4  ;;  %s917_s15 = sshll.u32 %s10347_s26, 4  ;;  %s892_s10 = int_to_ptr.vmem [resolvable:$true] %s891_s10  ;;  %s918_s15 = int_to_ptr.vmem [resolvable:$true] %s917_s15 }
  0xd1   : > { %s9917_s1 = scalar_lea.vmem %s892_s10, 32  ;;  %p9925_p7 = scmp.lt.s32.totalorder %s892_s10, %s892_s10 }
  0xd2   : > { %p9918_p2 = scmp.ne.s32.totalorder %s892_s10, %s9917_s1  ;;  %p9926_p8 = scmp.lt.s32.totalorder %s9917_s1, %s9917_s1 }
  0xd4   : > { %p9920_p3 = pnand %p9918_p2, %p10620_p13  ;;  %p9927_p9 = por %p9926_p8, %p9925_p7 }
  0xd6   : > { %p9921_p4 = pneg %p9920_p3 }
  0xd8   : > { %p9928_p11 = pnand %p9927_p9, %p9921_p4 }
  0xda   : > { %9931 = shalt.err (!%p9928_p11)
}
  0xdb   : > { %9220 = dma.hbm_to_vmem [thread:$0]  (!%p10614_p12), %s10400_s21, 32, %s892_s10, [#allocation3], %s11924_s0, %s11924_s0, %s11923_s13  }
  0xdc   : > { %s9943_s3 = scalar_lea.vmem %s918_s15, 32  ;;  %p9951_p1 = scmp.lt.s32.totalorder %s918_s15, %s918_s15 }
  0xdd   : > { %p9944_p5 = scmp.ne.s32.totalorder %s918_s15, %s9943_s3  ;;  %p9952_p2 = scmp.lt.s32.totalorder %s9943_s3, %s9943_s3 }
  0xdf   : > { %p9946_p6 = pnand %p9944_p5, %p10620_p13  ;;  %p9953_p3 = por %p9952_p2, %p9951_p1 }
  0xe1   : > { %p9947_p0 = pneg %p9946_p6 }
  0xe3   : > { %p9954_p7 = pnand %p9953_p3, %p9947_p0 }
  0xe5   : > { %9957 = shalt.err (!%p9954_p7)
}
  0xe6   : > { %9226 = dma.hbm_to_vmem [thread:$0]  (!%p10614_p12), %s10410_s29, 32, %s918_s15, [#allocation6], %s11924_s0, %s11924_s0, %s11923_s13  }
  0xe7   : > { %s10348_s16 = smov [#allocation10]   ;;  %s10349_s10 = smov [#allocation13]  }
  0xe8   : > { %s943_s6 = sshll.u32 %s10348_s16, 4  ;;  %s975_s26 = sshll.u32 %s10349_s10, 4  ;;  %s944_s6 = int_to_ptr.vmem [resolvable:$true] %s943_s6  ;;  %s976_s26 = int_to_ptr.vmem [resolvable:$true] %s975_s26 }
  0xe9   : > { %s9969_s1 = scalar_lea.vmem %s944_s6, 32  ;;  %p9977_p11 = scmp.lt.s32.totalorder %s944_s6, %s944_s6 }
  0xea   : > { %p9970_p4 = scmp.ne.s32.totalorder %s944_s6, %s9969_s1  ;;  %p9978_p5 = scmp.lt.s32.totalorder %s9969_s1, %s9969_s1 }
  0xec   : > { %p9972_p8 = pnand %p9970_p4, %p10620_p13  ;;  %p9979_p6 = por %p9978_p5, %p9977_p11 }
  0xee   : > { %p9973_p9 = pneg %p9972_p8 }
  0xf0   : > { %p9980_p0 = pnand %p9979_p6, %p9973_p9 }
  0xf2   : > { %9983 = shalt.err (!%p9980_p0)
}
  0xf3   : > { %s11927_s8 = sld [smem:[#allocation52_spill]]  ;;  %s9995_s15 = scalar_lea.vmem %s976_s26, 32 }
  0xf4   : > { %p9996_p1 = scmp.ne.s32.totalorder %s976_s26, %s9995_s15  ;;  %p10003_p7 = scmp.lt.s32.totalorder %s976_s26, %s976_s26 }
  0xf5   : > { %p10004_p4 = scmp.lt.s32.totalorder %s9995_s15, %s9995_s15 }
  0xf6   : > { %p9998_p2 = pnand %p9996_p1, %p10620_p13 }
  0xf7   : > { %p10005_p8 = por %p10004_p4, %p10003_p7 }
  0xf8   : > { %p9999_p3 = pneg %p9998_p2 }
  0xf9   : > { %9232 = dma.hbm_to_vmem [thread:$0]  (!%p10614_p12), %s11927_s8, 32, %s944_s6, [#allocation9], %s11924_s0, %s11924_s0, %s11923_s13  }
  0xfa   : > { %p10006_p11 = pnand %p10005_p8, %p9999_p3 }
  0xfc   : > { %10009 = shalt.err (!%p10006_p11)
}
  0xfd   : > { %9238 = dma.hbm_to_vmem [thread:$0]  (!%p10614_p12), %s10440_s30, 32, %s976_s26, [#allocation12], %s11924_s0, %s11924_s0, %s11923_s13  }
  0xfe   : > { %s10350_s3 = smov [#allocation16]   ;;  %s10351_s6 = smov [#allocation19]  }
  0xff   : > { %s1001_s16 = sshll.u32 %s10350_s3, 4  ;;  %s1042_s10 = sshll.u32 %s10351_s6, 4  ;;  %s1002_s16 = int_to_ptr.vmem [resolvable:$true] %s1001_s16  ;;  %s1043_s10 = int_to_ptr.vmem [resolvable:$true] %s1042_s10 }
 0x100   : > { %s10021_s1 = scalar_lea.vmem %s1002_s16, 32  ;;  %p10029_p0 = scmp.lt.s32.totalorder %s1002_s16, %s1002_s16 }
 0x101   : > { %p10022_p9 = scmp.ne.s32.totalorder %s1002_s16, %s10021_s1  ;;  %p10030_p1 = scmp.lt.s32.totalorder %s10021_s1, %s10021_s1 }
 0x103   : > { %p10024_p5 = pnand %p10022_p9, %p10620_p13  ;;  %p10031_p2 = por %p10030_p1, %p10029_p0 }
 0x105   : > { %p10025_p6 = pneg %p10024_p5 }
 0x107   : > { %p10032_p3 = pnand %p10031_p2, %p10025_p6 }
 0x109   : > { %10035 = shalt.err (!%p10032_p3)
}
 0x10a   : > { %s11928_s12 = sld [smem:[#allocation56_spill]]  ;;  %s10047_s26 = scalar_lea.vmem %s1043_s10, 2048 }
 0x10b   : > { %p10048_p7 = scmp.ne.s32.totalorder %s1043_s10, %s10047_s26  ;;  %p10055_p11 = scmp.lt.s32.totalorder %s1043_s10, %s1043_s10 }
 0x10c   : > { %p10056_p9 = scmp.lt.s32.totalorder %s10047_s26, %s10047_s26 }
 0x10d   : > { %p10050_p4 = pnand %p10048_p7, %p10620_p13 }
 0x10e   : > { %p10057_p5 = por %p10056_p9, %p10055_p11 }
 0x10f   : > { %p10051_p8 = pneg %p10050_p4 }
 0x110   : > { %9244 = dma.hbm_to_vmem [thread:$0]  (!%p10614_p12), %s11928_s12, 32, %s1002_s16, [#allocation15], %s11924_s0, %s11924_s0, %s11923_s13  }
 0x111   : > { %p10058_p0 = pnand %p10057_p5, %p10051_p8 }
 0x113   : > { %10061 = shalt.err (!%p10058_p0)
}
 0x114   : > { %s11929_s4 = sld [smem:[#allocation62_spill]]  ;;  %s10352_s15 = smov [#allocation22]  }
 0x115   : > { %s1074_s3 = sshll.u32 %s10352_s15, 4  ;;  %s10353_s16 = smov [#allocation25]   ;;  %s1075_s3 = int_to_ptr.vmem [resolvable:$true] %s1074_s3 }
 0x116   : > { %s1100_s6 = sshll.u32 %s10353_s16, 4  ;;  %s10073_s1 = scalar_lea.vmem %s1075_s3, 32  ;;  %s1101_s6 = int_to_ptr.vmem [resolvable:$true] %s1100_s6 }
 0x117   : > { %p10074_p6 = scmp.ne.s32.totalorder %s1075_s3, %s10073_s1  ;;  %p10081_p3 = scmp.lt.s32.totalorder %s1075_s3, %s1075_s3 }
 0x118   : > { %p10082_p7 = scmp.lt.s32.totalorder %s10073_s1, %s10073_s1 }
 0x119   : > { %p10076_p1 = pnand %p10074_p6, %p10620_p13 }
 0x11a   : > { %9250 = dma.hbm_to_vmem [thread:$0]  (!%p10614_p12), %s11929_s4, 2048, %s1043_s10, [#allocation18], %s11922_s22, %s11922_s22, %s11921_s11  }
 0x11b   : > { %p10077_p2 = pneg %p10076_p1  ;;  %p10083_p4 = por %p10082_p7, %p10081_p3 }
 0x11d   : > { %p10084_p8 = pnand %p10083_p4, %p10077_p2 }
 0x11f   : > { %10087 = shalt.err (!%p10084_p8)
}
 0x120   : > { %s11930_s10 = sld [smem:[#allocation65_spill]]  ;;  %s10099_s26 = scalar_lea.vmem %s1101_s6, 2048 }
 0x121   : > { %p10100_p11 = scmp.ne.s32.totalorder %s1101_s6, %s10099_s26  ;;  %p10107_p0 = scmp.lt.s32.totalorder %s1101_s6, %s1101_s6 }
 0x122   : > { %p10108_p6 = scmp.lt.s32.totalorder %s10099_s26, %s10099_s26 }
 0x123   : > { %p10102_p9 = pnand %p10100_p11, %p10620_p13 }
 0x124   : > { %p10109_p1 = por %p10108_p6, %p10107_p0 }
 0x125   : > { %p10103_p5 = pneg %p10102_p9 }
 0x126   : > { %9256 = dma.hbm_to_vmem [thread:$0]  (!%p10614_p12), %s11930_s10, 32, %s1075_s3, [#allocation21], %s11924_s0, %s11924_s0, %s11923_s13  }
 0x127   : > { %p10110_p3 = pnand %p10109_p1, %p10103_p5 }
 0x129   : > { %10113 = shalt.err (!%p10110_p3)
}
 0x12a   : > { %s11931_s15 = sld [smem:[#allocation67_spill]]  ;;  %s10354_s3 = smov [#allocation28]  }
 0x12b   : > { %s1132_s16 = sshll.u32 %s10354_s3, 4  ;;  %s10355_s1 = smov [#allocation31]   ;;  %s1133_s16 = int_to_ptr.vmem [resolvable:$true] %s1132_s16 }
 0x12c   : > { %s1158_s10 = sshll.u32 %s10355_s1, 4  ;;  %s10125_s4 = scalar_lea.vmem %s1133_s16, 32  ;;  %s1159_s10 = int_to_ptr.vmem [resolvable:$true] %s1158_s10 }
 0x12d   : > { %p10126_p2 = scmp.ne.s32.totalorder %s1133_s16, %s10125_s4  ;;  %p10133_p8 = scmp.lt.s32.totalorder %s1133_s16, %s1133_s16 }
 0x12e   : > { %p10134_p11 = scmp.lt.s32.totalorder %s10125_s4, %s10125_s4 }
 0x12f   : > { %p10128_p7 = pnand %p10126_p2, %p10620_p13 }
 0x130   : > { %9262 = dma.hbm_to_vmem [thread:$0]  (!%p10614_p12), %s11931_s15, 2048, %s1101_s6, [#allocation24], %s11922_s22, %s11922_s22, %s11921_s11  }
 0x131   : > { %p10129_p4 = pneg %p10128_p7  ;;  %p10135_p9 = por %p10134_p11, %p10133_p8 }
 0x133   : > { %p10136_p5 = pnand %p10135_p9, %p10129_p4 }
 0x135   : > { %10139 = shalt.err (!%p10136_p5)
}
 0x136   : > { %s11932_s6 = sld [smem:[#allocation71_spill]]  ;;  %s10151_s26 = scalar_lea.vmem %s1159_s10, 1024 }
 0x137   : > { %p10152_p0 = scmp.ne.s32.totalorder %s1159_s10, %s10151_s26  ;;  %p10159_p3 = scmp.lt.s32.totalorder %s1159_s10, %s1159_s10 }
 0x138   : > { %p10160_p2 = scmp.lt.s32.totalorder %s10151_s26, %s10151_s26 }
 0x139   : > { %p10154_p6 = pnand %p10152_p0, %p10620_p13 }
 0x13a   : > { %p10161_p7 = por %p10160_p2, %p10159_p3 }
 0x13b   : > { %p10155_p1 = pneg %p10154_p6 }
 0x13c   : > { %9268 = dma.hbm_to_vmem [thread:$0]  (!%p10614_p12), %s11932_s6, 32, %s1133_s16, [#allocation27], %s11924_s0, %s11924_s0, %s11923_s13  }
 0x13d   : > { %p10162_p8 = pnand %p10161_p7, %p10155_p1 }
 0x13f   : > { %10165 = shalt.err (!%p10162_p8)
}
 0x140   : > { %9274 = dma.hbm_to_vmem [thread:$0]  (!%p10614_p12), %s10545_s14, 1024, %s1159_s10, [#allocation30], %s11922_s22, %s11922_s22, %s11921_s11  }
 0x141   : > { %s10356_s4 = smov [#allocation32]  }
 0x142   : > { %s1172_s13 = sshll.u32 %s10356_s4, 4  ;;  %s1173_s13 = int_to_ptr.vmem [resolvable:$true] %s1172_s13 }
 0x143   : > { %s10177_s0 = scalar_lea.vmem %s1173_s13, 16  ;;  %s10184_s15 = scalar_lea.vmem %s1173_s13, 32 }
 0x144   : > { %p10178_p4 = scmp.ne.s32.totalorder %s1173_s13, %s10177_s0  ;;  %p10185_p5 = scmp.lt.s32.totalorder %s1173_s13, %s1173_s13 }
 0x145   : > { %p10186_p0 = scmp.lt.s32.totalorder %s10184_s15, %s10177_s0 }
 0x146   : > { %p10180_p11 = pnand %p10178_p4, %p10620_p13 }
 0x147   : > { %p10187_p6 = por %p10186_p0, %p10185_p5 }
 0x148   : > { %p10181_p9 = pneg %p10180_p11 }
 0x14a   : > { %p10188_p1 = pnand %p10187_p6, %p10181_p9 }
 0x14c   : > { %10191 = shalt.err (!%p10188_p1)
}
 0x14d   : > { %9277 = dma.hbm_to_vmem [thread:$0]  (!%p10614_p12), %s10550_s17, 16, %s1173_s13, [#allocation33]  }
 0x14e   : > { %1205 = sbr.rel (%p10606_p10) target bundleno = 21461 (0x53d5), region = 160  ;;  %p11933_p3 = scmp.eq.s32.totalorder (!%p10606_p10), %s10578_s28, 0 }
 0x153   : > { %10235 = dma.done.wait (%p11933_p3), [#allocation3], 32   ;;  %p11934_p2 = pmov %p11933_p3 }
 0x155   : > { %10237 = vsyncadd (%p11934_p2), [#allocation3], 4294967264  ;;  %p11935_p13 = pmov %p11934_p2 }
 0x156   : > { %p11936_p7 = pmov %p11934_p2 }
 0x157   : > { %10239 = dma.done.wait (%p11935_p13), [#allocation6], 544  }
 0x158   : > { %10241 = vsyncadd (%p11936_p7), [#allocation6], 4294966752  ;;  %p11937_p8 = pmov %p11934_p2 }
 0x159   : > { %p11938_p12 = pmov %p11934_p2 }
 0x15a   : > { %10243 = dma.done.wait (%p11937_p8), [#allocation9], 64  }
 0x15b   : > { %10245 = vsyncadd (%p11938_p12), [#allocation9], 4294967232  ;;  %p11939_p10 = pmov %p11934_p2 }
 0x15c   : > { %p11940_p4 = pmov %p11934_p2 }
 0x15d   : > { %10247 = dma.done.wait (%p11939_p10), [#allocation12], 64  }
 0x15e   : > { %10249 = vsyncadd (%p11940_p4), [#allocation12], 4294967232  ;;  %p11941_p11 = pmov %p11934_p2 }
 0x15f   : > { %p11942_p9 = pmov %p11934_p2 }
 0x160   : > { %10251 = dma.done.wait (%p11941_p11), [#allocation15], 64  }
 0x161   : > { %10253 = vsyncadd (%p11942_p9), [#allocation15], 4294967232  ;;  %p11943_p5 = pmov %p11934_p2 }
 0x162   : > { %p11944_p0 = pmov %p11934_p2 }
 0x163   : > { %10255 = dma.done.wait (%p11943_p5), [#allocation18], 4096  }
 0x164   : > { %10257 = vsyncadd (%p11944_p0), [#allocation18], 4294963200  ;;  %p11945_p6 = pmov %p11944_p0 }
 0x165   : > { %p11946_p1 = pmov %p11944_p0 }
 0x166   : > { %10259 = dma.done.wait (%p11945_p6), [#allocation21], 544  }
 0x167   : > { %10261 = vsyncadd (%p11946_p1), [#allocation21], 4294966752  ;;  %p11947_p3 = pmov %p11944_p0 }
 0x168   : > { %p11948_p2 = pmov %p11944_p0 }
 0x169   : > { %10263 = dma.done.wait (%p11947_p3), [#allocation24], 2080  }
 0x16a   : > { %10265 = vsyncadd (%p11948_p2), [#allocation24], 4294965216  ;;  %p11949_p13 = pmov %p11944_p0 }
 0x16b   : > { %p11950_p7 = pmov %p11944_p0 }
 0x16c   : > { %10267 = dma.done.wait (%p11949_p13), [#allocation27], 2080  }
 0x16d   : > { %10269 = vsyncadd (%p11950_p7), [#allocation27], 4294965216  ;;  %p11951_p8 = pmov %p11944_p0 }
 0x16e   : > { %p11952_p12 = pmov %p11944_p0 }
 0x16f   : > { %10271 = dma.done.wait (%p11951_p8), [#allocation30], 1056  }
 0x170   : > { %10273 = vsyncadd (%p11952_p12), [#allocation30], 4294966240  ;;  %p11953_p10 = pmov %p11944_p0 }
 0x171   : > { %p11954_p4 = pmov %p11944_p0 }
 0x172   : > { %10275 = dma.done.wait (%p11953_p10), [#allocation33], 16  }
 0x173   : > { %10277 = vsyncadd (%p11954_p4), [#allocation33], 4294967280  ;;  %s11955_s2 = sld [smem:[#allocation50_spill]]  ;;  %v10357_v0 = vmov 0.0   ;;  %vm10358_vm0 = vmmov 0   ;;  %p1375_p11 = scmp.lt.s32.totalorder %s10578_s28, 1  ;;  %v1561_v22 = vlaneseq }
 0x174   : > { %8363 = vmatprep.subr.bf16.mxu0 %v10357_v0  ;;  %8379 = vmatprep.mubr.msk.bf16.mxu0 %vm10358_vm0, %v10357_v0  ;;  %s11956_s18 = sld [smem:[#allocation47_spill]]  ;;  %v7769_v11 = vld [vmem:[#allocation2] ss:$0 sm:$0xff]  ;;  %s11869_s3 = smov 64   ;;  %vm1511_vm1 = vcmask 64512   ;;  %vm1584_vm2 = vcmask 1043456  }
 0x175   : > { %8383 = vmatprep.subr.bf16.mxu1 %v10357_v0  ;;  %8385 = vmatprep.mubr.msk.bf16.mxu1 %vm10358_vm0, %v10357_v0  ;;  %s10840_s7 = scalar_select %p1375_p11, %s10578_s28, 1  ;;  %v1562_v24 = vshrl.u32 %v1561_v22, 7  ;;  %v10361_v26 = vmov 0  }
 0x176   : > { %s11957_s16 = sld [smem:[#allocation49_spill]]  ;;  %s11873_s1 = smov 96  }
 0x177   : > { %s11854_s11 = sshll.u32 %s10840_s7, 3  ;;  %v1563_v25 = vsub.s32 0, %v1562_v24  ;;  %s11875_s6 = smov 88  }
 0x178   : > { %s11871_s26 = smov 120   ;;  %s11863_s4 = smov 56  }
 0x179   : > { %v9428_v1 = vld [vmem:[%s11955_s2 + $0x38] sm:$0xff]   ;;  %v9429_v2 = vld [vmem:[%s11955_s2 + $0x30] sm:$0xff]   ;;  %v9430_v3 = vld [vmem:[%s11955_s2 + $0x28] sm:$0xff]   ;;  %s11867_s13 = smov 80   ;;  %s11865_s0 = smov 112  }
 0x17a   : > { %8364 = vmatpush3.bf16.msra.mxu0 %v9428_v1  ;;  %v9431_v4 = vld [vmem:[%s11955_s2 + $0x20] sm:$0xff]   ;;  %v9432_v5 = vld [vmem:[%s11955_s2 + $0x18] sm:$0xff]   ;;  %v9433_v6 = vld [vmem:[%s11955_s2 + $0x10] sm:$0xff]   ;;  %s1378_s22 = scalar_lea.vmem %s11956_s18, %s11854_s11  ;;  %s11861_s15 = smov 48  }
 0x17b   : > { %8365 = vmatprep.subr.bf16.mxu0 %v10357_v0  ;;  %v9434_v7 = vld [vmem:[%s11955_s2 + $0x8] sm:$0xff]   ;;  %v9435_v8 = vld [vmem:[%s11955_s2] sm:$0xff]   ;;  %s11859_s18 = smov 72   ;;  %s11959_s11 = sld [smem:[#allocation54_spill]] }
 0x17c   : > { %v10855_v9 = vld [vmem:[%s1378_s22] sm:$0xff]  ;;  %s1385_s10 = scalar_lea.vmem %s11957_s16, %s10840_s7  ;;  %s11857_s22 = smov 104  }
 0x17d   : > { %v1412_v10 = vpack.c.bf16 %v10855_v9, %v10855_v9  ;;  %v1389_v23 = vld [vmem:[%s1385_s10] sm:$0x1]  ;;  %s11855_s16 = smov 40   ;;  %s11958_s10 = sld [smem:[#allocation53_spill]] }
 0x17e   : > { %8366 = vmatpush3.bf16.msra.mxu0 %v9429_v2  ;;  %vm1559_vm3 = vcmp.eq.f32.partialorder %v1389_v23, 0.0  ;;  %s11977_s5 = smov 112   ;;  %s11978_s8 = smov 56  }
 0x17f   : > { %8367 = vmatprep.subr.bf16.mxu0 %v10357_v0  ;;  %v1560_v27 = vsel %vm1559_vm3, 1, %v10361_v26  ;;  %s11979_s9 = smov 48   ;;  %s11982_s12 = sld [smem:[#allocation70_spill]] }
 0x180   : > { %v10880_v28 = vrot.slane %v1560_v27, %v1563_v25 }
 0x182   : > { %8368 = vmatpush3.bf16.msra.mxu0 %v9430_v3  ;;  %vm1565_vm4 = vcmp.eq.s32.totalorder %v10880_v28, 1 }
 0x183   : > { %8369 = vmatprep.subr.bf16.mxu0 %v10357_v0 }
 0x186   : > { %8370 = vmatpush3.bf16.msra.mxu0 %v9431_v4 }
 0x187   : > { %8371 = vmatprep.subr.bf16.mxu0 %v10357_v0 }
 0x18a   : > { %8372 = vmatpush3.bf16.msra.mxu0 %v9432_v5  ;;  %v1408_v5 = vld [vmem:[#allocation5 + $0x4] sm:$0xf] }
 0x18b   : > { %8373 = vmatprep.subr.bf16.mxu0 %v10357_v0 }
 0x18e   : > { %8374 = vmatpush3.bf16.msra.mxu0 %v9433_v6 }
 0x18f   : > { %8375 = vmatprep.subr.bf16.mxu0 %v10357_v0 }
 0x192   : > { %8376 = vmatpush3.bf16.msra.mxu0 %v9434_v7 }
 0x193   : > { %8377 = vmatprep.subr.bf16.mxu0 %v10357_v0 }
 0x196   : > { %8378 = vmatpush3.bf16.msra.mxu0 %v9435_v8  ;;  %v1746_v8 = vsel %vm1584_vm2, %v1408_v5, 0 }
 0x197   : > { %8431 = vmatprep.subr.bf16.mxu0 %v10357_v0 }
 0x199   : > { %8380 = vmatmul.mubr.bf16.vlgmr.msra.gmra.mxu0 %v1412_v10  ;;  %v1407_v10 = vld [vmem:[#allocation5] sm:$0xf] }
 0x19a   : > { %8433 = vmatprep.mubr.msk.bf16.mxu0 %vm10358_vm0, %v10357_v0 }
 0x259   : > { %v1501_v12 = vpop.f32.mrf.mxu0 }
 0x25a   : > { %v1502_v13 = vadd.f32 %v7769_v11, %v1501_v12 }
 0x25b   : > { %v8381_v14 = vpop.f32.mrf.mxu0 }
 0x25c   : > { %v10863_v15 = vpack.c.bf16 %v1502_v13, %v1502_v13  ;;  %v1792_v13 = vsel %vm1584_vm2, %v1407_v10, 0 }
 0x25d   : > { %v1504_v16 = vpop.f32.mrf.mxu0 }
 0x25e   : > { %1579 = vrot.lane.b32.xlu1 %v10863_v15, %s11869_s3  ;;  %1509 = vrot.lane.b32.xlu0 %v10863_v15, %s11873_s1 }
 0x25f   : > { %v8382_v17 = vpop.f32.mrf.mxu0 }
 0x2d0   : > { %v1510_v18 = vpop.permute.xlu0 %1509  ;;  %v1580_v20 = vpop.permute.xlu1 %1579 }
 0x2d1   : > { %v1516_v19 = vsel %vm1511_vm1, %v1510_v18, 0  ;;  %v1586_v21 = vsel %vm1584_vm2, %v1580_v20, 0 }
 0x2d2   : > { %8384 = vmatpush3.bf16.xpose.msra.mxu1 %v1516_v19 }
 0x2d3   : > { %8389 = vmatprep.subr.bf16.mxu1 %v10357_v0 }
 0x2d9   : > { %8386 = vmatmul.mubr.msk.bf16.vlgmr.msra.gmra.mxu1 %vm1511_vm1, %v10863_v15 }
 0x2da   : > { %8390 = vmatpush3.bf16.msra.mxu1 %v1586_v21  ;;  %8391 = vmatprep.mubr.msk.bf16.mxu1 %vm10358_vm0, %v10357_v0 }
 0x2db   : > { %8395 = vmatprep.subr.bf16.mxu1 %v10357_v0 }
 0x399   : > { %v1552_v29 = vpop.f32.mrf.mxu1 }
 0x39a   : > { %v1558_v30 = vmul.f32 0.35355338, %v1552_v29 }
 0x39b   : > { %v8387_v31 = vpop.f32.mrf.mxu1 }
 0x39c   : > { %v1566_v32 = vsel %vm1565_vm4, -1e+30, %v1558_v30 }
 0x39d   : > { %v1555_v33 = vpop.f32.mrf.mxu1  ;;  %v1567_v34 = vsel %vm1511_vm1, %v1566_v32, -inf }
 0x39e   : > { %1568 = vmax.xlane.f32.xlu0 %v1567_v34 }
 0x39f   : > { %v8388_v35 = vpop.f32.mrf.mxu1 }
 0x427   : > { %v1569_v36 = vpop.xlane.xlu0 %1568 }
 0x428   : > { %v1570_v37 = vsub.f32 %v1566_v32, %v1569_v36 }
 0x42a   : > { %v1571_v38 = vmul.f32 1.442695, %v1570_v37 }
 0x42c   : > { %9548 = vpow2.f32 %v1571_v38 }
 0x439   : > { %v9549_v39 = vpop.eup %9548 }
 0x43a   : > { %v1573_v40 = vsel %vm1511_vm1, %v9549_v39, 0.0 }
 0x43b   : > { %1574 = vadd.xlane.f32.xlu1 %v1573_v40 }
 0x44c   : > { %1631 = vrot.lane.b32.xlu1 %v10863_v15, %s11875_s6 }
 0x450   : > { %1629 = vrot.lane.b32.xlu1 %v10863_v15, %s11871_s26 }
 0x4c4   : > { %v1575_v41 = vpop.xlane.xlu1 %1574 }
 0x4c5   : > { %9550 = vrcp.f32 %v1575_v41 }
 0x4c8   : > { %v1632_v44 = vpop.permute.xlu1 %1631 }
 0x4c9   : > { %v1637_v46 = vsel %vm1511_vm1, %v1632_v44, 0 }
 0x4cc   : > { %v1630_v47 = vpop.permute.xlu1 %1629 }
 0x4d2   : > { %v9551_v42 = vpop.eup %9550 }
 0x4d3   : > { %v1577_v43 = vmul.f32 %v9551_v42, %v9549_v39 }
 0x4d5   : > { %v1578_v45 = vpack.c.bf16 %v1577_v43, %v1577_v43 }
 0x4d7   : > { %8392 = vmatmul.mubr.msk.bf16.vlgmr.msra.gmra.mxu1 %vm1511_vm1, %v1578_v45 }
 0x4d8   : > { %8396 = vmatpush3.bf16.xpose.msra.mxu1 %v1637_v46  ;;  %8397 = vmatprep.mubr.msk.bf16.mxu1 %vm10358_vm0, %v10357_v0 }
 0x4d9   : > { %8401 = vmatprep.subr.bf16.mxu1 %v10357_v0 }
 0x4df   : > { %8398 = vmatmul.mubr.msk.bf16.vlgmr.msra.gmra.mxu1 %vm1511_vm1, %v1630_v47 }
 0x4e0   : > { %8403 = vmatprep.mubr.msk.bf16.mxu1 %vm10358_vm0, %v10357_v0 }
 0x597   : > { %v1622_v48 = vpop.f32.mrf.mxu1 }
 0x598   : > { %v1628_v19 = vpack.c.bf16 %v1622_v48, %v1622_v48 }
 0x599   : > { %v8393_v49 = vpop.f32.mrf.mxu1 }
 0x59b   : > { %v1625_v50 = vpop.f32.mrf.mxu1 }
 0x59d   : > { %v8394_v51 = vpop.f32.mrf.mxu1 }
 0x59f   : > { %v1673_v52 = vpop.f32.mrf.mxu1 }
 0x5a0   : > { %v1679_v53 = vmul.f32 0.35355338, %v1673_v52 }
 0x5a1   : > { %v8399_v54 = vpop.f32.mrf.mxu1 }
 0x5a2   : > { %v1680_v55 = vsel %vm1565_vm4, -1e+30, %v1679_v53  ;;  %v1409_v54 = vld [vmem:[#allocation5 + $0x8] sm:$0xf] }
 0x5a3   : > { %v1676_v56 = vpop.f32.mrf.mxu1  ;;  %v1681_v57 = vsel %vm1511_vm1, %v1680_v55, -inf }
 0x5a4   : > { %1682 = vmax.xlane.f32.xlu1 %v1681_v57 }
 0x5a5   : > { %v8400_v58 = vpop.f32.mrf.mxu1 }
 0x62d   : > { %v1683_v59 = vpop.xlane.xlu1 %1682 }
 0x62e   : > { %v1684_v60 = vsub.f32 %v1680_v55, %v1683_v59  ;;  %v1951_v55 = vsel %vm1584_vm2, %v1409_v54, 0 }
 0x62f   : > { %8432 = vmatpush3.bf16.msra.mxu0 %v1951_v55 }
 0x630   : > { %v1685_v61 = vmul.f32 1.442695, %v1684_v60  ;;  %8443 = vmatprep.subr.bf16.mxu0 %v10357_v0 }
 0x632   : > { %9552 = vpow2.f32 %v1685_v61 }
 0x63f   : > { %v9553_v62 = vpop.eup %9552 }
 0x640   : > { %v1687_v63 = vsel %vm1511_vm1, %v9553_v62, 0.0 }
 0x641   : > { %1688 = vadd.xlane.f32.xlu0 %v1687_v63 }
 0x657   : > { %1693 = vrot.lane.b32.xlu0 %v10863_v15, %s11863_s4 }
 0x65b   : > { %1836 = vrot.lane.b32.xlu0 %v10863_v15, %s11867_s13 }
 0x65f   : > { %1834 = vrot.lane.b32.xlu0 %v10863_v15, %s11865_s0 }
 0x6ca   : > { %v1689_v1 = vpop.xlane.xlu0 %1688 }
 0x6cb   : > { %9554 = vrcp.f32 %v1689_v1 }
 0x6ce   : > { %v1694_v2 = vpop.permute.xlu0 %1693 }
 0x6cf   : > { %v1699_v3 = vsel %vm1584_vm2, %v1694_v2, 0 }
 0x6d0   : > { %8402 = vmatpush3.bf16.msra.mxu1 %v1699_v3 }
 0x6d1   : > { %8407 = vmatprep.subr.bf16.mxu1 %v10357_v0 }
 0x6d2   : > { %v1837_v18 = vpop.permute.xlu0 %1836 }
 0x6d3   : > { %v1842_v20 = vsel %vm1511_vm1, %v1837_v18, 0 }
 0x6d6   : > { %v1835_v21 = vpop.permute.xlu0 %1834 }
 0x6d8   : > { %v9555_v4 = vpop.eup %9554 }
 0x6d9   : > { %v1691_v6 = vmul.f32 %v9555_v4, %v9553_v62 }
 0x6db   : > { %v1692_v7 = vpack.c.bf16 %v1691_v6, %v1691_v6 }
 0x6dd   : > { %8404 = vmatmul.mubr.msk.bf16.vlgmr.msra.gmra.mxu1 %vm1511_vm1, %v1692_v7 }
 0x6de   : > { %8408 = vmatpush3.bf16.msra.mxu1 %v1746_v8  ;;  %8409 = vmatprep.mubr.msk.bf16.mxu1 %vm10358_vm0, %v10357_v0 }
 0x6df   : > { %8413 = vmatprep.subr.bf16.mxu1 %v10357_v0 }
 0x79d   : > { %v1735_v11 = vpop.f32.mrf.mxu1 }
 0x79e   : > { %v1741_v12 = vpack.c.bf16 %v1735_v11, %v1735_v11 }
 0x79f   : > { %v8405_v14 = vpop.f32.mrf.mxu1 }
 0x7a0   : > { %8410 = vmatmul.mubr.msk.bf16.vlgmr.msra.gmra.mxu1 %vm1511_vm1, %v1741_v12  ;;  %v1410_v14 = vld [vmem:[#allocation5 + $0xc] sm:$0xf] }
 0x7a1   : > { %v1738_v16 = vpop.f32.mrf.mxu1  ;;  %8414 = vmatpush3.bf16.msra.mxu1 %v1792_v13  ;;  %8415 = vmatprep.mubr.msk.bf16.mxu1 %vm10358_vm0, %v10357_v0 }
 0x7a2   : > { %8419 = vmatprep.subr.bf16.mxu1 %v10357_v0 }
 0x7a3   : > { %v8406_v17 = vpop.f32.mrf.mxu1 }
 0x7a4   : > { %v2111_v17 = vsel %vm1584_vm2, %v1410_v14, 0 }
 0x7a8   : > { %8416 = vmatmul.mubr.msk.bf16.vlgmr.msra.gmra.mxu1 %vm1511_vm1, %v1628_v19 }
 0x7a9   : > { %8420 = vmatpush3.bf16.xpose.msra.mxu1 %v1842_v20  ;;  %8421 = vmatprep.mubr.msk.bf16.mxu1 %vm10358_vm0, %v10357_v0 }
 0x7aa   : > { %8425 = vmatprep.subr.bf16.mxu1 %v10357_v0 }
 0x7b0   : > { %8422 = vmatmul.mubr.msk.bf16.vlgmr.msra.gmra.mxu1 %vm1511_vm1, %v1835_v21 }
 0x7b1   : > { %8427 = vmatprep.mubr.msk.bf16.mxu1 %vm10358_vm0, %v10357_v0 }
 0x860   : > { %v1782_v23 = vpop.f32.mrf.mxu1 }
 0x862   : > { %v8411_v24 = vpop.f32.mrf.mxu1 }
 0x864   : > { %v1785_v25 = vpop.f32.mrf.mxu1 }
 0x866   : > { %v8412_v26 = vpop.f32.mrf.mxu1 }
 0x868   : > { %v1828_v27 = vpop.f32.mrf.mxu1 }
 0x869   : > { %v10929_v29 = vadd.f32 %v1828_v27, %v1782_v23 }
 0x86a   : > { %v8417_v30 = vpop.f32.mrf.mxu1 }
 0x86c   : > { %v1831_v31 = vpop.f32.mrf.mxu1 }
 0x86d   : > { %v7790_v31 = vld [vmem:[#allocation7] ss:$0 sm:$0xff] }
 0x86e   : > { %v8418_v32 = vpop.f32.mrf.mxu1 }
 0x870   : > { %v1878_v33 = vpop.f32.mrf.mxu1 }
 0x871   : > { %v1884_v34 = vmul.f32 0.35355338, %v1878_v33 }
 0x872   : > { %v8423_v35 = vpop.f32.mrf.mxu1 }
 0x873   : > { %v1885_v36 = vsel %vm1565_vm4, -1e+30, %v1884_v34 }
 0x874   : > { %v1881_v37 = vpop.f32.mrf.mxu1  ;;  %v1886_v38 = vsel %vm1511_vm1, %v1885_v36, -inf }
 0x875   : > { %1887 = vmax.xlane.f32.xlu1 %v1886_v38 }
 0x876   : > { %v8424_v39 = vpop.f32.mrf.mxu1 }
 0x877   : > { %v9436_v39 = vld [vmem:[%s11958_s10 + $0x38] sm:$0xff]  }
 0x886   : > { %1898 = vrot.lane.b32.xlu1 %v10863_v15, %s11861_s15 }
 0x88a   : > { %1996 = vrot.lane.b32.xlu1 %v10863_v15, %s11859_s18 }
 0x88e   : > { %1994 = vrot.lane.b32.xlu1 %v10863_v15, %s11857_s22 }
 0x8fe   : > { %v1888_v40 = vpop.xlane.xlu1 %1887 }
 0x8ff   : > { %v1889_v41 = vsub.f32 %v1885_v36, %v1888_v40  ;;  %v9437_v40 = vld [vmem:[%s11958_s10 + $0x30] sm:$0xff]  }
 0x901   : > { %v1890_v42 = vmul.f32 1.442695, %v1889_v41  ;;  %v10979_v41 = vand.u32 127, %v1561_v22  ;;  %v9440_v22 = vld [vmem:[%s11958_s10 + $0x18] sm:$0xff]  }
 0x902   : > { %v1899_v43 = vpop.permute.xlu1 %1898 }
 0x903   : > { %9556 = vpow2.f32 %v1890_v42  ;;  %v1904_v44 = vsel %vm1584_vm2, %v1899_v43, 0  ;;  %vm2169_vm5 = vcmp.lt.s32.totalorder %v10979_v41, 32  ;;  %v9546_v41 = vld [vmem:[#allocation31 + $0x8] sm:$0xff]  }
 0x904   : > { %8426 = vmatpush3.bf16.msra.mxu1 %v1904_v44 }
 0x905   : > { %8437 = vmatprep.subr.bf16.mxu1 %v10357_v0 }
 0x906   : > { %v1997_v50 = vpop.permute.xlu1 %1996 }
 0x907   : > { %v2002_v52 = vsel %vm1511_vm1, %v1997_v50, 0  ;;  %v9443_v50 = vld [vmem:[%s11958_s10] sm:$0xff]  }
 0x90a   : > { %v1995_v53 = vpop.permute.xlu1 %1994 }
 0x910   : > { %v9557_v45 = vpop.eup %9556 }
 0x911   : > { %v1892_v46 = vsel %vm1511_vm1, %v9557_v45, 0.0 }
 0x912   : > { %1893 = vadd.xlane.f32.xlu0 %v1892_v46  ;;  %v9438_v46 = vld [vmem:[%s11958_s10 + $0x28] sm:$0xff]  }
 0x99b   : > { %v1894_v47 = vpop.xlane.xlu0 %1893 }
 0x99c   : > { %9558 = vrcp.f32 %v1894_v47  ;;  %v9439_v47 = vld [vmem:[%s11958_s10 + $0x20] sm:$0xff]  }
 0x9a9   : > { %v9559_v48 = vpop.eup %9558 }
 0x9aa   : > { %v1896_v49 = vmul.f32 %v9559_v48, %v9557_v45  ;;  %v9441_v48 = vld [vmem:[%s11958_s10 + $0x10] sm:$0xff]  }
 0x9ac   : > { %v1897_v51 = vpack.c.bf16 %v1896_v49, %v1896_v49  ;;  %v9442_v49 = vld [vmem:[%s11958_s10 + $0x8] sm:$0xff]  }
 0x9ae   : > { %8428 = vmatmul.mubr.msk.bf16.vlgmr.msra.gmra.mxu1 %vm1511_vm1, %v1897_v51  ;;  %v9444_v51 = vld [vmem:[%s11959_s11 + $0x38] sm:$0xff]  }
 0x9af   : > { %8438 = vmatpush3.bf16.xpose.msra.mxu1 %v2002_v52  ;;  %8439 = vmatprep.mubr.msk.bf16.mxu1 %vm10358_vm0, %v10357_v0  ;;  %v9445_v52 = vld [vmem:[%s11959_s11 + $0x30] sm:$0xff]  }
 0x9b0   : > { %8449 = vmatprep.subr.bf16.mxu1 %v10357_v0 }
 0x9b6   : > { %8440 = vmatmul.mubr.msk.bf16.vlgmr.msra.gmra.mxu1 %vm1511_vm1, %v1995_v53 }
 0x9b7   : > { %8451 = vmatprep.mubr.msk.bf16.mxu1 %vm10358_vm0, %v10357_v0  ;;  %8450 = vmatpush3.bf16.msra.mxu1 %v2111_v17 }
 0x9b8   : > { %8475 = vmatprep.subr.bf16.mxu1 %v10357_v0 }
 0xa6e   : > { %v1940_v56 = vpop.f32.mrf.mxu1 }
 0xa6f   : > { %v1946_v57 = vpack.c.bf16 %v1940_v56, %v1940_v56 }
 0xa70   : > { %v8429_v58 = vpop.f32.mrf.mxu1 }
 0xa71   : > { %8434 = vmatmul.mubr.msk.bf16.vlgmr.msra.gmra.mxu0 %vm1511_vm1, %v1946_v57  ;;  %v7791_v57 = vld [vmem:[#allocation8] ss:$0 sm:$0xff] }
 0xa72   : > { %v1943_v59 = vpop.f32.mrf.mxu1  ;;  %8445 = vmatprep.mubr.msk.bf16.mxu0 %vm10358_vm0, %v10357_v0 }
 0xa73   : > { %v7792_v59 = vld [vmem:[#allocation10] ss:$0 sm:$0xff] }
 0xa74   : > { %v8430_v60 = vpop.f32.mrf.mxu1 }
 0xa76   : > { %v2038_v61 = vpop.f32.mrf.mxu1 }
 0xa77   : > { %v2044_v62 = vmul.f32 0.35355338, %v2038_v61 }
 0xa78   : > { %v8441_v63 = vpop.f32.mrf.mxu1 }
 0xa79   : > { %v2045_v1 = vsel %vm1565_vm4, -1e+30, %v2044_v62  ;;  %v9446_v63 = vld [vmem:[%s11959_s11 + $0x28] sm:$0xff]  }
 0xa7a   : > { %v2041_v2 = vpop.f32.mrf.mxu1  ;;  %v2046_v3 = vsel %vm1511_vm1, %v2045_v1, -inf }
 0xa7b   : > { %2047 = vmax.xlane.f32.xlu1 %v2046_v3  ;;  %v9448_v2 = vld [vmem:[%s11959_s11 + $0x18] sm:$0xff]   ;;  %v9449_v3 = vld [vmem:[%s11959_s11 + $0x10] sm:$0xff]  }
 0xa7c   : > { %v8442_v4 = vpop.f32.mrf.mxu1 }
 0xa7d   : > { %v9450_v4 = vld [vmem:[%s11959_s11 + $0x8] sm:$0xff]  }
 0xb04   : > { %v2048_v5 = vpop.xlane.xlu1 %2047 }
 0xb05   : > { %v2049_v6 = vsub.f32 %v2045_v1, %v2048_v5  ;;  %v9447_v1 = vld [vmem:[%s11959_s11 + $0x20] sm:$0xff]  }
 0xb06   : > { %v9451_v5 = vld [vmem:[%s11959_s11] sm:$0xff]  }
 0xb07   : > { %v2050_v7 = vmul.f32 1.442695, %v2049_v6  ;;  %v7793_v6 = vld [vmem:[#allocation11] ss:$0 sm:$0xff] }
 0xb09   : > { %9560 = vpow2.f32 %v2050_v7 }
 0xb16   : > { %v9561_v8 = vpop.eup %9560 }
 0xb17   : > { %v2052_v10 = vsel %vm1511_vm1, %v9561_v8, 0.0 }
 0xb18   : > { %2053 = vadd.xlane.f32.xlu0 %v2052_v10 }
 0xb2e   : > { %2058 = vrot.lane.b32.xlu0 %v10863_v15, %s11855_s16 }
 0xb31   : > { %v1987_v11 = vpop.f32.mrf.mxu0 }
 0xb32   : > { %v1993_v12 = vadd.f32 %v1987_v11, %v10929_v29 }
 0xb33   : > { %v8435_v13 = vpop.f32.mrf.mxu0 }
 0xb35   : > { %v1990_v16 = vpop.f32.mrf.mxu0 }
 0xb37   : > { %v8436_v18 = vpop.f32.mrf.mxu0 }
 0xba1   : > { %v2054_v19 = vpop.xlane.xlu0 %2053 }
 0xba2   : > { %9562 = vrcp.f32 %v2054_v19 }
 0xba5   : > { %v2059_v20 = vpop.permute.xlu0 %2058 }
 0xba6   : > { %v2064_v21 = vsel %vm1584_vm2, %v2059_v20, 0  ;;  %v7802_v20 = vld [vmem:[#allocation13] ss:$0 sm:$0xff] }
 0xba7   : > { %8444 = vmatpush3.bf16.msra.mxu0 %v2064_v21 }
 0xba8   : > { %8455 = vmatprep.subr.bf16.mxu0 %v10357_v0 }
 0xbaf   : > { %v9563_v15 = vpop.eup %9562 }
 0xbb0   : > { %v2056_v23 = vmul.f32 %v9563_v15, %v9561_v8 }
 0xbb2   : > { %v2057_v24 = vpack.c.bf16 %v2056_v23, %v2056_v23 }
 0xbb4   : > { %8446 = vmatmul.mubr.msk.bf16.vlgmr.msra.gmra.mxu0 %vm1511_vm1, %v2057_v24 }
 0xbb5   : > { %8471 = vmatprep.mubr.msk.bf16.mxu0 %vm10358_vm0, %v10357_v0  ;;  %8456 = vmatpush3.bf16.msra.mxu0 %v9436_v39  ;;  %v9458_v39 = vld [vmem:[%s11955_s2 + $0x48] sm:$0xff]  }
 0xbb6   : > { %8457 = vmatprep.subr.bf16.mxu0 %v10357_v0 }
 0xbb9   : > { %8458 = vmatpush3.bf16.msra.mxu0 %v9437_v40  ;;  %v9459_v40 = vld [vmem:[%s11955_s2 + $0x40] sm:$0xff]  }
 0xbba   : > { %8459 = vmatprep.subr.bf16.mxu0 %v10357_v0 }
 0xbbd   : > { %8460 = vmatpush3.bf16.msra.mxu0 %v9438_v46 }
 0xbbe   : > { %8461 = vmatprep.subr.bf16.mxu0 %v10357_v0 }
 0xbc1   : > { %8462 = vmatpush3.bf16.msra.mxu0 %v9439_v47  ;;  %v7812_v47 = vld [vmem:[#allocation16] ss:$0 sm:$0xff] }
 0xbc2   : > { %8463 = vmatprep.subr.bf16.mxu0 %v10357_v0 }
 0xbc5   : > { %8464 = vmatpush3.bf16.msra.mxu0 %v9440_v22 }
 0xbc6   : > { %8465 = vmatprep.subr.bf16.mxu0 %v10357_v0 }
 0xbc9   : > { %8466 = vmatpush3.bf16.msra.mxu0 %v9441_v48 }
 0xbca   : > { %8467 = vmatprep.subr.bf16.mxu0 %v10357_v0 }
 0xbcd   : > { %8468 = vmatpush3.bf16.msra.mxu0 %v9442_v49 }
 0xbce   : > { %8469 = vmatprep.subr.bf16.mxu0 %v10357_v0 }
 0xbd1   : > { %8470 = vmatpush3.bf16.msra.mxu0 %v9443_v50  ;;  %v7829_v50 = vld [vmem:[#allocation2 + $0x1] ss:$0 sm:$0xff] }
 0xbd2   : > { %8495 = vmatprep.subr.bf16.mxu0 %v10357_v0 }
 0xc74   : > { %v2100_v25 = vpop.f32.mrf.mxu0 }
 0xc75   : > { %v2106_v26 = vpack.c.bf16 %v2100_v25, %v2100_v25 }
 0xc76   : > { %v8447_v27 = vpop.f32.mrf.mxu0 }
 0xc77   : > { %8452 = vmatmul.mubr.msk.bf16.vlgmr.msra.gmra.mxu1 %vm1511_vm1, %v2106_v26  ;;  %v9452_v27 = vld [vmem:[%s11955_s2 + $0x78] sm:$0xff]  }
 0xc78   : > { %v2103_v29 = vpop.f32.mrf.mxu0  ;;  %8491 = vmatprep.mubr.msk.bf16.mxu1 %vm10358_vm0, %v10357_v0  ;;  %8476 = vmatpush3.bf16.msra.mxu1 %v9444_v51 }
 0xc79   : > { %8477 = vmatprep.subr.bf16.mxu1 %v10357_v0  ;;  %v9453_v29 = vld [vmem:[%s11955_s2 + $0x70] sm:$0xff]  }
 0xc7a   : > { %v8448_v30 = vpop.f32.mrf.mxu0 }
 0xc7c   : > { %8478 = vmatpush3.bf16.msra.mxu1 %v9445_v52 }
 0xc7d   : > { %8479 = vmatprep.subr.bf16.mxu1 %v10357_v0 }
 0xc80   : > { %8480 = vmatpush3.bf16.msra.mxu1 %v9446_v63 }
 0xc81   : > { %8481 = vmatprep.subr.bf16.mxu1 %v10357_v0 }
 0xc84   : > { %8482 = vmatpush3.bf16.msra.mxu1 %v9447_v1 }
 0xc85   : > { %8483 = vmatprep.subr.bf16.mxu1 %v10357_v0 }
 0xc88   : > { %8484 = vmatpush3.bf16.msra.mxu1 %v9448_v2 }
 0xc89   : > { %8485 = vmatprep.subr.bf16.mxu1 %v10357_v0 }
 0xc8c   : > { %8486 = vmatpush3.bf16.msra.mxu1 %v9449_v3 }
 0xc8d   : > { %8487 = vmatprep.subr.bf16.mxu1 %v10357_v0 }
 0xc90   : > { %8488 = vmatpush3.bf16.msra.mxu1 %v9450_v4 }
 0xc91   : > { %8489 = vmatprep.subr.bf16.mxu1 %v10357_v0 }
 0xc94   : > { %8490 = vmatpush3.bf16.msra.mxu1 %v9451_v5 }
 0xc95   : > { %8515 = vmatprep.subr.bf16.mxu1 %v10357_v0 }
 0xd37   : > { %v2147_v32 = vpop.f32.mrf.mxu1 }
 0xd38   : > { %v2153_v33 = vadd.f32 %v2147_v32, %v1993_v12 }
 0xd39   : > { %v8453_v34 = vpop.f32.mrf.mxu1 }
 0xd3a   : > { %v2160_v35 = vadd.f32 %v7790_v31, %v2153_v33 }
 0xd3b   : > { %v2150_v36 = vpop.f32.mrf.mxu1 }
 0xd3c   : > { %v2163_v37 = vadd.f32 %v2160_v35, %v10855_v9  ;;  %v9454_v35 = vld [vmem:[%s11955_s2 + $0x68] sm:$0xff]   ;;  %v9455_v36 = vld [vmem:[%s11955_s2 + $0x60] sm:$0xff]  }
 0xd3d   : > { %v8454_v38 = vpop.f32.mrf.mxu1 }
 0xd3e   : > { %2164 = vadd.xlane.f32.xlu0 %v2163_v37  ;;  %v9457_v38 = vld [vmem:[%s11955_s2 + $0x50] sm:$0xff]  }
 0xdc7   : > { %v2165_v42 = vpop.xlane.xlu0 %2164 }
 0xdc8   : > { %v2166_v43 = vmul.f32 0.03125, %v2165_v42 }
 0xdca   : > { %v2170_v9 = vsub.f32 %v2163_v37, %v2166_v43  ;;  %v9456_v37 = vld [vmem:[%s11955_s2 + $0x58] sm:$0xff]   ;;  %s11976_s2 = smov 80  }
 0xdcc   : > { %v2171_v44 = vsel %vm2169_vm5, %v2170_v9, 0.0 }
 0xdcd   : > { %v2172_v45 = vmul.f32 %v2171_v44, %v2171_v44 }
 0xdcf   : > { %2173 = vadd.xlane.f32.xlu1 %v2172_v45  ;;  %v7811_v45 = vld [vmem:[#allocation14] ss:$0 sm:$0xff] }
 0xe58   : > { %v2174_v53 = vpop.xlane.xlu1 %2173 }
 0xe59   : > { %v2175_v54 = vmul.f32 0.03125, %v2174_v53 }
 0xe5b   : > { %v2176_v55 = vadd.f32 1e-05, %v2175_v54 }
 0xe5d   : > { %9564 = vrsqrt.f32 %v2176_v55 }
 0xe6a   : > { %v9565_v56 = vpop.eup %9564 }
 0xe6b   : > { %v2178_v58 = vmul.f32 %v9565_v56, %v2170_v9 }
 0xe6d   : > { %v2185_v60 = vmul.f32 %v7791_v57, %v2178_v58 }
 0xe6f   : > { %v2192_v61 = vadd.f32 %v7792_v59, %v2185_v60 }
 0xe71   : > { %v2227_v62 = vpack.c.bf16 %v2192_v61, %v2192_v61 }
 0xe73   : > { %8472 = vmatmul.mubr.bf16.vlgmr.msra.gmra.mxu0 %v2227_v62 }
 0xe74   : > { %8511 = vmatprep.mubr.msk.bf16.mxu0 %vm10358_vm0, %v10357_v0  ;;  %8496 = vmatpush3.bf16.msra.mxu0 %v9452_v27 }
 0xe75   : > { %8497 = vmatprep.subr.bf16.mxu0 %v10357_v0 }
 0xe78   : > { %8498 = vmatpush3.bf16.msra.mxu0 %v9453_v29 }
 0xe79   : > { %8499 = vmatprep.subr.bf16.mxu0 %v10357_v0 }
 0xe7c   : > { %8500 = vmatpush3.bf16.msra.mxu0 %v9454_v35 }
 0xe7d   : > { %8501 = vmatprep.subr.bf16.mxu0 %v10357_v0 }
 0xe80   : > { %8502 = vmatpush3.bf16.msra.mxu0 %v9455_v36  ;;  %v2472_v36 = vld [vmem:[#allocation5 + $0x14] sm:$0xf] }
 0xe81   : > { %8503 = vmatprep.subr.bf16.mxu0 %v10357_v0 }
 0xe84   : > { %8504 = vmatpush3.bf16.msra.mxu0 %v9456_v37  ;;  %v2802_v37 = vsel %vm1584_vm2, %v2472_v36, 0 }
 0xe85   : > { %8505 = vmatprep.subr.bf16.mxu0 %v10357_v0 }
 0xe88   : > { %8506 = vmatpush3.bf16.msra.mxu0 %v9457_v38 }
 0xe89   : > { %8507 = vmatprep.subr.bf16.mxu0 %v10357_v0 }
 0xe8c   : > { %8508 = vmatpush3.bf16.msra.mxu0 %v9458_v39 }
 0xe8d   : > { %8509 = vmatprep.subr.bf16.mxu0 %v10357_v0 }
 0xe90   : > { %8510 = vmatpush3.bf16.msra.mxu0 %v9459_v40 }
 0xe91   : > { %8539 = vmatprep.subr.bf16.mxu0 %v10357_v0 }
 0xf33   : > { %v2316_v7 = vpop.f32.mrf.mxu0 }
 0xf34   : > { %v2317_v8 = vadd.f32 %v7793_v6, %v2316_v7 }
 0xf35   : > { %v8473_v10 = vpop.f32.mrf.mxu0 }
 0xf36   : > { %v2323_v11 = vmul.f32 0.70710677, %v2317_v8  ;;  %v2322_v16 = vmul.f32 0.5, %v2317_v8 }
 0xf37   : > { %v2319_v12 = vpop.f32.mrf.mxu0 }
 0xf38   : > { %9566 = verf.f32 %v2323_v11 }
 0xf39   : > { %v8474_v13 = vpop.f32.mrf.mxu0 }
 0xf45   : > { %v9567_v14 = vpop.eup %9566 }
 0xf46   : > { %v2325_v17 = vadd.f32 1.0, %v9567_v14 }
 0xf48   : > { %v2326_v18 = vmul.f32 %v2325_v17, %v2322_v16 }
 0xf4a   : > { %v2327_v19 = vpack.c.bf16 %v2326_v18, %v2326_v18 }
 0xf4c   : > { %8492 = vmatmul.mubr.bf16.vlgmr.msra.gmra.mxu1 %v2327_v19 }
 0xf4d   : > { %8517 = vmatprep.mubr.msk.bf16.mxu1 %vm10358_vm0, %v10357_v0 }
0x100c   : > { %v2416_v21 = vpop.f32.mrf.mxu1 }
0x100d   : > { %v2417_v15 = vadd.f32 %v7802_v20, %v2416_v21 }
0x100e   : > { %v8493_v23 = vpop.f32.mrf.mxu1 }
0x100f   : > { %v2424_v24 = vadd.f32 %v2417_v15, %v2192_v61 }
0x1010   : > { %v2419_v25 = vpop.f32.mrf.mxu1 }
0x1011   : > { %2425 = vadd.xlane.f32.xlu1 %v2424_v24 }
0x1012   : > { %v8494_v26 = vpop.f32.mrf.mxu1 }
0x109a   : > { %v2426_v30 = vpop.xlane.xlu1 %2425 }
0x109b   : > { %v2427_v31 = vmul.f32 0.03125, %v2426_v30 }
0x109d   : > { %v2428_v32 = vsub.f32 %v2424_v24, %v2427_v31 }
0x109f   : > { %v2429_v33 = vsel %vm2169_vm5, %v2428_v32, 0.0 }
0x10a0   : > { %v2430_v34 = vmul.f32 %v2429_v33, %v2429_v33 }
0x10a2   : > { %2431 = vadd.xlane.f32.xlu1 %v2430_v34 }
0x112b   : > { %v2432_v42 = vpop.xlane.xlu1 %2431 }
0x112c   : > { %v2433_v43 = vmul.f32 0.03125, %v2432_v42 }
0x112e   : > { %v2434_v9 = vadd.f32 1e-05, %v2433_v43  ;;  %v2471_v43 = vld [vmem:[#allocation5 + $0x10] sm:$0xf] }
0x1130   : > { %9568 = vrsqrt.f32 %v2434_v9 }
0x113d   : > { %v9569_v44 = vpop.eup %9568 }
0x113e   : > { %v2436_v46 = vmul.f32 %v9569_v44, %v2428_v32 }
0x1140   : > { %v2443_v22 = vmul.f32 %v7811_v45, %v2436_v46  ;;  %v2848_v45 = vsel %vm1584_vm2, %v2471_v43, 0 }
0x1142   : > { %v11034_v48 = vadd.f32 %v7812_v47, %v2443_v22 }
0x1144   : > { %v2477_v49 = vpack.c.bf16 %v11034_v48, %v11034_v48 }
0x1146   : > { %8512 = vmatmul.mubr.bf16.vlgmr.msra.gmra.mxu0 %v2477_v49 }
0x1147   : > { %8541 = vmatprep.mubr.msk.bf16.mxu0 %vm10358_vm0, %v10357_v0  ;;  %8540 = vmatpush3.bf16.msra.mxu0 %v2802_v37 }
0x1148   : > { %8551 = vmatprep.subr.bf16.mxu0 %v10357_v0 }
0x1206   : > { %v2566_v51 = vpop.f32.mrf.mxu0 }
0x1207   : > { %v2567_v52 = vadd.f32 %v7829_v50, %v2566_v51 }
0x1208   : > { %v8513_v53 = vpop.f32.mrf.mxu0 }
0x1209   : > { %v11040_v54 = vpack.c.bf16 %v2567_v52, %v2567_v52 }
0x120a   : > { %v2569_v55 = vpop.f32.mrf.mxu0 }
0x120b   : > { %2574 = vrot.lane.b32.xlu1 %v11040_v54, %s11873_s1 }
0x120c   : > { %v8514_v56 = vpop.f32.mrf.mxu0 }
0x127d   : > { %v2575_v57 = vpop.permute.xlu1 %2574 }
0x127e   : > { %v2580_v58 = vsel %vm1511_vm1, %v2575_v57, 0 }
0x127f   : > { %8516 = vmatpush3.bf16.xpose.msra.mxu1 %v2580_v58 }
0x1280   : > { %8521 = vmatprep.subr.bf16.mxu1 %v10357_v0 }
0x1286   : > { %8518 = vmatmul.mubr.msk.bf16.vlgmr.msra.gmra.mxu1 %vm1511_vm1, %v11040_v54 }
0x1287   : > { %8523 = vmatprep.mubr.msk.bf16.mxu1 %vm10358_vm0, %v10357_v0 }
0x1346   : > { %v2616_v59 = vpop.f32.mrf.mxu1 }
0x1347   : > { %v2622_v60 = vmul.f32 0.35355338, %v2616_v59 }
0x1348   : > { %v8519_v61 = vpop.f32.mrf.mxu1 }
0x1349   : > { %v2623_v62 = vsel %vm1565_vm4, -1e+30, %v2622_v60 }
0x134a   : > { %v2619_v63 = vpop.f32.mrf.mxu1  ;;  %v2624_v1 = vsel %vm1511_vm1, %v2623_v62, -inf }
0x134b   : > { %2625 = vmax.xlane.f32.xlu0 %v2624_v1 }
0x134c   : > { %v8520_v2 = vpop.f32.mrf.mxu1 }
0x1361   : > { %2636 = vrot.lane.b32.xlu0 %v11040_v54, %s11869_s3 }
0x1365   : > { %2687 = vrot.lane.b32.xlu0 %v11040_v54, %s11875_s6 }
0x1369   : > { %2685 = vrot.lane.b32.xlu0 %v11040_v54, %s11871_s26 }
0x13d4   : > { %v2626_v3 = vpop.xlane.xlu0 %2625 }
0x13d5   : > { %v2627_v4 = vsub.f32 %v2623_v62, %v2626_v3 }
0x13d7   : > { %v2628_v5 = vmul.f32 1.442695, %v2627_v4 }
0x13d8   : > { %v2637_v6 = vpop.permute.xlu0 %2636 }
0x13d9   : > { %9570 = vpow2.f32 %v2628_v5  ;;  %v2642_v7 = vsel %vm1584_vm2, %v2637_v6, 0 }
0x13da   : > { %8522 = vmatpush3.bf16.msra.mxu1 %v2642_v7 }
0x13db   : > { %8527 = vmatprep.subr.bf16.mxu1 %v10357_v0 }
0x13dc   : > { %v2688_v14 = vpop.permute.xlu0 %2687 }
0x13dd   : > { %v2693_v17 = vsel %vm1511_vm1, %v2688_v14, 0 }
0x13e0   : > { %v2686_v18 = vpop.permute.xlu0 %2685 }
0x13e6   : > { %v9571_v8 = vpop.eup %9570 }
0x13e7   : > { %v2630_v10 = vsel %vm1511_vm1, %v9571_v8, 0.0 }
0x13e8   : > { %2631 = vadd.xlane.f32.xlu1 %v2630_v10 }
0x1471   : > { %v2632_v11 = vpop.xlane.xlu1 %2631 }
0x1472   : > { %9572 = vrcp.f32 %v2632_v11 }
0x147f   : > { %v9573_v12 = vpop.eup %9572 }
0x1480   : > { %v2634_v13 = vmul.f32 %v9573_v12, %v9571_v8 }
0x1482   : > { %v2635_v16 = vpack.c.bf16 %v2634_v13, %v2634_v13 }
0x1484   : > { %8524 = vmatmul.mubr.msk.bf16.vlgmr.msra.gmra.mxu1 %vm1511_vm1, %v2635_v16 }
0x1485   : > { %8528 = vmatpush3.bf16.xpose.msra.mxu1 %v2693_v17  ;;  %8529 = vmatprep.mubr.msk.bf16.mxu1 %vm10358_vm0, %v10357_v0 }
0x1486   : > { %8533 = vmatprep.subr.bf16.mxu1 %v10357_v0 }
0x148c   : > { %8530 = vmatmul.mubr.msk.bf16.vlgmr.msra.gmra.mxu1 %vm1511_vm1, %v2686_v18 }
0x148d   : > { %8535 = vmatprep.mubr.msk.bf16.mxu1 %vm10358_vm0, %v10357_v0 }
0x1544   : > { %v2678_v19 = vpop.f32.mrf.mxu1 }
0x1545   : > { %v2684_v46 = vpack.c.bf16 %v2678_v19, %v2678_v19 }
0x1546   : > { %v8525_v20 = vpop.f32.mrf.mxu1 }
0x1548   : > { %v2681_v21 = vpop.f32.mrf.mxu1 }
0x154a   : > { %v8526_v15 = vpop.f32.mrf.mxu1 }
0x154c   : > { %v2729_v23 = vpop.f32.mrf.mxu1 }
0x154d   : > { %v2735_v24 = vmul.f32 0.35355338, %v2729_v23 }
0x154e   : > { %v8531_v25 = vpop.f32.mrf.mxu1 }
0x154f   : > { %v2736_v26 = vsel %vm1565_vm4, -1e+30, %v2735_v24  ;;  %v2473_v24 = vld [vmem:[#allocation5 + $0x18] sm:$0xf] }
0x1550   : > { %v2732_v27 = vpop.f32.mrf.mxu1  ;;  %v2737_v29 = vsel %vm1511_vm1, %v2736_v26, -inf  ;;  %v3007_v25 = vsel %vm1584_vm2, %v2473_v24, 0 }
0x1551   : > { %2738 = vmax.xlane.f32.xlu0 %v2737_v29 }
0x1552   : > { %v8532_v30 = vpop.f32.mrf.mxu1 }
0x15da   : > { %v2739_v31 = vpop.xlane.xlu0 %2738 }
0x15db   : > { %v2740_v32 = vsub.f32 %v2736_v26, %v2739_v31 }
0x15dd   : > { %v2741_v33 = vmul.f32 1.442695, %v2740_v32 }
0x15df   : > { %9574 = vpow2.f32 %v2741_v33 }
0x15ec   : > { %v9575_v34 = vpop.eup %9574 }
0x15ed   : > { %v2743_v35 = vsel %vm1511_vm1, %v9575_v34, 0.0 }
0x15ee   : > { %2744 = vadd.xlane.f32.xlu1 %v2743_v35 }
0x15ff   : > { %2749 = vrot.lane.b32.xlu1 %v11040_v54, %s11863_s4 }
0x1603   : > { %2892 = vrot.lane.b32.xlu1 %v11040_v54, %s11867_s13 }
0x1607   : > { %2890 = vrot.lane.b32.xlu1 %v11040_v54, %s11865_s0 }
0x1677   : > { %v2745_v38 = vpop.xlane.xlu1 %2744 }
0x1678   : > { %9576 = vrcp.f32 %v2745_v38 }
0x167b   : > { %v2750_v39 = vpop.permute.xlu1 %2749 }
0x167c   : > { %v2755_v40 = vsel %vm1584_vm2, %v2750_v39, 0 }
0x167d   : > { %8534 = vmatpush3.bf16.msra.mxu1 %v2755_v40 }
0x167e   : > { %8545 = vmatprep.subr.bf16.mxu1 %v10357_v0 }
0x167f   : > { %v2893_v47 = vpop.permute.xlu1 %2892 }
0x1680   : > { %v2898_v51 = vsel %vm1511_vm1, %v2893_v47, 0 }
0x1683   : > { %v2891_v56 = vpop.permute.xlu1 %2890 }
0x1685   : > { %v9577_v42 = vpop.eup %9576 }
0x1686   : > { %v2747_v9 = vmul.f32 %v9577_v42, %v9575_v34 }
0x1688   : > { %v2748_v44 = vpack.c.bf16 %v2747_v9, %v2747_v9 }
0x168a   : > { %8536 = vmatmul.mubr.msk.bf16.vlgmr.msra.gmra.mxu1 %vm1511_vm1, %v2748_v44 }
0x168b   : > { %8546 = vmatpush3.bf16.msra.mxu1 %v2848_v45  ;;  %8547 = vmatprep.mubr.msk.bf16.mxu1 %vm10358_vm0, %v10357_v0 }
0x168c   : > { %8557 = vmatprep.subr.bf16.mxu1 %v10357_v0 }
0x1692   : > { %8548 = vmatmul.mubr.msk.bf16.vlgmr.msra.gmra.mxu1 %vm1511_vm1, %v2684_v46 }
0x1693   : > { %8559 = vmatprep.mubr.msk.bf16.mxu1 %vm10358_vm0, %v10357_v0 }
0x174a   : > { %v2791_v22 = vpop.f32.mrf.mxu1 }
0x174b   : > { %v2797_v49 = vpack.c.bf16 %v2791_v22, %v2791_v22  ;;  %v2474_v22 = vld [vmem:[#allocation5 + $0x1c] sm:$0xf] }
0x174c   : > { %v8537_v50 = vpop.f32.mrf.mxu1 }
0x174d   : > { %8542 = vmatmul.mubr.msk.bf16.vlgmr.msra.gmra.mxu0 %vm1511_vm1, %v2797_v49  ;;  %v3167_v50 = vsel %vm1584_vm2, %v2474_v22, 0  ;;  %v9481_v22 = vld [vmem:[%s11959_s11 + $0x50] sm:$0xff]  }
0x174e   : > { %8552 = vmatpush3.bf16.xpose.msra.mxu0 %v2898_v51  ;;  %v2794_v52 = vpop.f32.mrf.mxu1  ;;  %8553 = vmatprep.mubr.msk.bf16.mxu0 %vm10358_vm0, %v10357_v0 }
0x174f   : > { %8563 = vmatprep.subr.bf16.mxu0 %v10357_v0 }
0x1750   : > { %v8538_v53 = vpop.f32.mrf.mxu1 }
0x1752   : > { %v11097_v55 = vpop.f32.mrf.mxu1 }
0x1754   : > { %v8549_v57 = vpop.f32.mrf.mxu1 }
0x1755   : > { %8554 = vmatmul.mubr.msk.bf16.vlgmr.msra.gmra.mxu0 %vm1511_vm1, %v2891_v56 }
0x1756   : > { %v2887_v58 = vpop.f32.mrf.mxu1  ;;  %8565 = vmatprep.mubr.msk.bf16.mxu0 %vm10358_vm0, %v10357_v0  ;;  %8564 = vmatpush3.bf16.msra.mxu0 %v3007_v25 }
0x1757   : > { %8575 = vmatprep.subr.bf16.mxu0 %v10357_v0 }
0x1758   : > { %v8550_v59 = vpop.f32.mrf.mxu1 }
0x180d   : > { %v11102_v60 = vpop.f32.mrf.mxu0 }
0x180e   : > { %v2885_v44 = vadd.f32 %v11097_v55, %v11102_v60 }
0x180f   : > { %v8543_v61 = vpop.f32.mrf.mxu0 }
0x1811   : > { %v2841_v62 = vpop.f32.mrf.mxu0 }
0x1813   : > { %v8544_v63 = vpop.f32.mrf.mxu0 }
0x1814   : > { %v7850_v63 = vld [vmem:[#allocation7 + $0x1] ss:$0 sm:$0xff] }
0x1815   : > { %v2934_v1 = vpop.f32.mrf.mxu0 }
0x1816   : > { %v2940_v2 = vmul.f32 0.35355338, %v2934_v1 }
0x1817   : > { %v8555_v3 = vpop.f32.mrf.mxu0 }
0x1818   : > { %v2941_v4 = vsel %vm1565_vm4, -1e+30, %v2940_v2 }
0x1819   : > { %v2937_v5 = vpop.f32.mrf.mxu0  ;;  %v2942_v6 = vsel %vm1511_vm1, %v2941_v4, -inf }
0x181a   : > { %2943 = vmax.xlane.f32.xlu0 %v2942_v6 }
0x181b   : > { %v8556_v7 = vpop.f32.mrf.mxu0 }
0x1830   : > { %2954 = vrot.lane.b32.xlu0 %v11040_v54, %s11861_s15 }
0x1834   : > { %3052 = vrot.lane.b32.xlu0 %v11040_v54, %s11859_s18 }
0x1838   : > { %3050 = vrot.lane.b32.xlu0 %v11040_v54, %s11857_s22  ;;  %s11961_s22 = sshll.u32 %s10840_s7, 3  ;;  %s11962_s7 = sld [smem:[#allocation57_spill]] }
0x18a3   : > { %v2944_v8 = vpop.xlane.xlu0 %2943 }
0x18a4   : > { %v2945_v10 = vsub.f32 %v2941_v4, %v2944_v8  ;;  %v9460_v8 = vld [vmem:[%s11958_s10 + $0x78] sm:$0xff]  }
0x18a6   : > { %v2946_v11 = vmul.f32 1.442695, %v2945_v10  ;;  %v9461_v10 = vld [vmem:[%s11958_s10 + $0x70] sm:$0xff]  }
0x18a7   : > { %v2955_v12 = vpop.permute.xlu0 %2954 }
0x18a8   : > { %9578 = vpow2.f32 %v2946_v11  ;;  %v2960_v13 = vsel %vm1584_vm2, %v2955_v12, 0 }
0x18a9   : > { %8558 = vmatpush3.bf16.msra.mxu1 %v2960_v13 }
0x18aa   : > { %8569 = vmatprep.subr.bf16.mxu1 %v10357_v0 }
0x18ab   : > { %v3053_v20 = vpop.permute.xlu0 %3052 }
0x18ac   : > { %v3058_v15 = vsel %vm1511_vm1, %v3053_v20, 0  ;;  %v9466_v20 = vld [vmem:[%s11958_s10 + $0x48] sm:$0xff]  }
0x18af   : > { %v3051_v23 = vpop.permute.xlu0 %3050 }
0x18b5   : > { %v9579_v14 = vpop.eup %9578 }
0x18b6   : > { %v2948_v16 = vsel %vm1511_vm1, %v9579_v14, 0.0 }
0x18b7   : > { %2949 = vadd.xlane.f32.xlu1 %v2948_v16  ;;  %v9462_v16 = vld [vmem:[%s11958_s10 + $0x68] sm:$0xff]  }
0x1940   : > { %v2950_v17 = vpop.xlane.xlu1 %2949 }
0x1941   : > { %9580 = vrcp.f32 %v2950_v17  ;;  %v9463_v17 = vld [vmem:[%s11958_s10 + $0x60] sm:$0xff]  }
0x194e   : > { %v9581_v18 = vpop.eup %9580 }
0x194f   : > { %v2952_v19 = vmul.f32 %v9581_v18, %v9579_v14  ;;  %v9464_v18 = vld [vmem:[%s11958_s10 + $0x58] sm:$0xff]  }
0x1951   : > { %v2953_v21 = vpack.c.bf16 %v2952_v19, %v2952_v19  ;;  %v9465_v19 = vld [vmem:[%s11958_s10 + $0x50] sm:$0xff]  }
0x1953   : > { %8560 = vmatmul.mubr.msk.bf16.vlgmr.msra.gmra.mxu1 %vm1511_vm1, %v2953_v21  ;;  %v9467_v21 = vld [vmem:[%s11958_s10 + $0x40] sm:$0xff]   ;;  %s11980_s10 = sld [smem:[#allocation64_spill]] }
0x1954   : > { %8570 = vmatpush3.bf16.xpose.msra.mxu1 %v3058_v15  ;;  %8571 = vmatprep.mubr.msk.bf16.mxu1 %vm10358_vm0, %v10357_v0  ;;  %v9476_v15 = vld [vmem:[%s11959_s11 + $0x78] sm:$0xff]  }
0x1955   : > { %8581 = vmatprep.subr.bf16.mxu1 %v10357_v0 }
0x195b   : > { %8572 = vmatmul.mubr.msk.bf16.vlgmr.msra.gmra.mxu1 %vm1511_vm1, %v3051_v23  ;;  %v9477_v23 = vld [vmem:[%s11959_s11 + $0x70] sm:$0xff]  }
0x195c   : > { %8583 = vmatprep.mubr.msk.bf16.mxu1 %vm10358_vm0, %v10357_v0  ;;  %8582 = vmatpush3.bf16.msra.mxu1 %v3167_v50  ;;  %v9483_v50 = vld [vmem:[%s11959_s11 + $0x40] sm:$0xff]  }
0x195d   : > { %8607 = vmatprep.subr.bf16.mxu1 %v10357_v0 }
0x1a13   : > { %v2996_v26 = vpop.f32.mrf.mxu1 }
0x1a14   : > { %v3002_v27 = vpack.c.bf16 %v2996_v26, %v2996_v26 }
0x1a15   : > { %v8561_v29 = vpop.f32.mrf.mxu1 }
0x1a16   : > { %8566 = vmatmul.mubr.msk.bf16.vlgmr.msra.gmra.mxu0 %vm1511_vm1, %v3002_v27  ;;  %v7851_v29 = vld [vmem:[#allocation8 + $0x1] ss:$0 sm:$0xff] }
0x1a17   : > { %v2999_v30 = vpop.f32.mrf.mxu1  ;;  %8577 = vmatprep.mubr.msk.bf16.mxu0 %vm10358_vm0, %v10357_v0 }
0x1a19   : > { %v8562_v31 = vpop.f32.mrf.mxu1 }
0x1a1a   : > { %v7852_v31 = vld [vmem:[#allocation10 + $0x1] ss:$0 sm:$0xff] }
0x1a1b   : > { %v3094_v32 = vpop.f32.mrf.mxu1 }
0x1a1c   : > { %v3100_v33 = vmul.f32 0.35355338, %v3094_v32 }
0x1a1d   : > { %v8573_v34 = vpop.f32.mrf.mxu1 }
0x1a1e   : > { %v3101_v35 = vsel %vm1565_vm4, -1e+30, %v3100_v33  ;;  %v9468_v34 = vld [vmem:[#allocation17 + $0x38] sm:$0xff]  }
0x1a1f   : > { %v3097_v36 = vpop.f32.mrf.mxu1  ;;  %v3102_v37 = vsel %vm1511_vm1, %v3101_v35, -inf }
0x1a20   : > { %3103 = vmax.xlane.f32.xlu0 %v3102_v37  ;;  %v9469_v36 = vld [vmem:[#allocation17 + $0x30] sm:$0xff]   ;;  %v9470_v37 = vld [vmem:[#allocation17 + $0x28] sm:$0xff]  }
0x1a21   : > { %v8574_v38 = vpop.f32.mrf.mxu1 }
0x1a22   : > { %v9471_v38 = vld [vmem:[#allocation17 + $0x20] sm:$0xff]  }
0x1aa9   : > { %v3104_v39 = vpop.xlane.xlu0 %3103 }
0x1aaa   : > { %v3105_v40 = vsub.f32 %v3101_v35, %v3104_v39  ;;  %v9472_v39 = vld [vmem:[#allocation17 + $0x18] sm:$0xff]  }
0x1aac   : > { %v3106_v42 = vmul.f32 1.442695, %v3105_v40  ;;  %v9473_v40 = vld [vmem:[#allocation17 + $0x10] sm:$0xff]  }
0x1aae   : > { %9582 = vpow2.f32 %v3106_v42  ;;  %v9474_v42 = vld [vmem:[#allocation17 + $0x8] sm:$0xff]  }
0x1abb   : > { %v9583_v43 = vpop.eup %9582 }
0x1abc   : > { %v3108_v9 = vsel %vm1511_vm1, %v9583_v43, 0.0 }
0x1abd   : > { %3109 = vadd.xlane.f32.xlu1 %v3108_v9 }
0x1ace   : > { %3114 = vrot.lane.b32.xlu1 %v11040_v54, %s11855_s16  ;;  %s11960_s16 = sld [smem:[#allocation48_spill]] }
0x1ad4   : > { %s1382_s18 = scalar_lea.vmem %s11960_s16, %s11961_s22  ;;  %s11964_s22 = smov 72  }
0x1ad5   : > { %v11185_v9 = vld [vmem:[%s1382_s18] sm:$0xff]  ;;  %s11963_s18 = sld [smem:[#allocation58_spill]]  ;;  %s11965_s16 = smov 104  }
0x1ad6   : > { %v3043_v45 = vpop.f32.mrf.mxu0 }
0x1ad7   : > { %v3049_v46 = vadd.f32 %v3043_v45, %v2885_v44  ;;  %v3534_v44 = vpack.c.bf16 %v11185_v9, %v11185_v9  ;;  %v9478_v45 = vld [vmem:[%s11959_s11 + $0x68] sm:$0xff]  }
0x1ad8   : > { %v8567_v47 = vpop.f32.mrf.mxu0 }
0x1ad9   : > { %v9480_v47 = vld [vmem:[%s11959_s11 + $0x58] sm:$0xff]  }
0x1ada   : > { %v3046_v49 = vpop.f32.mrf.mxu0 }
0x1adb   : > { %v9482_v49 = vld [vmem:[%s11959_s11 + $0x48] sm:$0xff]  }
0x1adc   : > { %v8568_v51 = vpop.f32.mrf.mxu0 }
0x1add   : > { %v7885_v51 = vld [vmem:[#allocation11 + $0x1] ss:$0 sm:$0xff] }
0x1b46   : > { %v3110_v52 = vpop.xlane.xlu1 %3109 }
0x1b47   : > { %9584 = vrcp.f32 %v3110_v52 }
0x1b4a   : > { %v3115_v53 = vpop.permute.xlu1 %3114 }
0x1b4b   : > { %v3120_v56 = vsel %vm1584_vm2, %v3115_v53, 0 }
0x1b4c   : > { %8576 = vmatpush3.bf16.msra.mxu0 %v3120_v56 }
0x1b4d   : > { %8587 = vmatprep.subr.bf16.mxu0 %v10357_v0 }
0x1b54   : > { %v9585_v54 = vpop.eup %9584 }
0x1b55   : > { %v3112_v55 = vmul.f32 %v9585_v54, %v9583_v43  ;;  %v9475_v43 = vld [vmem:[#allocation17] sm:$0xff]  }
0x1b57   : > { %v3113_v57 = vpack.c.bf16 %v3112_v55, %v3112_v55 }
0x1b59   : > { %8578 = vmatmul.mubr.msk.bf16.vlgmr.msra.gmra.mxu0 %vm1511_vm1, %v3113_v57 }
0x1b5a   : > { %8603 = vmatprep.mubr.msk.bf16.mxu0 %vm10358_vm0, %v10357_v0  ;;  %8588 = vmatpush3.bf16.msra.mxu0 %v9460_v8 }
0x1b5b   : > { %8589 = vmatprep.subr.bf16.mxu0 %v10357_v0 }
0x1b5e   : > { %8590 = vmatpush3.bf16.msra.mxu0 %v9461_v10 }
0x1b5f   : > { %8591 = vmatprep.subr.bf16.mxu0 %v10357_v0 }
0x1b62   : > { %8592 = vmatpush3.bf16.msra.mxu0 %v9462_v16 }
0x1b63   : > { %8593 = vmatprep.subr.bf16.mxu0 %v10357_v0 }
0x1b66   : > { %8594 = vmatpush3.bf16.msra.mxu0 %v9463_v17 }
0x1b67   : > { %8595 = vmatprep.subr.bf16.mxu0 %v10357_v0 }
0x1b6a   : > { %8596 = vmatpush3.bf16.msra.mxu0 %v9464_v18 }
0x1b6b   : > { %8597 = vmatprep.subr.bf16.mxu0 %v10357_v0 }
0x1b6e   : > { %8598 = vmatpush3.bf16.msra.mxu0 %v9465_v19 }
0x1b6f   : > { %8599 = vmatprep.subr.bf16.mxu0 %v10357_v0 }
0x1b72   : > { %8600 = vmatpush3.bf16.msra.mxu0 %v9466_v20 }
0x1b73   : > { %8601 = vmatprep.subr.bf16.mxu0 %v10357_v0 }
0x1b76   : > { %8602 = vmatpush3.bf16.msra.mxu0 %v9467_v21 }
0x1b77   : > { %8627 = vmatprep.subr.bf16.mxu0 %v10357_v0 }
0x1c19   : > { %v3156_v58 = vpop.f32.mrf.mxu0 }
0x1c1a   : > { %v3162_v59 = vpack.c.bf16 %v3156_v58, %v3156_v58 }
0x1c1b   : > { %v8579_v60 = vpop.f32.mrf.mxu0 }
0x1c1c   : > { %8584 = vmatmul.mubr.msk.bf16.vlgmr.msra.gmra.mxu1 %vm1511_vm1, %v3162_v59 }
0x1c1d   : > { %v3159_v61 = vpop.f32.mrf.mxu0  ;;  %8623 = vmatprep.mubr.msk.bf16.mxu1 %vm10358_vm0, %v10357_v0  ;;  %8608 = vmatpush3.bf16.msra.mxu1 %v9476_v15 }
0x1c1e   : > { %8609 = vmatprep.subr.bf16.mxu1 %v10357_v0 }
0x1c1f   : > { %v8580_v62 = vpop.f32.mrf.mxu0 }
0x1c21   : > { %8610 = vmatpush3.bf16.msra.mxu1 %v9477_v23 }
0x1c22   : > { %8611 = vmatprep.subr.bf16.mxu1 %v10357_v0 }
0x1c25   : > { %8612 = vmatpush3.bf16.msra.mxu1 %v9478_v45 }
0x1c26   : > { %8613 = vmatprep.subr.bf16.mxu1 %v10357_v0 }
0x1cdc   : > { %v3203_v1 = vpop.f32.mrf.mxu1 }
0x1cdd   : > { %v3209_v2 = vadd.f32 %v3203_v1, %v3049_v46  ;;  %v9479_v46 = vld [vmem:[%s11959_s11 + $0x60] sm:$0xff]   ;;  %s11981_s11 = sld [smem:[#allocation68_spill]] }
0x1cde   : > { %v8585_v3 = vpop.f32.mrf.mxu1  ;;  %8614 = vmatpush3.bf16.msra.mxu1 %v9479_v46 }
0x1cdf   : > { %v3216_v4 = vadd.f32 %v7850_v63, %v3209_v2  ;;  %8615 = vmatprep.subr.bf16.mxu1 %v10357_v0  ;;  %v7905_v63 = vld [vmem:[%s11962_s7] ss:$0 sm:$0xff] }
0x1ce0   : > { %v3206_v5 = vpop.f32.mrf.mxu1 }
0x1ce1   : > { %v3221_v6 = vadd.f32 %v3216_v4, %v11034_v48 }
0x1ce2   : > { %v8586_v7 = vpop.f32.mrf.mxu1  ;;  %8616 = vmatpush3.bf16.msra.mxu1 %v9480_v47 }
0x1ce3   : > { %3222 = vadd.xlane.f32.xlu1 %v3221_v6  ;;  %8617 = vmatprep.subr.bf16.mxu1 %v10357_v0 }
0x1ce6   : > { %8618 = vmatpush3.bf16.msra.mxu1 %v9481_v22 }
0x1ce7   : > { %8619 = vmatprep.subr.bf16.mxu1 %v10357_v0 }
0x1cea   : > { %8620 = vmatpush3.bf16.msra.mxu1 %v9482_v49 }
0x1ceb   : > { %8621 = vmatprep.subr.bf16.mxu1 %v10357_v0 }
0x1cee   : > { %8622 = vmatpush3.bf16.msra.mxu1 %v9483_v50 }
0x1cef   : > { %8647 = vmatprep.subr.bf16.mxu1 %v10357_v0 }
0x1d6c   : > { %v3223_v11 = vpop.xlane.xlu1 %3222 }
0x1d6d   : > { %v3224_v12 = vmul.f32 0.03125, %v3223_v11 }
0x1d6f   : > { %v3225_v13 = vsub.f32 %v3221_v6, %v3224_v12 }
0x1d71   : > { %v3226_v48 = vsel %vm2169_vm5, %v3225_v13, 0.0 }
0x1d72   : > { %v3227_v14 = vmul.f32 %v3226_v48, %v3226_v48 }
0x1d74   : > { %3228 = vadd.xlane.f32.xlu0 %v3227_v14 }
0x1dfd   : > { %v3229_v24 = vpop.xlane.xlu0 %3228 }
0x1dfe   : > { %v3230_v25 = vmul.f32 0.03125, %v3229_v24 }
0x1e00   : > { %v3231_v26 = vadd.f32 1e-05, %v3230_v25 }
0x1e02   : > { %9586 = vrsqrt.f32 %v3231_v26 }
0x1e0f   : > { %v9587_v27 = vpop.eup %9586 }
0x1e10   : > { %v3233_v30 = vmul.f32 %v9587_v27, %v3225_v13 }
0x1e12   : > { %v3240_v32 = vmul.f32 %v7851_v29, %v3233_v30 }
0x1e14   : > { %v11170_v33 = vadd.f32 %v7852_v31, %v3240_v32 }
0x1e16   : > { %v3286_v35 = vpack.c.bf16 %v11170_v33, %v11170_v33 }
0x1e18   : > { %8604 = vmatmul.mubr.bf16.vlgmr.msra.gmra.mxu0 %v3286_v35 }
0x1e19   : > { %8628 = vmatpush3.bf16.msra.mxu0 %v9468_v34  ;;  %8643 = vmatprep.mubr.msk.bf16.mxu0 %vm10358_vm0, %v10357_v0 }
0x1e1a   : > { %8629 = vmatprep.subr.bf16.mxu0 %v10357_v0 }
0x1e1d   : > { %8630 = vmatpush3.bf16.msra.mxu0 %v9469_v36 }
0x1e1e   : > { %8631 = vmatprep.subr.bf16.mxu0 %v10357_v0 }
0x1e21   : > { %8632 = vmatpush3.bf16.msra.mxu0 %v9470_v37 }
0x1e22   : > { %8633 = vmatprep.subr.bf16.mxu0 %v10357_v0 }
0x1e25   : > { %8634 = vmatpush3.bf16.msra.mxu0 %v9471_v38 }
0x1e26   : > { %8635 = vmatprep.subr.bf16.mxu0 %v10357_v0 }
0x1e29   : > { %8636 = vmatpush3.bf16.msra.mxu0 %v9472_v39 }
0x1e2a   : > { %8637 = vmatprep.subr.bf16.mxu0 %v10357_v0 }
0x1e2d   : > { %8638 = vmatpush3.bf16.msra.mxu0 %v9473_v40 }
0x1e2e   : > { %8639 = vmatprep.subr.bf16.mxu0 %v10357_v0 }
0x1e31   : > { %8640 = vmatpush3.bf16.msra.mxu0 %v9474_v42 }
0x1e32   : > { %8641 = vmatprep.subr.bf16.mxu0 %v10357_v0 }
0x1e35   : > { %8642 = vmatpush3.bf16.msra.mxu0 %v9475_v43 }
0x1e36   : > { %8671 = vmatprep.subr.bf16.mxu0 %v10357_v0 }
0x1e38   : > { %8644 = vmatmul.mubr.bf16.vlgmr.msra.gmra.mxu0 %v3534_v44 }
0x1e39   : > { %8673 = vmatprep.mubr.msk.bf16.mxu0 %vm10358_vm0, %v10357_v0 }
0x1ed8   : > { %v3375_v52 = vpop.f32.mrf.mxu0 }
0x1ed9   : > { %v3376_v53 = vadd.f32 %v7885_v51, %v3375_v52 }
0x1eda   : > { %v8605_v56 = vpop.f32.mrf.mxu0 }
0x1edb   : > { %v3382_v54 = vmul.f32 0.70710677, %v3376_v53  ;;  %v3381_v59 = vmul.f32 0.5, %v3376_v53 }
0x1edc   : > { %v3378_v55 = vpop.f32.mrf.mxu0 }
0x1edd   : > { %9588 = verf.f32 %v3382_v54  ;;  %v3530_v55 = vld [vmem:[%s11963_s18 + $0x4] sm:$0xf] }
0x1ede   : > { %v8606_v57 = vpop.f32.mrf.mxu0 }
0x1edf   : > { %v3859_v57 = vsel %vm1584_vm2, %v3530_v55, 0 }
0x1ee0   : > { %8672 = vmatpush3.bf16.msra.mxu0 %v3859_v57 }
0x1ee1   : > { %8683 = vmatprep.subr.bf16.mxu0 %v10357_v0 }
0x1eea   : > { %v9589_v58 = vpop.eup %9588 }
0x1eeb   : > { %v3384_v60 = vadd.f32 1.0, %v9589_v58 }
0x1eed   : > { %v3385_v61 = vmul.f32 %v3384_v60, %v3381_v59  ;;  %v3529_v60 = vld [vmem:[%s11963_s18] sm:$0xf] }
0x1eef   : > { %v3386_v62 = vpack.c.bf16 %v3385_v61, %v3385_v61 }
0x1ef1   : > { %8624 = vmatmul.mubr.bf16.vlgmr.msra.gmra.mxu1 %v3386_v62 }
0x1ef2   : > { %8649 = vmatprep.mubr.msk.bf16.mxu1 %vm10358_vm0, %v10357_v0 }
0x1ef8   : > { %v3623_v1 = vpop.f32.mrf.mxu0 }
0x1ef9   : > { %v3624_v2 = vadd.f32 %v7905_v63, %v3623_v1  ;;  %v3905_v63 = vsel %vm1584_vm2, %v3529_v60, 0 }
0x1efa   : > { %v8645_v3 = vpop.f32.mrf.mxu0 }
0x1efb   : > { %v11208_v4 = vpack.c.bf16 %v3624_v2, %v3624_v2 }
0x1efc   : > { %v3626_v5 = vpop.f32.mrf.mxu0 }
0x1efd   : > { %3693 = vrot.lane.b32.xlu1 %v11208_v4, %s11869_s3  ;;  %3631 = vrot.lane.b32.xlu0 %v11208_v4, %s11873_s1  ;;  %s11970_s3 = sld [smem:[#allocation61_spill]] }
0x1efe   : > { %v8646_v6 = vpop.f32.mrf.mxu0 }
0x1f6f   : > { %v3632_v7 = vpop.permute.xlu0 %3631  ;;  %v3694_v10 = vpop.permute.xlu1 %3693 }
0x1f70   : > { %v3637_v8 = vsel %vm1511_vm1, %v3632_v7, 0  ;;  %v3699_v11 = vsel %vm1584_vm2, %v3694_v10, 0 }
0x1f71   : > { %8648 = vmatpush3.bf16.xpose.msra.mxu1 %v3637_v8 }
0x1f72   : > { %8653 = vmatprep.subr.bf16.mxu1 %v10357_v0 }
0x1f78   : > { %8650 = vmatmul.mubr.msk.bf16.vlgmr.msra.gmra.mxu1 %vm1511_vm1, %v11208_v4 }
0x1f79   : > { %8654 = vmatpush3.bf16.msra.mxu1 %v3699_v11  ;;  %8655 = vmatprep.mubr.msk.bf16.mxu1 %vm10358_vm0, %v10357_v0 }
0x1f7a   : > { %8659 = vmatprep.subr.bf16.mxu1 %v10357_v0 }
0x1fb1   : > { %v11222_v12 = vpop.f32.mrf.mxu1 }
0x1fb3   : > { %v8625_v13 = vpop.f32.mrf.mxu1 }
0x1fb5   : > { %v3478_v48 = vpop.f32.mrf.mxu1 }
0x1fb7   : > { %v8626_v14 = vpop.f32.mrf.mxu1 }
0x2038   : > { %v3673_v16 = vpop.f32.mrf.mxu1 }
0x2039   : > { %v3679_v17 = vmul.f32 0.35355338, %v3673_v16 }
0x203a   : > { %v8651_v18 = vpop.f32.mrf.mxu1 }
0x203b   : > { %v3680_v19 = vsel %vm1565_vm4, -1e+30, %v3679_v17 }
0x203c   : > { %v3676_v20 = vpop.f32.mrf.mxu1  ;;  %v3681_v21 = vsel %vm1511_vm1, %v3680_v19, -inf }
0x203d   : > { %3682 = vmax.xlane.f32.xlu0 %v3681_v21 }
0x203e   : > { %v8652_v15 = vpop.f32.mrf.mxu1 }
0x20c6   : > { %v3683_v23 = vpop.xlane.xlu0 %3682 }
0x20c7   : > { %v3684_v24 = vsub.f32 %v3680_v19, %v3683_v23 }
0x20c9   : > { %v3685_v25 = vmul.f32 1.442695, %v3684_v24 }
0x20cb   : > { %9590 = vpow2.f32 %v3685_v25 }
0x20d8   : > { %v9591_v26 = vpop.eup %9590 }
0x20d9   : > { %v3687_v27 = vsel %vm1511_vm1, %v9591_v26, 0.0 }
0x20da   : > { %3688 = vadd.xlane.f32.xlu1 %v3687_v27 }
0x20eb   : > { %3744 = vrot.lane.b32.xlu1 %v11208_v4, %s11875_s6 }
0x20ef   : > { %3742 = vrot.lane.b32.xlu1 %v11208_v4, %s11871_s26  ;;  %s11971_s26 = sld [smem:[#allocation63_spill]] }
0x20f5   : > { %s11972_s1 = smov %s11971_s26 }
0x2163   : > { %v3689_v29 = vpop.xlane.xlu1 %3688 }
0x2164   : > { %9592 = vrcp.f32 %v3689_v29 }
0x2167   : > { %v3745_v32 = vpop.permute.xlu1 %3744 }
0x2168   : > { %v3750_v35 = vsel %vm1511_vm1, %v3745_v32, 0 }
0x216b   : > { %v3743_v36 = vpop.permute.xlu1 %3742 }
0x2171   : > { %v9593_v30 = vpop.eup %9592 }
0x2172   : > { %v3691_v31 = vmul.f32 %v9593_v30, %v9591_v26 }
0x2174   : > { %v3692_v34 = vpack.c.bf16 %v3691_v31, %v3691_v31 }
0x2176   : > { %8656 = vmatmul.mubr.msk.bf16.vlgmr.msra.gmra.mxu1 %vm1511_vm1, %v3692_v34 }
0x2177   : > { %8660 = vmatpush3.bf16.xpose.msra.mxu1 %v3750_v35  ;;  %8661 = vmatprep.mubr.msk.bf16.mxu1 %vm10358_vm0, %v10357_v0 }
0x2178   : > { %8665 = vmatprep.subr.bf16.mxu1 %v10357_v0 }
0x217e   : > { %8662 = vmatmul.mubr.msk.bf16.vlgmr.msra.gmra.mxu1 %vm1511_vm1, %v3743_v36 }
0x217f   : > { %8667 = vmatprep.mubr.msk.bf16.mxu1 %vm10358_vm0, %v10357_v0 }
0x2236   : > { %v3735_v37 = vpop.f32.mrf.mxu1 }
0x2237   : > { %v3741_v2 = vpack.c.bf16 %v3735_v37, %v3735_v37 }
0x2238   : > { %v8657_v38 = vpop.f32.mrf.mxu1 }
0x223a   : > { %v3738_v39 = vpop.f32.mrf.mxu1 }
0x223c   : > { %v8658_v40 = vpop.f32.mrf.mxu1 }
0x223e   : > { %v3786_v42 = vpop.f32.mrf.mxu1 }
0x223f   : > { %v3792_v43 = vmul.f32 0.35355338, %v3786_v42 }
0x2240   : > { %v8663_v44 = vpop.f32.mrf.mxu1 }
0x2241   : > { %v3793_v45 = vsel %vm1565_vm4, -1e+30, %v3792_v43 }
0x2242   : > { %v3789_v46 = vpop.f32.mrf.mxu1  ;;  %v3794_v47 = vsel %vm1511_vm1, %v3793_v45, -inf }
0x2243   : > { %3795 = vmax.xlane.f32.xlu0 %v3794_v47 }
0x2244   : > { %v8664_v22 = vpop.f32.mrf.mxu1 }
0x2259   : > { %3806 = vrot.lane.b32.xlu0 %v11208_v4, %s11863_s4  ;;  %s11967_s4 = sld [smem:[#allocation59_spill]] }
0x225d   : > { %3949 = vrot.lane.b32.xlu0 %v11208_v4, %s11867_s13 }
0x2261   : > { %3947 = vrot.lane.b32.xlu0 %v11208_v4, %s11865_s0  ;;  %s11968_s0 = sld [smem:[#allocation60_spill]] }
0x2267   : > { %s11969_s13 = smov %s11968_s0 }
0x22cc   : > { %v3796_v49 = vpop.xlane.xlu0 %3795 }
0x22cd   : > { %v3797_v50 = vsub.f32 %v3793_v45, %v3796_v49  ;;  %v3531_v45 = vld [vmem:[%s11963_s18 + $0x8] sm:$0xf] }
0x22ce   : > { %v4064_v46 = vsel %vm1584_vm2, %v3531_v45, 0  ;;  %v9491_v45 = vld [vmem:[#allocation19] sm:$0xff]  }
0x22cf   : > { %v3798_v51 = vmul.f32 1.442695, %v3797_v50 }
0x22d0   : > { %v3807_v52 = vpop.permute.xlu0 %3806 }
0x22d1   : > { %9594 = vpow2.f32 %v3798_v51  ;;  %v3812_v53 = vsel %vm1584_vm2, %v3807_v52, 0 }
0x22d2   : > { %8666 = vmatpush3.bf16.msra.mxu1 %v3812_v53 }
0x22d3   : > { %8677 = vmatprep.subr.bf16.mxu1 %v10357_v0 }
0x22d4   : > { %v3950_v5 = vpop.permute.xlu0 %3949 }
0x22d5   : > { %v3955_v10 = vsel %vm1511_vm1, %v3950_v5, 0 }
0x22d8   : > { %v3948_v14 = vpop.permute.xlu0 %3947 }
0x22de   : > { %v9595_v56 = vpop.eup %9594 }
0x22df   : > { %v3800_v54 = vsel %vm1511_vm1, %v9595_v56, 0.0 }
0x22e0   : > { %3801 = vadd.xlane.f32.xlu1 %v3800_v54 }
0x22f1   : > { %4011 = vrot.lane.b32.xlu1 %v11208_v4, %s11861_s15  ;;  %s11966_s15 = smov 40  }
0x2369   : > { %v3802_v58 = vpop.xlane.xlu1 %3801 }
0x236a   : > { %9596 = vrcp.f32 %v3802_v58 }
0x236d   : > { %v4012_v1 = vpop.permute.xlu1 %4011 }
0x236e   : > { %v4017_v3 = vsel %vm1584_vm2, %v4012_v1, 0 }
0x2377   : > { %v9597_v59 = vpop.eup %9596 }
0x2378   : > { %v3804_v61 = vmul.f32 %v9597_v59, %v9595_v56  ;;  %v7894_v59 = vld [vmem:[#allocation13 + $0x1] ss:$0 sm:$0xff] }
0x2379   : > { %v3476_v60 = vadd.f32 %v7894_v59, %v11222_v12 }
0x237a   : > { %v3805_v62 = vpack.c.bf16 %v3804_v61, %v3804_v61 }
0x237b   : > { %v3485_v61 = vadd.f32 %v3476_v60, %v11170_v33 }
0x237c   : > { %8668 = vmatmul.mubr.msk.bf16.vlgmr.msra.gmra.mxu1 %vm1511_vm1, %v3805_v62 }
0x237d   : > { %8678 = vmatpush3.bf16.msra.mxu1 %v3905_v63  ;;  %8679 = vmatprep.mubr.msk.bf16.mxu1 %vm10358_vm0, %v10357_v0 }
0x237e   : > { %8689 = vmatprep.subr.bf16.mxu1 %v10357_v0 }
0x2384   : > { %8680 = vmatmul.mubr.msk.bf16.vlgmr.msra.gmra.mxu1 %vm1511_vm1, %v3741_v2 }
0x2385   : > { %8690 = vmatpush3.bf16.msra.mxu1 %v4017_v3  ;;  %8691 = vmatprep.mubr.msk.bf16.mxu1 %vm10358_vm0, %v10357_v0 }
0x2386   : > { %8701 = vmatprep.subr.bf16.mxu1 %v10357_v0 }
0x243c   : > { %v3848_v6 = vpop.f32.mrf.mxu1 }
0x243d   : > { %v3854_v7 = vpack.c.bf16 %v3848_v6, %v3848_v6 }
0x243e   : > { %v8669_v8 = vpop.f32.mrf.mxu1 }
0x243f   : > { %8674 = vmatmul.mubr.msk.bf16.vlgmr.msra.gmra.mxu0 %vm1511_vm1, %v3854_v7  ;;  %v3532_v8 = vld [vmem:[%s11963_s18 + $0xc] sm:$0xf] }
0x2440   : > { %8684 = vmatpush3.bf16.xpose.msra.mxu0 %v3955_v10  ;;  %v3851_v11 = vpop.f32.mrf.mxu1  ;;  %8685 = vmatprep.mubr.msk.bf16.mxu0 %vm10358_vm0, %v10357_v0 }
0x2441   : > { %8695 = vmatprep.subr.bf16.mxu0 %v10357_v0  ;;  %v4224_v11 = vsel %vm1584_vm2, %v3532_v8, 0 }
0x2442   : > { %v8670_v13 = vpop.f32.mrf.mxu1 }
0x2444   : > { %v11273_v48 = vpop.f32.mrf.mxu1 }
0x2446   : > { %v8681_v16 = vpop.f32.mrf.mxu1 }
0x2447   : > { %8686 = vmatmul.mubr.msk.bf16.vlgmr.msra.gmra.mxu0 %vm1511_vm1, %v3948_v14 }
0x2448   : > { %v3944_v17 = vpop.f32.mrf.mxu1  ;;  %8697 = vmatprep.mubr.msk.bf16.mxu0 %vm10358_vm0, %v10357_v0  ;;  %8696 = vmatpush3.bf16.msra.mxu0 %v4064_v46 }
0x2449   : > { %8707 = vmatprep.subr.bf16.mxu0 %v10357_v0 }
0x244a   : > { %v8682_v18 = vpop.f32.mrf.mxu1 }
0x24ff   : > { %v11278_v19 = vpop.f32.mrf.mxu0 }
0x2500   : > { %v3942_v12 = vadd.f32 %v11273_v48, %v11278_v19 }
0x2501   : > { %v8675_v20 = vpop.f32.mrf.mxu0 }
0x2503   : > { %v3898_v21 = vpop.f32.mrf.mxu0 }
0x2505   : > { %v8676_v15 = vpop.f32.mrf.mxu0 }
0x2507   : > { %v3991_v23 = vpop.f32.mrf.mxu0 }
0x2508   : > { %v3997_v24 = vmul.f32 0.35355338, %v3991_v23  ;;  %v9484_v23 = vld [vmem:[#allocation19 + $0x38] sm:$0xff]  }
0x2509   : > { %v8687_v25 = vpop.f32.mrf.mxu0 }
0x250a   : > { %v3998_v26 = vsel %vm1565_vm4, -1e+30, %v3997_v24 }
0x250b   : > { %v3994_v27 = vpop.f32.mrf.mxu0  ;;  %v3999_v29 = vsel %vm1511_vm1, %v3998_v26, -inf }
0x250c   : > { %4000 = vmax.xlane.f32.xlu0 %v3999_v29 }
0x250d   : > { %v8688_v30 = vpop.f32.mrf.mxu0 }
0x2595   : > { %v4001_v31 = vpop.xlane.xlu0 %4000 }
0x2596   : > { %v4002_v32 = vsub.f32 %v3998_v26, %v4001_v31  ;;  %v7926_v26 = vld [vmem:[%s11967_s4] ss:$0 sm:$0xff] }
0x2598   : > { %v4003_v34 = vmul.f32 1.442695, %v4002_v32 }
0x259a   : > { %9598 = vpow2.f32 %v4003_v34 }
0x25a7   : > { %v9599_v35 = vpop.eup %9598 }
0x25a8   : > { %v4005_v36 = vsel %vm1511_vm1, %v9599_v35, 0.0 }
0x25a9   : > { %4006 = vadd.xlane.f32.xlu1 %v4005_v36 }
0x25ba   : > { %4109 = vrot.lane.b32.xlu1 %v11208_v4, %s11964_s22 }
0x25be   : > { %4107 = vrot.lane.b32.xlu1 %v11208_v4, %s11965_s16 }
0x2632   : > { %v4007_v37 = vpop.xlane.xlu1 %4006 }
0x2633   : > { %9600 = vrcp.f32 %v4007_v37 }
0x2636   : > { %v4110_v40 = vpop.permute.xlu1 %4109 }
0x2637   : > { %v4115_v43 = vsel %vm1511_vm1, %v4110_v40, 0  ;;  %v9486_v40 = vld [vmem:[#allocation19 + $0x28] sm:$0xff]  }
0x263a   : > { %v4108_v44 = vpop.permute.xlu1 %4107 }
0x2640   : > { %v9601_v38 = vpop.eup %9600 }
0x2641   : > { %v4009_v39 = vmul.f32 %v9601_v38, %v9599_v35 }
0x2643   : > { %v4010_v42 = vpack.c.bf16 %v4009_v39, %v4009_v39  ;;  %v9485_v39 = vld [vmem:[#allocation19 + $0x30] sm:$0xff]  }
0x2645   : > { %8692 = vmatmul.mubr.msk.bf16.vlgmr.msra.gmra.mxu1 %vm1511_vm1, %v4010_v42  ;;  %v9488_v42 = vld [vmem:[#allocation19 + $0x18] sm:$0xff]  }
0x2646   : > { %8702 = vmatpush3.bf16.xpose.msra.mxu1 %v4115_v43  ;;  %8703 = vmatprep.mubr.msk.bf16.mxu1 %vm10358_vm0, %v10357_v0  ;;  %v9489_v43 = vld [vmem:[#allocation19 + $0x10] sm:$0xff]  }
0x2647   : > { %8713 = vmatprep.subr.bf16.mxu1 %v10357_v0 }
0x264d   : > { %8704 = vmatmul.mubr.msk.bf16.vlgmr.msra.gmra.mxu1 %vm1511_vm1, %v4108_v44  ;;  %v9490_v44 = vld [vmem:[#allocation19 + $0x8] sm:$0xff]  }
0x264e   : > { %8715 = vmatprep.mubr.msk.bf16.mxu1 %vm10358_vm0, %v10357_v0  ;;  %8714 = vmatpush3.bf16.msra.mxu1 %v4224_v11 }
0x264f   : > { %8739 = vmatprep.subr.bf16.mxu1 %v10357_v0 }
0x2705   : > { %v4053_v47 = vpop.f32.mrf.mxu1 }
0x2706   : > { %v4059_v22 = vpack.c.bf16 %v4053_v47, %v4053_v47 }
0x2707   : > { %v8693_v49 = vpop.f32.mrf.mxu1 }
0x2708   : > { %8698 = vmatmul.mubr.msk.bf16.vlgmr.msra.gmra.mxu0 %vm1511_vm1, %v4059_v22 }
0x2709   : > { %v4056_v50 = vpop.f32.mrf.mxu1  ;;  %8709 = vmatprep.mubr.msk.bf16.mxu0 %vm10358_vm0, %v10357_v0 }
0x270b   : > { %v8694_v51 = vpop.f32.mrf.mxu1 }
0x270d   : > { %v4151_v52 = vpop.f32.mrf.mxu1 }
0x270e   : > { %v4157_v53 = vmul.f32 0.35355338, %v4151_v52 }
0x270f   : > { %v8705_v56 = vpop.f32.mrf.mxu1 }
0x2710   : > { %v4158_v54 = vsel %vm1565_vm4, -1e+30, %v4157_v53 }
0x2711   : > { %v4154_v55 = vpop.f32.mrf.mxu1  ;;  %v4159_v57 = vsel %vm1511_vm1, %v4158_v54, -inf }
0x2712   : > { %4160 = vmax.xlane.f32.xlu0 %v4159_v57  ;;  %v7904_v57 = vld [vmem:[#allocation16 + $0x1] ss:$0 sm:$0xff] }
0x2713   : > { %v8706_v58 = vpop.f32.mrf.mxu1 }
0x2728   : > { %4171 = vrot.lane.b32.xlu0 %v11208_v4, %s11966_s15 }
0x2747   : > { %3486 = vadd.xlane.f32.xlu0 %v3485_v61 }
0x279b   : > { %v4161_v62 = vpop.xlane.xlu0 %4160 }
0x279c   : > { %v4162_v63 = vsub.f32 %v4158_v54, %v4161_v62  ;;  %v7903_v54 = vld [vmem:[#allocation14 + $0x1] ss:$0 sm:$0xff] }
0x279e   : > { %v4163_v1 = vmul.f32 1.442695, %v4162_v63 }
0x279f   : > { %v4172_v2 = vpop.permute.xlu0 %4171 }
0x27a0   : > { %9602 = vpow2.f32 %v4163_v1  ;;  %v4177_v3 = vsel %vm1584_vm2, %v4172_v2, 0  ;;  %v7927_v2 = vld [vmem:[%s11968_s0] ss:$0 sm:$0xff]  ;;  %s11973_s0 = smov 96  }
0x27a1   : > { %8708 = vmatpush3.bf16.msra.mxu0 %v4177_v3 }
0x27a2   : > { %8719 = vmatprep.subr.bf16.mxu0 %v10357_v0 }
0x27ad   : > { %v9603_v5 = vpop.eup %9602 }
0x27ae   : > { %v4165_v4 = vsel %vm1511_vm1, %v9603_v5, 0.0 }
0x27af   : > { %4166 = vadd.xlane.f32.xlu1 %v4165_v4 }
0x27c8   : > { %v4100_v33 = vpop.f32.mrf.mxu0 }
0x27c9   : > { %v4106_v6 = vadd.f32 %v4100_v33, %v3942_v12 }
0x27ca   : > { %v8699_v7 = vpop.f32.mrf.mxu0 }
0x27cc   : > { %v4103_v10 = vpop.f32.mrf.mxu0 }
0x27ce   : > { %v8700_v13 = vpop.f32.mrf.mxu0 }
0x27d0   : > { %v3487_v24 = vpop.xlane.xlu0 %3486 }
0x27d1   : > { %v3488_v25 = vmul.f32 0.03125, %v3487_v24 }
0x27d3   : > { %v3489_v30 = vsub.f32 %v3485_v61, %v3488_v25 }
0x27d5   : > { %v3490_v37 = vsel %vm2169_vm5, %v3489_v30, 0.0 }
0x27d6   : > { %v3491_v38 = vmul.f32 %v3490_v37, %v3490_v37 }
0x2838   : > { %v4167_v14 = vpop.xlane.xlu1 %4166 }
0x2839   : > { %9604 = vrcp.f32 %v4167_v14 }
0x2846   : > { %v9605_v16 = vpop.eup %9604 }
0x2847   : > { %v4169_v17 = vmul.f32 %v9605_v16, %v9603_v5  ;;  %v7928_v5 = vld [vmem:[%s11970_s3] ss:$0 sm:$0xff] }
0x2849   : > { %v4170_v18 = vpack.c.bf16 %v4169_v17, %v4169_v17 }
0x284b   : > { %8710 = vmatmul.mubr.msk.bf16.vlgmr.msra.gmra.mxu0 %vm1511_vm1, %v4170_v18 }
0x284c   : > { %8735 = vmatprep.mubr.msk.bf16.mxu0 %vm10358_vm0, %v10357_v0  ;;  %8720 = vmatpush3.bf16.msra.mxu0 %v9484_v23 }
0x284d   : > { %8721 = vmatprep.subr.bf16.mxu0 %v10357_v0 }
0x2850   : > { %8722 = vmatpush3.bf16.msra.mxu0 %v9485_v39 }
0x2851   : > { %8723 = vmatprep.subr.bf16.mxu0 %v10357_v0 }
0x2854   : > { %8724 = vmatpush3.bf16.msra.mxu0 %v9486_v40 }
0x2855   : > { %8725 = vmatprep.subr.bf16.mxu0 %v10357_v0 }
0x290b   : > { %v4213_v48 = vpop.f32.mrf.mxu0 }
0x290c   : > { %v4219_v19 = vpack.c.bf16 %v4213_v48, %v4213_v48 }
0x290d   : > { %v8711_v20 = vpop.f32.mrf.mxu0 }
0x290e   : > { %8716 = vmatmul.mubr.msk.bf16.vlgmr.msra.gmra.mxu1 %vm1511_vm1, %v4219_v19 }
0x290f   : > { %v4216_v21 = vpop.f32.mrf.mxu0  ;;  %8755 = vmatprep.mubr.msk.bf16.mxu1 %vm10358_vm0, %v10357_v0  ;;  %8740 = vmatpush3.bf16.msra.mxu1 %v9484_v23 }
0x2910   : > { %8741 = vmatprep.subr.bf16.mxu1 %v10357_v0 }
0x2911   : > { %v8712_v15 = vpop.f32.mrf.mxu0 }
0x2913   : > { %8742 = vmatpush3.bf16.msra.mxu1 %v9485_v39 }
0x2914   : > { %8743 = vmatprep.subr.bf16.mxu1 %v10357_v0 }
0x2917   : > { %8744 = vmatpush3.bf16.msra.mxu1 %v9486_v40 }
0x2918   : > { %8745 = vmatprep.subr.bf16.mxu1 %v10357_v0 }
0x29ce   : > { %v4260_v27 = vpop.f32.mrf.mxu1 }
0x29cf   : > { %v4266_v29 = vadd.f32 %v4260_v27, %v4106_v6  ;;  %v7929_v6 = vld [vmem:[%s11971_s26] ss:$0 sm:$0xff]  ;;  %s11974_s26 = smov 120  }
0x29d0   : > { %v8717_v31 = vpop.f32.mrf.mxu1 }
0x29d1   : > { %v4273_v32 = vadd.f32 %v7926_v26, %v4266_v29 }
0x29d2   : > { %v4263_v34 = vpop.f32.mrf.mxu1 }
0x29d3   : > { %v4276_v35 = vadd.f32 %v4273_v32, %v11185_v9  ;;  %v9487_v9 = vld [vmem:[#allocation19 + $0x20] sm:$0xff]  }
0x29d4   : > { %v8718_v36 = vpop.f32.mrf.mxu1  ;;  %8746 = vmatpush3.bf16.msra.mxu1 %v9487_v9  ;;  %8726 = vmatpush3.bf16.msra.mxu0 %v9487_v9 }
0x29d5   : > { %4277 = vadd.xlane.f32.xlu1 %v4276_v35  ;;  %8747 = vmatprep.subr.bf16.mxu1 %v10357_v0 }
0x29d6   : > { %8727 = vmatprep.subr.bf16.mxu0 %v10357_v0 }
0x29d8   : > { %8748 = vmatpush3.bf16.msra.mxu1 %v9488_v42  ;;  %8728 = vmatpush3.bf16.msra.mxu0 %v9488_v42 }
0x29d9   : > { %3492 = vadd.xlane.f32.xlu1 %v3491_v38  ;;  %8749 = vmatprep.subr.bf16.mxu1 %v10357_v0 }
0x29da   : > { %8729 = vmatprep.subr.bf16.mxu0 %v10357_v0 }
0x29dc   : > { %8750 = vmatpush3.bf16.msra.mxu1 %v9489_v43  ;;  %8730 = vmatpush3.bf16.msra.mxu0 %v9489_v43 }
0x29dd   : > { %8751 = vmatprep.subr.bf16.mxu1 %v10357_v0  ;;  %8731 = vmatprep.subr.bf16.mxu0 %v10357_v0 }
0x29e0   : > { %8752 = vmatpush3.bf16.msra.mxu1 %v9490_v44  ;;  %8732 = vmatpush3.bf16.msra.mxu0 %v9490_v44 }
0x29e1   : > { %8753 = vmatprep.subr.bf16.mxu1 %v10357_v0  ;;  %8733 = vmatprep.subr.bf16.mxu0 %v10357_v0 }
0x29e4   : > { %8754 = vmatpush3.bf16.msra.mxu1 %v9491_v45  ;;  %8734 = vmatpush3.bf16.msra.mxu0 %v9491_v45 }
0x29e5   : > { %8759 = vmatprep.subr.bf16.mxu0 %v10357_v0  ;;  %8765 = vmatprep.subr.bf16.mxu1 %v10357_v0 }
0x2a5e   : > { %v4278_v46 = vpop.xlane.xlu1 %4277 }
0x2a5f   : > { %v4279_v47 = vmul.f32 0.03125, %v4278_v46 }
0x2a61   : > { %v4280_v22 = vsub.f32 %v4276_v35, %v4279_v47 }
0x2a62   : > { %v3493_v49 = vpop.xlane.xlu1 %3492 }
0x2a63   : > { %v3494_v50 = vmul.f32 0.03125, %v3493_v49  ;;  %v4281_v51 = vsel %vm2169_vm5, %v4280_v22, 0.0 }
0x2a64   : > { %v4282_v52 = vmul.f32 %v4281_v51, %v4281_v51 }
0x2a65   : > { %v3495_v53 = vadd.f32 1e-05, %v3494_v50 }
0x2a66   : > { %4283 = vadd.xlane.f32.xlu1 %v4282_v52 }
0x2a67   : > { %9606 = vrsqrt.f32 %v3495_v53 }
0x2a74   : > { %v9607_v56 = vpop.eup %9606 }
0x2a75   : > { %v3497_v55 = vmul.f32 %v9607_v56, %v3489_v30 }
0x2a77   : > { %v3504_v58 = vmul.f32 %v7903_v54, %v3497_v55  ;;  %v4321_v55 = vld [vmem:[#allocation20 + $0x4] sm:$0xf] }
0x2a79   : > { %v3511_v59 = vadd.f32 %v7904_v57, %v3504_v58  ;;  %v4691_v57 = vsel %vm1584_vm2, %v4321_v55, 0 }
0x2a7b   : > { %v11345_v60 = vpack.c.bf16 %v3511_v59, %v3511_v59 }
0x2a7d   : > { %8756 = vmatmul.mubr.bf16.vlgmr.msra.gmra.mxu1 %v11345_v60 }
0x2a7e   : > { %8767 = vmatprep.mubr.msk.bf16.mxu1 %vm10358_vm0, %v10357_v0 }
0x2aef   : > { %v4284_v61 = vpop.xlane.xlu1 %4283 }
0x2af0   : > { %v4285_v62 = vmul.f32 0.03125, %v4284_v61 }
0x2af2   : > { %v4286_v63 = vadd.f32 1e-05, %v4285_v62 }
0x2af4   : > { %9608 = vrsqrt.f32 %v4286_v63  ;;  %v4320_v63 = vld [vmem:[#allocation20] sm:$0xf] }
0x2b01   : > { %v9609_v1 = vpop.eup %9608 }
0x2b02   : > { %v4288_v3 = vmul.f32 %v9609_v1, %v4280_v22 }
0x2b04   : > { %v4295_v4 = vmul.f32 %v7927_v2, %v4288_v3  ;;  %v4737_v3 = vsel %vm1584_vm2, %v4320_v63, 0 }
0x2b06   : > { %v11352_v12 = vadd.f32 %v7928_v5, %v4295_v4 }
0x2b08   : > { %v4325_v33 = vpack.c.bf16 %v11352_v12, %v11352_v12 }
0x2b0a   : > { %8736 = vmatmul.mubr.bf16.vlgmr.msra.gmra.mxu0 %v4325_v33 }
0x2b0b   : > { %8761 = vmatprep.mubr.msk.bf16.mxu0 %vm10358_vm0, %v10357_v0 }
0x2b3d   : > { %v4455_v7 = vpop.f32.mrf.mxu1 }
0x2b3e   : > { %v4456_v8 = vadd.f32 %v7929_v6, %v4455_v7 }
0x2b3f   : > { %v8757_v10 = vpop.f32.mrf.mxu1 }
0x2b40   : > { %v11359_v11 = vpack.c.bf16 %v4456_v8, %v4456_v8 }
0x2b41   : > { %v4458_v13 = vpop.f32.mrf.mxu1 }
0x2b42   : > { %4577 = vrot.lane.b32.xlu0 %v11359_v11, %s11875_s6  ;;  %4464 = vrot.lane.b32.xlu1 %v11359_v11, %s11973_s0  ;;  %s11975_s6 = smov 64  }
0x2b43   : > { %v8758_v14 = vpop.f32.mrf.mxu1 }
0x2bb4   : > { %v4465_v16 = vpop.permute.xlu1 %4464  ;;  %v4578_v19 = vpop.permute.xlu0 %4577 }
0x2bb5   : > { %v4470_v17 = vsel %vm1511_vm1, %v4465_v16, 0  ;;  %v4583_v23 = vsel %vm1511_vm1, %v4578_v19, 0 }
0x2bb6   : > { %8760 = vmatpush3.bf16.xpose.msra.mxu0 %v4470_v17 }
0x2bb7   : > { %8771 = vmatprep.subr.bf16.mxu0 %v10357_v0 }
0x2bca   : > { %v4414_v18 = vpop.f32.mrf.mxu0 }
0x2bcb   : > { %v4415_v48 = vadd.f32 %v7929_v6, %v4414_v18 }
0x2bcc   : > { %v8737_v20 = vpop.f32.mrf.mxu0 }
0x2bcd   : > { %v11367_v21 = vpack.c.bf16 %v4415_v48, %v4415_v48 }
0x2bce   : > { %v4417_v15 = vpop.f32.mrf.mxu0 }
0x2bcf   : > { %4575 = vrot.lane.b32.xlu1 %v11367_v21, %s11974_s26  ;;  %8762 = vmatmul.mubr.msk.bf16.vlgmr.msra.gmra.mxu0 %vm1511_vm1, %v11367_v21 }
0x2bd0   : > { %8772 = vmatpush3.bf16.xpose.msra.mxu0 %v4583_v23  ;;  %v8738_v24 = vpop.f32.mrf.mxu0  ;;  %8773 = vmatprep.mubr.msk.bf16.mxu0 %vm10358_vm0, %v10357_v0 }
0x2bd1   : > { %8783 = vmatprep.subr.bf16.mxu0 %v10357_v0 }
0x2c41   : > { %v4576_v25 = vpop.permute.xlu1 %4575 }
0x2c42   : > { %8774 = vmatmul.mubr.msk.bf16.vlgmr.msra.gmra.mxu0 %vm1511_vm1, %v4576_v25 }
0x2c43   : > { %8785 = vmatprep.mubr.msk.bf16.mxu0 %vm10358_vm0, %v10357_v0  ;;  %8784 = vmatpush3.bf16.msra.mxu0 %v4691_v57 }
0x2c44   : > { %8795 = vmatprep.subr.bf16.mxu0 %v10357_v0 }
0x2c8f   : > { %v4506_v26 = vpop.f32.mrf.mxu0 }
0x2c90   : > { %v4512_v27 = vmul.f32 0.35355338, %v4506_v26 }
0x2c91   : > { %v8763_v29 = vpop.f32.mrf.mxu0 }
0x2c92   : > { %v4513_v30 = vsel %vm1511_vm1, %v4512_v27, -inf }
0x2c93   : > { %4514 = vmax.xlane.f32.xlu1 %v4513_v30  ;;  %v4509_v31 = vpop.f32.mrf.mxu0 }
0x2c95   : > { %v8764_v32 = vpop.f32.mrf.mxu0 }
0x2d02   : > { %v4619_v34 = vpop.f32.mrf.mxu0 }
0x2d03   : > { %v4625_v35 = vmul.f32 0.35355338, %v4619_v34 }
0x2d04   : > { %v8775_v36 = vpop.f32.mrf.mxu0 }
0x2d05   : > { %v4626_v37 = vsel %vm1511_vm1, %v4625_v35, -inf }
0x2d06   : > { %4627 = vmax.xlane.f32.xlu0 %v4626_v37  ;;  %v4622_v38 = vpop.f32.mrf.mxu0 }
0x2d08   : > { %v8776_v39 = vpop.f32.mrf.mxu0 }
0x2d1c   : > { %v4515_v40 = vpop.xlane.xlu1 %4514 }
0x2d1d   : > { %v4516_v9 = vsub.f32 %v4512_v27, %v4515_v40 }
0x2d1f   : > { %v4517_v42 = vmul.f32 1.442695, %v4516_v9 }
0x2d21   : > { %9610 = vpow2.f32 %v4517_v42 }
0x2d2e   : > { %v9611_v43 = vpop.eup %9610 }
0x2d2f   : > { %v4519_v44 = vsel %vm1511_vm1, %v9611_v43, 0.0 }
0x2d30   : > { %4520 = vadd.xlane.f32.xlu1 %v4519_v44 }
0x2d41   : > { %4525 = vrot.lane.b32.xlu1 %v11359_v11, %s11975_s6 }
0x2d45   : > { %4781 = vrot.lane.b32.xlu1 %v11359_v11, %s11976_s2 }
0x2d49   : > { %4779 = vrot.lane.b32.xlu1 %v11367_v21, %s11977_s5 }
0x2d8f   : > { %v4628_v45 = vpop.xlane.xlu0 %4627 }
0x2d90   : > { %v4629_v46 = vsub.f32 %v4625_v35, %v4628_v45 }
0x2d92   : > { %v4630_v47 = vmul.f32 1.442695, %v4629_v46 }
0x2d94   : > { %9612 = vpow2.f32 %v4630_v47 }
0x2da1   : > { %v9613_v22 = vpop.eup %9612 }
0x2da2   : > { %v4632_v49 = vsel %vm1511_vm1, %v9613_v22, 0.0 }
0x2da3   : > { %4633 = vadd.xlane.f32.xlu0 %v4632_v49  ;;  %v4322_v49 = vld [vmem:[#allocation20 + $0x8] sm:$0xf] }
0x2db9   : > { %v4521_v50 = vpop.xlane.xlu1 %4520  ;;  %4638 = vrot.lane.b32.xlu0 %v11359_v11, %s11978_s8 }
0x2dba   : > { %9614 = vrcp.f32 %v4521_v50  ;;  %v4895_v50 = vsel %vm1584_vm2, %v4322_v49, 0 }
0x2dbd   : > { %v4526_v51 = vpop.permute.xlu1 %4525 }
0x2dbe   : > { %v4531_v52 = vsel %vm1584_vm2, %v4526_v51, 0 }
0x2dbf   : > { %8766 = vmatpush3.bf16.msra.mxu1 %v4531_v52 }
0x2dc0   : > { %8777 = vmatprep.subr.bf16.mxu1 %v10357_v0 }
0x2dc1   : > { %v4782_v8 = vpop.permute.xlu1 %4781 }
0x2dc2   : > { %v4787_v16 = vsel %vm1511_vm1, %v4782_v8, 0  ;;  %v4323_v8 = vld [vmem:[#allocation20 + $0xc] sm:$0xf] }
0x2dc5   : > { %v4780_v48 = vpop.permute.xlu1 %4779 }
0x2dc7   : > { %v9615_v53 = vpop.eup %9614 }
0x2dc8   : > { %v4523_v56 = vmul.f32 %v9615_v53, %v9611_v43 }
0x2dca   : > { %v4524_v54 = vpack.c.bf16 %v4523_v56, %v4523_v56 }
0x2dcc   : > { %8768 = vmatmul.mubr.msk.bf16.vlgmr.msra.gmra.mxu1 %vm1511_vm1, %v4524_v54 }
0x2dcd   : > { %8779 = vmatprep.mubr.msk.bf16.mxu1 %vm10358_vm0, %v10357_v0 }
0x2e2c   : > { %v4634_v58 = vpop.xlane.xlu0 %4633 }
0x2e2d   : > { %9616 = vrcp.f32 %v4634_v58 }
0x2e30   : > { %v4639_v59 = vpop.permute.xlu0 %4638 }
0x2e31   : > { %v4644_v61 = vsel %vm1584_vm2, %v4639_v59, 0 }
0x2e32   : > { %8778 = vmatpush3.bf16.msra.mxu1 %v4644_v61 }
0x2e33   : > { %8789 = vmatprep.subr.bf16.mxu1 %v10357_v0 }
0x2e3a   : > { %v9617_v62 = vpop.eup %9616 }
0x2e3b   : > { %v4636_v1 = vmul.f32 %v9617_v62, %v9613_v22 }
0x2e3d   : > { %v4637_v2 = vpack.c.bf16 %v4636_v1, %v4636_v1 }
0x2e3f   : > { %8780 = vmatmul.mubr.msk.bf16.vlgmr.msra.gmra.mxu1 %vm1511_vm1, %v4637_v2 }
0x2e40   : > { %8790 = vmatpush3.bf16.msra.mxu1 %v4737_v3  ;;  %8791 = vmatprep.mubr.msk.bf16.mxu1 %vm10358_vm0, %v10357_v0 }
0x2e41   : > { %8801 = vmatprep.subr.bf16.mxu1 %v10357_v0 }
0x2e8c   : > { %v4567_v5 = vpop.f32.mrf.mxu1 }
0x2e8d   : > { %v4573_v4 = vpack.c.bf16 %v4567_v5, %v4567_v5 }
0x2e8e   : > { %v8769_v33 = vpop.f32.mrf.mxu1 }
0x2e8f   : > { %8792 = vmatmul.mubr.msk.bf16.vlgmr.msra.gmra.mxu1 %vm1511_vm1, %v4573_v4 }
0x2e90   : > { %v4570_v6 = vpop.f32.mrf.mxu1  ;;  %8803 = vmatprep.mubr.msk.bf16.mxu1 %vm10358_vm0, %v10357_v0 }
0x2e92   : > { %v8770_v7 = vpop.f32.mrf.mxu1 }
0x2eff   : > { %v4680_v10 = vpop.f32.mrf.mxu1 }
0x2f00   : > { %v4686_v13 = vpack.c.bf16 %v4680_v10, %v4680_v10  ;;  %v5054_v10 = vsel %vm1584_vm2, %v4323_v8, 0 }
0x2f01   : > { %v8781_v14 = vpop.f32.mrf.mxu1 }
0x2f02   : > { %8786 = vmatmul.mubr.msk.bf16.vlgmr.msra.gmra.mxu0 %vm1511_vm1, %v4686_v13 }
0x2f03   : > { %8796 = vmatpush3.bf16.xpose.msra.mxu0 %v4787_v16  ;;  %v4683_v17 = vpop.f32.mrf.mxu1  ;;  %8797 = vmatprep.mubr.msk.bf16.mxu0 %vm10358_vm0, %v10357_v0 }
0x2f04   : > { %8807 = vmatprep.subr.bf16.mxu0 %v10357_v0 }
0x2f05   : > { %v8782_v18 = vpop.f32.mrf.mxu1 }
0x2f0a   : > { %8798 = vmatmul.mubr.msk.bf16.vlgmr.msra.gmra.mxu0 %vm1511_vm1, %v4780_v48 }
0x2f0b   : > { %8809 = vmatprep.mubr.msk.bf16.mxu0 %vm10358_vm0, %v10357_v0  ;;  %8808 = vmatpush3.bf16.msra.mxu0 %v4895_v50 }
0x2f0c   : > { %8819 = vmatprep.subr.bf16.mxu0 %v10357_v0 }
0x2f4f   : > { %v11417_v19 = vpop.f32.mrf.mxu1 }
0x2f51   : > { %v8793_v20 = vpop.f32.mrf.mxu1 }
0x2f53   : > { %v4776_v15 = vpop.f32.mrf.mxu1 }
0x2f55   : > { %v8794_v23 = vpop.f32.mrf.mxu1 }
0x2fc2   : > { %v11419_v24 = vpop.f32.mrf.mxu0 }
0x2fc3   : > { %v4774_v4 = vadd.f32 %v11417_v19, %v11419_v24 }
0x2fc4   : > { %v8787_v25 = vpop.f32.mrf.mxu0 }
0x2fc6   : > { %v4730_v26 = vpop.f32.mrf.mxu0 }
0x2fc7   : > { %v7950_v26 = vld [vmem:[%s11980_s10] ss:$0 sm:$0xff] }
0x2fc8   : > { %v8788_v27 = vpop.f32.mrf.mxu0 }
0x2fca   : > { %v4823_v29 = vpop.f32.mrf.mxu0 }
0x2fcb   : > { %v4829_v30 = vmul.f32 0.35355338, %v4823_v29 }
0x2fcc   : > { %v8799_v31 = vpop.f32.mrf.mxu0 }
0x2fcd   : > { %v4830_v32 = vsel %vm1511_vm1, %v4829_v30, -inf }
0x2fce   : > { %4831 = vmax.xlane.f32.xlu0 %v4830_v32  ;;  %v4826_v34 = vpop.f32.mrf.mxu0 }
0x2fd0   : > { %v8800_v35 = vpop.f32.mrf.mxu0 }
0x2fe4   : > { %4842 = vrot.lane.b32.xlu0 %v11359_v11, %s11979_s9 }
0x2fe8   : > { %4938 = vrot.lane.b32.xlu0 %v11367_v21, %s11965_s16 }
0x3057   : > { %v4832_v36 = vpop.xlane.xlu0 %4831 }
0x3058   : > { %v4833_v37 = vsub.f32 %v4829_v30, %v4832_v36  ;;  %v9492_v36 = vld [vmem:[#allocation25 + $0x38] sm:$0xff]  }
0x305a   : > { %v4834_v38 = vmul.f32 1.442695, %v4833_v37  ;;  %v9493_v37 = vld [vmem:[#allocation25 + $0x30] sm:$0xff]  }
0x305b   : > { %v4843_v39 = vpop.permute.xlu0 %4842 }
0x305c   : > { %9618 = vpow2.f32 %v4834_v38  ;;  %v4848_v40 = vsel %vm1584_vm2, %v4843_v39, 0 }
0x305d   : > { %8802 = vmatpush3.bf16.msra.mxu1 %v4848_v40 }
0x305e   : > { %8813 = vmatprep.subr.bf16.mxu1 %v10357_v0 }
0x305f   : > { %v4939_v22 = vpop.permute.xlu0 %4938 }
0x3069   : > { %v9619_v9 = vpop.eup %9618 }
0x306a   : > { %v4836_v42 = vsel %vm1511_vm1, %v9619_v9, 0.0 }
0x306b   : > { %4837 = vadd.xlane.f32.xlu1 %v4836_v42 }
0x307c   : > { %4940 = vrot.lane.b32.xlu1 %v11359_v11, %s11964_s22 }
0x30f4   : > { %v4838_v43 = vpop.xlane.xlu1 %4837 }
0x30f5   : > { %9620 = vrcp.f32 %v4838_v43  ;;  %v9494_v43 = vld [vmem:[#allocation25 + $0x28] sm:$0xff]  }
0x30f8   : > { %v4941_v45 = vpop.permute.xlu1 %4940 }
0x30f9   : > { %v4946_v47 = vsel %vm1511_vm1, %v4941_v45, 0  ;;  %v9498_v45 = vld [vmem:[#allocation25 + $0x8] sm:$0xff]  }
0x3102   : > { %v9621_v21 = vpop.eup %9620 }
0x3103   : > { %v4840_v44 = vmul.f32 %v9621_v21, %v9619_v9  ;;  %v9496_v21 = vld [vmem:[#allocation25 + $0x18] sm:$0xff]  }
0x3105   : > { %v4841_v46 = vpack.c.bf16 %v4840_v44, %v4840_v44  ;;  %v9497_v44 = vld [vmem:[#allocation25 + $0x10] sm:$0xff]  }
0x3107   : > { %8804 = vmatmul.mubr.msk.bf16.vlgmr.msra.gmra.mxu1 %vm1511_vm1, %v4841_v46  ;;  %v9499_v46 = vld [vmem:[#allocation25] sm:$0xff]  }
0x3108   : > { %8814 = vmatpush3.bf16.xpose.msra.mxu1 %v4946_v47  ;;  %8815 = vmatprep.mubr.msk.bf16.mxu1 %vm10358_vm0, %v10357_v0  ;;  %v9500_v47 = vld [vmem:[#allocation26 + $0x38] sm:$0xff]  }
0x3109   : > { %8825 = vmatprep.subr.bf16.mxu1 %v10357_v0 }
0x310f   : > { %8816 = vmatmul.mubr.msk.bf16.vlgmr.msra.gmra.mxu1 %vm1511_vm1, %v4939_v22  ;;  %v9501_v22 = vld [vmem:[#allocation26 + $0x30] sm:$0xff]  }
0x3110   : > { %8827 = vmatprep.mubr.msk.bf16.mxu1 %vm10358_vm0, %v10357_v0  ;;  %8826 = vmatpush3.bf16.msra.mxu1 %v5054_v10 }
0x3111   : > { %8851 = vmatprep.subr.bf16.mxu1 %v10357_v0 }
0x31c7   : > { %v4884_v51 = vpop.f32.mrf.mxu1 }
0x31c8   : > { %v4890_v52 = vpack.c.bf16 %v4884_v51, %v4884_v51 }
0x31c9   : > { %v8805_v53 = vpop.f32.mrf.mxu1 }
0x31ca   : > { %8810 = vmatmul.mubr.msk.bf16.vlgmr.msra.gmra.mxu0 %vm1511_vm1, %v4890_v52  ;;  %v7951_v53 = vld [vmem:[#allocation22] ss:$0 sm:$0xff] }
0x31cb   : > { %v4887_v56 = vpop.f32.mrf.mxu1  ;;  %8821 = vmatprep.mubr.msk.bf16.mxu0 %vm10358_vm0, %v10357_v0 }
0x31cd   : > { %v8806_v54 = vpop.f32.mrf.mxu1 }
0x31ce   : > { %v7952_v54 = vld [vmem:[#allocation23] ss:$0 sm:$0xff] }
0x31cf   : > { %v4982_v55 = vpop.f32.mrf.mxu1 }
0x31d0   : > { %v4988_v57 = vmul.f32 0.35355338, %v4982_v55 }
0x31d1   : > { %v8817_v58 = vpop.f32.mrf.mxu1 }
0x31d2   : > { %v4989_v59 = vsel %vm1511_vm1, %v4988_v57, -inf }
0x31d3   : > { %4990 = vmax.xlane.f32.xlu1 %v4989_v59  ;;  %v4985_v61 = vpop.f32.mrf.mxu1  ;;  %v9502_v59 = vld [vmem:[#allocation26 + $0x28] sm:$0xff]  }
0x31d4   : > { %v9503_v61 = vld [vmem:[#allocation26 + $0x20] sm:$0xff]  }
0x31d5   : > { %v8818_v62 = vpop.f32.mrf.mxu1 }
0x31d6   : > { %v9504_v62 = vld [vmem:[#allocation26 + $0x18] sm:$0xff]  }
0x325c   : > { %v4991_v63 = vpop.xlane.xlu1 %4990 }
0x325d   : > { %v4992_v1 = vsub.f32 %v4988_v57, %v4991_v63  ;;  %v9505_v63 = vld [vmem:[#allocation26 + $0x10] sm:$0xff]  }
0x325f   : > { %v4993_v2 = vmul.f32 1.442695, %v4992_v1  ;;  %v9506_v1 = vld [vmem:[#allocation26 + $0x8] sm:$0xff]  }
0x3261   : > { %9622 = vpow2.f32 %v4993_v2  ;;  %v9507_v2 = vld [vmem:[#allocation26] sm:$0xff]  }
0x326e   : > { %v9623_v3 = vpop.eup %9622 }
0x326f   : > { %v4995_v5 = vsel %vm1511_vm1, %v9623_v3, 0.0 }
0x3270   : > { %4996 = vadd.xlane.f32.xlu0 %v4995_v5 }
0x3286   : > { %5001 = vrot.lane.b32.xlu0 %v11359_v11, %s11966_s15 }
0x328a   : > { %v4931_v33 = vpop.f32.mrf.mxu0 }
0x328b   : > { %v4937_v6 = vadd.f32 %v4931_v33, %v4774_v4 }
0x328c   : > { %v8811_v7 = vpop.f32.mrf.mxu0 }
0x328e   : > { %v4934_v13 = vpop.f32.mrf.mxu0 }
0x3290   : > { %v8812_v14 = vpop.f32.mrf.mxu0 }
0x32f9   : > { %v4997_v16 = vpop.xlane.xlu0 %4996 }
0x32fa   : > { %9624 = vrcp.f32 %v4997_v16 }
0x32fd   : > { %v5002_v17 = vpop.permute.xlu0 %5001 }
0x32fe   : > { %v5007_v11 = vsel %vm1584_vm2, %v5002_v17, 0 }
0x32ff   : > { %8820 = vmatpush3.bf16.msra.mxu0 %v5007_v11  ;;  %v7962_v11 = vld [vmem:[%s11982_s12] ss:$0 sm:$0xff] }
0x3300   : > { %8831 = vmatprep.subr.bf16.mxu0 %v10357_v0 }
0x3307   : > { %v9625_v18 = vpop.eup %9624 }
0x3308   : > { %v4999_v48 = vmul.f32 %v9625_v18, %v9623_v3  ;;  %v7953_v3 = vld [vmem:[%s11981_s11] ss:$0 sm:$0xff] }
0x330a   : > { %v5000_v19 = vpack.c.bf16 %v4999_v48, %v4999_v48 }
0x330c   : > { %8822 = vmatmul.mubr.msk.bf16.vlgmr.msra.gmra.mxu0 %vm1511_vm1, %v5000_v19 }
0x330d   : > { %8847 = vmatprep.mubr.msk.bf16.mxu0 %vm10358_vm0, %v10357_v0  ;;  %8832 = vmatpush3.bf16.msra.mxu0 %v9492_v36  ;;  %v9513_v36 = vld [vmem:[#allocation17 + $0x50] sm:$0xff]  }
0x330e   : > { %8833 = vmatprep.subr.bf16.mxu0 %v10357_v0 }
0x3311   : > { %8834 = vmatpush3.bf16.msra.mxu0 %v9493_v37  ;;  %v9514_v37 = vld [vmem:[#allocation17 + $0x48] sm:$0xff]  }
0x3312   : > { %8835 = vmatprep.subr.bf16.mxu0 %v10357_v0 }
0x3315   : > { %8836 = vmatpush3.bf16.msra.mxu0 %v9494_v43  ;;  %v7971_v43 = vld [vmem:[#allocation28] ss:$0 sm:$0xff] }
0x3316   : > { %8837 = vmatprep.subr.bf16.mxu0 %v10357_v0 }
0x33cc   : > { %v5043_v20 = vpop.f32.mrf.mxu0 }
0x33cd   : > { %v5049_v15 = vpack.c.bf16 %v5043_v20, %v5043_v20 }
0x33ce   : > { %v8823_v23 = vpop.f32.mrf.mxu0 }
0x33cf   : > { %8828 = vmatmul.mubr.msk.bf16.vlgmr.msra.gmra.mxu1 %vm1511_vm1, %v5049_v15 }
0x33d0   : > { %v5046_v24 = vpop.f32.mrf.mxu0  ;;  %8867 = vmatprep.mubr.msk.bf16.mxu1 %vm10358_vm0, %v10357_v0  ;;  %8852 = vmatpush3.bf16.msra.mxu1 %v9500_v47  ;;  %v7979_v47 = vld [vmem:[%s11962_s7 + $0x1] ss:$0 sm:$0xff]  ;;  %s11983_s7 = smov 88  }
0x33d1   : > { %8853 = vmatprep.subr.bf16.mxu1 %v10357_v0  ;;  %v9508_v24 = vld [vmem:[#allocation17 + $0x78] sm:$0xff]  }
0x33d2   : > { %v8824_v25 = vpop.f32.mrf.mxu0 }
0x33d3   : > { %v9509_v25 = vld [vmem:[#allocation17 + $0x70] sm:$0xff]  }
0x33d4   : > { %8854 = vmatpush3.bf16.msra.mxu1 %v9501_v22 }
0x33d5   : > { %8855 = vmatprep.subr.bf16.mxu1 %v10357_v0 }
0x33d8   : > { %8856 = vmatpush3.bf16.msra.mxu1 %v9502_v59 }
0x33d9   : > { %8857 = vmatprep.subr.bf16.mxu1 %v10357_v0 }
0x33dc   : > { %8858 = vmatpush3.bf16.msra.mxu1 %v9503_v61 }
0x33dd   : > { %8859 = vmatprep.subr.bf16.mxu1 %v10357_v0 }
0x33e0   : > { %8860 = vmatpush3.bf16.msra.mxu1 %v9504_v62 }
0x33e1   : > { %8861 = vmatprep.subr.bf16.mxu1 %v10357_v0 }
0x33e4   : > { %8862 = vmatpush3.bf16.msra.mxu1 %v9505_v63 }
0x33e5   : > { %8863 = vmatprep.subr.bf16.mxu1 %v10357_v0 }
0x33e8   : > { %8864 = vmatpush3.bf16.msra.mxu1 %v9506_v1 }
0x33e9   : > { %8865 = vmatprep.subr.bf16.mxu1 %v10357_v0 }
0x33ec   : > { %8866 = vmatpush3.bf16.msra.mxu1 %v9507_v2 }
0x33ed   : > { %8891 = vmatprep.subr.bf16.mxu1 %v10357_v0 }
0x348f   : > { %v5090_v27 = vpop.f32.mrf.mxu1 }
0x3490   : > { %v5096_v29 = vadd.f32 %v5090_v27, %v4937_v6 }
0x3491   : > { %v8829_v30 = vpop.f32.mrf.mxu1 }
0x3492   : > { %v5103_v31 = vadd.f32 %v7950_v26, %v5096_v29 }
0x3493   : > { %v5093_v32 = vpop.f32.mrf.mxu1 }
0x3494   : > { %v5106_v34 = vadd.f32 %v5103_v31, %v11352_v12  ;;  %v9495_v12 = vld [vmem:[#allocation25 + $0x20] sm:$0xff]  }
0x3495   : > { %v8830_v35 = vpop.f32.mrf.mxu1  ;;  %8838 = vmatpush3.bf16.msra.mxu0 %v9495_v12  ;;  %v9510_v32 = vld [vmem:[#allocation17 + $0x68] sm:$0xff]  }
0x3496   : > { %5107 = vadd.xlane.f32.xlu1 %v5106_v34  ;;  %8839 = vmatprep.subr.bf16.mxu0 %v10357_v0  ;;  %v9512_v35 = vld [vmem:[#allocation17 + $0x58] sm:$0xff]  }
0x3499   : > { %8840 = vmatpush3.bf16.msra.mxu0 %v9496_v21  ;;  %v7972_v21 = vld [vmem:[#allocation29] ss:$0 sm:$0xff] }
0x349a   : > { %8841 = vmatprep.subr.bf16.mxu0 %v10357_v0 }
0x349d   : > { %8842 = vmatpush3.bf16.msra.mxu0 %v9497_v44 }
0x349e   : > { %8843 = vmatprep.subr.bf16.mxu0 %v10357_v0 }
0x34a1   : > { %8844 = vmatpush3.bf16.msra.mxu0 %v9498_v45 }
0x34a2   : > { %8845 = vmatprep.subr.bf16.mxu0 %v10357_v0 }
0x34a5   : > { %8846 = vmatpush3.bf16.msra.mxu0 %v9499_v46 }
0x34a6   : > { %8871 = vmatprep.subr.bf16.mxu0 %v10357_v0 }
0x351f   : > { %v5108_v38 = vpop.xlane.xlu1 %5107 }
0x3520   : > { %v5109_v39 = vmul.f32 0.03125, %v5108_v38  ;;  %v9515_v38 = vld [vmem:[#allocation17 + $0x40] sm:$0xff]  }
0x3522   : > { %v5110_v40 = vsub.f32 %v5106_v34, %v5109_v39  ;;  %v9511_v34 = vld [vmem:[#allocation17 + $0x60] sm:$0xff]  }
0x3524   : > { %v5111_v9 = vsel %vm2169_vm5, %v5110_v40, 0.0 }
0x3525   : > { %v5112_v42 = vmul.f32 %v5111_v9, %v5111_v9 }
0x3527   : > { %5113 = vadd.xlane.f32.xlu1 %v5112_v42 }
0x35b0   : > { %v5114_v49 = vpop.xlane.xlu1 %5113 }
0x35b1   : > { %v5115_v50 = vmul.f32 0.03125, %v5114_v49 }
0x35b3   : > { %v5116_v51 = vadd.f32 1e-05, %v5115_v50 }
0x35b5   : > { %9626 = vrsqrt.f32 %v5116_v51 }
0x35c2   : > { %v9627_v52 = vpop.eup %9626 }
0x35c3   : > { %v5118_v56 = vmul.f32 %v9627_v52, %v5110_v40 }
0x35c5   : > { %v5125_v55 = vmul.f32 %v7951_v53, %v5118_v56 }
0x35c7   : > { %v5132_v57 = vadd.f32 %v7952_v54, %v5125_v55 }
0x35c9   : > { %v5167_v58 = vpack.c.bf16 %v5132_v57, %v5132_v57 }
0x35cb   : > { %8848 = vmatmul.mubr.bf16.vlgmr.msra.gmra.mxu0 %v5167_v58 }
0x35cc   : > { %8887 = vmatprep.mubr.msk.bf16.mxu0 %vm10358_vm0, %v10357_v0  ;;  %8872 = vmatpush3.bf16.msra.mxu0 %v9508_v24 }
0x35cd   : > { %8873 = vmatprep.subr.bf16.mxu0 %v10357_v0 }
0x35d0   : > { %8874 = vmatpush3.bf16.msra.mxu0 %v9509_v25 }
0x35d1   : > { %8875 = vmatprep.subr.bf16.mxu0 %v10357_v0 }
0x35d4   : > { %8876 = vmatpush3.bf16.msra.mxu0 %v9510_v32 }
0x35d5   : > { %8877 = vmatprep.subr.bf16.mxu0 %v10357_v0 }
0x35d8   : > { %8878 = vmatpush3.bf16.msra.mxu0 %v9511_v34 }
0x35d9   : > { %8879 = vmatprep.subr.bf16.mxu0 %v10357_v0 }
0x35dc   : > { %8880 = vmatpush3.bf16.msra.mxu0 %v9512_v35 }
0x35dd   : > { %8881 = vmatprep.subr.bf16.mxu0 %v10357_v0 }
0x35e0   : > { %8882 = vmatpush3.bf16.msra.mxu0 %v9513_v36 }
0x35e1   : > { %8883 = vmatprep.subr.bf16.mxu0 %v10357_v0 }
0x35e4   : > { %8884 = vmatpush3.bf16.msra.mxu0 %v9514_v37  ;;  %v7975_v37 = vld [vmem:[%s11963_s18 + $0x14] sm:$0xf] }
0x35e5   : > { %8885 = vmatprep.subr.bf16.mxu0 %v10357_v0 }
0x35e8   : > { %8886 = vmatpush3.bf16.msra.mxu0 %v9515_v38  ;;  %v5742_v38 = vsel %vm1584_vm2, %v7975_v37, 0 }
0x35e9   : > { %8915 = vmatprep.subr.bf16.mxu0 %v10357_v0 }
0x368b   : > { %v5256_v5 = vpop.f32.mrf.mxu0 }
0x368c   : > { %v5257_v4 = vadd.f32 %v7953_v3, %v5256_v5 }
0x368d   : > { %v8849_v33 = vpop.f32.mrf.mxu0 }
0x368e   : > { %v5263_v6 = vmul.f32 0.70710677, %v5257_v4  ;;  %v5262_v13 = vmul.f32 0.5, %v5257_v4 }
0x368f   : > { %v5259_v7 = vpop.f32.mrf.mxu0 }
0x3690   : > { %9628 = verf.f32 %v5263_v6 }
0x3691   : > { %v8850_v8 = vpop.f32.mrf.mxu0 }
0x369d   : > { %v9629_v10 = vpop.eup %9628 }
0x369e   : > { %v5265_v14 = vadd.f32 1.0, %v9629_v10 }
0x36a0   : > { %v5266_v16 = vmul.f32 %v5265_v14, %v5262_v13 }
0x36a2   : > { %v5267_v17 = vpack.c.bf16 %v5266_v16, %v5266_v16 }
0x36a4   : > { %8868 = vmatmul.mubr.bf16.vlgmr.msra.gmra.mxu1 %v5267_v17 }
0x36a5   : > { %8893 = vmatprep.mubr.msk.bf16.mxu1 %vm10358_vm0, %v10357_v0 }
0x3764   : > { %v5356_v18 = vpop.f32.mrf.mxu1 }
0x3765   : > { %v5357_v48 = vadd.f32 %v7962_v11, %v5356_v18 }
0x3766   : > { %v8869_v19 = vpop.f32.mrf.mxu1 }
0x3767   : > { %v5364_v20 = vadd.f32 %v5357_v48, %v5132_v57 }
0x3768   : > { %v5359_v15 = vpop.f32.mrf.mxu1 }
0x3769   : > { %5365 = vadd.xlane.f32.xlu1 %v5364_v20 }
0x376a   : > { %v8870_v23 = vpop.f32.mrf.mxu1 }
0x37f2   : > { %v5366_v26 = vpop.xlane.xlu1 %5365 }
0x37f3   : > { %v5367_v27 = vmul.f32 0.03125, %v5366_v26 }
0x37f5   : > { %v5368_v29 = vsub.f32 %v5364_v20, %v5367_v27 }
0x37f7   : > { %v5369_v30 = vsel %vm2169_vm5, %v5368_v29, 0.0 }
0x37f8   : > { %v5370_v31 = vmul.f32 %v5369_v30, %v5369_v30 }
0x37fa   : > { %5371 = vadd.xlane.f32.xlu1 %v5370_v31 }
0x3883   : > { %v5372_v39 = vpop.xlane.xlu1 %5371 }
0x3884   : > { %v5373_v40 = vmul.f32 0.03125, %v5372_v39 }
0x3886   : > { %v5374_v9 = vadd.f32 1e-05, %v5373_v40 }
0x3888   : > { %9630 = vrsqrt.f32 %v5374_v9  ;;  %v7974_v9 = vld [vmem:[%s11963_s18 + $0x10] sm:$0xf] }
0x3895   : > { %v9631_v42 = vpop.eup %9630 }
0x3896   : > { %v5376_v12 = vmul.f32 %v9631_v42, %v5368_v29 }
0x3898   : > { %v5383_v44 = vmul.f32 %v7971_v43, %v5376_v12  ;;  %v5788_v12 = vsel %vm1584_vm2, %v7974_v9, 0 }
0x389a   : > { %v11496_v45 = vadd.f32 %v7972_v21, %v5383_v44 }
0x389c   : > { %v5417_v46 = vpack.c.bf16 %v11496_v45, %v11496_v45 }
0x389e   : > { %8888 = vmatmul.mubr.bf16.vlgmr.msra.gmra.mxu0 %v5417_v46 }
0x389f   : > { %8917 = vmatprep.mubr.msk.bf16.mxu0 %vm10358_vm0, %v10357_v0  ;;  %8916 = vmatpush3.bf16.msra.mxu0 %v5742_v38 }
0x38a0   : > { %8927 = vmatprep.subr.bf16.mxu0 %v10357_v0 }
0x395e   : > { %v5506_v22 = vpop.f32.mrf.mxu0 }
0x395f   : > { %v5507_v49 = vadd.f32 %v7979_v47, %v5506_v22 }
0x3960   : > { %v8889_v50 = vpop.f32.mrf.mxu0 }
0x3961   : > { %v11503_v51 = vpack.c.bf16 %v5507_v49, %v5507_v49 }
0x3962   : > { %v5509_v52 = vpop.f32.mrf.mxu0 }
0x3963   : > { %5514 = vrot.lane.b32.xlu1 %v11503_v51, %s11973_s0 }
0x3964   : > { %v8890_v53 = vpop.f32.mrf.mxu0 }
0x39d5   : > { %v5515_v56 = vpop.permute.xlu1 %5514 }
0x39d6   : > { %v5520_v54 = vsel %vm1511_vm1, %v5515_v56, 0 }
0x39d7   : > { %8892 = vmatpush3.bf16.xpose.msra.mxu1 %v5520_v54 }
0x39d8   : > { %8897 = vmatprep.subr.bf16.mxu1 %v10357_v0 }
0x39de   : > { %8894 = vmatmul.mubr.msk.bf16.vlgmr.msra.gmra.mxu1 %vm1511_vm1, %v11503_v51 }
0x39df   : > { %8899 = vmatprep.mubr.msk.bf16.mxu1 %vm10358_vm0, %v10357_v0 }
0x3a9e   : > { %v5556_v55 = vpop.f32.mrf.mxu1 }
0x3a9f   : > { %v5562_v57 = vmul.f32 0.35355338, %v5556_v55 }
0x3aa0   : > { %v8895_v58 = vpop.f32.mrf.mxu1 }
0x3aa1   : > { %v5563_v59 = vsel %vm1565_vm4, -1e+30, %v5562_v57 }
0x3aa2   : > { %v5559_v61 = vpop.f32.mrf.mxu1  ;;  %v5564_v62 = vsel %vm1511_vm1, %v5563_v59, -inf }
0x3aa3   : > { %5565 = vmax.xlane.f32.xlu0 %v5564_v62 }
0x3aa4   : > { %v8896_v63 = vpop.f32.mrf.mxu1 }
0x3ab9   : > { %5576 = vrot.lane.b32.xlu0 %v11503_v51, %s11975_s6 }
0x3abd   : > { %5625 = vrot.lane.b32.xlu0 %v11503_v51, %s11974_s26 }
0x3b2c   : > { %v5566_v1 = vpop.xlane.xlu0 %5565 }
0x3b2d   : > { %v5567_v2 = vsub.f32 %v5563_v59, %v5566_v1 }
0x3b2f   : > { %v5568_v3 = vmul.f32 1.442695, %v5567_v2 }
0x3b30   : > { %v5577_v5 = vpop.permute.xlu0 %5576 }
0x3b31   : > { %9632 = vpow2.f32 %v5568_v3  ;;  %v5582_v4 = vsel %vm1584_vm2, %v5577_v5, 0 }
0x3b32   : > { %8898 = vmatpush3.bf16.msra.mxu1 %v5582_v4 }
0x3b33   : > { %8903 = vmatprep.subr.bf16.mxu1 %v10357_v0 }
0x3b34   : > { %v5626_v17 = vpop.permute.xlu0 %5625 }
0x3b3e   : > { %v9633_v33 = vpop.eup %9632 }
0x3b3f   : > { %v5570_v6 = vsel %vm1511_vm1, %v9633_v33, 0.0 }
0x3b40   : > { %5571 = vadd.xlane.f32.xlu1 %v5570_v6 }
0x3b51   : > { %5627 = vrot.lane.b32.xlu1 %v11503_v51, %s11983_s7 }
0x3bc9   : > { %v5572_v7 = vpop.xlane.xlu1 %5571 }
0x3bca   : > { %9634 = vrcp.f32 %v5572_v7 }
0x3bcd   : > { %v5628_v13 = vpop.permute.xlu1 %5627 }
0x3bce   : > { %v5633_v16 = vsel %vm1511_vm1, %v5628_v13, 0 }
0x3bd7   : > { %v9635_v8 = vpop.eup %9634 }
0x3bd8   : > { %v5574_v10 = vmul.f32 %v9635_v8, %v9633_v33 }
0x3bda   : > { %v5575_v14 = vpack.c.bf16 %v5574_v10, %v5574_v10 }
0x3bdc   : > { %8900 = vmatmul.mubr.msk.bf16.vlgmr.msra.gmra.mxu1 %vm1511_vm1, %v5575_v14 }
0x3bdd   : > { %8904 = vmatpush3.bf16.xpose.msra.mxu1 %v5633_v16  ;;  %8905 = vmatprep.mubr.msk.bf16.mxu1 %vm10358_vm0, %v10357_v0 }
0x3bde   : > { %8909 = vmatprep.subr.bf16.mxu1 %v10357_v0 }
0x3be4   : > { %8906 = vmatmul.mubr.msk.bf16.vlgmr.msra.gmra.mxu1 %vm1511_vm1, %v5626_v17 }
0x3be5   : > { %8911 = vmatprep.mubr.msk.bf16.mxu1 %vm10358_vm0, %v10357_v0 }
0x3c9c   : > { %v5618_v11 = vpop.f32.mrf.mxu1 }
0x3c9d   : > { %v5624_v21 = vpack.c.bf16 %v5618_v11, %v5618_v11 }
0x3c9e   : > { %v8901_v18 = vpop.f32.mrf.mxu1 }
0x3ca0   : > { %v5621_v48 = vpop.f32.mrf.mxu1 }
0x3ca2   : > { %v8902_v19 = vpop.f32.mrf.mxu1 }
0x3ca4   : > { %v5669_v20 = vpop.f32.mrf.mxu1 }
0x3ca5   : > { %v5675_v15 = vmul.f32 0.35355338, %v5669_v20 }
0x3ca6   : > { %v8907_v23 = vpop.f32.mrf.mxu1 }
0x3ca7   : > { %v5676_v24 = vsel %vm1565_vm4, -1e+30, %v5675_v15  ;;  %v7976_v23 = vld [vmem:[%s11963_s18 + $0x18] sm:$0xf] }
0x3ca8   : > { %v5672_v25 = vpop.f32.mrf.mxu1  ;;  %v5677_v26 = vsel %vm1511_vm1, %v5676_v24, -inf }
0x3ca9   : > { %5678 = vmax.xlane.f32.xlu0 %v5677_v26 }
0x3caa   : > { %v8908_v27 = vpop.f32.mrf.mxu1 }
0x3cbf   : > { %5689 = vrot.lane.b32.xlu0 %v11503_v51, %s11978_s8 }
0x3cc3   : > { %5830 = vrot.lane.b32.xlu0 %v11503_v51, %s11977_s5 }
0x3d32   : > { %v5679_v29 = vpop.xlane.xlu0 %5678 }
0x3d33   : > { %v5680_v30 = vsub.f32 %v5676_v24, %v5679_v29  ;;  %v5947_v24 = vsel %vm1584_vm2, %v7976_v23, 0 }
0x3d35   : > { %v5681_v31 = vmul.f32 1.442695, %v5680_v30 }
0x3d36   : > { %v5690_v32 = vpop.permute.xlu0 %5689 }
0x3d37   : > { %9636 = vpow2.f32 %v5681_v31  ;;  %v5695_v34 = vsel %vm1584_vm2, %v5690_v32, 0 }
0x3d38   : > { %8910 = vmatpush3.bf16.msra.mxu1 %v5695_v34 }
0x3d39   : > { %8921 = vmatprep.subr.bf16.mxu1 %v10357_v0 }
0x3d3a   : > { %v5831_v56 = vpop.permute.xlu0 %5830 }
0x3d44   : > { %v9637_v35 = vpop.eup %9636 }
0x3d45   : > { %v5683_v36 = vsel %vm1511_vm1, %v9637_v35, 0.0 }
0x3d46   : > { %5684 = vadd.xlane.f32.xlu1 %v5683_v36 }
0x3d57   : > { %5832 = vrot.lane.b32.xlu1 %v11503_v51, %s11976_s2 }
0x3dcf   : > { %v5685_v39 = vpop.xlane.xlu1 %5684 }
0x3dd0   : > { %9638 = vrcp.f32 %v5685_v39 }
0x3dd3   : > { %v5833_v44 = vpop.permute.xlu1 %5832 }
0x3dd4   : > { %v5838_v49 = vsel %vm1511_vm1, %v5833_v44, 0 }
0x3ddd   : > { %v9639_v40 = vpop.eup %9638 }
0x3dde   : > { %v5687_v42 = vmul.f32 %v9639_v40, %v9637_v35 }
0x3de0   : > { %v5688_v43 = vpack.c.bf16 %v5687_v42, %v5687_v42 }
0x3de2   : > { %8912 = vmatmul.mubr.msk.bf16.vlgmr.msra.gmra.mxu1 %vm1511_vm1, %v5688_v43 }
0x3de3   : > { %8922 = vmatpush3.bf16.msra.mxu1 %v5788_v12  ;;  %8923 = vmatprep.mubr.msk.bf16.mxu1 %vm10358_vm0, %v10357_v0 }
0x3de4   : > { %8933 = vmatprep.subr.bf16.mxu1 %v10357_v0 }
0x3dea   : > { %8924 = vmatmul.mubr.msk.bf16.vlgmr.msra.gmra.mxu1 %vm1511_vm1, %v5624_v21 }
0x3deb   : > { %8935 = vmatprep.mubr.msk.bf16.mxu1 %vm10358_vm0, %v10357_v0 }
0x3ea2   : > { %v5731_v46 = vpop.f32.mrf.mxu1 }
0x3ea3   : > { %v5737_v47 = vpack.c.bf16 %v5731_v46, %v5731_v46 }
0x3ea4   : > { %v8913_v22 = vpop.f32.mrf.mxu1 }
0x3ea5   : > { %8918 = vmatmul.mubr.msk.bf16.vlgmr.msra.gmra.mxu0 %vm1511_vm1, %v5737_v47  ;;  %v7977_v47 = vld [vmem:[%s11963_s18 + $0x1c] sm:$0xf] }
0x3ea6   : > { %8928 = vmatpush3.bf16.xpose.msra.mxu0 %v5838_v49  ;;  %v5734_v50 = vpop.f32.mrf.mxu1  ;;  %8929 = vmatprep.mubr.msk.bf16.mxu0 %vm10358_vm0, %v10357_v0  ;;  %v6107_v49 = vsel %vm1584_vm2, %v7977_v47, 0 }
0x3ea7   : > { %8939 = vmatprep.subr.bf16.mxu0 %v10357_v0 }
0x3ea8   : > { %v8914_v52 = vpop.f32.mrf.mxu1 }
0x3eaa   : > { %v11562_v53 = vpop.f32.mrf.mxu1 }
0x3eac   : > { %v8925_v54 = vpop.f32.mrf.mxu1 }
0x3ead   : > { %8930 = vmatmul.mubr.msk.bf16.vlgmr.msra.gmra.mxu0 %vm1511_vm1, %v5831_v56 }
0x3eae   : > { %v5827_v55 = vpop.f32.mrf.mxu1  ;;  %8941 = vmatprep.mubr.msk.bf16.mxu0 %vm10358_vm0, %v10357_v0  ;;  %8940 = vmatpush3.bf16.msra.mxu0 %v5947_v24 }
0x3eaf   : > { %8951 = vmatprep.subr.bf16.mxu0 %v10357_v0 }
0x3eb0   : > { %v8926_v57 = vpop.f32.mrf.mxu1 }
0x3eb1   : > { %v9517_v57 = vld [vmem:[#allocation19 + $0x70] sm:$0xff]  }
0x3f65   : > { %v11567_v58 = vpop.f32.mrf.mxu0 }
0x3f66   : > { %v5825_v21 = vadd.f32 %v11562_v53, %v11567_v58  ;;  %v9516_v53 = vld [vmem:[#allocation19 + $0x78] sm:$0xff]   ;;  %v9518_v58 = vld [vmem:[#allocation19 + $0x68] sm:$0xff]  }
0x3f67   : > { %v8919_v59 = vpop.f32.mrf.mxu0 }
0x3f68   : > { %v9519_v59 = vld [vmem:[#allocation19 + $0x60] sm:$0xff]  }
0x3f69   : > { %v5781_v61 = vpop.f32.mrf.mxu0 }
0x3f6a   : > { %v9520_v61 = vld [vmem:[#allocation19 + $0x58] sm:$0xff]  }
0x3f6b   : > { %v8920_v62 = vpop.f32.mrf.mxu0 }
0x3f6c   : > { %v9521_v62 = vld [vmem:[#allocation19 + $0x50] sm:$0xff]  }
0x3f6d   : > { %v5874_v63 = vpop.f32.mrf.mxu0 }
0x3f6e   : > { %v5880_v1 = vmul.f32 0.35355338, %v5874_v63  ;;  %v9522_v63 = vld [vmem:[#allocation19 + $0x48] sm:$0xff]  }
0x3f6f   : > { %v8931_v2 = vpop.f32.mrf.mxu0 }
0x3f70   : > { %v5881_v3 = vsel %vm1565_vm4, -1e+30, %v5880_v1  ;;  %v9523_v1 = vld [vmem:[#allocation19 + $0x40] sm:$0xff]  }
0x3f71   : > { %v5877_v5 = vpop.f32.mrf.mxu0  ;;  %v5882_v4 = vsel %vm1511_vm1, %v5881_v3, -inf }
0x3f72   : > { %5883 = vmax.xlane.f32.xlu0 %v5882_v4 }
0x3f73   : > { %v8932_v33 = vpop.f32.mrf.mxu0 }
0x3f88   : > { %5894 = vrot.lane.b32.xlu0 %v11503_v51, %s11979_s9 }
0x3f8c   : > { %5990 = vrot.lane.b32.xlu0 %v11503_v51, %s11965_s16 }
0x3ffb   : > { %v5884_v6 = vpop.xlane.xlu0 %5883 }
0x3ffc   : > { %v5885_v7 = vsub.f32 %v5881_v3, %v5884_v6  ;;  %v8000_v6 = vld [vmem:[%s11967_s4 + $0x1] ss:$0 sm:$0xff] }
0x3ffe   : > { %v5886_v8 = vmul.f32 1.442695, %v5885_v7 }
0x3fff   : > { %v5895_v10 = vpop.permute.xlu0 %5894 }
0x4000   : > { %9640 = vpow2.f32 %v5886_v8  ;;  %v5900_v13 = vsel %vm1584_vm2, %v5895_v10, 0 }
0x4001   : > { %8934 = vmatpush3.bf16.msra.mxu1 %v5900_v13 }
0x4002   : > { %8945 = vmatprep.subr.bf16.mxu1 %v10357_v0 }
0x4003   : > { %v5991_v15 = vpop.permute.xlu0 %5990 }
0x400d   : > { %v9641_v14 = vpop.eup %9640 }
0x400e   : > { %v5888_v16 = vsel %vm1511_vm1, %v9641_v14, 0.0 }
0x400f   : > { %5889 = vadd.xlane.f32.xlu1 %v5888_v16 }
0x4020   : > { %5992 = vrot.lane.b32.xlu1 %v11503_v51, %s11964_s22 }
0x4098   : > { %v5890_v17 = vpop.xlane.xlu1 %5889 }
0x4099   : > { %9642 = vrcp.f32 %v5890_v17 }
0x409c   : > { %v5993_v48 = vpop.permute.xlu1 %5992 }
0x409d   : > { %v5998_v20 = vsel %vm1511_vm1, %v5993_v48, 0 }
0x40a6   : > { %v9643_v11 = vpop.eup %9642 }
0x40a7   : > { %v5892_v18 = vmul.f32 %v9643_v11, %v9641_v14  ;;  %v8007_v11 = vld [vmem:[%s11972_s1 + $0x1] ss:$0 sm:$0xff] }
0x40a9   : > { %v5893_v19 = vpack.c.bf16 %v5892_v18, %v5892_v18 }
0x40ab   : > { %8936 = vmatmul.mubr.msk.bf16.vlgmr.msra.gmra.mxu1 %vm1511_vm1, %v5893_v19 }
0x40ac   : > { %8946 = vmatpush3.bf16.xpose.msra.mxu1 %v5998_v20  ;;  %8947 = vmatprep.mubr.msk.bf16.mxu1 %vm10358_vm0, %v10357_v0 }
0x40ad   : > { %8957 = vmatprep.subr.bf16.mxu1 %v10357_v0 }
0x40b3   : > { %8948 = vmatmul.mubr.msk.bf16.vlgmr.msra.gmra.mxu1 %vm1511_vm1, %v5991_v15 }
0x40b4   : > { %8959 = vmatprep.mubr.msk.bf16.mxu1 %vm10358_vm0, %v10357_v0  ;;  %8958 = vmatpush3.bf16.msra.mxu1 %v6107_v49 }
0x40b5   : > { %8983 = vmatprep.subr.bf16.mxu1 %v10357_v0 }
0x416b   : > { %v5936_v25 = vpop.f32.mrf.mxu1 }
0x416c   : > { %v5942_v26 = vpack.c.bf16 %v5936_v25, %v5936_v25 }
0x416d   : > { %v8937_v27 = vpop.f32.mrf.mxu1 }
0x416e   : > { %8942 = vmatmul.mubr.msk.bf16.vlgmr.msra.gmra.mxu0 %vm1511_vm1, %v5942_v26 }
0x416f   : > { %v5939_v29 = vpop.f32.mrf.mxu1  ;;  %8953 = vmatprep.mubr.msk.bf16.mxu0 %vm10358_vm0, %v10357_v0 }
0x4171   : > { %v8938_v30 = vpop.f32.mrf.mxu1 }
0x4173   : > { %v6034_v31 = vpop.f32.mrf.mxu1 }
0x4174   : > { %v6040_v32 = vmul.f32 0.35355338, %v6034_v31 }
0x4175   : > { %v8949_v34 = vpop.f32.mrf.mxu1 }
0x4176   : > { %v6041_v35 = vsel %vm1565_vm4, -1e+30, %v6040_v32  ;;  %v8003_v32 = vld [vmem:[%s11969_s13 + $0x1] ss:$0 sm:$0xff] }
0x4177   : > { %v6037_v36 = vpop.f32.mrf.mxu1  ;;  %v6042_v37 = vsel %vm1511_vm1, %v6041_v35, -inf }
0x4178   : > { %6043 = vmax.xlane.f32.xlu0 %v6042_v37 }
0x4179   : > { %v8950_v38 = vpop.f32.mrf.mxu1 }
0x418e   : > { %6054 = vrot.lane.b32.xlu0 %v11503_v51, %s11966_s15 }
0x4201   : > { %v6044_v39 = vpop.xlane.xlu0 %6043 }
0x4202   : > { %v6045_v40 = vsub.f32 %v6041_v35, %v6044_v39  ;;  %v8004_v35 = vld [vmem:[%s11970_s3 + $0x1] ss:$0 sm:$0xff] }
0x4204   : > { %v6046_v9 = vmul.f32 1.442695, %v6045_v40 }
0x4205   : > { %v6055_v42 = vpop.permute.xlu0 %6054 }
0x4206   : > { %9644 = vpow2.f32 %v6046_v9  ;;  %v6060_v43 = vsel %vm1584_vm2, %v6055_v42, 0 }
0x4207   : > { %8952 = vmatpush3.bf16.msra.mxu0 %v6060_v43 }
0x4208   : > { %8963 = vmatprep.subr.bf16.mxu0 %v10357_v0 }
0x4213   : > { %v9645_v28 = vpop.eup %9644 }
0x4214   : > { %v6048_v12 = vsel %vm1511_vm1, %v9645_v28, 0.0 }
0x4215   : > { %6049 = vadd.xlane.f32.xlu1 %v6048_v12 }
0x422e   : > { %v5983_v44 = vpop.f32.mrf.mxu0 }
0x422f   : > { %v11605_v51 = vadd.f32 %v5983_v44, %v5825_v21 }
0x4230   : > { %v8943_v46 = vpop.f32.mrf.mxu0 }
0x4232   : > { %v5986_v22 = vpop.f32.mrf.mxu0 }
0x4234   : > { %v8944_v50 = vpop.f32.mrf.mxu0 }
0x429e   : > { %v6050_v52 = vpop.xlane.xlu1 %6049 }
0x429f   : > { %9646 = vrcp.f32 %v6050_v52 }
0x42ac   : > { %v9647_v56 = vpop.eup %9646 }
0x42ad   : > { %v6052_v54 = vmul.f32 %v9647_v56, %v9645_v28 }
0x42af   : > { %v6053_v55 = vpack.c.bf16 %v6052_v54, %v6052_v54 }
0x42b1   : > { %8954 = vmatmul.mubr.msk.bf16.vlgmr.msra.gmra.mxu0 %vm1511_vm1, %v6053_v55 }
0x42b2   : > { %8979 = vmatprep.mubr.msk.bf16.mxu0 %vm10358_vm0, %v10357_v0  ;;  %8964 = vmatpush3.bf16.msra.mxu0 %v9516_v53 }
0x42b3   : > { %8965 = vmatprep.subr.bf16.mxu0 %v10357_v0 }
0x42b6   : > { %8966 = vmatpush3.bf16.msra.mxu0 %v9517_v57 }
0x42b7   : > { %8967 = vmatprep.subr.bf16.mxu0 %v10357_v0 }
0x42ba   : > { %8968 = vmatpush3.bf16.msra.mxu0 %v9518_v58 }
0x42bb   : > { %8969 = vmatprep.subr.bf16.mxu0 %v10357_v0 }
0x42be   : > { %8970 = vmatpush3.bf16.msra.mxu0 %v9519_v59 }
0x42bf   : > { %8971 = vmatprep.subr.bf16.mxu0 %v10357_v0 }
0x42c2   : > { %8972 = vmatpush3.bf16.msra.mxu0 %v9520_v61 }
0x42c3   : > { %8973 = vmatprep.subr.bf16.mxu0 %v10357_v0 }
0x42c6   : > { %8974 = vmatpush3.bf16.msra.mxu0 %v9521_v62 }
0x42c7   : > { %8975 = vmatprep.subr.bf16.mxu0 %v10357_v0 }
0x42ca   : > { %8976 = vmatpush3.bf16.msra.mxu0 %v9522_v63 }
0x42cb   : > { %8977 = vmatprep.subr.bf16.mxu0 %v10357_v0 }
0x42ce   : > { %8978 = vmatpush3.bf16.msra.mxu0 %v9523_v1 }
0x42cf   : > { %9003 = vmatprep.subr.bf16.mxu0 %v10357_v0 }
0x4371   : > { %v6096_v2 = vpop.f32.mrf.mxu0 }
0x4372   : > { %v6102_v3 = vpack.c.bf16 %v6096_v2, %v6096_v2 }
0x4373   : > { %v8955_v5 = vpop.f32.mrf.mxu0 }
0x4374   : > { %8960 = vmatmul.mubr.msk.bf16.vlgmr.msra.gmra.mxu1 %vm1511_vm1, %v6102_v3 }
0x4375   : > { %8984 = vmatpush3.bf16.msra.mxu1 %v9516_v53  ;;  %v6099_v4 = vpop.f32.mrf.mxu0  ;;  %8999 = vmatprep.mubr.msk.bf16.mxu1 %vm10358_vm0, %v10357_v0 }
0x4376   : > { %8985 = vmatprep.subr.bf16.mxu1 %v10357_v0 }
0x4377   : > { %v8956_v33 = vpop.f32.mrf.mxu0 }
0x4379   : > { %8986 = vmatpush3.bf16.msra.mxu1 %v9517_v57 }
0x437a   : > { %8987 = vmatprep.subr.bf16.mxu1 %v10357_v0 }
0x437d   : > { %8988 = vmatpush3.bf16.msra.mxu1 %v9518_v58 }
0x437e   : > { %8989 = vmatprep.subr.bf16.mxu1 %v10357_v0 }
0x4381   : > { %8990 = vmatpush3.bf16.msra.mxu1 %v9519_v59 }
0x4382   : > { %8991 = vmatprep.subr.bf16.mxu1 %v10357_v0 }
0x4385   : > { %8992 = vmatpush3.bf16.msra.mxu1 %v9520_v61 }
0x4386   : > { %8993 = vmatprep.subr.bf16.mxu1 %v10357_v0 }
0x4389   : > { %8994 = vmatpush3.bf16.msra.mxu1 %v9521_v62 }
0x438a   : > { %8995 = vmatprep.subr.bf16.mxu1 %v10357_v0 }
0x438d   : > { %8996 = vmatpush3.bf16.msra.mxu1 %v9522_v63 }
0x438e   : > { %8997 = vmatprep.subr.bf16.mxu1 %v10357_v0 }
0x4391   : > { %8998 = vmatpush3.bf16.msra.mxu1 %v9523_v1 }
0x4392   : > { %9009 = vmatprep.subr.bf16.mxu1 %v10357_v0 }
0x4394   : > { %9000 = vmatmul.mubr.bf16.vlgmr.msra.gmra.mxu1 %v11345_v60 }
0x4395   : > { %9011 = vmatprep.mubr.msk.bf16.mxu1 %vm10358_vm0, %v10357_v0 }
0x4434   : > { %v6143_v7 = vpop.f32.mrf.mxu1 }
0x4435   : > { %v6149_v8 = vadd.f32 %v6143_v7, %v11605_v51 }
0x4436   : > { %v8961_v10 = vpop.f32.mrf.mxu1 }
0x4437   : > { %v6156_v13 = vadd.f32 %v8000_v6, %v6149_v8 }
0x4438   : > { %v6146_v14 = vpop.f32.mrf.mxu1 }
0x4439   : > { %v6161_v16 = vadd.f32 %v6156_v13, %v11496_v45 }
0x443a   : > { %v8962_v17 = vpop.f32.mrf.mxu1 }
0x443b   : > { %6162 = vadd.xlane.f32.xlu1 %v6161_v16  ;;  %v6209_v17 = vld [vmem:[#allocation20 + $0x14] sm:$0xf] }
0x4454   : > { %v6343_v18 = vpop.f32.mrf.mxu1 }
0x4455   : > { %v6344_v48 = vadd.f32 %v8007_v11, %v6343_v18 }
0x4456   : > { %v9001_v19 = vpop.f32.mrf.mxu1 }
0x4457   : > { %v11639_v20 = vpack.c.bf16 %v6344_v48, %v6344_v48 }
0x4458   : > { %v6346_v60 = vpop.f32.mrf.mxu1 }
0x4459   : > { %6465 = vrot.lane.b32.xlu0 %v11639_v20, %s11983_s7 }
0x445a   : > { %v9002_v15 = vpop.f32.mrf.mxu1 }
0x445b   : > { %v6208_v15 = vld [vmem:[#allocation20 + $0x10] sm:$0xf] }
0x44c4   : > { %v6163_v23 = vpop.xlane.xlu1 %6162 }
0x44c5   : > { %v6164_v24 = vmul.f32 0.03125, %v6163_v23 }
0x44c7   : > { %v6165_v25 = vsub.f32 %v6161_v16, %v6164_v24 }
0x44c9   : > { %v6166_v45 = vsel %vm2169_vm5, %v6165_v25, 0.0 }
0x44ca   : > { %v6167_v26 = vmul.f32 %v6166_v45, %v6166_v45 }
0x44cb   : > { %v6466_v43 = vpop.permute.xlu0 %6465 }
0x44cc   : > { %6168 = vadd.xlane.f32.xlu1 %v6167_v26  ;;  %v6471_v44 = vsel %vm1511_vm1, %v6466_v43, 0 }
0x44dd   : > { %6352 = vrot.lane.b32.xlu1 %v11639_v20, %s11973_s0 }
0x4555   : > { %v6169_v27 = vpop.xlane.xlu1 %6168 }
0x4556   : > { %v6170_v29 = vmul.f32 0.03125, %v6169_v27 }
0x4558   : > { %v6171_v30 = vadd.f32 1e-05, %v6170_v29 }
0x4559   : > { %v6353_v38 = vpop.permute.xlu1 %6352 }
0x455a   : > { %9648 = vrsqrt.f32 %v6171_v30  ;;  %v6358_v40 = vsel %vm1511_vm1, %v6353_v38, 0 }
0x4567   : > { %v9649_v31 = vpop.eup %9648 }
0x4568   : > { %v6173_v34 = vmul.f32 %v9649_v31, %v6165_v25  ;;  %v6625_v25 = vsel %vm1584_vm2, %v6208_v15, 0 }
0x456a   : > { %v6180_v36 = vmul.f32 %v8003_v32, %v6173_v34 }
0x456c   : > { %v11649_v37 = vadd.f32 %v8004_v35, %v6180_v36 }
0x456e   : > { %v6214_v39 = vpack.c.bf16 %v11649_v37, %v11649_v37 }
0x4570   : > { %8980 = vmatmul.mubr.bf16.vlgmr.msra.gmra.mxu0 %v6214_v39 }
0x4571   : > { %9004 = vmatpush3.bf16.xpose.msra.mxu0 %v6358_v40  ;;  %9005 = vmatprep.mubr.msk.bf16.mxu0 %vm10358_vm0, %v10357_v0 }
0x4572   : > { %9015 = vmatprep.subr.bf16.mxu0 %v10357_v0 }
0x4630   : > { %v6303_v9 = vpop.f32.mrf.mxu0 }
0x4631   : > { %v6304_v42 = vadd.f32 %v8007_v11, %v6303_v9  ;;  %v6579_v11 = vsel %vm1584_vm2, %v6209_v17, 0 }
0x4632   : > { %v8981_v28 = vpop.f32.mrf.mxu0 }
0x4633   : > { %v11657_v12 = vpack.c.bf16 %v6304_v42, %v6304_v42 }
0x4634   : > { %v6306_v21 = vpop.f32.mrf.mxu0 }
0x4635   : > { %6463 = vrot.lane.b32.xlu0 %v11657_v12, %s11974_s26  ;;  %9006 = vmatmul.mubr.msk.bf16.vlgmr.msra.gmra.mxu0 %vm1511_vm1, %v11657_v12 }
0x4636   : > { %9016 = vmatpush3.bf16.xpose.msra.mxu0 %v6471_v44  ;;  %v8982_v51 = vpop.f32.mrf.mxu0  ;;  %9017 = vmatprep.mubr.msk.bf16.mxu0 %vm10358_vm0, %v10357_v0 }
0x4637   : > { %9027 = vmatprep.subr.bf16.mxu0 %v10357_v0 }
0x46a7   : > { %v6464_v46 = vpop.permute.xlu0 %6463 }
0x46a8   : > { %9018 = vmatmul.mubr.msk.bf16.vlgmr.msra.gmra.mxu0 %vm1511_vm1, %v6464_v46 }
0x46a9   : > { %9029 = vmatprep.mubr.msk.bf16.mxu0 %vm10358_vm0, %v10357_v0  ;;  %9028 = vmatpush3.bf16.msra.mxu0 %v6579_v11 }
0x46aa   : > { %9039 = vmatprep.subr.bf16.mxu0 %v10357_v0 }
0x46f5   : > { %v6394_v47 = vpop.f32.mrf.mxu0 }
0x46f6   : > { %v6400_v22 = vmul.f32 0.35355338, %v6394_v47 }
0x46f7   : > { %v9007_v49 = vpop.f32.mrf.mxu0 }
0x46f8   : > { %v6401_v50 = vsel %vm1511_vm1, %v6400_v22, -inf }
0x46f9   : > { %6402 = vmax.xlane.f32.xlu0 %v6401_v50  ;;  %v6397_v52 = vpop.f32.mrf.mxu0 }
0x46fb   : > { %v9008_v56 = vpop.f32.mrf.mxu0 }
0x4768   : > { %v6507_v54 = vpop.f32.mrf.mxu0 }
0x4769   : > { %v6513_v55 = vmul.f32 0.35355338, %v6507_v54 }
0x476a   : > { %v9019_v53 = vpop.f32.mrf.mxu0 }
0x476b   : > { %v6514_v57 = vsel %vm1511_vm1, %v6513_v55, -inf }
0x476c   : > { %6515 = vmax.xlane.f32.xlu1 %v6514_v57  ;;  %v6510_v58 = vpop.f32.mrf.mxu0 }
0x476e   : > { %v9020_v59 = vpop.f32.mrf.mxu0 }
0x477d   : > { %6413 = vrot.lane.b32.xlu1 %v11639_v20, %s11975_s6  ;;  %s8063_s6 = sshll.u32 %s10578_s28, 7  ;;  %s10371_s28 = smov [#allocation34]  }
0x477e   : > { %s10196_s26 = sshll.u32 %s10371_s28, 4  ;;  %s10197_s26 = int_to_ptr.vmem [resolvable:$false] %s10196_s26 }
0x4781   : > { %6669 = vrot.lane.b32.xlu1 %v11639_v20, %s11976_s2 }
0x4782   : > { %v6403_v61 = vpop.xlane.xlu0 %6402 }
0x4783   : > { %v6404_v62 = vsub.f32 %v6400_v22, %v6403_v61 }
0x4785   : > { %v6405_v63 = vmul.f32 1.442695, %v6404_v62  ;;  %6667 = vrot.lane.b32.xlu1 %v11657_v12, %s11977_s5  ;;  %s11984_s5 = sld [smem:[#allocation72_spill]] }
0x4787   : > { %9650 = vpow2.f32 %v6405_v63 }
0x4794   : > { %v9651_v1 = vpop.eup %9650 }
0x4795   : > { %v6407_v2 = vsel %vm1511_vm1, %v9651_v1, 0.0 }
0x4796   : > { %6408 = vadd.xlane.f32.xlu0 %v6407_v2 }
0x47f5   : > { %v6516_v3 = vpop.xlane.xlu1 %6515 }
0x47f6   : > { %v6517_v5 = vsub.f32 %v6513_v55, %v6516_v3 }
0x47f8   : > { %v6518_v4 = vmul.f32 1.442695, %v6517_v5 }
0x47f9   : > { %v6414_v33 = vpop.permute.xlu1 %6413 }
0x47fa   : > { %9652 = vpow2.f32 %v6518_v4  ;;  %v6419_v6 = vsel %vm1584_vm2, %v6414_v33, 0  ;;  %v6210_v4 = vld [vmem:[#allocation20 + $0x18] sm:$0xf] }
0x47fb   : > { %9010 = vmatpush3.bf16.msra.mxu1 %v6419_v6  ;;  %v6783_v33 = vsel %vm1584_vm2, %v6210_v4, 0 }
0x47fc   : > { %9021 = vmatprep.subr.bf16.mxu1 %v10357_v0 }
0x47fd   : > { %v6670_v31 = vpop.permute.xlu1 %6669 }
0x47fe   : > { %v6675_v36 = vsel %vm1511_vm1, %v6670_v31, 0 }
0x4801   : > { %v6668_v40 = vpop.permute.xlu1 %6667 }
0x4807   : > { %v9653_v7 = vpop.eup %9652 }
0x4808   : > { %v6520_v8 = vsel %vm1511_vm1, %v9653_v7, 0.0 }
0x4809   : > { %6521 = vadd.xlane.f32.xlu0 %v6520_v8 }
0x481f   : > { %v6409_v10 = vpop.xlane.xlu0 %6408  ;;  %6526 = vrot.lane.b32.xlu0 %v11639_v20, %s11978_s8  ;;  %s11985_s8 = sld [smem:[#allocation78_spill]] }
0x4820   : > { %9654 = vrcp.f32 %v6409_v10 }
0x4825   : > { %p11986_p5 = scmp.ne.s32.totalorder %s11985_s8, 0 }
0x482d   : > { %v9655_v13 = vpop.eup %9654 }
0x482e   : > { %v6411_v14 = vmul.f32 %v9655_v13, %v9651_v1 }
0x4830   : > { %v6412_v16 = vpack.c.bf16 %v6411_v14, %v6411_v14 }
0x4832   : > { %9012 = vmatmul.mubr.msk.bf16.vlgmr.msra.gmra.mxu1 %vm1511_vm1, %v6412_v16 }
0x4833   : > { %9023 = vmatprep.mubr.msk.bf16.mxu1 %vm10358_vm0, %v10357_v0 }
0x4892   : > { %v6522_v18 = vpop.xlane.xlu0 %6521 }
0x4893   : > { %9656 = vrcp.f32 %v6522_v18 }
0x4896   : > { %v6527_v48 = vpop.permute.xlu0 %6526 }
0x4897   : > { %v6532_v19 = vsel %vm1584_vm2, %v6527_v48, 0 }
0x4898   : > { %9022 = vmatpush3.bf16.msra.mxu1 %v6532_v19 }
0x4899   : > { %9033 = vmatprep.subr.bf16.mxu1 %v10357_v0 }
0x48a0   : > { %v9657_v60 = vpop.eup %9656 }
0x48a1   : > { %v6524_v23 = vmul.f32 %v9657_v60, %v9653_v7 }
0x48a3   : > { %v6525_v24 = vpack.c.bf16 %v6524_v23, %v6524_v23 }
0x48a5   : > { %9024 = vmatmul.mubr.msk.bf16.vlgmr.msra.gmra.mxu1 %vm1511_vm1, %v6525_v24 }
0x48a6   : > { %9034 = vmatpush3.bf16.msra.mxu1 %v6625_v25  ;;  %9035 = vmatprep.mubr.msk.bf16.mxu1 %vm10358_vm0, %v10357_v0 }
0x48a7   : > { %9045 = vmatprep.subr.bf16.mxu1 %v10357_v0 }
0x48f2   : > { %v6455_v45 = vpop.f32.mrf.mxu1 }
0x48f3   : > { %v6461_v26 = vpack.c.bf16 %v6455_v45, %v6455_v45 }
0x48f4   : > { %v9013_v27 = vpop.f32.mrf.mxu1 }
0x48f5   : > { %9036 = vmatmul.mubr.msk.bf16.vlgmr.msra.gmra.mxu1 %vm1511_vm1, %v6461_v26 }
0x48f6   : > { %v6458_v29 = vpop.f32.mrf.mxu1  ;;  %9047 = vmatprep.mubr.msk.bf16.mxu1 %vm10358_vm0, %v10357_v0 }
0x48f7   : > { %v6211_v29 = vld [vmem:[#allocation20 + $0x1c] sm:$0xf] }
0x48f8   : > { %v9014_v30 = vpop.f32.mrf.mxu1 }
0x48f9   : > { %v6942_v30 = vsel %vm1584_vm2, %v6211_v29, 0 }
0x4965   : > { %v6568_v32 = vpop.f32.mrf.mxu1 }
0x4966   : > { %v6574_v34 = vpack.c.bf16 %v6568_v32, %v6568_v32 }
0x4967   : > { %v9025_v35 = vpop.f32.mrf.mxu1 }
0x4968   : > { %9030 = vmatmul.mubr.msk.bf16.vlgmr.msra.gmra.mxu0 %vm1511_vm1, %v6574_v34 }
0x4969   : > { %9040 = vmatpush3.bf16.xpose.msra.mxu0 %v6675_v36  ;;  %v6571_v38 = vpop.f32.mrf.mxu1  ;;  %9041 = vmatprep.mubr.msk.bf16.mxu0 %vm10358_vm0, %v10357_v0 }
0x496a   : > { %9051 = vmatprep.subr.bf16.mxu0 %v10357_v0 }
0x496b   : > { %v9026_v39 = vpop.f32.mrf.mxu1 }
0x4970   : > { %9042 = vmatmul.mubr.msk.bf16.vlgmr.msra.gmra.mxu0 %vm1511_vm1, %v6668_v40 }
0x4971   : > { %9053 = vmatprep.mubr.msk.bf16.mxu0 %vm10358_vm0, %v10357_v0  ;;  %9052 = vmatpush3.bf16.msra.mxu0 %v6783_v33 }
0x4972   : > { %9063 = vmatprep.subr.bf16.mxu0 %v10357_v0 }
0x49b5   : > { %v11707_v9 = vpop.f32.mrf.mxu1 }
0x49b7   : > { %v9037_v42 = vpop.f32.mrf.mxu1 }
0x49b9   : > { %v6664_v43 = vpop.f32.mrf.mxu1 }
0x49bb   : > { %v9038_v28 = vpop.f32.mrf.mxu1 }
0x4a28   : > { %v11709_v21 = vpop.f32.mrf.mxu0 }
0x4a29   : > { %v6662_v25 = vadd.f32 %v11707_v9, %v11709_v21  ;;  %v8028_v21 = vld [vmem:[%s11980_s10 + $0x1] ss:$0 sm:$0xff] }
0x4a2a   : > { %v9031_v44 = vpop.f32.mrf.mxu0 }
0x4a2c   : > { %v6618_v51 = vpop.f32.mrf.mxu0 }
0x4a2e   : > { %v9032_v46 = vpop.f32.mrf.mxu0 }
0x4a30   : > { %v6711_v47 = vpop.f32.mrf.mxu0 }
0x4a31   : > { %v6717_v22 = vmul.f32 0.35355338, %v6711_v47 }
0x4a32   : > { %v9043_v49 = vpop.f32.mrf.mxu0 }
0x4a33   : > { %v6718_v50 = vsel %vm1511_vm1, %v6717_v22, -inf }
0x4a34   : > { %6719 = vmax.xlane.f32.xlu0 %v6718_v50  ;;  %v6714_v52 = vpop.f32.mrf.mxu0 }
0x4a35   : > { %v9524_v52 = vld [vmem:[#allocation25 + $0x78] sm:$0xff]  }
0x4a36   : > { %v9044_v56 = vpop.f32.mrf.mxu0 }
0x4a37   : > { %v9525_v56 = vld [vmem:[#allocation25 + $0x70] sm:$0xff]  }
0x4a4a   : > { %6730 = vrot.lane.b32.xlu0 %v11639_v20, %s11979_s9  ;;  %s1372_s9 = sand.u32 1, %s10288_s23  }
0x4a4b   : > { %s7766_s2 = sshll.u32 %s1372_s9, 3 }
0x4a4e   : > { %6826 = vrot.lane.b32.xlu0 %v11657_v12, %s11965_s16  ;;  %s7401_s16 = scalar_lea.sflag [#allocation4], %s1372_s9 }
0x4abd   : > { %v6720_v54 = vpop.xlane.xlu0 %6719 }
0x4abe   : > { %v6721_v55 = vsub.f32 %v6717_v22, %v6720_v54 }
0x4ac0   : > { %v6722_v53 = vmul.f32 1.442695, %v6721_v55 }
0x4ac1   : > { %v6731_v57 = vpop.permute.xlu0 %6730 }
0x4ac2   : > { %9658 = vpow2.f32 %v6722_v53  ;;  %v6736_v58 = vsel %vm1584_vm2, %v6731_v57, 0 }
0x4ac3   : > { %9046 = vmatpush3.bf16.msra.mxu1 %v6736_v58 }
0x4ac4   : > { %9057 = vmatprep.subr.bf16.mxu1 %v10357_v0 }
0x4ac5   : > { %v6827_v5 = vpop.permute.xlu0 %6826 }
0x4acf   : > { %v9659_v59 = vpop.eup %9658 }
0x4ad0   : > { %v6724_v61 = vsel %vm1511_vm1, %v9659_v59, 0.0 }
0x4ad1   : > { %6725 = vadd.xlane.f32.xlu1 %v6724_v61  ;;  %v9528_v61 = vld [vmem:[#allocation25 + $0x58] sm:$0xff]  }
0x4ae2   : > { %6828 = vrot.lane.b32.xlu1 %v11639_v20, %s11964_s22  ;;  %s11785_s22 = scalar_lea.hbm %s11984_s5, %s8063_s6 }
0x4b5a   : > { %v6726_v62 = vpop.xlane.xlu1 %6725 }
0x4b5b   : > { %9660 = vrcp.f32 %v6726_v62  ;;  %v9529_v62 = vld [vmem:[#allocation25 + $0x50] sm:$0xff]  }
0x4b5e   : > { %v6829_v1 = vpop.permute.xlu1 %6828 }
0x4b5f   : > { %v6834_v3 = vsel %vm1511_vm1, %v6829_v1, 0  ;;  %v9532_v1 = vld [vmem:[#allocation26 + $0x78] sm:$0xff]  }
0x4b68   : > { %v9661_v12 = vpop.eup %9660 }
0x4b69   : > { %v6728_v63 = vmul.f32 %v9661_v12, %v9659_v59  ;;  %v9526_v59 = vld [vmem:[#allocation25 + $0x68] sm:$0xff]  }
0x4b6a   : > { %v9530_v12 = vld [vmem:[#allocation25 + $0x48] sm:$0xff]  }
0x4b6b   : > { %v6729_v2 = vpack.c.bf16 %v6728_v63, %v6728_v63  ;;  %v9531_v63 = vld [vmem:[#allocation25 + $0x40] sm:$0xff]  }
0x4b6d   : > { %9048 = vmatmul.mubr.msk.bf16.vlgmr.msra.gmra.mxu1 %vm1511_vm1, %v6729_v2  ;;  %v9533_v2 = vld [vmem:[#allocation26 + $0x70] sm:$0xff]  }
0x4b6e   : > { %9058 = vmatpush3.bf16.xpose.msra.mxu1 %v6834_v3  ;;  %9059 = vmatprep.mubr.msk.bf16.mxu1 %vm10358_vm0, %v10357_v0 }
0x4b6f   : > { %9069 = vmatprep.subr.bf16.mxu1 %v10357_v0 }
0x4b75   : > { %9060 = vmatmul.mubr.msk.bf16.vlgmr.msra.gmra.mxu1 %vm1511_vm1, %v6827_v5 }
0x4b76   : > { %9071 = vmatprep.mubr.msk.bf16.mxu1 %vm10358_vm0, %v10357_v0  ;;  %9070 = vmatpush3.bf16.msra.mxu1 %v6942_v30 }
0x4b77   : > { %9095 = vmatprep.subr.bf16.mxu1 %v10357_v0 }
0x4c2d   : > { %v6772_v6 = vpop.f32.mrf.mxu1 }
0x4c2e   : > { %v6778_v7 = vpack.c.bf16 %v6772_v6, %v6772_v6  ;;  %v8029_v6 = vld [vmem:[#allocation22 + $0x1] ss:$0 sm:$0xff] }
0x4c2f   : > { %v9049_v8 = vpop.f32.mrf.mxu1 }
0x4c30   : > { %9054 = vmatmul.mubr.msk.bf16.vlgmr.msra.gmra.mxu0 %vm1511_vm1, %v6778_v7  ;;  %v8030_v8 = vld [vmem:[#allocation23 + $0x1] ss:$0 sm:$0xff] }
0x4c31   : > { %v6775_v10 = vpop.f32.mrf.mxu1  ;;  %9065 = vmatprep.mubr.msk.bf16.mxu0 %vm10358_vm0, %v10357_v0 }
0x4c33   : > { %v9050_v13 = vpop.f32.mrf.mxu1 }
0x4c35   : > { %v6870_v14 = vpop.f32.mrf.mxu1 }
0x4c36   : > { %v6876_v16 = vmul.f32 0.35355338, %v6870_v14 }
0x4c37   : > { %v9061_v17 = vpop.f32.mrf.mxu1 }
0x4c38   : > { %v6877_v11 = vsel %vm1511_vm1, %v6876_v16, -inf  ;;  %v9535_v17 = vld [vmem:[#allocation26 + $0x60] sm:$0xff]  }
0x4c39   : > { %6878 = vmax.xlane.f32.xlu1 %v6877_v11  ;;  %v6873_v18 = vpop.f32.mrf.mxu1  ;;  %v9536_v11 = vld [vmem:[#allocation26 + $0x58] sm:$0xff]  }
0x4c3a   : > { %v9537_v18 = vld [vmem:[#allocation26 + $0x50] sm:$0xff]  }
0x4c3b   : > { %v9062_v48 = vpop.f32.mrf.mxu1 }
0x4c3c   : > { %v9538_v48 = vld [vmem:[#allocation26 + $0x48] sm:$0xff]  }
0x4cc2   : > { %v6879_v19 = vpop.xlane.xlu1 %6878 }
0x4cc3   : > { %v6880_v60 = vsub.f32 %v6876_v16, %v6879_v19  ;;  %v9534_v16 = vld [vmem:[#allocation26 + $0x68] sm:$0xff]   ;;  %v9539_v19 = vld [vmem:[#allocation26 + $0x40] sm:$0xff]  }
0x4cc5   : > { %v6881_v15 = vmul.f32 1.442695, %v6880_v60  ;;  %v8033_v60 = vld [vmem:[%s11981_s11 + $0x1] ss:$0 sm:$0xff] }
0x4cc7   : > { %9662 = vpow2.f32 %v6881_v15 }
0x4cd4   : > { %v9663_v23 = vpop.eup %9662 }
0x4cd5   : > { %v6883_v24 = vsel %vm1511_vm1, %v9663_v23, 0.0 }
0x4cd6   : > { %6884 = vadd.xlane.f32.xlu0 %v6883_v24 }
0x4cec   : > { %6889 = vrot.lane.b32.xlu0 %v11639_v20, %s11966_s15  ;;  %s1374_s15 = scalar_lea.vmem [#allocation34], %s7766_s2  ;;  %s10198_s2 = scalar_lea.vmem %s10197_s26, 256 }
0x4ced   : > { %s7414_s7 = sshll.u32 %s1374_s15, 4  ;;  %s11787_s7 = int_to_ptr.vmem [resolvable:$true] %s7414_s7 }
0x4cee   : > { %s10192_s0 = scalar_lea.vmem %s11787_s7, 128  ;;  %p10199_p1 = scmp.lt.s32.totalorder %s11787_s7, %s10197_s26 }
0x4cef   : > { %p10193_p9 = scmp.ne.s32.totalorder %s11787_s7, %s10192_s0  ;;  %p10200_p3 = scmp.lt.s32.totalorder %s10198_s2, %s10192_s0 }
0x4cf0   : > { %v6819_v45 = vpop.f32.mrf.mxu0 }
0x4cf1   : > { %v6825_v26 = vadd.f32 %v6819_v45, %v6662_v25  ;;  %p10194_p0 = pnand %p10193_p9, %p11986_p5  ;;  %p10201_p2 = por %p10200_p3, %p10199_p1 }
0x4cf2   : > { %v9055_v27 = vpop.f32.mrf.mxu0 }
0x4cf3   : > { %p10195_p6 = pneg %p10194_p0 }
0x4cf4   : > { %v6822_v31 = vpop.f32.mrf.mxu0 }
0x4cf5   : > { %p10202_p13 = pnand %p10201_p2, %p10195_p6 }
0x4cf6   : > { %v9056_v32 = vpop.f32.mrf.mxu0 }
0x4d5f   : > { %v6885_v34 = vpop.xlane.xlu0 %6884 }
0x4d60   : > { %9664 = vrcp.f32 %v6885_v34  ;;  %v8042_v34 = vld [vmem:[%s11982_s12 + $0x1] ss:$0 sm:$0xff] }
0x4d63   : > { %v6890_v35 = vpop.permute.xlu0 %6889 }
0x4d64   : > { %v6895_v20 = vsel %vm1584_vm2, %v6890_v35, 0 }
0x4d65   : > { %9064 = vmatpush3.bf16.msra.mxu0 %v6895_v20 }
0x4d66   : > { %9075 = vmatprep.subr.bf16.mxu0 %v10357_v0 }
0x4d6d   : > { %v9665_v36 = vpop.eup %9664 }
0x4d6e   : > { %v6887_v38 = vmul.f32 %v9665_v36, %v9663_v23 }
0x4d70   : > { %v6888_v39 = vpack.c.bf16 %v6887_v38, %v6887_v38 }
0x4d72   : > { %9066 = vmatmul.mubr.msk.bf16.vlgmr.msra.gmra.mxu0 %vm1511_vm1, %v6888_v39 }
0x4d73   : > { %9091 = vmatprep.mubr.msk.bf16.mxu0 %vm10358_vm0, %v10357_v0  ;;  %9076 = vmatpush3.bf16.msra.mxu0 %v9524_v52 }
0x4d74   : > { %9077 = vmatprep.subr.bf16.mxu0 %v10357_v0 }
0x4d77   : > { %9078 = vmatpush3.bf16.msra.mxu0 %v9525_v56 }
0x4d78   : > { %9079 = vmatprep.subr.bf16.mxu0 %v10357_v0 }
0x4d7b   : > { %9080 = vmatpush3.bf16.msra.mxu0 %v9526_v59 }
0x4d7c   : > { %9081 = vmatprep.subr.bf16.mxu0 %v10357_v0 }
0x4e32   : > { %v6931_v40 = vpop.f32.mrf.mxu0 }
0x4e33   : > { %v6937_v9 = vpack.c.bf16 %v6931_v40, %v6931_v40 }
0x4e34   : > { %v9067_v42 = vpop.f32.mrf.mxu0 }
0x4e35   : > { %9072 = vmatmul.mubr.msk.bf16.vlgmr.msra.gmra.mxu1 %vm1511_vm1, %v6937_v9  ;;  %v9540_v9 = vld [vmem:[#allocation31 + $0x38] sm:$0xff]   ;;  %v9541_v42 = vld [vmem:[#allocation31 + $0x30] sm:$0xff]  }
0x4e36   : > { %v6934_v43 = vpop.f32.mrf.mxu0  ;;  %9111 = vmatprep.mubr.msk.bf16.mxu1 %vm10358_vm0, %v10357_v0  ;;  %9096 = vmatpush3.bf16.msra.mxu1 %v9532_v1 }
0x4e37   : > { %9097 = vmatprep.subr.bf16.mxu1 %v10357_v0 }
0x4e38   : > { %v9068_v28 = vpop.f32.mrf.mxu0 }
0x4e3a   : > { %9098 = vmatpush3.bf16.msra.mxu1 %v9533_v2 }
0x4e3b   : > { %9099 = vmatprep.subr.bf16.mxu1 %v10357_v0 }
0x4e3e   : > { %9100 = vmatpush3.bf16.msra.mxu1 %v9534_v16 }
0x4e3f   : > { %9101 = vmatprep.subr.bf16.mxu1 %v10357_v0 }
0x4e42   : > { %9102 = vmatpush3.bf16.msra.mxu1 %v9535_v17 }
0x4e43   : > { %9103 = vmatprep.subr.bf16.mxu1 %v10357_v0 }
0x4e46   : > { %9104 = vmatpush3.bf16.msra.mxu1 %v9536_v11 }
0x4e47   : > { %9105 = vmatprep.subr.bf16.mxu1 %v10357_v0 }
0x4e4a   : > { %9106 = vmatpush3.bf16.msra.mxu1 %v9537_v18 }
0x4e4b   : > { %9107 = vmatprep.subr.bf16.mxu1 %v10357_v0 }
0x4e4e   : > { %9108 = vmatpush3.bf16.msra.mxu1 %v9538_v48 }
0x4e4f   : > { %9109 = vmatprep.subr.bf16.mxu1 %v10357_v0 }
0x4e52   : > { %9110 = vmatpush3.bf16.msra.mxu1 %v9539_v19 }
0x4ef5   : > { %v6978_v44 = vpop.f32.mrf.mxu1 }
0x4ef6   : > { %v6984_v51 = vadd.f32 %v6978_v44, %v6825_v26 }
0x4ef7   : > { %v9073_v46 = vpop.f32.mrf.mxu1 }
0x4ef8   : > { %v6991_v47 = vadd.f32 %v8028_v21, %v6984_v51  ;;  %v9542_v46 = vld [vmem:[#allocation31 + $0x28] sm:$0xff]  }
0x4ef9   : > { %v6981_v22 = vpop.f32.mrf.mxu1 }
0x4efa   : > { %v6996_v49 = vadd.f32 %v6991_v47, %v11649_v37  ;;  %v9527_v37 = vld [vmem:[#allocation25 + $0x60] sm:$0xff]  }
0x4efb   : > { %v9074_v50 = vpop.f32.mrf.mxu1  ;;  %9082 = vmatpush3.bf16.msra.mxu0 %v9527_v37  ;;  %v9543_v47 = vld [vmem:[#allocation31 + $0x20] sm:$0xff]   ;;  %v9544_v22 = vld [vmem:[#allocation31 + $0x18] sm:$0xff]  }
0x4efc   : > { %6997 = vadd.xlane.f32.xlu1 %v6996_v49  ;;  %9083 = vmatprep.subr.bf16.mxu0 %v10357_v0  ;;  %v9547_v50 = vld [vmem:[#allocation31] sm:$0xff]  }
0x4eff   : > { %9084 = vmatpush3.bf16.msra.mxu0 %v9528_v61 }
0x4f00   : > { %9085 = vmatprep.subr.bf16.mxu0 %v10357_v0 }
0x4f03   : > { %9086 = vmatpush3.bf16.msra.mxu0 %v9529_v62  ;;  %v8053_v62 = vld [vmem:[#allocation32] ss:$0 sm:$0xff] }
0x4f04   : > { %9087 = vmatprep.subr.bf16.mxu0 %v10357_v0 }
0x4f07   : > { %9088 = vmatpush3.bf16.msra.mxu0 %v9530_v12 }
0x4f08   : > { %9089 = vmatprep.subr.bf16.mxu0 %v10357_v0 }
0x4f0b   : > { %9090 = vmatpush3.bf16.msra.mxu0 %v9531_v63 }
0x4f0c   : > { %9115 = vmatprep.subr.bf16.mxu0 %v10357_v0 }
0x4f85   : > { %v6998_v54 = vpop.xlane.xlu1 %6997 }
0x4f86   : > { %v6999_v55 = vmul.f32 0.03125, %v6998_v54 }
0x4f88   : > { %v7000_v53 = vsub.f32 %v6996_v49, %v6999_v55  ;;  %v9545_v49 = vld [vmem:[#allocation31 + $0x10] sm:$0xff]  }
0x4f8a   : > { %v7001_v57 = vsel %vm2169_vm5, %v7000_v53, 0.0 }
0x4f8b   : > { %v7002_v58 = vmul.f32 %v7001_v57, %v7001_v57 }
0x4f8d   : > { %7003 = vadd.xlane.f32.xlu1 %v7002_v58  ;;  %v8052_v58 = vld [vmem:[#allocation29 + $0x1] ss:$0 sm:$0xff] }
0x5016   : > { %v7004_v3 = vpop.xlane.xlu1 %7003 }
0x5017   : > { %v7005_v5 = vmul.f32 0.03125, %v7004_v3 }
0x5019   : > { %v7006_v4 = vadd.f32 1e-05, %v7005_v5 }
0x501b   : > { %9666 = vrsqrt.f32 %v7006_v4 }
0x5028   : > { %v9667_v33 = vpop.eup %9666 }
0x5029   : > { %v7008_v7 = vmul.f32 %v9667_v33, %v7000_v53  ;;  %v8051_v53 = vld [vmem:[#allocation28 + $0x1] ss:$0 sm:$0xff] }
0x502b   : > { %v7015_v10 = vmul.f32 %v8029_v6, %v7008_v7 }
0x502d   : > { %v7022_v13 = vadd.f32 %v8030_v8, %v7015_v10 }
0x502f   : > { %v7061_v14 = vpack.c.bf16 %v7022_v13, %v7022_v13 }
0x5031   : > { %9092 = vmatmul.mubr.bf16.vlgmr.msra.gmra.mxu0 %v7061_v14 }
0x5032   : > { %9131 = vmatprep.mubr.msk.bf16.mxu0 %vm10358_vm0, %v10357_v0  ;;  %9116 = vmatpush3.bf16.msra.mxu0 %v9540_v9 }
0x5033   : > { %9117 = vmatprep.subr.bf16.mxu0 %v10357_v0 }
0x5036   : > { %9118 = vmatpush3.bf16.msra.mxu0 %v9541_v42 }
0x5037   : > { %9119 = vmatprep.subr.bf16.mxu0 %v10357_v0 }
0x503a   : > { %9120 = vmatpush3.bf16.msra.mxu0 %v9542_v46 }
0x503b   : > { %9121 = vmatprep.subr.bf16.mxu0 %v10357_v0 }
0x503e   : > { %9122 = vmatpush3.bf16.msra.mxu0 %v9543_v47 }
0x503f   : > { %9123 = vmatprep.subr.bf16.mxu0 %v10357_v0 }
0x5042   : > { %9124 = vmatpush3.bf16.msra.mxu0 %v9544_v22 }
0x5043   : > { %9125 = vmatprep.subr.bf16.mxu0 %v10357_v0 }
0x5046   : > { %9126 = vmatpush3.bf16.msra.mxu0 %v9545_v49 }
0x5047   : > { %9127 = vmatprep.subr.bf16.mxu0 %v10357_v0 }
0x504a   : > { %9128 = vmatpush3.bf16.msra.mxu0 %v9546_v41 }
0x504b   : > { %9129 = vmatprep.subr.bf16.mxu0 %v10357_v0 }
0x504e   : > { %9130 = vmatpush3.bf16.msra.mxu0 %v9547_v50 }
0x50f1   : > { %v7150_v15 = vpop.f32.mrf.mxu0 }
0x50f2   : > { %v7151_v23 = vadd.f32 %v8033_v60, %v7150_v15 }
0x50f3   : > { %v9093_v24 = vpop.f32.mrf.mxu0 }
0x50f4   : > { %v7157_v25 = vmul.f32 0.70710677, %v7151_v23  ;;  %v7156_v29 = vmul.f32 0.5, %v7151_v23 }
0x50f5   : > { %v7153_v45 = vpop.f32.mrf.mxu0 }
0x50f6   : > { %9668 = verf.f32 %v7157_v25 }
0x50f7   : > { %v9094_v26 = vpop.f32.mrf.mxu0 }
0x5103   : > { %v9669_v27 = vpop.eup %9668 }
0x5104   : > { %v7159_v30 = vadd.f32 1.0, %v9669_v27 }
0x5106   : > { %v7160_v31 = vmul.f32 %v7159_v30, %v7156_v29 }
0x5108   : > { %v7161_v32 = vpack.c.bf16 %v7160_v31, %v7160_v31 }
0x510a   : > { %9112 = vmatmul.mubr.bf16.vlgmr.msra.gmra.mxu1 %v7161_v32 }
0x51ca   : > { %v7250_v35 = vpop.f32.mrf.mxu1 }
0x51cb   : > { %v7251_v20 = vadd.f32 %v8042_v34, %v7250_v35 }
0x51cc   : > { %v9113_v36 = vpop.f32.mrf.mxu1 }
0x51cd   : > { %v7260_v38 = vadd.f32 %v7251_v20, %v7022_v13 }
0x51ce   : > { %v7253_v39 = vpop.f32.mrf.mxu1 }
0x51cf   : > { %7261 = vadd.xlane.f32.xlu1 %v7260_v38 }
0x51d0   : > { %v9114_v40 = vpop.f32.mrf.mxu1 }
0x5258   : > { %v7262_v43 = vpop.xlane.xlu1 %7261 }
0x5259   : > { %v7263_v28 = vmul.f32 0.03125, %v7262_v43 }
0x525b   : > { %v7264_v21 = vsub.f32 %v7260_v38, %v7263_v28 }
0x525d   : > { %v7265_v44 = vsel %vm2169_vm5, %v7264_v21, 0.0 }
0x525e   : > { %v7266_v51 = vmul.f32 %v7265_v44, %v7265_v44 }
0x5260   : > { %7267 = vadd.xlane.f32.xlu1 %v7266_v51 }
0x52e9   : > { %v7268_v52 = vpop.xlane.xlu1 %7267 }
0x52ea   : > { %v7269_v56 = vmul.f32 0.03125, %v7268_v52 }
0x52ec   : > { %v7270_v54 = vadd.f32 1e-05, %v7269_v56 }
0x52ee   : > { %9670 = vrsqrt.f32 %v7270_v54 }
0x52fb   : > { %v9671_v55 = vpop.eup %9670 }
0x52fc   : > { %v7272_v57 = vmul.f32 %v9671_v55, %v7264_v21 }
0x52fe   : > { %v7279_v59 = vmul.f32 %v8051_v53, %v7272_v57 }
0x5300   : > { %v7286_v37 = vadd.f32 %v8052_v58, %v7279_v59 }
0x5302   : > { %v7287_v61 = vpack.c.bf16 %v7286_v37, %v7286_v37 }
0x5304   : > { %9132 = vmatmul.mubr.bf16.vlgmr.msra.gmra.mxu0 %v7287_v61 }
0x53c4   : > { %v7393_v0 = vpop.f32.mrf.mxu0 }
0x53c5   : > { %v7394_v12 = vadd.f32 %v8053_v62, %v7393_v0 }
0x53c6   : > { %v9133_v63 = vpop.f32.mrf.mxu0 }
0x53c7   : > { %7399 = vst [vmem:[%s1374_s15] sm:$0xff] %v7394_v12 }
0x53c8   : > { %v7396_v1 = vpop.f32.mrf.mxu0 }
0x53c9   : > { %10205 = shalt.err (!%p10202_p13)
}
0x53ca   : > { %s10206_s9 = scalar_lea.hbm %s11785_s22, 128  ;;  %s10210_s6 = scalar_lea.hbm %s11984_s5, 256 }
0x53cb   : > { %p10207_p7 = scmp.ne.s32.totalorder %s11785_s22, %s10206_s9  ;;  %p10211_p10 = scmp.lt.s32.totalorder %s11785_s22, %s11984_s5 }
0x53cc   : > { %p10212_p4 = scmp.lt.s32.totalorder %s10210_s6, %s10206_s9 }
0x53cd   : > { %p10208_p8 = pnand %p10207_p7, %p11986_p5 }
0x53ce   : > { %p10213_p11 = por %p10212_p4, %p10211_p10 }
0x53cf   : > { %p10209_p12 = pneg %p10208_p8 }
0x53d1   : > { %p10214_p9 = pnand %p10213_p11, %p10209_p12 }
0x53d3   : > { %10217 = shalt.err (!%p10214_p9)
}
0x53d4   : > { %9215 = dma.vmem_to_hbm [thread:$0]  (%p11986_p5), %s11787_s7, 128, %s11785_s22, %s7401_s16   ;;  %v9134_v2 = vpop.f32.mrf.mxu0 }
0x53d5 PF: > { %s11987_s15 = sld [smem:[#allocation75_spill]] }
0x53d6   : > { %s11988_s0 = sld [smem:[#allocation73_spill]] }
0x53d7   : > { %s11989_s28 = sld [smem:[#allocation79_spill]] }
0x53db   : > { %p9322_p0 = scmp.ge.s32.totalorder %s11987_s15, 2 }
0x53dc   : > { %s7426_s26 = sand.u32 1, %s11988_s0  }
0x53dd   : > { %p11990_p6 = scmp.ne.s32.totalorder %s11989_s28, 0  ;;  %s7427_s2 = scalar_lea.sflag [#allocation4], %s7426_s26 }
0x53df   : > { %p9279_p1 = pnand %p9322_p0, %p11990_p6 }
0x53e1   : > { %p9280_p3 = pneg %p9279_p1 }
0x53e3   : > { %10279 = dma.done.wait (%p9280_p3), %s7427_s2, 128  }
0x53e4   : > { %10281 = vsyncadd (%p9280_p3), %s7427_s2, 4294967168  ;;  %s11991_s0 = sld [smem:[#allocation76_spill]]  ;;  %s11994_s22 = smov %s10288_s23 }
0x53e5   : > { %s11992_s9 = sld [smem:[#allocation74_spill]] }
0x53e6   : > { %s11993_s26 = sld [smem:[#allocation77_spill]] }
0x53ea   : > { %p92_p2 = scmp.ge.s32.totalorder %s11991_s0, 4  }
0x53eb   : > { %s11995_s23 = smov %s11992_s9 }
0x53ec   :  { %94 = sbr.rel (!%p92_p2) target bundleno = 82 (0x52), region = 347 }
0x53f1   :  { %7432 = vsyncpa [#allocation3], 1 }
0x53f2   :  { %7434 = vsyncpa [#allocation3 + $0x1], 1 }
0x53f3   :  { %7435 = vsyncpa [#allocation6], 1 }
0x53f4   :  { %7436 = vsyncpa [#allocation9], 1 }
0x53f5   :  { %7437 = vsyncpa [#allocation12], 1 }
0x53f6   :  { %7438 = vsyncpa [#allocation15], 1 }
0x53f7   :  { %7439 = vsyncpa [#allocation18], 1 }
0x53f8   :  { %7440 = vsyncpa [#allocation21], 1 }
0x53f9   :  { %7441 = vsyncpa [#allocation24], 1 }
0x53fa   :  { %7442 = vsyncpa [#allocation27], 1 }
0x53fb   :  { %7443 = vsyncpa [#allocation30], 1 }
0x53fc   :  { %7444 = vsyncpa [#allocation33], 1 }
0x53fd   :  { %7445 = vsyncpa [#allocation4], 1 }
0x53fe   :  { %7447 = vsyncpa [#allocation4 + $0x1], 1 }

</bundles_post_ra>
